<compile_context>
chip_gen: v6e
topology: v6e:2x2x1
jax: 0.10.0
libtpu: 0.0.40
codegen_flags: <defaults>
</compile_context>

<pallas_src>
import jax
import jax.numpy as jnp
from jax.experimental import pallas as pl
from jax.experimental.pallas import tpu as pltpu

BN_EPS = 1e-5


# ------------------------------ Pallas kernel ------------------------------

def _maxpool2x2_val(a, ph, pw):
    """2x2 / stride-2 / floor-mode max pool of an (H, W, C) value -> (ph, pw, C)."""
    # W (sublane) direction: pair-max + subsample via static slices + concat.
    cols = [jnp.maximum(a[:, 2 * w:2 * w + 1, :], a[:, 2 * w + 1:2 * w + 2, :])
            for w in range(pw)]
    cm = jnp.concatenate(cols, axis=1)                       # (H, pw, C)
    # H (leading) direction: pair-max via integer indexing + stack.
    rows = [jnp.maximum(cm[2 * h], cm[2 * h + 1]) for h in range(ph)]
    return jnp.stack(rows, axis=0)                           # (ph, pw, C)


def _digit_cnn_kernel(x_ref, w1_ref, b1_ref, w2_ref, b2_ref,
                      wf1_ref, bf1_ref, wf2_ref, bf2_ref, o_ref):
    f32 = jnp.float32
    x = x_ref[...]                                           # (28, 28, 1) NHWC, batch squeezed

    # ---- conv1 (1->16, 3x3, valid) + folded BN1 + ReLU ----  (Cin=1 -> VPU FMAs)
    acc1 = jnp.zeros((26, 26, 16), f32)
    for i in range(3):
        for j in range(3):
            patch = x[i:i + 26, j:j + 26, :]                 # (26, 26, 1)
            acc1 = acc1 + patch * w1_ref[i, j]               # bcast with (1, 16)
    a1 = jnp.maximum(acc1 + b1_ref[...], 0.0)                # (26, 26, 16)

    p1 = _maxpool2x2_val(a1, 13, 13)                         # (13, 13, 16)

    # ---- conv2 (16->32, 3x3, valid) + folded BN2 + ReLU ----  (MXU, batched over H)
    acc2 = jnp.zeros((11, 11, 32), f32)
    for i in range(3):
        for j in range(3):
            patch = p1[i:i + 11, j:j + 11, :]                # (11, 11, 16)
            w_ij = jnp.broadcast_to(w2_ref[i, j], (11, 16, 32))
            acc2 = acc2 + jnp.einsum('hwc,hco->hwo', patch, w_ij,
                                     preferred_element_type=f32)
    a2 = jnp.maximum(acc2 + b2_ref[...], 0.0)                # (11, 11, 32)

    p2 = _maxpool2x2_val(a2, 5, 5)                           # (5, 5, 32)

    # ---- fc1 (800 -> 128) + ReLU ----  flatten fused as 25 small MXU matmuls
    h1 = jnp.zeros((1, 128), f32)
    for ph in range(5):
        row = p2[ph]                                         # (5, 32)
        for pw in range(5):
            h1 = h1 + jnp.dot(row[pw:pw + 1, :], wf1_ref[ph, pw],
                              preferred_element_type=f32)
    h1 = jnp.maximum(h1 + bf1_ref[...], 0.0)                 # (1, 128)

    # dropout(0.5): identity in inference mode.

    # ---- fc2 (128 -> 10, zero-padded to 128 output lanes) ----
    logits = jnp.dot(h1, wf2_ref[...], preferred_element_type=f32) + bf2_ref[...]
    o_ref[...] = logits.astype(o_ref.dtype)                  # lane-dense (1, 128) store


# --------------------------- params & preparation ---------------------------

def init_params(key):
    ks = jax.random.split(key, 8)
    return {
        "conv1_w": 0.1 * jax.random.normal(ks[0], (16, 1, 3, 3), jnp.float32),
        "conv1_b": 0.01 * jax.random.normal(ks[1], (16,), jnp.float32),
        "conv2_w": 0.1 * jax.random.normal(ks[2], (32, 16, 3, 3), jnp.float32),
        "conv2_b": 0.01 * jax.random.normal(ks[3], (32,), jnp.float32),
        "fc1_w": 0.05 * jax.random.normal(ks[4], (128, 800), jnp.float32),
        "fc1_b": 0.01 * jax.random.normal(ks[5], (128,), jnp.float32),
        "fc2_w": 0.05 * jax.random.normal(ks[6], (10, 128), jnp.float32),
        "fc2_b": 0.01 * jax.random.normal(ks[7], (10,), jnp.float32),
        # BatchNorm params at PyTorch init values (inference mode).
        "bn1_gamma": jnp.ones((16,), jnp.float32),
        "bn1_beta": jnp.zeros((16,), jnp.float32),
        "bn1_mean": jnp.zeros((16,), jnp.float32),
        "bn1_var": jnp.ones((16,), jnp.float32),
        "bn2_gamma": jnp.ones((32,), jnp.float32),
        "bn2_beta": jnp.zeros((32,), jnp.float32),
        "bn2_mean": jnp.zeros((32,), jnp.float32),
        "bn2_var": jnp.ones((32,), jnp.float32),
    }


def prepare_params(p):
    """One-time folding / re-layout of PyTorch-style params for the kernel."""
    s1 = p["bn1_gamma"] / jnp.sqrt(p["bn1_var"] + BN_EPS)
    t1 = p["bn1_beta"] - p["bn1_mean"] * s1
    s2 = p["bn2_gamma"] / jnp.sqrt(p["bn2_var"] + BN_EPS)
    t2 = p["bn2_beta"] - p["bn2_mean"] * s2
    # conv weights: (O, I, kh, kw) -> (kh, kw, I, O), BN scale folded per out-channel.
    w1 = jnp.transpose(p["conv1_w"], (2, 3, 1, 0)) * s1              # (3, 3, 1, 16)
    b1 = (p["conv1_b"] * s1 + t1).reshape(1, 16)
    w2 = jnp.transpose(p["conv2_w"], (2, 3, 1, 0)) * s2              # (3, 3, 16, 32)
    b2 = (p["conv2_b"] * s2 + t2).reshape(1, 32)
    # fc1: PyTorch flatten index is c*25 + h*5 + w  ->  reorder to (h, w, c, o).
    wf1 = jnp.transpose(p["fc1_w"].reshape(128, 32, 5, 5), (2, 3, 1, 0))  # (5,5,32,128)
    bf1 = p["fc1_b"].reshape(1, 128)
    # fc2: (10, 128) -> (128, 10), zero-padded to 128 output lanes.
    wf2 = jnp.zeros((128, 128), jnp.float32).at[:, :10].set(p["fc2_w"].T)
    bf2 = jnp.zeros((1, 128), jnp.float32).at[0, :10].set(p["fc2_b"])
    return {"w1": w1, "b1": b1, "w2": w2, "b2": b2,
            "wf1": wf1, "bf1": bf1, "wf2": wf2, "bf2": bf2}


# --------------------------------- forward ---------------------------------

@jax.jit
def digit_cnn_forward(x_nchw, prep):
    N = x_nchw.shape[0]
    x = x_nchw.reshape(N, 28, 28, 1).astype(jnp.float32)   # C==1: NCHW->NHWC is a reshape

    out = pl.pallas_call(
        _digit_cnn_kernel,
        out_shape=jax.ShapeDtypeStruct((N, 1, 128), jnp.float32),
        grid=(N,),
        in_specs=[
            pl.BlockSpec((None, 28, 28, 1), lambda b: (b, 0, 0, 0)),   # per-sample input
            pl.BlockSpec((3, 3, 1, 16), lambda b: (0, 0, 0, 0)),       # conv1 w (folded)
            pl.BlockSpec((1, 16), lambda b: (0, 0)),                   # conv1 b (folded)
            pl.BlockSpec((3, 3, 16, 32), lambda b: (0, 0, 0, 0)),      # conv2 w (folded)
            pl.BlockSpec((1, 32), lambda b: (0, 0)),                   # conv2 b (folded)
            pl.BlockSpec((5, 5, 32, 128), lambda b: (0, 0, 0, 0)),     # fc1 w (permuted)
            pl.BlockSpec((1, 128), lambda b: (0, 0)),                  # fc1 b
            pl.BlockSpec((128, 128), lambda b: (0, 0)),                # fc2 w (padded)
            pl.BlockSpec((1, 128), lambda b: (0, 0)),                  # fc2 b (padded)
        ],
        out_specs=pl.BlockSpec((None, 1, 128), lambda b: (b, 0, 0)),   # lane-dense logits
        compiler_params=pltpu.CompilerParams(
            dimension_semantics=("parallel",),
            vmem_limit_bytes=32 * 1024 * 1024,
        ),
    )(x, prep["w1"], prep["b1"], prep["w2"], prep["b2"],
      prep["wf1"], prep["bf1"], prep["wf2"], prep["bf2"])

    return out[:, 0, :10]


if __name__ == "__main__":
    key = jax.random.PRNGKey(0)
    k_x, k_p = jax.random.split(key)
    # Input shape fixed by fc1 (32*5*5): N x 1 x 28 x 28, small batch = 2.
    x = jax.random.normal(k_x, (2, 1, 28, 28), jnp.float32)
    params = init_params(k_p)
    prep = prepare_params(params)

    out = digit_cnn_forward(x, prep)
    out = jax.block_until_ready(out)
    assert out.shape == (2, 10) and out.dtype == jnp.float32
    assert bool(jnp.isfinite(out).all())
    print("KERNEL_OK")
</pallas_src>

<mosaic_0001>
module attributes {stable_mosaic.version = 11 : i64} {
  func.func @_digit_cnn_kernel(%arg0: i32, %arg1: memref<1x28x28x1xf32, #tpu.memory_space<vmem>>, %arg2: memref<3x3x1x16xf32, #tpu.memory_space<vmem>>, %arg3: memref<1x16xf32, #tpu.memory_space<vmem>>, %arg4: memref<3x3x16x32xf32, #tpu.memory_space<vmem>>, %arg5: memref<1x32xf32, #tpu.memory_space<vmem>>, %arg6: memref<5x5x32x128xf32, #tpu.memory_space<vmem>>, %arg7: memref<1x128xf32, #tpu.memory_space<vmem>>, %arg8: memref<128x128xf32, #tpu.memory_space<vmem>>, %arg9: memref<1x128xf32, #tpu.memory_space<vmem>>, %arg10: memref<1x1x128xf32, #tpu.memory_space<vmem>>) attributes {dimension_semantics = [#tpu.dimension_semantics<parallel>], iteration_bounds = array<i64: 2>, scalar_prefetch = 0 : i64, scratch_operands = 0 : i64, tpu.core_type = #tpu.core_type<tc>, window_params = [{transform_indices = @transform_0, window_bounds = array<i64: 1, 28, 28, 1>}, {pipeline_mode = #tpu.pipeline_mode<synchronous>, transform_indices = @transform_1, window_bounds = array<i64: 3, 3, 1, 16>}, {pipeline_mode = #tpu.pipeline_mode<synchronous>, transform_indices = @transform_2, window_bounds = array<i64: 1, 16>}, {pipeline_mode = #tpu.pipeline_mode<synchronous>, transform_indices = @transform_3, window_bounds = array<i64: 3, 3, 16, 32>}, {pipeline_mode = #tpu.pipeline_mode<synchronous>, transform_indices = @transform_4, window_bounds = array<i64: 1, 32>}, {pipeline_mode = #tpu.pipeline_mode<synchronous>, transform_indices = @transform_5, window_bounds = array<i64: 5, 5, 32, 128>}, {pipeline_mode = #tpu.pipeline_mode<synchronous>, transform_indices = @transform_6, window_bounds = array<i64: 1, 128>}, {pipeline_mode = #tpu.pipeline_mode<synchronous>, transform_indices = @transform_7, window_bounds = array<i64: 128, 128>}, {pipeline_mode = #tpu.pipeline_mode<synchronous>, transform_indices = @transform_8, window_bounds = array<i64: 1, 128>}, {transform_indices = @transform_9, window_bounds = array<i64: 1, 1, 128>}]} {
    %c0 = arith.constant 0 : index
    %c0_0 = arith.constant 0 : index
    %c0_1 = arith.constant 0 : index
    %c0_2 = arith.constant 0 : index
    %0 = vector.load %arg1[%c0, %c0_0, %c0_1, %c0_2] : memref<1x28x28x1xf32, #tpu.memory_space<vmem>>, vector<1x28x28x1xf32>
    %1 = vector.shape_cast %0 : vector<1x28x28x1xf32> to vector<28x28x1xf32>
    %cst = arith.constant 0.000000e+00 : f32
    %2 = vector.broadcast %cst : f32 to vector<26x26x16xf32>
    %3 = vector.extract_strided_slice %1 {offsets = [0, 0, 0], sizes = [26, 26, 1], strides = [1, 1, 1]} : vector<28x28x1xf32> to vector<26x26x1xf32>
    %c0_3 = arith.constant 0 : index
    %c0_4 = arith.constant 0 : index
    %c0_5 = arith.constant 0 : index
    %c0_6 = arith.constant 0 : index
    %4 = vector.load %arg2[%c0_3, %c0_4, %c0_5, %c0_6] : memref<3x3x1x16xf32, #tpu.memory_space<vmem>>, vector<1x1x1x16xf32>
    %5 = vector.shape_cast %4 : vector<1x1x1x16xf32> to vector<1x16xf32>
    %6 = vector.shape_cast %5 : vector<1x16xf32> to vector<1x1x16xf32>
    %7 = vector.broadcast %3 : vector<26x26x1xf32> to vector<26x26x16xf32>
    %8 = vector.broadcast %6 : vector<1x1x16xf32> to vector<26x26x16xf32>
    %9 = arith.mulf %7, %8 : vector<26x26x16xf32>
    %10 = arith.addf %2, %9 : vector<26x26x16xf32>
    %11 = vector.extract_strided_slice %1 {offsets = [0, 1, 0], sizes = [26, 26, 1], strides = [1, 1, 1]} : vector<28x28x1xf32> to vector<26x26x1xf32>
    %c0_7 = arith.constant 0 : index
    %c1 = arith.constant 1 : index
    %c0_8 = arith.constant 0 : index
    %c0_9 = arith.constant 0 : index
    %12 = vector.load %arg2[%c0_7, %c1, %c0_8, %c0_9] : memref<3x3x1x16xf32, #tpu.memory_space<vmem>>, vector<1x1x1x16xf32>
    %13 = vector.shape_cast %12 : vector<1x1x1x16xf32> to vector<1x16xf32>
    %14 = vector.shape_cast %13 : vector<1x16xf32> to vector<1x1x16xf32>
    %15 = vector.broadcast %11 : vector<26x26x1xf32> to vector<26x26x16xf32>
    %16 = vector.broadcast %14 : vector<1x1x16xf32> to vector<26x26x16xf32>
    %17 = arith.mulf %15, %16 : vector<26x26x16xf32>
    %18 = arith.addf %10, %17 : vector<26x26x16xf32>
    %19 = vector.extract_strided_slice %1 {offsets = [0, 2, 0], sizes = [26, 26, 1], strides = [1, 1, 1]} : vector<28x28x1xf32> to vector<26x26x1xf32>
    %c0_10 = arith.constant 0 : index
    %c2 = arith.constant 2 : index
    %c0_11 = arith.constant 0 : index
    %c0_12 = arith.constant 0 : index
    %20 = vector.load %arg2[%c0_10, %c2, %c0_11, %c0_12] : memref<3x3x1x16xf32, #tpu.memory_space<vmem>>, vector<1x1x1x16xf32>
    %21 = vector.shape_cast %20 : vector<1x1x1x16xf32> to vector<1x16xf32>
    %22 = vector.shape_cast %21 : vector<1x16xf32> to vector<1x1x16xf32>
    %23 = vector.broadcast %19 : vector<26x26x1xf32> to vector<26x26x16xf32>
    %24 = vector.broadcast %22 : vector<1x1x16xf32> to vector<26x26x16xf32>
    %25 = arith.mulf %23, %24 : vector<26x26x16xf32>
    %26 = arith.addf %18, %25 : vector<26x26x16xf32>
    %27 = vector.extract_strided_slice %1 {offsets = [1, 0, 0], sizes = [26, 26, 1], strides = [1, 1, 1]} : vector<28x28x1xf32> to vector<26x26x1xf32>
    %c1_13 = arith.constant 1 : index
    %c0_14 = arith.constant 0 : index
    %c0_15 = arith.constant 0 : index
    %c0_16 = arith.constant 0 : index
    %28 = vector.load %arg2[%c1_13, %c0_14, %c0_15, %c0_16] : memref<3x3x1x16xf32, #tpu.memory_space<vmem>>, vector<1x1x1x16xf32>
    %29 = vector.shape_cast %28 : vector<1x1x1x16xf32> to vector<1x16xf32>
    %30 = vector.shape_cast %29 : vector<1x16xf32> to vector<1x1x16xf32>
    %31 = vector.broadcast %27 : vector<26x26x1xf32> to vector<26x26x16xf32>
    %32 = vector.broadcast %30 : vector<1x1x16xf32> to vector<26x26x16xf32>
    %33 = arith.mulf %31, %32 : vector<26x26x16xf32>
    %34 = arith.addf %26, %33 : vector<26x26x16xf32>
    %35 = vector.extract_strided_slice %1 {offsets = [1, 1, 0], sizes = [26, 26, 1], strides = [1, 1, 1]} : vector<28x28x1xf32> to vector<26x26x1xf32>
    %c1_17 = arith.constant 1 : index
    %c1_18 = arith.constant 1 : index
    %c0_19 = arith.constant 0 : index
    %c0_20 = arith.constant 0 : index
    %36 = vector.load %arg2[%c1_17, %c1_18, %c0_19, %c0_20] : memref<3x3x1x16xf32, #tpu.memory_space<vmem>>, vector<1x1x1x16xf32>
    %37 = vector.shape_cast %36 : vector<1x1x1x16xf32> to vector<1x16xf32>
    %38 = vector.shape_cast %37 : vector<1x16xf32> to vector<1x1x16xf32>
    %39 = vector.broadcast %35 : vector<26x26x1xf32> to vector<26x26x16xf32>
    %40 = vector.broadcast %38 : vector<1x1x16xf32> to vector<26x26x16xf32>
    %41 = arith.mulf %39, %40 : vector<26x26x16xf32>
    %42 = arith.addf %34, %41 : vector<26x26x16xf32>
    %43 = vector.extract_strided_slice %1 {offsets = [1, 2, 0], sizes = [26, 26, 1], strides = [1, 1, 1]} : vector<28x28x1xf32> to vector<26x26x1xf32>
    %c1_21 = arith.constant 1 : index
    %c2_22 = arith.constant 2 : index
    %c0_23 = arith.constant 0 : index
    %c0_24 = arith.constant 0 : index
    %44 = vector.load %arg2[%c1_21, %c2_22, %c0_23, %c0_24] : memref<3x3x1x16xf32, #tpu.memory_space<vmem>>, vector<1x1x1x16xf32>
    %45 = vector.shape_cast %44 : vector<1x1x1x16xf32> to vector<1x16xf32>
    %46 = vector.shape_cast %45 : vector<1x16xf32> to vector<1x1x16xf32>
    %47 = vector.broadcast %43 : vector<26x26x1xf32> to vector<26x26x16xf32>
    %48 = vector.broadcast %46 : vector<1x1x16xf32> to vector<26x26x16xf32>
    %49 = arith.mulf %47, %48 : vector<26x26x16xf32>
    %50 = arith.addf %42, %49 : vector<26x26x16xf32>
    %51 = vector.extract_strided_slice %1 {offsets = [2, 0, 0], sizes = [26, 26, 1], strides = [1, 1, 1]} : vector<28x28x1xf32> to vector<26x26x1xf32>
    %c2_25 = arith.constant 2 : index
    %c0_26 = arith.constant 0 : index
    %c0_27 = arith.constant 0 : index
    %c0_28 = arith.constant 0 : index
    %52 = vector.load %arg2[%c2_25, %c0_26, %c0_27, %c0_28] : memref<3x3x1x16xf32, #tpu.memory_space<vmem>>, vector<1x1x1x16xf32>
    %53 = vector.shape_cast %52 : vector<1x1x1x16xf32> to vector<1x16xf32>
    %54 = vector.shape_cast %53 : vector<1x16xf32> to vector<1x1x16xf32>
    %55 = vector.broadcast %51 : vector<26x26x1xf32> to vector<26x26x16xf32>
    %56 = vector.broadcast %54 : vector<1x1x16xf32> to vector<26x26x16xf32>
    %57 = arith.mulf %55, %56 : vector<26x26x16xf32>
    %58 = arith.addf %50, %57 : vector<26x26x16xf32>
    %59 = vector.extract_strided_slice %1 {offsets = [2, 1, 0], sizes = [26, 26, 1], strides = [1, 1, 1]} : vector<28x28x1xf32> to vector<26x26x1xf32>
    %c2_29 = arith.constant 2 : index
    %c1_30 = arith.constant 1 : index
    %c0_31 = arith.constant 0 : index
    %c0_32 = arith.constant 0 : index
    %60 = vector.load %arg2[%c2_29, %c1_30, %c0_31, %c0_32] : memref<3x3x1x16xf32, #tpu.memory_space<vmem>>, vector<1x1x1x16xf32>
    %61 = vector.shape_cast %60 : vector<1x1x1x16xf32> to vector<1x16xf32>
    %62 = vector.shape_cast %61 : vector<1x16xf32> to vector<1x1x16xf32>
    %63 = vector.broadcast %59 : vector<26x26x1xf32> to vector<26x26x16xf32>
    %64 = vector.broadcast %62 : vector<1x1x16xf32> to vector<26x26x16xf32>
    %65 = arith.mulf %63, %64 : vector<26x26x16xf32>
    %66 = arith.addf %58, %65 : vector<26x26x16xf32>
    %67 = vector.extract_strided_slice %1 {offsets = [2, 2, 0], sizes = [26, 26, 1], strides = [1, 1, 1]} : vector<28x28x1xf32> to vector<26x26x1xf32>
    %c2_33 = arith.constant 2 : index
    %c2_34 = arith.constant 2 : index
    %c0_35 = arith.constant 0 : index
    %c0_36 = arith.constant 0 : index
    %68 = vector.load %arg2[%c2_33, %c2_34, %c0_35, %c0_36] : memref<3x3x1x16xf32, #tpu.memory_space<vmem>>, vector<1x1x1x16xf32>
    %69 = vector.shape_cast %68 : vector<1x1x1x16xf32> to vector<1x16xf32>
    %70 = vector.shape_cast %69 : vector<1x16xf32> to vector<1x1x16xf32>
    %71 = vector.broadcast %67 : vector<26x26x1xf32> to vector<26x26x16xf32>
    %72 = vector.broadcast %70 : vector<1x1x16xf32> to vector<26x26x16xf32>
    %73 = arith.mulf %71, %72 : vector<26x26x16xf32>
    %74 = arith.addf %66, %73 : vector<26x26x16xf32>
    %c0_37 = arith.constant 0 : index
    %c0_38 = arith.constant 0 : index
    %75 = vector.load %arg3[%c0_37, %c0_38] : memref<1x16xf32, #tpu.memory_space<vmem>>, vector<1x16xf32>
    %76 = vector.shape_cast %75 : vector<1x16xf32> to vector<1x1x16xf32>
    %77 = vector.broadcast %76 : vector<1x1x16xf32> to vector<26x26x16xf32>
    %78 = arith.addf %74, %77 : vector<26x26x16xf32>
    %cst_39 = arith.constant 0.000000e+00 : f32
    %79 = vector.broadcast %cst_39 : f32 to vector<26x26x16xf32>
    %80 = arith.maximumf %78, %79 : vector<26x26x16xf32>
    %81 = vector.extract_strided_slice %80 {offsets = [0, 0, 0], sizes = [26, 1, 16], strides = [1, 1, 1]} : vector<26x26x16xf32> to vector<26x1x16xf32>
    %82 = vector.extract_strided_slice %80 {offsets = [0, 1, 0], sizes = [26, 1, 16], strides = [1, 1, 1]} : vector<26x26x16xf32> to vector<26x1x16xf32>
    %83 = arith.maximumf %81, %82 : vector<26x1x16xf32>
    %84 = vector.extract_strided_slice %80 {offsets = [0, 2, 0], sizes = [26, 1, 16], strides = [1, 1, 1]} : vector<26x26x16xf32> to vector<26x1x16xf32>
    %85 = vector.extract_strided_slice %80 {offsets = [0, 3, 0], sizes = [26, 1, 16], strides = [1, 1, 1]} : vector<26x26x16xf32> to vector<26x1x16xf32>
    %86 = arith.maximumf %84, %85 : vector<26x1x16xf32>
    %87 = vector.extract_strided_slice %80 {offsets = [0, 4, 0], sizes = [26, 1, 16], strides = [1, 1, 1]} : vector<26x26x16xf32> to vector<26x1x16xf32>
    %88 = vector.extract_strided_slice %80 {offsets = [0, 5, 0], sizes = [26, 1, 16], strides = [1, 1, 1]} : vector<26x26x16xf32> to vector<26x1x16xf32>
    %89 = arith.maximumf %87, %88 : vector<26x1x16xf32>
    %90 = vector.extract_strided_slice %80 {offsets = [0, 6, 0], sizes = [26, 1, 16], strides = [1, 1, 1]} : vector<26x26x16xf32> to vector<26x1x16xf32>
    %91 = vector.extract_strided_slice %80 {offsets = [0, 7, 0], sizes = [26, 1, 16], strides = [1, 1, 1]} : vector<26x26x16xf32> to vector<26x1x16xf32>
    %92 = arith.maximumf %90, %91 : vector<26x1x16xf32>
    %93 = vector.extract_strided_slice %80 {offsets = [0, 8, 0], sizes = [26, 1, 16], strides = [1, 1, 1]} : vector<26x26x16xf32> to vector<26x1x16xf32>
    %94 = vector.extract_strided_slice %80 {offsets = [0, 9, 0], sizes = [26, 1, 16], strides = [1, 1, 1]} : vector<26x26x16xf32> to vector<26x1x16xf32>
    %95 = arith.maximumf %93, %94 : vector<26x1x16xf32>
    %96 = vector.extract_strided_slice %80 {offsets = [0, 10, 0], sizes = [26, 1, 16], strides = [1, 1, 1]} : vector<26x26x16xf32> to vector<26x1x16xf32>
    %97 = vector.extract_strided_slice %80 {offsets = [0, 11, 0], sizes = [26, 1, 16], strides = [1, 1, 1]} : vector<26x26x16xf32> to vector<26x1x16xf32>
    %98 = arith.maximumf %96, %97 : vector<26x1x16xf32>
    %99 = vector.extract_strided_slice %80 {offsets = [0, 12, 0], sizes = [26, 1, 16], strides = [1, 1, 1]} : vector<26x26x16xf32> to vector<26x1x16xf32>
    %100 = vector.extract_strided_slice %80 {offsets = [0, 13, 0], sizes = [26, 1, 16], strides = [1, 1, 1]} : vector<26x26x16xf32> to vector<26x1x16xf32>
    %101 = arith.maximumf %99, %100 : vector<26x1x16xf32>
    %102 = vector.extract_strided_slice %80 {offsets = [0, 14, 0], sizes = [26, 1, 16], strides = [1, 1, 1]} : vector<26x26x16xf32> to vector<26x1x16xf32>
    %103 = vector.extract_strided_slice %80 {offsets = [0, 15, 0], sizes = [26, 1, 16], strides = [1, 1, 1]} : vector<26x26x16xf32> to vector<26x1x16xf32>
    %104 = arith.maximumf %102, %103 : vector<26x1x16xf32>
    %105 = vector.extract_strided_slice %80 {offsets = [0, 16, 0], sizes = [26, 1, 16], strides = [1, 1, 1]} : vector<26x26x16xf32> to vector<26x1x16xf32>
    %106 = vector.extract_strided_slice %80 {offsets = [0, 17, 0], sizes = [26, 1, 16], strides = [1, 1, 1]} : vector<26x26x16xf32> to vector<26x1x16xf32>
    %107 = arith.maximumf %105, %106 : vector<26x1x16xf32>
    %108 = vector.extract_strided_slice %80 {offsets = [0, 18, 0], sizes = [26, 1, 16], strides = [1, 1, 1]} : vector<26x26x16xf32> to vector<26x1x16xf32>
    %109 = vector.extract_strided_slice %80 {offsets = [0, 19, 0], sizes = [26, 1, 16], strides = [1, 1, 1]} : vector<26x26x16xf32> to vector<26x1x16xf32>
    %110 = arith.maximumf %108, %109 : vector<26x1x16xf32>
    %111 = vector.extract_strided_slice %80 {offsets = [0, 20, 0], sizes = [26, 1, 16], strides = [1, 1, 1]} : vector<26x26x16xf32> to vector<26x1x16xf32>
    %112 = vector.extract_strided_slice %80 {offsets = [0, 21, 0], sizes = [26, 1, 16], strides = [1, 1, 1]} : vector<26x26x16xf32> to vector<26x1x16xf32>
    %113 = arith.maximumf %111, %112 : vector<26x1x16xf32>
    %114 = vector.extract_strided_slice %80 {offsets = [0, 22, 0], sizes = [26, 1, 16], strides = [1, 1, 1]} : vector<26x26x16xf32> to vector<26x1x16xf32>
    %115 = vector.extract_strided_slice %80 {offsets = [0, 23, 0], sizes = [26, 1, 16], strides = [1, 1, 1]} : vector<26x26x16xf32> to vector<26x1x16xf32>
    %116 = arith.maximumf %114, %115 : vector<26x1x16xf32>
    %117 = vector.extract_strided_slice %80 {offsets = [0, 24, 0], sizes = [26, 1, 16], strides = [1, 1, 1]} : vector<26x26x16xf32> to vector<26x1x16xf32>
    %118 = vector.extract_strided_slice %80 {offsets = [0, 25, 0], sizes = [26, 1, 16], strides = [1, 1, 1]} : vector<26x26x16xf32> to vector<26x1x16xf32>
    %119 = arith.maximumf %117, %118 : vector<26x1x16xf32>
    %120 = tpu.concatenate %83, %86, %89, %92, %95, %98, %101, %104, %107, %110, %113, %116, %119 in 1 : vector<26x1x16xf32>, vector<26x1x16xf32>, vector<26x1x16xf32>, vector<26x1x16xf32>, vector<26x1x16xf32>, vector<26x1x16xf32>, vector<26x1x16xf32>, vector<26x1x16xf32>, vector<26x1x16xf32>, vector<26x1x16xf32>, vector<26x1x16xf32>, vector<26x1x16xf32>, vector<26x1x16xf32> -> vector<26x13x16xf32>
    %121 = vector.extract_strided_slice %120 {offsets = [0, 0, 0], sizes = [1, 13, 16], strides = [1, 1, 1]} : vector<26x13x16xf32> to vector<1x13x16xf32>
    %122 = vector.shape_cast %121 : vector<1x13x16xf32> to vector<13x16xf32>
    %123 = vector.extract_strided_slice %120 {offsets = [1, 0, 0], sizes = [1, 13, 16], strides = [1, 1, 1]} : vector<26x13x16xf32> to vector<1x13x16xf32>
    %124 = vector.shape_cast %123 : vector<1x13x16xf32> to vector<13x16xf32>
    %125 = arith.maximumf %122, %124 : vector<13x16xf32>
    %126 = vector.extract_strided_slice %120 {offsets = [2, 0, 0], sizes = [1, 13, 16], strides = [1, 1, 1]} : vector<26x13x16xf32> to vector<1x13x16xf32>
    %127 = vector.shape_cast %126 : vector<1x13x16xf32> to vector<13x16xf32>
    %128 = vector.extract_strided_slice %120 {offsets = [3, 0, 0], sizes = [1, 13, 16], strides = [1, 1, 1]} : vector<26x13x16xf32> to vector<1x13x16xf32>
    %129 = vector.shape_cast %128 : vector<1x13x16xf32> to vector<13x16xf32>
    %130 = arith.maximumf %127, %129 : vector<13x16xf32>
    %131 = vector.extract_strided_slice %120 {offsets = [4, 0, 0], sizes = [1, 13, 16], strides = [1, 1, 1]} : vector<26x13x16xf32> to vector<1x13x16xf32>
    %132 = vector.shape_cast %131 : vector<1x13x16xf32> to vector<13x16xf32>
    %133 = vector.extract_strided_slice %120 {offsets = [5, 0, 0], sizes = [1, 13, 16], strides = [1, 1, 1]} : vector<26x13x16xf32> to vector<1x13x16xf32>
    %134 = vector.shape_cast %133 : vector<1x13x16xf32> to vector<13x16xf32>
    %135 = arith.maximumf %132, %134 : vector<13x16xf32>
    %136 = vector.extract_strided_slice %120 {offsets = [6, 0, 0], sizes = [1, 13, 16], strides = [1, 1, 1]} : vector<26x13x16xf32> to vector<1x13x16xf32>
    %137 = vector.shape_cast %136 : vector<1x13x16xf32> to vector<13x16xf32>
    %138 = vector.extract_strided_slice %120 {offsets = [7, 0, 0], sizes = [1, 13, 16], strides = [1, 1, 1]} : vector<26x13x16xf32> to vector<1x13x16xf32>
    %139 = vector.shape_cast %138 : vector<1x13x16xf32> to vector<13x16xf32>
    %140 = arith.maximumf %137, %139 : vector<13x16xf32>
    %141 = vector.extract_strided_slice %120 {offsets = [8, 0, 0], sizes = [1, 13, 16], strides = [1, 1, 1]} : vector<26x13x16xf32> to vector<1x13x16xf32>
    %142 = vector.shape_cast %141 : vector<1x13x16xf32> to vector<13x16xf32>
    %143 = vector.extract_strided_slice %120 {offsets = [9, 0, 0], sizes = [1, 13, 16], strides = [1, 1, 1]} : vector<26x13x16xf32> to vector<1x13x16xf32>
    %144 = vector.shape_cast %143 : vector<1x13x16xf32> to vector<13x16xf32>
    %145 = arith.maximumf %142, %144 : vector<13x16xf32>
    %146 = vector.extract_strided_slice %120 {offsets = [10, 0, 0], sizes = [1, 13, 16], strides = [1, 1, 1]} : vector<26x13x16xf32> to vector<1x13x16xf32>
    %147 = vector.shape_cast %146 : vector<1x13x16xf32> to vector<13x16xf32>
    %148 = vector.extract_strided_slice %120 {offsets = [11, 0, 0], sizes = [1, 13, 16], strides = [1, 1, 1]} : vector<26x13x16xf32> to vector<1x13x16xf32>
    %149 = vector.shape_cast %148 : vector<1x13x16xf32> to vector<13x16xf32>
    %150 = arith.maximumf %147, %149 : vector<13x16xf32>
    %151 = vector.extract_strided_slice %120 {offsets = [12, 0, 0], sizes = [1, 13, 16], strides = [1, 1, 1]} : vector<26x13x16xf32> to vector<1x13x16xf32>
    %152 = vector.shape_cast %151 : vector<1x13x16xf32> to vector<13x16xf32>
    %153 = vector.extract_strided_slice %120 {offsets = [13, 0, 0], sizes = [1, 13, 16], strides = [1, 1, 1]} : vector<26x13x16xf32> to vector<1x13x16xf32>
    %154 = vector.shape_cast %153 : vector<1x13x16xf32> to vector<13x16xf32>
    %155 = arith.maximumf %152, %154 : vector<13x16xf32>
    %156 = vector.extract_strided_slice %120 {offsets = [14, 0, 0], sizes = [1, 13, 16], strides = [1, 1, 1]} : vector<26x13x16xf32> to vector<1x13x16xf32>
    %157 = vector.shape_cast %156 : vector<1x13x16xf32> to vector<13x16xf32>
    %158 = vector.extract_strided_slice %120 {offsets = [15, 0, 0], sizes = [1, 13, 16], strides = [1, 1, 1]} : vector<26x13x16xf32> to vector<1x13x16xf32>
    %159 = vector.shape_cast %158 : vector<1x13x16xf32> to vector<13x16xf32>
    %160 = arith.maximumf %157, %159 : vector<13x16xf32>
    %161 = vector.extract_strided_slice %120 {offsets = [16, 0, 0], sizes = [1, 13, 16], strides = [1, 1, 1]} : vector<26x13x16xf32> to vector<1x13x16xf32>
    %162 = vector.shape_cast %161 : vector<1x13x16xf32> to vector<13x16xf32>
    %163 = vector.extract_strided_slice %120 {offsets = [17, 0, 0], sizes = [1, 13, 16], strides = [1, 1, 1]} : vector<26x13x16xf32> to vector<1x13x16xf32>
    %164 = vector.shape_cast %163 : vector<1x13x16xf32> to vector<13x16xf32>
    %165 = arith.maximumf %162, %164 : vector<13x16xf32>
    %166 = vector.extract_strided_slice %120 {offsets = [18, 0, 0], sizes = [1, 13, 16], strides = [1, 1, 1]} : vector<26x13x16xf32> to vector<1x13x16xf32>
    %167 = vector.shape_cast %166 : vector<1x13x16xf32> to vector<13x16xf32>
    %168 = vector.extract_strided_slice %120 {offsets = [19, 0, 0], sizes = [1, 13, 16], strides = [1, 1, 1]} : vector<26x13x16xf32> to vector<1x13x16xf32>
    %169 = vector.shape_cast %168 : vector<1x13x16xf32> to vector<13x16xf32>
    %170 = arith.maximumf %167, %169 : vector<13x16xf32>
    %171 = vector.extract_strided_slice %120 {offsets = [20, 0, 0], sizes = [1, 13, 16], strides = [1, 1, 1]} : vector<26x13x16xf32> to vector<1x13x16xf32>
    %172 = vector.shape_cast %171 : vector<1x13x16xf32> to vector<13x16xf32>
    %173 = vector.extract_strided_slice %120 {offsets = [21, 0, 0], sizes = [1, 13, 16], strides = [1, 1, 1]} : vector<26x13x16xf32> to vector<1x13x16xf32>
    %174 = vector.shape_cast %173 : vector<1x13x16xf32> to vector<13x16xf32>
    %175 = arith.maximumf %172, %174 : vector<13x16xf32>
    %176 = vector.extract_strided_slice %120 {offsets = [22, 0, 0], sizes = [1, 13, 16], strides = [1, 1, 1]} : vector<26x13x16xf32> to vector<1x13x16xf32>
    %177 = vector.shape_cast %176 : vector<1x13x16xf32> to vector<13x16xf32>
    %178 = vector.extract_strided_slice %120 {offsets = [23, 0, 0], sizes = [1, 13, 16], strides = [1, 1, 1]} : vector<26x13x16xf32> to vector<1x13x16xf32>
    %179 = vector.shape_cast %178 : vector<1x13x16xf32> to vector<13x16xf32>
    %180 = arith.maximumf %177, %179 : vector<13x16xf32>
    %181 = vector.extract_strided_slice %120 {offsets = [24, 0, 0], sizes = [1, 13, 16], strides = [1, 1, 1]} : vector<26x13x16xf32> to vector<1x13x16xf32>
    %182 = vector.shape_cast %181 : vector<1x13x16xf32> to vector<13x16xf32>
    %183 = vector.extract_strided_slice %120 {offsets = [25, 0, 0], sizes = [1, 13, 16], strides = [1, 1, 1]} : vector<26x13x16xf32> to vector<1x13x16xf32>
    %184 = vector.shape_cast %183 : vector<1x13x16xf32> to vector<13x16xf32>
    %185 = arith.maximumf %182, %184 : vector<13x16xf32>
    %186 = vector.shape_cast %125 : vector<13x16xf32> to vector<1x13x16xf32>
    %187 = vector.shape_cast %130 : vector<13x16xf32> to vector<1x13x16xf32>
    %188 = vector.shape_cast %135 : vector<13x16xf32> to vector<1x13x16xf32>
    %189 = vector.shape_cast %140 : vector<13x16xf32> to vector<1x13x16xf32>
    %190 = vector.shape_cast %145 : vector<13x16xf32> to vector<1x13x16xf32>
    %191 = vector.shape_cast %150 : vector<13x16xf32> to vector<1x13x16xf32>
    %192 = vector.shape_cast %155 : vector<13x16xf32> to vector<1x13x16xf32>
    %193 = vector.shape_cast %160 : vector<13x16xf32> to vector<1x13x16xf32>
    %194 = vector.shape_cast %165 : vector<13x16xf32> to vector<1x13x16xf32>
    %195 = vector.shape_cast %170 : vector<13x16xf32> to vector<1x13x16xf32>
    %196 = vector.shape_cast %175 : vector<13x16xf32> to vector<1x13x16xf32>
    %197 = vector.shape_cast %180 : vector<13x16xf32> to vector<1x13x16xf32>
    %198 = vector.shape_cast %185 : vector<13x16xf32> to vector<1x13x16xf32>
    %199 = tpu.concatenate %186, %187, %188, %189, %190, %191, %192, %193, %194, %195, %196, %197, %198 in 0 : vector<1x13x16xf32>, vector<1x13x16xf32>, vector<1x13x16xf32>, vector<1x13x16xf32>, vector<1x13x16xf32>, vector<1x13x16xf32>, vector<1x13x16xf32>, vector<1x13x16xf32>, vector<1x13x16xf32>, vector<1x13x16xf32>, vector<1x13x16xf32>, vector<1x13x16xf32>, vector<1x13x16xf32> -> vector<13x13x16xf32>
    %cst_40 = arith.constant 0.000000e+00 : f32
    %200 = vector.broadcast %cst_40 : f32 to vector<11x11x32xf32>
    %201 = vector.extract_strided_slice %199 {offsets = [0, 0, 0], sizes = [11, 11, 16], strides = [1, 1, 1]} : vector<13x13x16xf32> to vector<11x11x16xf32>
    %c0_41 = arith.constant 0 : index
    %c0_42 = arith.constant 0 : index
    %c0_43 = arith.constant 0 : index
    %c0_44 = arith.constant 0 : index
    %202 = vector.load %arg4[%c0_41, %c0_42, %c0_43, %c0_44] : memref<3x3x16x32xf32, #tpu.memory_space<vmem>>, vector<1x1x16x32xf32>
    %203 = vector.shape_cast %202 : vector<1x1x16x32xf32> to vector<16x32xf32>
    %204 = vector.shape_cast %203 : vector<16x32xf32> to vector<1x16x32xf32>
    %205 = vector.broadcast %204 : vector<1x16x32xf32> to vector<11x16x32xf32>
    "tpu.trace_start"() <{level = 10 : i32, message = "hwc,hco->hwo"}> : () -> ()
    %cst_45 = arith.constant dense<0.000000e+00> : vector<11x11x32xf32>
    %206 = tpu.matmul %201, %205, %cst_45 {dimension_numbers = #tpu.dot_dimension_numbers<[2], [1], [1], [2], [0, 0, 0, 1, 1, 2], [0], [0]>} : vector<11x11x16xf32>, vector<11x16x32xf32>, vector<11x11x32xf32> -> vector<11x11x32xf32>
    "tpu.trace_stop"() : () -> ()
    %207 = arith.addf %200, %206 : vector<11x11x32xf32>
    %208 = vector.extract_strided_slice %199 {offsets = [0, 1, 0], sizes = [11, 11, 16], strides = [1, 1, 1]} : vector<13x13x16xf32> to vector<11x11x16xf32>
    %c0_46 = arith.constant 0 : index
    %c1_47 = arith.constant 1 : index
    %c0_48 = arith.constant 0 : index
    %c0_49 = arith.constant 0 : index
    %209 = vector.load %arg4[%c0_46, %c1_47, %c0_48, %c0_49] : memref<3x3x16x32xf32, #tpu.memory_space<vmem>>, vector<1x1x16x32xf32>
    %210 = vector.shape_cast %209 : vector<1x1x16x32xf32> to vector<16x32xf32>
    %211 = vector.shape_cast %210 : vector<16x32xf32> to vector<1x16x32xf32>
    %212 = vector.broadcast %211 : vector<1x16x32xf32> to vector<11x16x32xf32>
    "tpu.trace_start"() <{level = 10 : i32, message = "hwc,hco->hwo"}> : () -> ()
    %cst_50 = arith.constant dense<0.000000e+00> : vector<11x11x32xf32>
    %213 = tpu.matmul %208, %212, %cst_50 {dimension_numbers = #tpu.dot_dimension_numbers<[2], [1], [1], [2], [0, 0, 0, 1, 1, 2], [0], [0]>} : vector<11x11x16xf32>, vector<11x16x32xf32>, vector<11x11x32xf32> -> vector<11x11x32xf32>
    "tpu.trace_stop"() : () -> ()
    %214 = arith.addf %207, %213 : vector<11x11x32xf32>
    %215 = vector.extract_strided_slice %199 {offsets = [0, 2, 0], sizes = [11, 11, 16], strides = [1, 1, 1]} : vector<13x13x16xf32> to vector<11x11x16xf32>
    %c0_51 = arith.constant 0 : index
    %c2_52 = arith.constant 2 : index
    %c0_53 = arith.constant 0 : index
    %c0_54 = arith.constant 0 : index
    %216 = vector.load %arg4[%c0_51, %c2_52, %c0_53, %c0_54] : memref<3x3x16x32xf32, #tpu.memory_space<vmem>>, vector<1x1x16x32xf32>
    %217 = vector.shape_cast %216 : vector<1x1x16x32xf32> to vector<16x32xf32>
    %218 = vector.shape_cast %217 : vector<16x32xf32> to vector<1x16x32xf32>
    %219 = vector.broadcast %218 : vector<1x16x32xf32> to vector<11x16x32xf32>
    "tpu.trace_start"() <{level = 10 : i32, message = "hwc,hco->hwo"}> : () -> ()
    %cst_55 = arith.constant dense<0.000000e+00> : vector<11x11x32xf32>
    %220 = tpu.matmul %215, %219, %cst_55 {dimension_numbers = #tpu.dot_dimension_numbers<[2], [1], [1], [2], [0, 0, 0, 1, 1, 2], [0], [0]>} : vector<11x11x16xf32>, vector<11x16x32xf32>, vector<11x11x32xf32> -> vector<11x11x32xf32>
    "tpu.trace_stop"() : () -> ()
    %221 = arith.addf %214, %220 : vector<11x11x32xf32>
    %222 = vector.extract_strided_slice %199 {offsets = [1, 0, 0], sizes = [11, 11, 16], strides = [1, 1, 1]} : vector<13x13x16xf32> to vector<11x11x16xf32>
    %c1_56 = arith.constant 1 : index
    %c0_57 = arith.constant 0 : index
    %c0_58 = arith.constant 0 : index
    %c0_59 = arith.constant 0 : index
    %223 = vector.load %arg4[%c1_56, %c0_57, %c0_58, %c0_59] : memref<3x3x16x32xf32, #tpu.memory_space<vmem>>, vector<1x1x16x32xf32>
    %224 = vector.shape_cast %223 : vector<1x1x16x32xf32> to vector<16x32xf32>
    %225 = vector.shape_cast %224 : vector<16x32xf32> to vector<1x16x32xf32>
    %226 = vector.broadcast %225 : vector<1x16x32xf32> to vector<11x16x32xf32>
    "tpu.trace_start"() <{level = 10 : i32, message = "hwc,hco->hwo"}> : () -> ()
    %cst_60 = arith.constant dense<0.000000e+00> : vector<11x11x32xf32>
    %227 = tpu.matmul %222, %226, %cst_60 {dimension_numbers = #tpu.dot_dimension_numbers<[2], [1], [1], [2], [0, 0, 0, 1, 1, 2], [0], [0]>} : vector<11x11x16xf32>, vector<11x16x32xf32>, vector<11x11x32xf32> -> vector<11x11x32xf32>
    "tpu.trace_stop"() : () -> ()
    %228 = arith.addf %221, %227 : vector<11x11x32xf32>
    %229 = vector.extract_strided_slice %199 {offsets = [1, 1, 0], sizes = [11, 11, 16], strides = [1, 1, 1]} : vector<13x13x16xf32> to vector<11x11x16xf32>
    %c1_61 = arith.constant 1 : index
    %c1_62 = arith.constant 1 : index
    %c0_63 = arith.constant 0 : index
    %c0_64 = arith.constant 0 : index
    %230 = vector.load %arg4[%c1_61, %c1_62, %c0_63, %c0_64] : memref<3x3x16x32xf32, #tpu.memory_space<vmem>>, vector<1x1x16x32xf32>
    %231 = vector.shape_cast %230 : vector<1x1x16x32xf32> to vector<16x32xf32>
    %232 = vector.shape_cast %231 : vector<16x32xf32> to vector<1x16x32xf32>
    %233 = vector.broadcast %232 : vector<1x16x32xf32> to vector<11x16x32xf32>
    "tpu.trace_start"() <{level = 10 : i32, message = "hwc,hco->hwo"}> : () -> ()
    %cst_65 = arith.constant dense<0.000000e+00> : vector<11x11x32xf32>
    %234 = tpu.matmul %229, %233, %cst_65 {dimension_numbers = #tpu.dot_dimension_numbers<[2], [1], [1], [2], [0, 0, 0, 1, 1, 2], [0], [0]>} : vector<11x11x16xf32>, vector<11x16x32xf32>, vector<11x11x32xf32> -> vector<11x11x32xf32>
    "tpu.trace_stop"() : () -> ()
    %235 = arith.addf %228, %234 : vector<11x11x32xf32>
    %236 = vector.extract_strided_slice %199 {offsets = [1, 2, 0], sizes = [11, 11, 16], strides = [1, 1, 1]} : vector<13x13x16xf32> to vector<11x11x16xf32>
    %c1_66 = arith.constant 1 : index
    %c2_67 = arith.constant 2 : index
    %c0_68 = arith.constant 0 : index
    %c0_69 = arith.constant 0 : index
    %237 = vector.load %arg4[%c1_66, %c2_67, %c0_68, %c0_69] : memref<3x3x16x32xf32, #tpu.memory_space<vmem>>, vector<1x1x16x32xf32>
    %238 = vector.shape_cast %237 : vector<1x1x16x32xf32> to vector<16x32xf32>
    %239 = vector.shape_cast %238 : vector<16x32xf32> to vector<1x16x32xf32>
    %240 = vector.broadcast %239 : vector<1x16x32xf32> to vector<11x16x32xf32>
    "tpu.trace_start"() <{level = 10 : i32, message = "hwc,hco->hwo"}> : () -> ()
    %cst_70 = arith.constant dense<0.000000e+00> : vector<11x11x32xf32>
    %241 = tpu.matmul %236, %240, %cst_70 {dimension_numbers = #tpu.dot_dimension_numbers<[2], [1], [1], [2], [0, 0, 0, 1, 1, 2], [0], [0]>} : vector<11x11x16xf32>, vector<11x16x32xf32>, vector<11x11x32xf32> -> vector<11x11x32xf32>
    "tpu.trace_stop"() : () -> ()
    %242 = arith.addf %235, %241 : vector<11x11x32xf32>
    %243 = vector.extract_strided_slice %199 {offsets = [2, 0, 0], sizes = [11, 11, 16], strides = [1, 1, 1]} : vector<13x13x16xf32> to vector<11x11x16xf32>
    %c2_71 = arith.constant 2 : index
    %c0_72 = arith.constant 0 : index
    %c0_73 = arith.constant 0 : index
    %c0_74 = arith.constant 0 : index
    %244 = vector.load %arg4[%c2_71, %c0_72, %c0_73, %c0_74] : memref<3x3x16x32xf32, #tpu.memory_space<vmem>>, vector<1x1x16x32xf32>
    %245 = vector.shape_cast %244 : vector<1x1x16x32xf32> to vector<16x32xf32>
    %246 = vector.shape_cast %245 : vector<16x32xf32> to vector<1x16x32xf32>
    %247 = vector.broadcast %246 : vector<1x16x32xf32> to vector<11x16x32xf32>
    "tpu.trace_start"() <{level = 10 : i32, message = "hwc,hco->hwo"}> : () -> ()
    %cst_75 = arith.constant dense<0.000000e+00> : vector<11x11x32xf32>
    %248 = tpu.matmul %243, %247, %cst_75 {dimension_numbers = #tpu.dot_dimension_numbers<[2], [1], [1], [2], [0, 0, 0, 1, 1, 2], [0], [0]>} : vector<11x11x16xf32>, vector<11x16x32xf32>, vector<11x11x32xf32> -> vector<11x11x32xf32>
    "tpu.trace_stop"() : () -> ()
    %249 = arith.addf %242, %248 : vector<11x11x32xf32>
    %250 = vector.extract_strided_slice %199 {offsets = [2, 1, 0], sizes = [11, 11, 16], strides = [1, 1, 1]} : vector<13x13x16xf32> to vector<11x11x16xf32>
    %c2_76 = arith.constant 2 : index
    %c1_77 = arith.constant 1 : index
    %c0_78 = arith.constant 0 : index
    %c0_79 = arith.constant 0 : index
    %251 = vector.load %arg4[%c2_76, %c1_77, %c0_78, %c0_79] : memref<3x3x16x32xf32, #tpu.memory_space<vmem>>, vector<1x1x16x32xf32>
    %252 = vector.shape_cast %251 : vector<1x1x16x32xf32> to vector<16x32xf32>
    %253 = vector.shape_cast %252 : vector<16x32xf32> to vector<1x16x32xf32>
    %254 = vector.broadcast %253 : vector<1x16x32xf32> to vector<11x16x32xf32>
    "tpu.trace_start"() <{level = 10 : i32, message = "hwc,hco->hwo"}> : () -> ()
    %cst_80 = arith.constant dense<0.000000e+00> : vector<11x11x32xf32>
    %255 = tpu.matmul %250, %254, %cst_80 {dimension_numbers = #tpu.dot_dimension_numbers<[2], [1], [1], [2], [0, 0, 0, 1, 1, 2], [0], [0]>} : vector<11x11x16xf32>, vector<11x16x32xf32>, vector<11x11x32xf32> -> vector<11x11x32xf32>
    "tpu.trace_stop"() : () -> ()
    %256 = arith.addf %249, %255 : vector<11x11x32xf32>
    %257 = vector.extract_strided_slice %199 {offsets = [2, 2, 0], sizes = [11, 11, 16], strides = [1, 1, 1]} : vector<13x13x16xf32> to vector<11x11x16xf32>
    %c2_81 = arith.constant 2 : index
    %c2_82 = arith.constant 2 : index
    %c0_83 = arith.constant 0 : index
    %c0_84 = arith.constant 0 : index
    %258 = vector.load %arg4[%c2_81, %c2_82, %c0_83, %c0_84] : memref<3x3x16x32xf32, #tpu.memory_space<vmem>>, vector<1x1x16x32xf32>
    %259 = vector.shape_cast %258 : vector<1x1x16x32xf32> to vector<16x32xf32>
    %260 = vector.shape_cast %259 : vector<16x32xf32> to vector<1x16x32xf32>
    %261 = vector.broadcast %260 : vector<1x16x32xf32> to vector<11x16x32xf32>
    "tpu.trace_start"() <{level = 10 : i32, message = "hwc,hco->hwo"}> : () -> ()
    %cst_85 = arith.constant dense<0.000000e+00> : vector<11x11x32xf32>
    %262 = tpu.matmul %257, %261, %cst_85 {dimension_numbers = #tpu.dot_dimension_numbers<[2], [1], [1], [2], [0, 0, 0, 1, 1, 2], [0], [0]>} : vector<11x11x16xf32>, vector<11x16x32xf32>, vector<11x11x32xf32> -> vector<11x11x32xf32>
    "tpu.trace_stop"() : () -> ()
    %263 = arith.addf %256, %262 : vector<11x11x32xf32>
    %c0_86 = arith.constant 0 : index
    %c0_87 = arith.constant 0 : index
    %264 = vector.load %arg5[%c0_86, %c0_87] : memref<1x32xf32, #tpu.memory_space<vmem>>, vector<1x32xf32>
    %265 = vector.shape_cast %264 : vector<1x32xf32> to vector<1x1x32xf32>
    %266 = vector.broadcast %265 : vector<1x1x32xf32> to vector<11x11x32xf32>
    %267 = arith.addf %263, %266 : vector<11x11x32xf32>
    %cst_88 = arith.constant 0.000000e+00 : f32
    %268 = vector.broadcast %cst_88 : f32 to vector<11x11x32xf32>
    %269 = arith.maximumf %267, %268 : vector<11x11x32xf32>
    %270 = vector.extract_strided_slice %269 {offsets = [0, 0, 0], sizes = [11, 1, 32], strides = [1, 1, 1]} : vector<11x11x32xf32> to vector<11x1x32xf32>
    %271 = vector.extract_strided_slice %269 {offsets = [0, 1, 0], sizes = [11, 1, 32], strides = [1, 1, 1]} : vector<11x11x32xf32> to vector<11x1x32xf32>
    %272 = arith.maximumf %270, %271 : vector<11x1x32xf32>
    %273 = vector.extract_strided_slice %269 {offsets = [0, 2, 0], sizes = [11, 1, 32], strides = [1, 1, 1]} : vector<11x11x32xf32> to vector<11x1x32xf32>
    %274 = vector.extract_strided_slice %269 {offsets = [0, 3, 0], sizes = [11, 1, 32], strides = [1, 1, 1]} : vector<11x11x32xf32> to vector<11x1x32xf32>
    %275 = arith.maximumf %273, %274 : vector<11x1x32xf32>
    %276 = vector.extract_strided_slice %269 {offsets = [0, 4, 0], sizes = [11, 1, 32], strides = [1, 1, 1]} : vector<11x11x32xf32> to vector<11x1x32xf32>
    %277 = vector.extract_strided_slice %269 {offsets = [0, 5, 0], sizes = [11, 1, 32], strides = [1, 1, 1]} : vector<11x11x32xf32> to vector<11x1x32xf32>
    %278 = arith.maximumf %276, %277 : vector<11x1x32xf32>
    %279 = vector.extract_strided_slice %269 {offsets = [0, 6, 0], sizes = [11, 1, 32], strides = [1, 1, 1]} : vector<11x11x32xf32> to vector<11x1x32xf32>
    %280 = vector.extract_strided_slice %269 {offsets = [0, 7, 0], sizes = [11, 1, 32], strides = [1, 1, 1]} : vector<11x11x32xf32> to vector<11x1x32xf32>
    %281 = arith.maximumf %279, %280 : vector<11x1x32xf32>
    %282 = vector.extract_strided_slice %269 {offsets = [0, 8, 0], sizes = [11, 1, 32], strides = [1, 1, 1]} : vector<11x11x32xf32> to vector<11x1x32xf32>
    %283 = vector.extract_strided_slice %269 {offsets = [0, 9, 0], sizes = [11, 1, 32], strides = [1, 1, 1]} : vector<11x11x32xf32> to vector<11x1x32xf32>
    %284 = arith.maximumf %282, %283 : vector<11x1x32xf32>
    %285 = tpu.concatenate %272, %275, %278, %281, %284 in 1 : vector<11x1x32xf32>, vector<11x1x32xf32>, vector<11x1x32xf32>, vector<11x1x32xf32>, vector<11x1x32xf32> -> vector<11x5x32xf32>
    %286 = vector.extract_strided_slice %285 {offsets = [0, 0, 0], sizes = [1, 5, 32], strides = [1, 1, 1]} : vector<11x5x32xf32> to vector<1x5x32xf32>
    %287 = vector.shape_cast %286 : vector<1x5x32xf32> to vector<5x32xf32>
    %288 = vector.extract_strided_slice %285 {offsets = [1, 0, 0], sizes = [1, 5, 32], strides = [1, 1, 1]} : vector<11x5x32xf32> to vector<1x5x32xf32>
    %289 = vector.shape_cast %288 : vector<1x5x32xf32> to vector<5x32xf32>
    %290 = arith.maximumf %287, %289 : vector<5x32xf32>
    %291 = vector.extract_strided_slice %285 {offsets = [2, 0, 0], sizes = [1, 5, 32], strides = [1, 1, 1]} : vector<11x5x32xf32> to vector<1x5x32xf32>
    %292 = vector.shape_cast %291 : vector<1x5x32xf32> to vector<5x32xf32>
    %293 = vector.extract_strided_slice %285 {offsets = [3, 0, 0], sizes = [1, 5, 32], strides = [1, 1, 1]} : vector<11x5x32xf32> to vector<1x5x32xf32>
    %294 = vector.shape_cast %293 : vector<1x5x32xf32> to vector<5x32xf32>
    %295 = arith.maximumf %292, %294 : vector<5x32xf32>
    %296 = vector.extract_strided_slice %285 {offsets = [4, 0, 0], sizes = [1, 5, 32], strides = [1, 1, 1]} : vector<11x5x32xf32> to vector<1x5x32xf32>
    %297 = vector.shape_cast %296 : vector<1x5x32xf32> to vector<5x32xf32>
    %298 = vector.extract_strided_slice %285 {offsets = [5, 0, 0], sizes = [1, 5, 32], strides = [1, 1, 1]} : vector<11x5x32xf32> to vector<1x5x32xf32>
    %299 = vector.shape_cast %298 : vector<1x5x32xf32> to vector<5x32xf32>
    %300 = arith.maximumf %297, %299 : vector<5x32xf32>
    %301 = vector.extract_strided_slice %285 {offsets = [6, 0, 0], sizes = [1, 5, 32], strides = [1, 1, 1]} : vector<11x5x32xf32> to vector<1x5x32xf32>
    %302 = vector.shape_cast %301 : vector<1x5x32xf32> to vector<5x32xf32>
    %303 = vector.extract_strided_slice %285 {offsets = [7, 0, 0], sizes = [1, 5, 32], strides = [1, 1, 1]} : vector<11x5x32xf32> to vector<1x5x32xf32>
    %304 = vector.shape_cast %303 : vector<1x5x32xf32> to vector<5x32xf32>
    %305 = arith.maximumf %302, %304 : vector<5x32xf32>
    %306 = vector.extract_strided_slice %285 {offsets = [8, 0, 0], sizes = [1, 5, 32], strides = [1, 1, 1]} : vector<11x5x32xf32> to vector<1x5x32xf32>
    %307 = vector.shape_cast %306 : vector<1x5x32xf32> to vector<5x32xf32>
    %308 = vector.extract_strided_slice %285 {offsets = [9, 0, 0], sizes = [1, 5, 32], strides = [1, 1, 1]} : vector<11x5x32xf32> to vector<1x5x32xf32>
    %309 = vector.shape_cast %308 : vector<1x5x32xf32> to vector<5x32xf32>
    %310 = arith.maximumf %307, %309 : vector<5x32xf32>
    %311 = vector.shape_cast %290 : vector<5x32xf32> to vector<1x5x32xf32>
    %312 = vector.shape_cast %295 : vector<5x32xf32> to vector<1x5x32xf32>
    %313 = vector.shape_cast %300 : vector<5x32xf32> to vector<1x5x32xf32>
    %314 = vector.shape_cast %305 : vector<5x32xf32> to vector<1x5x32xf32>
    %315 = vector.shape_cast %310 : vector<5x32xf32> to vector<1x5x32xf32>
    %316 = tpu.concatenate %311, %312, %313, %314, %315 in 0 : vector<1x5x32xf32>, vector<1x5x32xf32>, vector<1x5x32xf32>, vector<1x5x32xf32>, vector<1x5x32xf32> -> vector<5x5x32xf32>
    %cst_89 = arith.constant 0.000000e+00 : f32
    %317 = vector.broadcast %cst_89 : f32 to vector<1x128xf32>
    %318 = vector.extract_strided_slice %316 {offsets = [0, 0, 0], sizes = [1, 5, 32], strides = [1, 1, 1]} : vector<5x5x32xf32> to vector<1x5x32xf32>
    %319 = vector.shape_cast %318 : vector<1x5x32xf32> to vector<5x32xf32>
    %320 = vector.extract_strided_slice %319 {offsets = [0, 0], sizes = [1, 32], strides = [1, 1]} : vector<5x32xf32> to vector<1x32xf32>
    %c0_90 = arith.constant 0 : index
    %c0_91 = arith.constant 0 : index
    %c0_92 = arith.constant 0 : index
    %c0_93 = arith.constant 0 : index
    %321 = vector.load %arg6[%c0_90, %c0_91, %c0_92, %c0_93] : memref<5x5x32x128xf32, #tpu.memory_space<vmem>>, vector<1x1x32x128xf32>
    %322 = vector.shape_cast %321 : vector<1x1x32x128xf32> to vector<32x128xf32>
    %cst_94 = arith.constant dense<0.000000e+00> : vector<1x128xf32>
    %323 = tpu.matmul %320, %322, %cst_94 {dimension_numbers = #tpu.dot_dimension_numbers<[1], [0], [0], [1], [0, 0, 1, 1], [], []>} : vector<1x32xf32>, vector<32x128xf32>, vector<1x128xf32> -> vector<1x128xf32>
    %324 = arith.addf %317, %323 : vector<1x128xf32>
    %325 = vector.extract_strided_slice %319 {offsets = [1, 0], sizes = [1, 32], strides = [1, 1]} : vector<5x32xf32> to vector<1x32xf32>
    %c0_95 = arith.constant 0 : index
    %c1_96 = arith.constant 1 : index
    %c0_97 = arith.constant 0 : index
    %c0_98 = arith.constant 0 : index
    %326 = vector.load %arg6[%c0_95, %c1_96, %c0_97, %c0_98] : memref<5x5x32x128xf32, #tpu.memory_space<vmem>>, vector<1x1x32x128xf32>
    %327 = vector.shape_cast %326 : vector<1x1x32x128xf32> to vector<32x128xf32>
    %cst_99 = arith.constant dense<0.000000e+00> : vector<1x128xf32>
    %328 = tpu.matmul %325, %327, %cst_99 {dimension_numbers = #tpu.dot_dimension_numbers<[1], [0], [0], [1], [0, 0, 1, 1], [], []>} : vector<1x32xf32>, vector<32x128xf32>, vector<1x128xf32> -> vector<1x128xf32>
    %329 = arith.addf %324, %328 : vector<1x128xf32>
    %330 = vector.extract_strided_slice %319 {offsets = [2, 0], sizes = [1, 32], strides = [1, 1]} : vector<5x32xf32> to vector<1x32xf32>
    %c0_100 = arith.constant 0 : index
    %c2_101 = arith.constant 2 : index
    %c0_102 = arith.constant 0 : index
    %c0_103 = arith.constant 0 : index
    %331 = vector.load %arg6[%c0_100, %c2_101, %c0_102, %c0_103] : memref<5x5x32x128xf32, #tpu.memory_space<vmem>>, vector<1x1x32x128xf32>
    %332 = vector.shape_cast %331 : vector<1x1x32x128xf32> to vector<32x128xf32>
    %cst_104 = arith.constant dense<0.000000e+00> : vector<1x128xf32>
    %333 = tpu.matmul %330, %332, %cst_104 {dimension_numbers = #tpu.dot_dimension_numbers<[1], [0], [0], [1], [0, 0, 1, 1], [], []>} : vector<1x32xf32>, vector<32x128xf32>, vector<1x128xf32> -> vector<1x128xf32>
    %334 = arith.addf %329, %333 : vector<1x128xf32>
    %335 = vector.extract_strided_slice %319 {offsets = [3, 0], sizes = [1, 32], strides = [1, 1]} : vector<5x32xf32> to vector<1x32xf32>
    %c0_105 = arith.constant 0 : index
    %c3 = arith.constant 3 : index
    %c0_106 = arith.constant 0 : index
    %c0_107 = arith.constant 0 : index
    %336 = vector.load %arg6[%c0_105, %c3, %c0_106, %c0_107] : memref<5x5x32x128xf32, #tpu.memory_space<vmem>>, vector<1x1x32x128xf32>
    %337 = vector.shape_cast %336 : vector<1x1x32x128xf32> to vector<32x128xf32>
    %cst_108 = arith.constant dense<0.000000e+00> : vector<1x128xf32>
    %338 = tpu.matmul %335, %337, %cst_108 {dimension_numbers = #tpu.dot_dimension_numbers<[1], [0], [0], [1], [0, 0, 1, 1], [], []>} : vector<1x32xf32>, vector<32x128xf32>, vector<1x128xf32> -> vector<1x128xf32>
    %339 = arith.addf %334, %338 : vector<1x128xf32>
    %340 = vector.extract_strided_slice %319 {offsets = [4, 0], sizes = [1, 32], strides = [1, 1]} : vector<5x32xf32> to vector<1x32xf32>
    %c0_109 = arith.constant 0 : index
    %c4 = arith.constant 4 : index
    %c0_110 = arith.constant 0 : index
    %c0_111 = arith.constant 0 : index
    %341 = vector.load %arg6[%c0_109, %c4, %c0_110, %c0_111] : memref<5x5x32x128xf32, #tpu.memory_space<vmem>>, vector<1x1x32x128xf32>
    %342 = vector.shape_cast %341 : vector<1x1x32x128xf32> to vector<32x128xf32>
    %cst_112 = arith.constant dense<0.000000e+00> : vector<1x128xf32>
    %343 = tpu.matmul %340, %342, %cst_112 {dimension_numbers = #tpu.dot_dimension_numbers<[1], [0], [0], [1], [0, 0, 1, 1], [], []>} : vector<1x32xf32>, vector<32x128xf32>, vector<1x128xf32> -> vector<1x128xf32>
    %344 = arith.addf %339, %343 : vector<1x128xf32>
    %345 = vector.extract_strided_slice %316 {offsets = [1, 0, 0], sizes = [1, 5, 32], strides = [1, 1, 1]} : vector<5x5x32xf32> to vector<1x5x32xf32>
    %346 = vector.shape_cast %345 : vector<1x5x32xf32> to vector<5x32xf32>
    %347 = vector.extract_strided_slice %346 {offsets = [0, 0], sizes = [1, 32], strides = [1, 1]} : vector<5x32xf32> to vector<1x32xf32>
    %c1_113 = arith.constant 1 : index
    %c0_114 = arith.constant 0 : index
    %c0_115 = arith.constant 0 : index
    %c0_116 = arith.constant 0 : index
    %348 = vector.load %arg6[%c1_113, %c0_114, %c0_115, %c0_116] : memref<5x5x32x128xf32, #tpu.memory_space<vmem>>, vector<1x1x32x128xf32>
    %349 = vector.shape_cast %348 : vector<1x1x32x128xf32> to vector<32x128xf32>
    %cst_117 = arith.constant dense<0.000000e+00> : vector<1x128xf32>
    %350 = tpu.matmul %347, %349, %cst_117 {dimension_numbers = #tpu.dot_dimension_numbers<[1], [0], [0], [1], [0, 0, 1, 1], [], []>} : vector<1x32xf32>, vector<32x128xf32>, vector<1x128xf32> -> vector<1x128xf32>
    %351 = arith.addf %344, %350 : vector<1x128xf32>
    %352 = vector.extract_strided_slice %346 {offsets = [1, 0], sizes = [1, 32], strides = [1, 1]} : vector<5x32xf32> to vector<1x32xf32>
    %c1_118 = arith.constant 1 : index
    %c1_119 = arith.constant 1 : index
    %c0_120 = arith.constant 0 : index
    %c0_121 = arith.constant 0 : index
    %353 = vector.load %arg6[%c1_118, %c1_119, %c0_120, %c0_121] : memref<5x5x32x128xf32, #tpu.memory_space<vmem>>, vector<1x1x32x128xf32>
    %354 = vector.shape_cast %353 : vector<1x1x32x128xf32> to vector<32x128xf32>
    %cst_122 = arith.constant dense<0.000000e+00> : vector<1x128xf32>
    %355 = tpu.matmul %352, %354, %cst_122 {dimension_numbers = #tpu.dot_dimension_numbers<[1], [0], [0], [1], [0, 0, 1, 1], [], []>} : vector<1x32xf32>, vector<32x128xf32>, vector<1x128xf32> -> vector<1x128xf32>
    %356 = arith.addf %351, %355 : vector<1x128xf32>
    %357 = vector.extract_strided_slice %346 {offsets = [2, 0], sizes = [1, 32], strides = [1, 1]} : vector<5x32xf32> to vector<1x32xf32>
    %c1_123 = arith.constant 1 : index
    %c2_124 = arith.constant 2 : index
    %c0_125 = arith.constant 0 : index
    %c0_126 = arith.constant 0 : index
    %358 = vector.load %arg6[%c1_123, %c2_124, %c0_125, %c0_126] : memref<5x5x32x128xf32, #tpu.memory_space<vmem>>, vector<1x1x32x128xf32>
    %359 = vector.shape_cast %358 : vector<1x1x32x128xf32> to vector<32x128xf32>
    %cst_127 = arith.constant dense<0.000000e+00> : vector<1x128xf32>
    %360 = tpu.matmul %357, %359, %cst_127 {dimension_numbers = #tpu.dot_dimension_numbers<[1], [0], [0], [1], [0, 0, 1, 1], [], []>} : vector<1x32xf32>, vector<32x128xf32>, vector<1x128xf32> -> vector<1x128xf32>
    %361 = arith.addf %356, %360 : vector<1x128xf32>
    %362 = vector.extract_strided_slice %346 {offsets = [3, 0], sizes = [1, 32], strides = [1, 1]} : vector<5x32xf32> to vector<1x32xf32>
    %c1_128 = arith.constant 1 : index
    %c3_129 = arith.constant 3 : index
    %c0_130 = arith.constant 0 : index
    %c0_131 = arith.constant 0 : index
    %363 = vector.load %arg6[%c1_128, %c3_129, %c0_130, %c0_131] : memref<5x5x32x128xf32, #tpu.memory_space<vmem>>, vector<1x1x32x128xf32>
    %364 = vector.shape_cast %363 : vector<1x1x32x128xf32> to vector<32x128xf32>
    %cst_132 = arith.constant dense<0.000000e+00> : vector<1x128xf32>
    %365 = tpu.matmul %362, %364, %cst_132 {dimension_numbers = #tpu.dot_dimension_numbers<[1], [0], [0], [1], [0, 0, 1, 1], [], []>} : vector<1x32xf32>, vector<32x128xf32>, vector<1x128xf32> -> vector<1x128xf32>
    %366 = arith.addf %361, %365 : vector<1x128xf32>
    %367 = vector.extract_strided_slice %346 {offsets = [4, 0], sizes = [1, 32], strides = [1, 1]} : vector<5x32xf32> to vector<1x32xf32>
    %c1_133 = arith.constant 1 : index
    %c4_134 = arith.constant 4 : index
    %c0_135 = arith.constant 0 : index
    %c0_136 = arith.constant 0 : index
    %368 = vector.load %arg6[%c1_133, %c4_134, %c0_135, %c0_136] : memref<5x5x32x128xf32, #tpu.memory_space<vmem>>, vector<1x1x32x128xf32>
    %369 = vector.shape_cast %368 : vector<1x1x32x128xf32> to vector<32x128xf32>
    %cst_137 = arith.constant dense<0.000000e+00> : vector<1x128xf32>
    %370 = tpu.matmul %367, %369, %cst_137 {dimension_numbers = #tpu.dot_dimension_numbers<[1], [0], [0], [1], [0, 0, 1, 1], [], []>} : vector<1x32xf32>, vector<32x128xf32>, vector<1x128xf32> -> vector<1x128xf32>
    %371 = arith.addf %366, %370 : vector<1x128xf32>
    %372 = vector.extract_strided_slice %316 {offsets = [2, 0, 0], sizes = [1, 5, 32], strides = [1, 1, 1]} : vector<5x5x32xf32> to vector<1x5x32xf32>
    %373 = vector.shape_cast %372 : vector<1x5x32xf32> to vector<5x32xf32>
    %374 = vector.extract_strided_slice %373 {offsets = [0, 0], sizes = [1, 32], strides = [1, 1]} : vector<5x32xf32> to vector<1x32xf32>
    %c2_138 = arith.constant 2 : index
    %c0_139 = arith.constant 0 : index
    %c0_140 = arith.constant 0 : index
    %c0_141 = arith.constant 0 : index
    %375 = vector.load %arg6[%c2_138, %c0_139, %c0_140, %c0_141] : memref<5x5x32x128xf32, #tpu.memory_space<vmem>>, vector<1x1x32x128xf32>
    %376 = vector.shape_cast %375 : vector<1x1x32x128xf32> to vector<32x128xf32>
    %cst_142 = arith.constant dense<0.000000e+00> : vector<1x128xf32>
    %377 = tpu.matmul %374, %376, %cst_142 {dimension_numbers = #tpu.dot_dimension_numbers<[1], [0], [0], [1], [0, 0, 1, 1], [], []>} : vector<1x32xf32>, vector<32x128xf32>, vector<1x128xf32> -> vector<1x128xf32>
    %378 = arith.addf %371, %377 : vector<1x128xf32>
    %379 = vector.extract_strided_slice %373 {offsets = [1, 0], sizes = [1, 32], strides = [1, 1]} : vector<5x32xf32> to vector<1x32xf32>
    %c2_143 = arith.constant 2 : index
    %c1_144 = arith.constant 1 : index
    %c0_145 = arith.constant 0 : index
    %c0_146 = arith.constant 0 : index
    %380 = vector.load %arg6[%c2_143, %c1_144, %c0_145, %c0_146] : memref<5x5x32x128xf32, #tpu.memory_space<vmem>>, vector<1x1x32x128xf32>
    %381 = vector.shape_cast %380 : vector<1x1x32x128xf32> to vector<32x128xf32>
    %cst_147 = arith.constant dense<0.000000e+00> : vector<1x128xf32>
    %382 = tpu.matmul %379, %381, %cst_147 {dimension_numbers = #tpu.dot_dimension_numbers<[1], [0], [0], [1], [0, 0, 1, 1], [], []>} : vector<1x32xf32>, vector<32x128xf32>, vector<1x128xf32> -> vector<1x128xf32>
    %383 = arith.addf %378, %382 : vector<1x128xf32>
    %384 = vector.extract_strided_slice %373 {offsets = [2, 0], sizes = [1, 32], strides = [1, 1]} : vector<5x32xf32> to vector<1x32xf32>
    %c2_148 = arith.constant 2 : index
    %c2_149 = arith.constant 2 : index
    %c0_150 = arith.constant 0 : index
    %c0_151 = arith.constant 0 : index
    %385 = vector.load %arg6[%c2_148, %c2_149, %c0_150, %c0_151] : memref<5x5x32x128xf32, #tpu.memory_space<vmem>>, vector<1x1x32x128xf32>
    %386 = vector.shape_cast %385 : vector<1x1x32x128xf32> to vector<32x128xf32>
    %cst_152 = arith.constant dense<0.000000e+00> : vector<1x128xf32>
    %387 = tpu.matmul %384, %386, %cst_152 {dimension_numbers = #tpu.dot_dimension_numbers<[1], [0], [0], [1], [0, 0, 1, 1], [], []>} : vector<1x32xf32>, vector<32x128xf32>, vector<1x128xf32> -> vector<1x128xf32>
    %388 = arith.addf %383, %387 : vector<1x128xf32>
    %389 = vector.extract_strided_slice %373 {offsets = [3, 0], sizes = [1, 32], strides = [1, 1]} : vector<5x32xf32> to vector<1x32xf32>
    %c2_153 = arith.constant 2 : index
    %c3_154 = arith.constant 3 : index
    %c0_155 = arith.constant 0 : index
    %c0_156 = arith.constant 0 : index
    %390 = vector.load %arg6[%c2_153, %c3_154, %c0_155, %c0_156] : memref<5x5x32x128xf32, #tpu.memory_space<vmem>>, vector<1x1x32x128xf32>
    %391 = vector.shape_cast %390 : vector<1x1x32x128xf32> to vector<32x128xf32>
    %cst_157 = arith.constant dense<0.000000e+00> : vector<1x128xf32>
    %392 = tpu.matmul %389, %391, %cst_157 {dimension_numbers = #tpu.dot_dimension_numbers<[1], [0], [0], [1], [0, 0, 1, 1], [], []>} : vector<1x32xf32>, vector<32x128xf32>, vector<1x128xf32> -> vector<1x128xf32>
    %393 = arith.addf %388, %392 : vector<1x128xf32>
    %394 = vector.extract_strided_slice %373 {offsets = [4, 0], sizes = [1, 32], strides = [1, 1]} : vector<5x32xf32> to vector<1x32xf32>
    %c2_158 = arith.constant 2 : index
    %c4_159 = arith.constant 4 : index
    %c0_160 = arith.constant 0 : index
    %c0_161 = arith.constant 0 : index
    %395 = vector.load %arg6[%c2_158, %c4_159, %c0_160, %c0_161] : memref<5x5x32x128xf32, #tpu.memory_space<vmem>>, vector<1x1x32x128xf32>
    %396 = vector.shape_cast %395 : vector<1x1x32x128xf32> to vector<32x128xf32>
    %cst_162 = arith.constant dense<0.000000e+00> : vector<1x128xf32>
    %397 = tpu.matmul %394, %396, %cst_162 {dimension_numbers = #tpu.dot_dimension_numbers<[1], [0], [0], [1], [0, 0, 1, 1], [], []>} : vector<1x32xf32>, vector<32x128xf32>, vector<1x128xf32> -> vector<1x128xf32>
    %398 = arith.addf %393, %397 : vector<1x128xf32>
    %399 = vector.extract_strided_slice %316 {offsets = [3, 0, 0], sizes = [1, 5, 32], strides = [1, 1, 1]} : vector<5x5x32xf32> to vector<1x5x32xf32>
    %400 = vector.shape_cast %399 : vector<1x5x32xf32> to vector<5x32xf32>
    %401 = vector.extract_strided_slice %400 {offsets = [0, 0], sizes = [1, 32], strides = [1, 1]} : vector<5x32xf32> to vector<1x32xf32>
    %c3_163 = arith.constant 3 : index
    %c0_164 = arith.constant 0 : index
    %c0_165 = arith.constant 0 : index
    %c0_166 = arith.constant 0 : index
    %402 = vector.load %arg6[%c3_163, %c0_164, %c0_165, %c0_166] : memref<5x5x32x128xf32, #tpu.memory_space<vmem>>, vector<1x1x32x128xf32>
    %403 = vector.shape_cast %402 : vector<1x1x32x128xf32> to vector<32x128xf32>
    %cst_167 = arith.constant dense<0.000000e+00> : vector<1x128xf32>
    %404 = tpu.matmul %401, %403, %cst_167 {dimension_numbers = #tpu.dot_dimension_numbers<[1], [0], [0], [1], [0, 0, 1, 1], [], []>} : vector<1x32xf32>, vector<32x128xf32>, vector<1x128xf32> -> vector<1x128xf32>
    %405 = arith.addf %398, %404 : vector<1x128xf32>
    %406 = vector.extract_strided_slice %400 {offsets = [1, 0], sizes = [1, 32], strides = [1, 1]} : vector<5x32xf32> to vector<1x32xf32>
    %c3_168 = arith.constant 3 : index
    %c1_169 = arith.constant 1 : index
    %c0_170 = arith.constant 0 : index
    %c0_171 = arith.constant 0 : index
    %407 = vector.load %arg6[%c3_168, %c1_169, %c0_170, %c0_171] : memref<5x5x32x128xf32, #tpu.memory_space<vmem>>, vector<1x1x32x128xf32>
    %408 = vector.shape_cast %407 : vector<1x1x32x128xf32> to vector<32x128xf32>
    %cst_172 = arith.constant dense<0.000000e+00> : vector<1x128xf32>
    %409 = tpu.matmul %406, %408, %cst_172 {dimension_numbers = #tpu.dot_dimension_numbers<[1], [0], [0], [1], [0, 0, 1, 1], [], []>} : vector<1x32xf32>, vector<32x128xf32>, vector<1x128xf32> -> vector<1x128xf32>
    %410 = arith.addf %405, %409 : vector<1x128xf32>
    %411 = vector.extract_strided_slice %400 {offsets = [2, 0], sizes = [1, 32], strides = [1, 1]} : vector<5x32xf32> to vector<1x32xf32>
    %c3_173 = arith.constant 3 : index
    %c2_174 = arith.constant 2 : index
    %c0_175 = arith.constant 0 : index
    %c0_176 = arith.constant 0 : index
    %412 = vector.load %arg6[%c3_173, %c2_174, %c0_175, %c0_176] : memref<5x5x32x128xf32, #tpu.memory_space<vmem>>, vector<1x1x32x128xf32>
    %413 = vector.shape_cast %412 : vector<1x1x32x128xf32> to vector<32x128xf32>
    %cst_177 = arith.constant dense<0.000000e+00> : vector<1x128xf32>
    %414 = tpu.matmul %411, %413, %cst_177 {dimension_numbers = #tpu.dot_dimension_numbers<[1], [0], [0], [1], [0, 0, 1, 1], [], []>} : vector<1x32xf32>, vector<32x128xf32>, vector<1x128xf32> -> vector<1x128xf32>
    %415 = arith.addf %410, %414 : vector<1x128xf32>
    %416 = vector.extract_strided_slice %400 {offsets = [3, 0], sizes = [1, 32], strides = [1, 1]} : vector<5x32xf32> to vector<1x32xf32>
    %c3_178 = arith.constant 3 : index
    %c3_179 = arith.constant 3 : index
    %c0_180 = arith.constant 0 : index
    %c0_181 = arith.constant 0 : index
    %417 = vector.load %arg6[%c3_178, %c3_179, %c0_180, %c0_181] : memref<5x5x32x128xf32, #tpu.memory_space<vmem>>, vector<1x1x32x128xf32>
    %418 = vector.shape_cast %417 : vector<1x1x32x128xf32> to vector<32x128xf32>
    %cst_182 = arith.constant dense<0.000000e+00> : vector<1x128xf32>
    %419 = tpu.matmul %416, %418, %cst_182 {dimension_numbers = #tpu.dot_dimension_numbers<[1], [0], [0], [1], [0, 0, 1, 1], [], []>} : vector<1x32xf32>, vector<32x128xf32>, vector<1x128xf32> -> vector<1x128xf32>
    %420 = arith.addf %415, %419 : vector<1x128xf32>
    %421 = vector.extract_strided_slice %400 {offsets = [4, 0], sizes = [1, 32], strides = [1, 1]} : vector<5x32xf32> to vector<1x32xf32>
    %c3_183 = arith.constant 3 : index
    %c4_184 = arith.constant 4 : index
    %c0_185 = arith.constant 0 : index
    %c0_186 = arith.constant 0 : index
    %422 = vector.load %arg6[%c3_183, %c4_184, %c0_185, %c0_186] : memref<5x5x32x128xf32, #tpu.memory_space<vmem>>, vector<1x1x32x128xf32>
    %423 = vector.shape_cast %422 : vector<1x1x32x128xf32> to vector<32x128xf32>
    %cst_187 = arith.constant dense<0.000000e+00> : vector<1x128xf32>
    %424 = tpu.matmul %421, %423, %cst_187 {dimension_numbers = #tpu.dot_dimension_numbers<[1], [0], [0], [1], [0, 0, 1, 1], [], []>} : vector<1x32xf32>, vector<32x128xf32>, vector<1x128xf32> -> vector<1x128xf32>
    %425 = arith.addf %420, %424 : vector<1x128xf32>
    %426 = vector.extract_strided_slice %316 {offsets = [4, 0, 0], sizes = [1, 5, 32], strides = [1, 1, 1]} : vector<5x5x32xf32> to vector<1x5x32xf32>
    %427 = vector.shape_cast %426 : vector<1x5x32xf32> to vector<5x32xf32>
    %428 = vector.extract_strided_slice %427 {offsets = [0, 0], sizes = [1, 32], strides = [1, 1]} : vector<5x32xf32> to vector<1x32xf32>
    %c4_188 = arith.constant 4 : index
    %c0_189 = arith.constant 0 : index
    %c0_190 = arith.constant 0 : index
    %c0_191 = arith.constant 0 : index
    %429 = vector.load %arg6[%c4_188, %c0_189, %c0_190, %c0_191] : memref<5x5x32x128xf32, #tpu.memory_space<vmem>>, vector<1x1x32x128xf32>
    %430 = vector.shape_cast %429 : vector<1x1x32x128xf32> to vector<32x128xf32>
    %cst_192 = arith.constant dense<0.000000e+00> : vector<1x128xf32>
    %431 = tpu.matmul %428, %430, %cst_192 {dimension_numbers = #tpu.dot_dimension_numbers<[1], [0], [0], [1], [0, 0, 1, 1], [], []>} : vector<1x32xf32>, vector<32x128xf32>, vector<1x128xf32> -> vector<1x128xf32>
    %432 = arith.addf %425, %431 : vector<1x128xf32>
    %433 = vector.extract_strided_slice %427 {offsets = [1, 0], sizes = [1, 32], strides = [1, 1]} : vector<5x32xf32> to vector<1x32xf32>
    %c4_193 = arith.constant 4 : index
    %c1_194 = arith.constant 1 : index
    %c0_195 = arith.constant 0 : index
    %c0_196 = arith.constant 0 : index
    %434 = vector.load %arg6[%c4_193, %c1_194, %c0_195, %c0_196] : memref<5x5x32x128xf32, #tpu.memory_space<vmem>>, vector<1x1x32x128xf32>
    %435 = vector.shape_cast %434 : vector<1x1x32x128xf32> to vector<32x128xf32>
    %cst_197 = arith.constant dense<0.000000e+00> : vector<1x128xf32>
    %436 = tpu.matmul %433, %435, %cst_197 {dimension_numbers = #tpu.dot_dimension_numbers<[1], [0], [0], [1], [0, 0, 1, 1], [], []>} : vector<1x32xf32>, vector<32x128xf32>, vector<1x128xf32> -> vector<1x128xf32>
    %437 = arith.addf %432, %436 : vector<1x128xf32>
    %438 = vector.extract_strided_slice %427 {offsets = [2, 0], sizes = [1, 32], strides = [1, 1]} : vector<5x32xf32> to vector<1x32xf32>
    %c4_198 = arith.constant 4 : index
    %c2_199 = arith.constant 2 : index
    %c0_200 = arith.constant 0 : index
    %c0_201 = arith.constant 0 : index
    %439 = vector.load %arg6[%c4_198, %c2_199, %c0_200, %c0_201] : memref<5x5x32x128xf32, #tpu.memory_space<vmem>>, vector<1x1x32x128xf32>
    %440 = vector.shape_cast %439 : vector<1x1x32x128xf32> to vector<32x128xf32>
    %cst_202 = arith.constant dense<0.000000e+00> : vector<1x128xf32>
    %441 = tpu.matmul %438, %440, %cst_202 {dimension_numbers = #tpu.dot_dimension_numbers<[1], [0], [0], [1], [0, 0, 1, 1], [], []>} : vector<1x32xf32>, vector<32x128xf32>, vector<1x128xf32> -> vector<1x128xf32>
    %442 = arith.addf %437, %441 : vector<1x128xf32>
    %443 = vector.extract_strided_slice %427 {offsets = [3, 0], sizes = [1, 32], strides = [1, 1]} : vector<5x32xf32> to vector<1x32xf32>
    %c4_203 = arith.constant 4 : index
    %c3_204 = arith.constant 3 : index
    %c0_205 = arith.constant 0 : index
    %c0_206 = arith.constant 0 : index
    %444 = vector.load %arg6[%c4_203, %c3_204, %c0_205, %c0_206] : memref<5x5x32x128xf32, #tpu.memory_space<vmem>>, vector<1x1x32x128xf32>
    %445 = vector.shape_cast %444 : vector<1x1x32x128xf32> to vector<32x128xf32>
    %cst_207 = arith.constant dense<0.000000e+00> : vector<1x128xf32>
    %446 = tpu.matmul %443, %445, %cst_207 {dimension_numbers = #tpu.dot_dimension_numbers<[1], [0], [0], [1], [0, 0, 1, 1], [], []>} : vector<1x32xf32>, vector<32x128xf32>, vector<1x128xf32> -> vector<1x128xf32>
    %447 = arith.addf %442, %446 : vector<1x128xf32>
    %448 = vector.extract_strided_slice %427 {offsets = [4, 0], sizes = [1, 32], strides = [1, 1]} : vector<5x32xf32> to vector<1x32xf32>
    %c4_208 = arith.constant 4 : index
    %c4_209 = arith.constant 4 : index
    %c0_210 = arith.constant 0 : index
    %c0_211 = arith.constant 0 : index
    %449 = vector.load %arg6[%c4_208, %c4_209, %c0_210, %c0_211] : memref<5x5x32x128xf32, #tpu.memory_space<vmem>>, vector<1x1x32x128xf32>
    %450 = vector.shape_cast %449 : vector<1x1x32x128xf32> to vector<32x128xf32>
    %cst_212 = arith.constant dense<0.000000e+00> : vector<1x128xf32>
    %451 = tpu.matmul %448, %450, %cst_212 {dimension_numbers = #tpu.dot_dimension_numbers<[1], [0], [0], [1], [0, 0, 1, 1], [], []>} : vector<1x32xf32>, vector<32x128xf32>, vector<1x128xf32> -> vector<1x128xf32>
    %452 = arith.addf %447, %451 : vector<1x128xf32>
    %c0_213 = arith.constant 0 : index
    %c0_214 = arith.constant 0 : index
    %453 = vector.load %arg7[%c0_213, %c0_214] : memref<1x128xf32, #tpu.memory_space<vmem>>, vector<1x128xf32>
    %454 = arith.addf %452, %453 : vector<1x128xf32>
    %cst_215 = arith.constant 0.000000e+00 : f32
    %455 = vector.broadcast %cst_215 : f32 to vector<1x128xf32>
    %456 = arith.maximumf %454, %455 : vector<1x128xf32>
    %c0_216 = arith.constant 0 : index
    %c0_217 = arith.constant 0 : index
    %457 = vector.load %arg8[%c0_216, %c0_217] : memref<128x128xf32, #tpu.memory_space<vmem>>, vector<128x128xf32>
    %cst_218 = arith.constant dense<0.000000e+00> : vector<1x128xf32>
    %458 = tpu.matmul %456, %457, %cst_218 {dimension_numbers = #tpu.dot_dimension_numbers<[1], [0], [0], [1], [0, 0, 1, 1], [], []>} : vector<1x128xf32>, vector<128x128xf32>, vector<1x128xf32> -> vector<1x128xf32>
    %c0_219 = arith.constant 0 : index
    %c0_220 = arith.constant 0 : index
    %459 = vector.load %arg9[%c0_219, %c0_220] : memref<1x128xf32, #tpu.memory_space<vmem>>, vector<1x128xf32>
    %460 = arith.addf %458, %459 : vector<1x128xf32>
    %c0_221 = arith.constant 0 : index
    %c0_222 = arith.constant 0 : index
    %c0_223 = arith.constant 0 : index
    %461 = vector.load %arg10[%c0_221, %c0_222, %c0_223] : memref<1x1x128xf32, #tpu.memory_space<vmem>>, vector<1x1x128xf32>
    %462 = vector.shape_cast %461 : vector<1x1x128xf32> to vector<1x128xf32>
    %463 = vector.shape_cast %460 : vector<1x128xf32> to vector<1x1x128xf32>
    tpu.vector_store %arg10[%c0_221, %c0_222, %c0_223], %463 {strides = array<i32>} : memref<1x1x128xf32, #tpu.memory_space<vmem>>, vector<1x1x128xf32>,
    return
  }
  func.func @transform_0(%arg0: i32) -> (i32, i32, i32, i32) {
    %c0_i32 = arith.constant 0 : i32
    %c0_i32_0 = arith.constant 0 : i32
    %c0_i32_1 = arith.constant 0 : i32
    %c0_i32_2 = arith.constant 0 : i32
    return %arg0, %c0_i32, %c0_i32_0, %c0_i32_1 : i32, i32, i32, i32
  }
  func.func @transform_1(%arg0: i32) -> (i32, i32, i32, i32) {
    %c0_i32 = arith.constant 0 : i32
    %c0_i32_0 = arith.constant 0 : i32
    %c0_i32_1 = arith.constant 0 : i32
    %c0_i32_2 = arith.constant 0 : i32
    %c0_i32_3 = arith.constant 0 : i32
    return %c0_i32, %c0_i32_0, %c0_i32_1, %c0_i32_2 : i32, i32, i32, i32
  }
  func.func @transform_2(%arg0: i32) -> (i32, i32) {
    %c0_i32 = arith.constant 0 : i32
    %c0_i32_0 = arith.constant 0 : i32
    %c0_i32_1 = arith.constant 0 : i32
    return %c0_i32, %c0_i32_0 : i32, i32
  }
  func.func @transform_3(%arg0: i32) -> (i32, i32, i32, i32) {
    %c0_i32 = arith.constant 0 : i32
    %c0_i32_0 = arith.constant 0 : i32
    %c0_i32_1 = arith.constant 0 : i32
    %c0_i32_2 = arith.constant 0 : i32
    %c0_i32_3 = arith.constant 0 : i32
    return %c0_i32, %c0_i32_0, %c0_i32_1, %c0_i32_2 : i32, i32, i32, i32
  }
  func.func @transform_4(%arg0: i32) -> (i32, i32) {
    %c0_i32 = arith.constant 0 : i32
    %c0_i32_0 = arith.constant 0 : i32
    %c0_i32_1 = arith.constant 0 : i32
    return %c0_i32, %c0_i32_0 : i32, i32
  }
  func.func @transform_5(%arg0: i32) -> (i32, i32, i32, i32) {
    %c0_i32 = arith.constant 0 : i32
    %c0_i32_0 = arith.constant 0 : i32
    %c0_i32_1 = arith.constant 0 : i32
    %c0_i32_2 = arith.constant 0 : i32
    %c0_i32_3 = arith.constant 0 : i32
    return %c0_i32, %c0_i32_0, %c0_i32_1, %c0_i32_2 : i32, i32, i32, i32
  }
  func.func @transform_6(%arg0: i32) -> (i32, i32) {
    %c0_i32 = arith.constant 0 : i32
    %c0_i32_0 = arith.constant 0 : i32
    %c0_i32_1 = arith.constant 0 : i32
    return %c0_i32, %c0_i32_0 : i32, i32
  }
  func.func @transform_7(%arg0: i32) -> (i32, i32) {
    %c0_i32 = arith.constant 0 : i32
    %c0_i32_0 = arith.constant 0 : i32
    %c0_i32_1 = arith.constant 0 : i32
    return %c0_i32, %c0_i32_0 : i32, i32
  }
  func.func @transform_8(%arg0: i32) -> (i32, i32) {
    %c0_i32 = arith.constant 0 : i32
    %c0_i32_0 = arith.constant 0 : i32
    %c0_i32_1 = arith.constant 0 : i32
    return %c0_i32, %c0_i32_0 : i32, i32
  }
  func.func @transform_9(%arg0: i32) -> (i32, i32, i32) {
    %c0_i32 = arith.constant 0 : i32
    %c0_i32_0 = arith.constant 0 : i32
    %c0_i32_1 = arith.constant 0 : i32
    return %arg0, %c0_i32, %c0_i32_0 : i32, i32, i32
  }
}

</mosaic_0001>

<bundles_post_ra>
// kernel: digit_cnn_forward.1
= control target key start
LH: loop header
LB: loop body
LE: loop exit
PB: predicated region body
PF: predicated region fallthrough
CT: control target
= control target key end

     0   :  { %14 = vsyncpa [#allocation3], 0  ;;  %s26016_s0 = inlined_call_operand.vmem [shape: f32[2,28,28,1], index: 0, kind: input, shape index: {}]   ;;  %s26017_s1 = inlined_call_operand.vmem [shape: f32[3,3,1,16], index: 1, kind: input, shape index: {}]   ;;  %s26018_s2 = inlined_call_operand.vmem [shape: f32[1,16], index: 2, kind: input, shape index: {}]   ;;  %s26019_s3 = inlined_call_operand.vmem [shape: f32[3,3,16,32], index: 3, kind: input, shape index: {}]   ;;  %s26020_s4 = inlined_call_operand.vmem [shape: f32[1,32], index: 4, kind: input, shape index: {}]   ;;  %s26021_s5 = inlined_call_operand.vmem [shape: f32[5,5,32,128], index: 5, kind: input, shape index: {}]   ;;  %s26022_s6 = inlined_call_operand.vmem [shape: f32[1,128], index: 6, kind: input, shape index: {}]   ;;  %s26023_s7 = inlined_call_operand.vmem [shape: f32[128,128], index: 7, kind: input, shape index: {}]   ;;  %s26024_s8 = inlined_call_operand.vmem [shape: f32[1,128], index: 8, kind: input, shape index: {}]   ;;  %s26025_s9 = inlined_call_operand.hbm [shape: f32[2,1,128], index: 9, kind: output, shape index: {}]  }
   0x1   :  { %16 = vsyncpa [#allocation3 + $0x1], 0  ;;  %s18000_s30 = smov 0   ;;  %s18002_s10 = smov 0  }
   0x2   :  { %s18004_s11 = smov 0   ;;  %s18006_s12 = smov 0  }
   0x3 LB: > { %s18021_s13 = sadd.s32 4294967295, %s17944_s12   ;;  %s15976_s14 = sadd.s32 4294967294, %s17944_s12   ;;  %s17944_s12 = sphi %s18006_s12, %s27407_s12   ;;  %s17940_s11 = sphi %s18004_s11, %s27406_s11   ;;  %s17936_s10 = sphi %s18002_s10, %s27405_s10   ;;  %s17932_s30 = sphi %s18000_s30, %s27404_s30  }
   0x4   : > { %s18025_s15 = sadd.s32 1, %s17944_s12   ;;  %s223_s16 = sadd.s32 1, %s17940_s11 }
   0x5   : > { %s220_s17 = ssub.s32 %s17944_s12, %s18025_s15  ;;  %p233_p0 = scmp.ne.s32.totalorder %s17940_s11, %s17936_s10 }
   0x6   : > { %p221_p1 = scmp.eq.s32.totalorder %s220_s17, 0  ;;  %p234_p2 = scmp.eq.s32.totalorder %s18021_s13, 1 }
   0x7   : > { %p239_p3 = scmp.ne.s32.totalorder %s17936_s10, %s17932_s30  ;;  %p240_p4 = scmp.eq.s32.totalorder %s15976_s14, 1 }
   0x8   : > { %s18036_s18 = scalar_select %p221_p1, %s17940_s11, %s223_s16  }
   0x9   : > { %p18038_p5 = por %p234_p2, %p233_p0  ;;  %p18042_p6 = por %p240_p4, %p239_p3 }
   0xa   : > { %p15979_p7 = scmp.ge.s32.totalorder %s17944_s12, 1  ;;  %p290_p8 = scmp.lt.s32.totalorder %s17944_s12, 3 }
   0xc   : > { %p291_p9 = pnand %p15979_p7, %p290_p8 }
   0xe   : > { %294 = sbr.rel (%p291_p9) target bundleno = 1975 (0x7b7), region = 56 }
  0x13   : > { %p325_p10 = scmp.lt.s32.totalorder %s18021_s13, 1  ;;  %v17946_v0 = vmov 0   ;;  %vm1313_vm0 = vcmask 1046528   ;;  %vm1874_vm1 = vcmask 1045504   ;;  %vm6122_vm2 = vcmask 1040384   ;;  %s323_s29 = sand.u32 1, %s17936_s10  }
  0x14   : > { %17806 = vset.pattern.permute.xlu1 %v17946_v0  ;;  %17805 = vset.pattern.permute.xlu0 %v17946_v0  ;;  %vm6147_vm3 = vcmask 1041408   ;;  %vm6172_vm4 = vcmask 1042432   ;;  %vm6197_vm5 = vcmask 1043456   ;;  %vm6222_vm6 = vcmask 1044480   ;;  %s16317_s17 = sshll.u32 %s18021_s13, 4  ;;  %s15909_s27 = scalar_lea.sflag [#allocation3], %s323_s29 }
  0x15   : > { %s326_s21 = scalar_select %p325_p10, %s18021_s13, 1  ;;  %vm6425_vm7 = vcmask 130048   ;;  %vm17948_vm8 = vmmov 0   ;;  %vm13855_vm9 = vcmask 261120  }
  0x16   : > { %s25981_s26 = scalar_lea.hbm %s26025_s9, %s16317_s17  ;;  %s17949_s28 = smov [#allocation2]  }
  0x17   : > { %s17762_s22 = smul.u32 896, %s326_s21  ;;  %s324_s21 = scalar_lea.vmem [#allocation2], %s323_s29 }
  0x18   : > { %s17888_s13 = sshll.u32 %s17949_s28, 4  ;;  %s17889_s13 = int_to_ptr.vmem [resolvable:$false] %s17888_s13 }
  0x19   : > { %s18053_s25 = scalar_lea.vmem %s26016_s0, %s17762_s22  ;;  %s15921_s22 = sshll.u32 %s324_s21, 4  ;;  %s15922_s22 = int_to_ptr.vmem [resolvable:$true] %s15921_s22 }
  0x1a   : > { %v334_v1 = vld [vmem:[%s18053_s25 + $0x20] sm:$0xff]  ;;  %v335_v3 = vld [vmem:[%s18053_s25 + $0x28] sm:$0xff]  ;;  %v333_v5 = vld [vmem:[%s18053_s25 + $0x18] sm:$0xf]  ;;  %s17890_s14 = scalar_lea.vmem %s17889_s13, 32  ;;  %p17891_p0 = scmp.lt.s32.totalorder %s15922_s22, %s17889_s13 }
  0x1b   : > { %v330_v2 = vld [vmem:[%s18053_s25] sm:$0xff]  ;;  %457 = vperm.xlu1 %17806, %v334_v1   ;;  %v331_v4 = vld [vmem:[%s18053_s25 + $0x8] sm:$0xff]  ;;  %v332_v6 = vld [vmem:[%s18053_s25 + $0x10] sm:$0xff] }
  0x1c   : > { %437 = vperm.xlu0 %17805, %v330_v2   ;;  %v337_v7 = vld [vmem:[%s18053_s25 + $0x38] sm:$0xf]  ;;  %v336_v8 = vld [vmem:[%s18053_s25 + $0x30] sm:$0xff]  ;;  %v339_v9 = vld [vmem:[%s18053_s25 + $0x48] sm:$0xff] }
  0x1d   : > { %v338_v10 = vld [vmem:[%s18053_s25 + $0x40] sm:$0xff]  ;;  %v343_v11 = vld [vmem:[%s18053_s25 + $0x68] sm:$0xff]  ;;  %v341_v13 = vld [vmem:[%s18053_s25 + $0x58] sm:$0xf] }
  0x1e   : > { %v342_v12 = vld [vmem:[%s18053_s25 + $0x60] sm:$0xff]  ;;  %v340_v14 = vld [vmem:[%s18053_s25 + $0x50] sm:$0xff]  ;;  %v345_v15 = vld [vmem:[%s18053_s25 + $0x78] sm:$0xf] }
  0x1f   : > { %462 = vperm.xlu1 %17806, %v335_v3   ;;  %v344_v16 = vld [vmem:[%s18053_s25 + $0x70] sm:$0xff]  ;;  %v347_v17 = vld [vmem:[%s18053_s25 + $0x88] sm:$0xff]  ;;  %v346_v18 = vld [vmem:[%s18053_s25 + $0x80] sm:$0xff] }
  0x20   : > { %442 = vperm.xlu0 %17805, %v331_v4   ;;  %v351_v19 = vld [vmem:[%s18053_s25 + $0xa8] sm:$0xff]  ;;  %v350_v20 = vld [vmem:[%s18053_s25 + $0xa0] sm:$0xff]  ;;  %v349_v25 = vld [vmem:[%s18053_s25 + $0x98] sm:$0xf] }
  0x21   : > { %v355_v21 = vld [vmem:[%s18053_s25 + $0xc8] sm:$0xff]  ;;  %v354_v22 = vld [vmem:[%s18053_s25 + $0xc0] sm:$0xff]  ;;  %v348_v26 = vld [vmem:[%s18053_s25 + $0x90] sm:$0xff] }
  0x22   : > { %v359_v23 = vld [vmem:[%s18053_s25 + $0xe8] sm:$0xff]  ;;  %v358_v24 = vld [vmem:[%s18053_s25 + $0xe0] sm:$0xff]  ;;  %v353_v27 = vld [vmem:[%s18053_s25 + $0xb8] sm:$0xf] }
  0x23   : > { %452 = vperm.xlu1 %17806, %v333_v5   ;;  %v352_v28 = vld [vmem:[%s18053_s25 + $0xb0] sm:$0xff]  ;;  %v357_v29 = vld [vmem:[%s18053_s25 + $0xd8] sm:$0xf]  ;;  %v363_v33 = vld [vmem:[%s18053_s25 + $0x108] sm:$0xff] }
  0x24   : > { %447 = vperm.xlu0 %17805, %v332_v6   ;;  %v356_v30 = vld [vmem:[%s18053_s25 + $0xd0] sm:$0xff]  ;;  %v361_v31 = vld [vmem:[%s18053_s25 + $0xf8] sm:$0xf]  ;;  %v362_v34 = vld [vmem:[%s18053_s25 + $0x100] sm:$0xff] }
  0x25   : > { %v360_v32 = vld [vmem:[%s18053_s25 + $0xf0] sm:$0xff]  ;;  %v367_v35 = vld [vmem:[%s18053_s25 + $0x128] sm:$0xff]  ;;  %v366_v36 = vld [vmem:[%s18053_s25 + $0x120] sm:$0xff] }
  0x26   : > { %v371_v37 = vld [vmem:[%s18053_s25 + $0x148] sm:$0xff]  ;;  %v370_v38 = vld [vmem:[%s18053_s25 + $0x140] sm:$0xff]  ;;  %v365_v41 = vld [vmem:[%s18053_s25 + $0x118] sm:$0xf] }
  0x27   : > { %472 = vperm.xlu1 %17806, %v337_v7   ;;  %v375_v39 = vld [vmem:[%s18053_s25 + $0x168] sm:$0xff]  ;;  %v374_v40 = vld [vmem:[%s18053_s25 + $0x160] sm:$0xff]  ;;  %v364_v42 = vld [vmem:[%s18053_s25 + $0x110] sm:$0xff] }
  0x28   : > { %467 = vperm.xlu0 %17805, %v336_v8   ;;  %v369_v43 = vld [vmem:[%s18053_s25 + $0x138] sm:$0xf]  ;;  %v368_v44 = vld [vmem:[%s18053_s25 + $0x130] sm:$0xff]  ;;  %v379_v49 = vld [vmem:[%s18053_s25 + $0x188] sm:$0xff] }
  0x29   : > { %v373_v45 = vld [vmem:[%s18053_s25 + $0x158] sm:$0xf]  ;;  %v372_v46 = vld [vmem:[%s18053_s25 + $0x150] sm:$0xff]  ;;  %v378_v50 = vld [vmem:[%s18053_s25 + $0x180] sm:$0xff] }
  0x2a   : > { %v377_v47 = vld [vmem:[%s18053_s25 + $0x178] sm:$0xf]  ;;  %v376_v48 = vld [vmem:[%s18053_s25 + $0x170] sm:$0xff]  ;;  %v383_v51 = vld [vmem:[%s18053_s25 + $0x1a8] sm:$0xff] }
  0x2b   : > { %482 = vperm.xlu1 %17806, %v339_v9   ;;  %v382_v52 = vld [vmem:[%s18053_s25 + $0x1a0] sm:$0xff]  ;;  %v387_v53 = vld [vmem:[%s18053_s25 + $0x1c8] sm:$0xff]  ;;  %v381_v57 = vld [vmem:[%s18053_s25 + $0x198] sm:$0xf] }
  0x2c   : > { %477 = vperm.xlu0 %17805, %v338_v10   ;;  %v386_v54 = vld [vmem:[%s18053_s25 + $0x1c0] sm:$0xff]  ;;  %v391_v55 = vld [vmem:[%s18053_s25 + $0x1e8] sm:$0xff]  ;;  %v380_v58 = vld [vmem:[%s18053_s25 + $0x190] sm:$0xff] }
  0x2d   : > { %v390_v56 = vld [vmem:[%s18053_s25 + $0x1e0] sm:$0xff]  ;;  %v385_v59 = vld [vmem:[%s18053_s25 + $0x1b8] sm:$0xf]  ;;  %v384_v60 = vld [vmem:[%s18053_s25 + $0x1b0] sm:$0xff] }
  0x2e   : > { %v389_v61 = vld [vmem:[%s18053_s25 + $0x1d8] sm:$0xf]  ;;  %v388_v62 = vld [vmem:[%s18053_s25 + $0x1d0] sm:$0xff]  ;;  %v395_v2 = vld [vmem:[%s18053_s25 + $0x208] sm:$0xff] }
  0x2f   : > { %502 = vperm.xlu1 %17806, %v343_v11   ;;  %v393_v63 = vld [vmem:[%s18053_s25 + $0x1f8] sm:$0xf]  ;;  %v392_v0 = vld [vmem:[%s18053_s25 + $0x1f0] sm:$0xff]  ;;  %v394_v3 = vld [vmem:[%s18053_s25 + $0x200] sm:$0xff] }
  0x30   : > { %497 = vperm.xlu0 %17805, %v342_v12   ;;  %v399_v5 = vld [vmem:[%s18053_s25 + $0x228] sm:$0xff]  ;;  %v398_v7 = vld [vmem:[%s18053_s25 + $0x220] sm:$0xff] }
  0x31   : > { %v403_v8 = vld [vmem:[%s18053_s25 + $0x248] sm:$0xff]  ;;  %v402_v10 = vld [vmem:[%s18053_s25 + $0x240] sm:$0xff] }
  0x32   : > { %v407_v12 = vld [vmem:[%s18053_s25 + $0x268] sm:$0xff] }
  0x33   : > { %492 = vperm.xlu1 %17806, %v341_v13   ;;  %v406_v13 = vld [vmem:[%s18053_s25 + $0x260] sm:$0xff] }
  0x34   : > { %487 = vperm.xlu0 %17805, %v340_v14  }
  0x37   : > { %512 = vperm.xlu1 %17806, %v345_v15   ;;  %v397_v15 = vld [vmem:[%s18053_s25 + $0x218] sm:$0xf] }
  0x38   : > { %507 = vperm.xlu0 %17805, %v344_v16  }
  0x3b   : > { %522 = vperm.xlu1 %17806, %v347_v17   ;;  %v396_v17 = vld [vmem:[%s18053_s25 + $0x210] sm:$0xff] }
  0x3c   : > { %517 = vperm.xlu0 %17805, %v346_v18   ;;  %v401_v18 = vld [vmem:[%s18053_s25 + $0x238] sm:$0xf] }
  0x3f   : > { %542 = vperm.xlu1 %17806, %v351_v19  }
  0x40   : > { %537 = vperm.xlu0 %17805, %v350_v20   ;;  %v400_v20 = vld [vmem:[%s18053_s25 + $0x230] sm:$0xff] }
  0x43   : > { %562 = vperm.xlu1 %17806, %v355_v21  }
  0x44   : > { %557 = vperm.xlu0 %17805, %v354_v22   ;;  %v18152_v22 = vld [vmem:[%s26019_s3 + $0x18] sm:$0xff] }
  0x45   : > { %16822 = vmatprep.subr.mxu0 %v18152_v22  ;;  %16843 = vmatprep.subr.mxu1 %v18152_v22 }
  0x46   : > { %16823 = vmatpush3.msra.mxu0 %v18152_v22  ;;  %16844 = vmatpush3.msra.mxu1 %v18152_v22 }
  0x47   : > { %582 = vperm.xlu1 %17806, %v359_v23   ;;  %v405_v23 = vld [vmem:[%s18053_s25 + $0x258] sm:$0xf] }
  0x48   : > { %577 = vperm.xlu0 %17805, %v358_v24   ;;  %v18158_v24 = vld [vmem:[%s26017_s1 + $0x1] ss:$0 sm:$0xff] }
  0x4b   : > { %532 = vperm.xlu1 %17806, %v349_v25   ;;  %v404_v25 = vld [vmem:[%s18053_s25 + $0x250] sm:$0xff] }
  0x4c   : > { %527 = vperm.xlu0 %17805, %v348_v26  }
  0x4f   : > { %552 = vperm.xlu1 %17806, %v353_v27  }
  0x50   : > { %547 = vperm.xlu0 %17805, %v352_v28   ;;  %v409_v28 = vld [vmem:[%s18053_s25 + $0x278] sm:$0xf] }
  0x53   : > { %572 = vperm.xlu1 %17806, %v357_v29   ;;  %v408_v29 = vld [vmem:[%s18053_s25 + $0x270] sm:$0xff] }
  0x54   : > { %567 = vperm.xlu0 %17805, %v356_v30  }
  0x57   : > { %592 = vperm.xlu1 %17806, %v361_v31  }
  0x58   : > { %587 = vperm.xlu0 %17805, %v360_v32   ;;  %v18179_v32 = vld [vmem:[%s26017_s1 + $0x2] ss:$0 sm:$0xff] }
  0x5b   : > { %602 = vperm.xlu1 %17806, %v363_v33   ;;  %v18184_v33 = vld [vmem:[%s26017_s1] ss:$0 sm:$0xff] }
  0x5c   : > { %597 = vperm.xlu0 %17805, %v362_v34  }
  0x5f   : > { %622 = vperm.xlu1 %17806, %v367_v35  }
  0x60   : > { %617 = vperm.xlu0 %17805, %v366_v36  }
  0x63   : > { %642 = vperm.xlu1 %17806, %v371_v37   ;;  %v411_v37 = vld [vmem:[%s18053_s25 + $0x288] sm:$0xff] }
  0x64   : > { %637 = vperm.xlu0 %17805, %v370_v38  }
  0x67   : > { %662 = vperm.xlu1 %17806, %v375_v39   ;;  %v410_v39 = vld [vmem:[%s18053_s25 + $0x280] sm:$0xff] }
  0x68   : > { %657 = vperm.xlu0 %17805, %v374_v40  }
  0x6b   : > { %612 = vperm.xlu1 %17806, %v365_v41  }
  0x6c   : > { %607 = vperm.xlu0 %17805, %v364_v42  }
  0x6f   : > { %632 = vperm.xlu1 %17806, %v369_v43  }
  0x70   : > { %627 = vperm.xlu0 %17805, %v368_v44  }
  0x73   : > { %652 = vperm.xlu1 %17806, %v373_v45   ;;  %v413_v45 = vld [vmem:[%s18053_s25 + $0x298] sm:$0xf] }
  0x74   : > { %647 = vperm.xlu0 %17805, %v372_v46   ;;  %v412_v46 = vld [vmem:[%s18053_s25 + $0x290] sm:$0xff] }
  0x77   : > { %672 = vperm.xlu1 %17806, %v377_v47   ;;  %v18207_v47 = vld [vmem:[%s26017_s1 + $0x4] ss:$0 sm:$0xff] }
  0x78   : > { %667 = vperm.xlu0 %17805, %v376_v48  }
  0x7b   : > { %682 = vperm.xlu1 %17806, %v379_v49  }
  0x7c   : > { %677 = vperm.xlu0 %17805, %v378_v50  }
  0x7f   : > { %702 = vperm.xlu1 %17806, %v383_v51  }
  0x80   : > { %697 = vperm.xlu0 %17805, %v382_v52   ;;  %v415_v52 = vld [vmem:[%s18053_s25 + $0x2a8] sm:$0xff] }
  0x83   : > { %722 = vperm.xlu1 %17806, %v387_v53   ;;  %v18226_v53 = vld [vmem:[%s26017_s1 + $0x3] ss:$0 sm:$0xff] }
  0x84   : > { %717 = vperm.xlu0 %17805, %v386_v54  }
  0x87   : > { %742 = vperm.xlu1 %17806, %v391_v55   ;;  %v414_v55 = vld [vmem:[%s18053_s25 + $0x2a0] sm:$0xff] }
  0x88   : > { %737 = vperm.xlu0 %17805, %v390_v56   ;;  %v15999_v56 = vld [vmem:[%s26019_s3 + $0x10] sm:$0xff] }
  0x89   : > { %16824 = vmatprep.subr.mxu0 %v15999_v56  ;;  %16845 = vmatprep.subr.mxu1 %v15999_v56 }
  0x8a   : > { %16825 = vmatpush3.msra.mxu0 %v15999_v56  ;;  %16846 = vmatpush3.msra.mxu1 %v15999_v56 }
  0x8b   : > { %692 = vperm.xlu1 %17806, %v381_v57   ;;  %16829 = vmatprep.subr.mxu0 %v18152_v22 }
  0x8c   : > { %687 = vperm.xlu0 %17805, %v380_v58   ;;  %16857 = vmatprep.subr.mxu1 %v18152_v22  ;;  %v421_v22 = vld [vmem:[%s18053_s25 + $0x2d8] sm:$0xf] }
  0x8f   : > { %712 = vperm.xlu1 %17806, %v385_v59  }
  0x90   : > { %707 = vperm.xlu0 %17805, %v384_v60  }
  0x93   : > { %732 = vperm.xlu1 %17806, %v389_v61  }
  0x94   : > { %727 = vperm.xlu0 %17805, %v388_v62  }
  0x96   : > { %v18119_v1 = vpop.permute.xlu1 %457 }
  0x97   : > { %752 = vperm.xlu1 %17806, %v393_v63   ;;  %v18123_v4 = vpop.permute.xlu0 %437 }
  0x98   : > { %747 = vperm.xlu0 %17805, %v392_v0   ;;  %v417_v0 = vld [vmem:[%s18053_s25 + $0x2b8] sm:$0xf] }
  0x9a   : > { %v18126_v6 = vpop.permute.xlu1 %462 }
  0x9b   : > { %762 = vperm.xlu1 %17806, %v395_v2   ;;  %v18130_v9 = vpop.permute.xlu0 %442 }
  0x9c   : > { %757 = vperm.xlu0 %17805, %v394_v3  }
  0x9e   : > { %v18133_v11 = vpop.permute.xlu1 %452 }
  0x9f   : > { %782 = vperm.xlu1 %17806, %v399_v5   ;;  %v18137_v14 = vpop.permute.xlu0 %447  ;;  %v416_v5 = vld [vmem:[%s18053_s25 + $0x2b0] sm:$0xff] }
  0xa0   : > { %777 = vperm.xlu0 %17805, %v398_v7  }
  0xa2   : > { %v18140_v16 = vpop.permute.xlu1 %472 }
  0xa3   : > { %802 = vperm.xlu1 %17806, %v403_v8   ;;  %v18144_v19 = vpop.permute.xlu0 %467 }
  0xa4   : > { %797 = vperm.xlu0 %17805, %v402_v10  }
  0xa6   : > { %v18147_v21 = vpop.permute.xlu1 %482 }
  0xa7   : > { %822 = vperm.xlu1 %17806, %v407_v12   ;;  %v18164_v26 = vmul.f32 %v18158_v24, %v18147_v21  ;;  %v18168_v27 = vpop.permute.xlu0 %477  ;;  %v18188_v34 = vmul.f32 %v18179_v32, %v18147_v21 }
  0xa8   : > { %817 = vperm.xlu0 %17805, %v406_v13   ;;  %v1129_v31 = vmul.f32 %v18158_v24, %v18168_v27  ;;  %v1690_v36 = vmul.f32 %v18179_v32, %v18168_v27  ;;  %v929_v38 = vmul.f32 %v18184_v33, %v18168_v27 }
  0xa9   : > { %v1329_v30 = vrot.slane %v18164_v26, 1  ;;  %v1890_v43 = vrot.slane %v18188_v34, 2 }
  0xaa   : > { %v1328_v35 = vrot.slane %v1129_v31, 1  ;;  %v18199_v42 = vpop.permute.xlu1 %502  ;;  %v1889_v44 = vrot.slane %v1690_v36, 2  ;;  %v420_v31 = vld [vmem:[%s18053_s25 + $0x2d0] sm:$0xff] }
  0xab   : > { %772 = vperm.xlu1 %17806, %v397_v15   ;;  %26452 = vst [vmem:[#allocation5_spill] sm:$0xff] %v18199_v42  ;;  %v18211_v48 = vmul.f32 %v18158_v24, %v18199_v42  ;;  %v18215_v49 = vmul.f32 %v18207_v47, %v18199_v42  ;;  %v18217_v50 = vpop.permute.xlu0 %497 }
  0xac   : > { %767 = vperm.xlu0 %17805, %v396_v17   ;;  %v1330_v40 = vsel %vm1313_vm0, %v1328_v35, %v1329_v30  ;;  %26453 = vst [vmem:[#allocation6_spill] sm:$0xff] %v18217_v50  ;;  %v1891_v51 = vsel %vm1874_vm1, %v1889_v44, %v1890_v43  ;;  %v1133_v58 = vmul.f32 %v18158_v24, %v18217_v50  ;;  %v419_v17 = vld [vmem:[%s18053_s25 + $0x2c8] sm:$0xff] }
  0xad   : > { %v1586_v41 = vadd.f32 %v1330_v40, %v929_v38  ;;  %v1336_v57 = vrot.slane %v18211_v48, 1  ;;  %v2271_v59 = vmul.f32 %v18226_v53, %v18217_v50  ;;  %v2670_v60 = vrot.slane %v18215_v49, 1 }
  0xae   : > { %v2471_v61 = vmul.f32 %v18207_v47, %v18217_v50  ;;  %v1335_v62 = vrot.slane %v1133_v58, 1  ;;  %v933_v2 = vmul.f32 %v18184_v33, %v18217_v50  ;;  %v18248_v8 = vpop.permute.xlu1 %492  ;;  %v930_v35 = vmul.f32 %v18184_v33, %v18147_v21 }
  0xaf   : > { %792 = vperm.xlu1 %17806, %v401_v18   ;;  %v2147_v54 = vadd.f32 %v1891_v51, %v1586_v41  ;;  %26454 = vst [vmem:[#allocation7_spill] sm:$0xff] %v18248_v8  ;;  %v18258_v15 = vpop.permute.xlu0 %487  ;;  %v18263_v18 = vmul.f32 %v18158_v24, %v18248_v8 }
  0xb0   : > { %787 = vperm.xlu0 %17805, %v400_v20   ;;  %v2669_v3 = vrot.slane %v2471_v61, 1  ;;  %v1337_v7 = vsel %vm1313_vm0, %v1335_v62, %v1336_v57  ;;  %26455 = vst [vmem:[#allocation8_spill] sm:$0xff] %v18258_v15  ;;  %v418_v20 = vld [vmem:[%s18053_s25 + $0x2c0] sm:$0xff]  ;;  %v931_v44 = vmul.f32 %v18184_v33, %v18258_v15 }
  0xb1   : > { %v2367_v63 = vadd.f32 %v2271_v59, %v2147_v54  ;;  %v18250_v10 = vadd.f32 %v1337_v7, %v933_v2  ;;  %26456 = vst [vmem:[#allocation9_spill] sm:$0xff] %v18263_v18  ;;  %v18305_v54 = vld [vmem:[%s26017_s1 + $0x5] ss:$0 sm:$0xff]  ;;  %v1695_v59 = vmul.f32 %v18179_v32, %v18199_v42 }
  0xb2   : > { %v2671_v12 = vsel %vm1313_vm0, %v2669_v3, %v2670_v60  ;;  %v18291_v26 = vpop.permute.xlu1 %512  ;;  %v3031_v7 = vmul.f32 %v18305_v54, %v18217_v50 }
  0xb3   : > { %812 = vperm.xlu1 %17806, %v405_v23   ;;  %v18256_v13 = vadd.f32 %v2671_v12, %v2367_v63  ;;  %v1131_v23 = vmul.f32 %v18158_v24, %v18258_v15  ;;  %v18295_v51 = vmul.f32 %v18207_v47, %v18291_v26  ;;  %v18297_v34 = vpop.permute.xlu0 %507 }
  0xb4   : > { %807 = vperm.xlu0 %17805, %v404_v25   ;;  %v1692_v25 = vmul.f32 %v18179_v32, %v18258_v15  ;;  %26459 = vst [vmem:[#allocation12_spill] sm:$0xff] %v18297_v34  ;;  %v18313_v56 = vmul.f32 %v18179_v32, %v18297_v34  ;;  %v2273_v58 = vmul.f32 %v18226_v53, %v18297_v34 }
  0xb5   : > { %26458 = vst [vmem:[#allocation11_spill] sm:$0xff] %v18295_v51  ;;  %v26028_v61 = vrot.slane %v18295_v51, 1  ;;  %v2473_v62 = vmul.f32 %v18207_v47, %v18297_v34  ;;  %v18324_v63 = vmul.f32 %v18305_v54, %v18297_v34 }
  0xb6   : > { %v1892_v36 = vrot.slane %v1692_v25, 2  ;;  %26461 = vst [vmem:[#allocation14_spill] sm:$0xff] %v18313_v56  ;;  %v26026_v12 = vrot.slane %v18313_v56, 2  ;;  %v18518_v56 = vld [vmem:[%s26017_s1 + $0x8] ss:$0 sm:$0xff] }
  0xb7   : > { %832 = vperm.xlu1 %17806, %v409_v28   ;;  %v26030_v28 = vrot.slane %v18263_v18, 1 }
  0xb8   : > { %827 = vperm.xlu0 %17805, %v408_v29   ;;  %v1331_v29 = vrot.slane %v1131_v23, 1  ;;  %v1893_v40 = vsel %vm1874_vm1, %v1890_v43, %v1892_v36  ;;  %v2272_v23 = vmul.f32 %v18226_v53, %v18199_v42 }
  0xba   : > { %v1332_v38 = vsel %vm1313_vm0, %v1329_v30, %v1331_v29  ;;  %v1334_v41 = vsel %vm1313_vm0, %v1331_v29, %v26030_v28 }
  0xbb   : > { %842 = vperm.xlu1 %17806, %v411_v37   ;;  %v18277_v37 = vmul.f32 %v18179_v32, %v18248_v8  ;;  %v1588_v30 = vadd.f32 %v1334_v41, %v931_v44  ;;  %v3229_v41 = vrot.slane %v3031_v7, 2 }
  0xbc   : > { %837 = vperm.xlu0 %17805, %v410_v39   ;;  %v1587_v39 = vadd.f32 %v1332_v38, %v930_v35  ;;  %v26034_v35 = vrot.slane %v18324_v63, 2 }
  0xbd   : > { %26457 = vst [vmem:[#allocation10_spill] sm:$0xff] %v18277_v37 }
  0xbf   : > { %852 = vperm.xlu1 %17806, %v413_v45   ;;  %v2148_v45 = vadd.f32 %v1893_v40, %v1587_v39  ;;  %v18352_v39 = vpop.permute.xlu1 %522 }
  0xc0   : > { %847 = vperm.xlu0 %17805, %v412_v46   ;;  %v26029_v46 = vrot.slane %v18277_v37, 2  ;;  %v18361_v44 = vmul.f32 %v18158_v24, %v18352_v39  ;;  %v18383_v7 = vmul.f32 %v18179_v32, %v18352_v39 }
  0xc2   : > { %v1895_v43 = vsel %vm1874_vm1, %v1892_v36, %v26029_v46 }
  0xc3   : > { %862 = vperm.xlu1 %17806, %v415_v52   ;;  %v2149_v52 = vadd.f32 %v1895_v43, %v1588_v30 }
  0xc4   : > { %857 = vperm.xlu0 %17805, %v414_v55   ;;  %v18309_v55 = vmul.f32 %v18158_v24, %v18297_v34 }
  0xc5   : > { %v2369_v3 = vadd.f32 %v2273_v58, %v2149_v52  ;;  %v18366_v52 = vpop.permute.xlu0 %517 }
  0xc6   : > { %26460 = vst [vmem:[#allocation13_spill] sm:$0xff] %v18309_v55  ;;  %v26027_v2 = vrot.slane %v18309_v55, 1  ;;  %26463 = vst [vmem:[#allocation16_spill] sm:$0xff] %v18366_v52 }
  0xc7   : > { %872 = vperm.xlu1 %17806, %v417_v0   ;;  %v3032_v0 = vmul.f32 %v18305_v54, %v18199_v42 }
  0xc8   : > { %867 = vperm.xlu0 %17805, %v416_v5   ;;  %v1694_v5 = vmul.f32 %v18179_v32, %v18217_v50  ;;  %v1339_v25 = vsel %vm1313_vm0, %v1336_v57, %v26027_v2  ;;  %v2368_v57 = vadd.f32 %v2272_v23, %v2148_v45  ;;  %v18392_v23 = vpop.permute.xlu1 %542 }
  0xc9   : > { %v3230_v36 = vrot.slane %v3032_v0, 2  ;;  %26467 = vst [vmem:[#allocation20_spill] sm:$0xff] %v18392_v23 }
  0xca   : > { %v1896_v48 = vrot.slane %v1694_v5, 2  ;;  %v1137_v5 = vmul.f32 %v18158_v24, %v18366_v52 }
  0xcb   : > { %882 = vperm.xlu1 %17806, %v419_v17   ;;  %v2672_v17 = vrot.slane %v2473_v62, 1  ;;  %v3233_v43 = vsel %vm1874_vm1, %v3230_v36, %v26034_v35  ;;  %v3231_v62 = vsel %vm1874_vm1, %v3229_v41, %v3230_v36  ;;  %v18401_v36 = vmul.f32 %v18207_v47, %v18392_v23 }
  0xcc   : > { %877 = vperm.xlu0 %17805, %v418_v20   ;;  %v934_v20 = vmul.f32 %v18184_v33, %v18199_v42  ;;  %v18376_v0 = vadd.f32 %v3231_v62, %v18256_v13  ;;  %v18471_v35 = vmul.f32 %v18184_v33, %v18123_v4 }
  0xcd   : > { %v2673_v29 = vsel %vm1313_vm0, %v2670_v60, %v2672_v17  ;;  %26469 = vst [vmem:[#allocation22_spill] sm:$0xff] %v18401_v36 }
  0xce   : > { %v1591_v40 = vadd.f32 %v1339_v25, %v934_v20  ;;  %v2928_v30 = vadd.f32 %v2673_v29, %v2368_v57  ;;  %26466 = vst [vmem:[#allocation19_spill] sm:$0xff] %v18376_v0  ;;  %v1342_v20 = vrot.slane %v1137_v5, 1  ;;  %v26031_v25 = vrot.slane %v18383_v7, 2  ;;  %v423_v5 = vld [vmem:[%s18053_s25 + $0x2e8] sm:$0xff] }
  0xcf   : > { %892 = vperm.xlu1 %17806, %v421_v22   ;;  %v1897_v22 = vrot.slane %v1695_v59, 2 }
  0xd0   : > { %887 = vperm.xlu0 %17805, %v420_v31   ;;  %v2675_v31 = vsel %vm1313_vm0, %v2672_v17, %v26028_v61  ;;  %v18368_v58 = vadd.f32 %v3233_v43, %v2928_v30  ;;  %v1698_v17 = vmul.f32 %v18179_v32, %v18366_v52  ;;  %v18413_v30 = vmul.f32 %v18184_v33, %v18119_v1 }
  0xd1   : > { %v18350_v38 = vadd.f32 %v2675_v31, %v2369_v3  ;;  %v1900_v49 = vsel %vm1874_vm1, %v1897_v22, %v26026_v12  ;;  %v1898_v59 = vsel %vm1874_vm1, %v1896_v48, %v1897_v22  ;;  %v26033_v3 = vrot.slane %v18361_v44, 1 }
  0xd2   : > { %v18357_v60 = vadd.f32 %v1900_v49, %v1591_v40  ;;  %26464 = vst [vmem:[#allocation17_spill] sm:$0xff] %v18368_v58  ;;  %v18373_v45 = vadd.f32 %v1898_v59, %v18250_v10  ;;  %v937_v10 = vmul.f32 %v18184_v33, %v18366_v52  ;;  %v1903_v29 = vrot.slane %v1698_v17, 2  ;;  %v18403_v40 = vpop.permute.xlu0 %537  ;;  %v422_v17 = vld [vmem:[%s18053_s25 + $0x2e0] sm:$0xff] }
  0xd3   : > { %v1344_v13 = vsel %vm1313_vm0, %v1342_v20, %v26033_v3  ;;  %v18397_v31 = vmul.f32 %v18158_v24, %v18392_v23  ;;  %26470 = vst [vmem:[#allocation23_spill] sm:$0xff] %v18403_v40  ;;  %v1141_v57 = vmul.f32 %v18158_v24, %v18403_v40  ;;  %v26036_v43 = vrot.slane %v18401_v36, 1  ;;  %902 = vperm.xlu1 %17806, %v423_v5  }
  0xd4   : > { %26462 = vst [vmem:[#allocation15_spill] sm:$0xff] %v18357_v60  ;;  %26465 = vst [vmem:[#allocation18_spill] sm:$0xff] %v18373_v45  ;;  %v1594_v22 = vadd.f32 %v1344_v13, %v937_v10  ;;  %v1905_v48 = vsel %vm1874_vm1, %v1903_v29, %v26031_v25  ;;  %v2279_v59 = vmul.f32 %v18226_v53, %v18403_v40  ;;  %897 = vperm.xlu0 %17805, %v422_v17  }
  0xd5   : > { %26468 = vst [vmem:[#allocation21_spill] sm:$0xff] %v18397_v31  ;;  %v26032_v49 = vrot.slane %v18397_v31, 1  ;;  %v2479_v62 = vmul.f32 %v18207_v47, %v18403_v40  ;;  %v18424_v20 = vmul.f32 %v18179_v32, %v18392_v23  ;;  %v18428_v10 = vmul.f32 %v18305_v54, %v18392_v23 }
  0xd6   : > { %v2155_v41 = vadd.f32 %v1905_v48, %v1594_v22  ;;  %v1349_v13 = vrot.slane %v1141_v57, 1  ;;  %v1702_v22 = vmul.f32 %v18179_v32, %v18403_v40  ;;  %v941_v29 = vmul.f32 %v18184_v33, %v18403_v40 }
  0xd7   : > { %26471 = vst [vmem:[#allocation24_spill] sm:$0xff] %v18424_v20  ;;  %26472 = vst [vmem:[#allocation25_spill] sm:$0xff] %v18428_v10  ;;  %v2683_v12 = vrot.slane %v2479_v62, 1  ;;  %v3039_v2 = vmul.f32 %v18305_v54, %v18403_v40  ;;  %v18438_v61 = vmul.f32 %v18158_v24, %v18119_v1  ;;  %v18442_v57 = vmul.f32 %v18179_v32, %v18119_v1  ;;  %v18540_v40 = vld [vmem:[%s26017_s1 + $0x6] ss:$0 sm:$0xff] }
  0xd8   : > { %v2375_v48 = vadd.f32 %v2279_v59, %v2155_v41  ;;  %v18446_v5 = vmul.f32 %v18207_v47, %v18119_v1  ;;  %v1351_v41 = vsel %vm1313_vm0, %v1349_v13, %v26032_v49  ;;  %v18451_v59 = vpop.permute.xlu1 %562  ;;  %v18455_v62 = vmul.f32 %v18305_v54, %v18119_v1 }
  0xd9   : > { %26473 = vst [vmem:[#allocation26_spill] sm:$0xff] %v18451_v59  ;;  %v18459_v17 = vmul.f32 %v18158_v24, %v18123_v4  ;;  %v1598_v46 = vadd.f32 %v1351_v41, %v941_v29  ;;  %v2685_v28 = vsel %vm1313_vm0, %v2683_v12, %v26036_v43  ;;  %v18466_v25 = vmul.f32 %v18226_v53, %v18119_v1  ;;  %v558_v1 = vpop.permute.xlu0 %557 }
  0xda   : > { %v26041_v13 = vrot.slane %v18424_v20, 2  ;;  %v1910_v49 = vrot.slane %v1702_v22, 2  ;;  %v2935_v3 = vadd.f32 %v2685_v28, %v2375_v48  ;;  %v3243_v58 = vrot.slane %v3039_v2, 2  ;;  %v18488_v22 = vld [vmem:[%s26017_s1 + $0x7] ss:$0 sm:$0xff] }
  0xdb   : > { %v18476_v29 = vmul.f32 %v18158_v24, %v18451_v59  ;;  %v18483_v28 = vmul.f32 %v18179_v32, %v18123_v4  ;;  %v18494_v43 = vmul.f32 %v18207_v47, %v18451_v59  ;;  %v18498_v41 = vmul.f32 %v18488_v22, %v18451_v59 }
  0xdc   : > { %v18502_v4 = vmul.f32 %v18158_v24, %v18126_v6  ;;  %v18506_v12 = vmul.f32 %v18179_v32, %v18126_v6  ;;  %v18510_v2 = vmul.f32 %v18207_v47, %v18126_v6  ;;  %v1912_v48 = vsel %vm1874_vm1, %v1910_v49, %v26041_v13 }
  0xdd   : > { %26474 = vst [vmem:[#allocation27_spill] sm:$0xff] %v18476_v29  ;;  %26475 = vst [vmem:[#allocation28_spill] sm:$0xff] %v18498_v41  ;;  %v18523_v55 = vmul.f32 %v18179_v32, %v18451_v59  ;;  %v2159_v51 = vadd.f32 %v1912_v48, %v1598_v46  ;;  %v26477_v37 = vrot.slane %v18428_v10, 2  ;;  %v18530_v0 = vmul.f32 %v18305_v54, %v18451_v59 }
  0xde   : > { %v18534_v49 = vmul.f32 %v18518_v56, %v18451_v59  ;;  %v1145_v60 = vmul.f32 %v18158_v24, %v558_v1  ;;  %v2483_v48 = vmul.f32 %v18207_v47, %v558_v1  ;;  %v1706_v52 = vmul.f32 %v18179_v32, %v558_v1 }
  0xdf   : > { %26476 = vst [vmem:[#allocation29_spill] sm:$0xff] %v18523_v55  ;;  %v3245_v18 = vsel %vm1874_vm1, %v3243_v58, %v26477_v37  ;;  %v2283_v58 = vmul.f32 %v18226_v53, %v558_v1  ;;  %v945_v34 = vmul.f32 %v18184_v33, %v558_v1  ;;  %v3043_v8 = vmul.f32 %v18305_v54, %v558_v1 }
  0xe0   : > { %26478 = vst [vmem:[#allocation30_spill] sm:$0xff] %v18534_v49  ;;  %v3495_v13 = vadd.f32 %v3245_v18, %v2935_v3  ;;  %v1356_v45 = vrot.slane %v1145_v60, 1  ;;  %v3619_v18 = vmul.f32 %v18540_v40, %v558_v1  ;;  %v3819_v3 = vmul.f32 %v18488_v22, %v558_v1 }
  0xe1   : > { %v2379_v59 = vadd.f32 %v2283_v58, %v2159_v51  ;;  %v2690_v20 = vrot.slane %v2483_v48, 1  ;;  %v18553_v37 = vmul.f32 %v18158_v24, %v18130_v9  ;;  %v26479_v46 = vrot.slane %v18476_v29, 1 }
  0xe2   : > { %v3715_v50 = vadd.f32 %v3619_v18, %v3495_v13  ;;  %v4023_v10 = vrot.slane %v3819_v3, 1  ;;  %v26065_v15 = vrot.slane %v18534_v49, 2  ;;  %v26480_v36 = vrot.slane %v18494_v43, 1  ;;  %v18567_v13 = vpop.permute.xlu1 %582 }
  0xe3   : > { %v1358_v60 = vsel %vm1313_vm0, %v1356_v45, %v26479_v46  ;;  %v4379_v58 = vmul.f32 %v18518_v56, %v558_v1  ;;  %v26066_v48 = vrot.slane %v18523_v55, 2  ;;  %v1917_v31 = vrot.slane %v1706_v52, 2  ;;  %26482 = vst [vmem:[#allocation31_spill] sm:$0xff] %v18567_v13  ;;  %v425_v1 = vld [vmem:[%s18053_s25 + $0x2f8] sm:$0xf] }
  0xe4   : > { %v1602_v42 = vadd.f32 %v1358_v60, %v945_v34  ;;  %v2692_v51 = vsel %vm1313_vm0, %v2690_v20, %v26480_v36  ;;  %v26481_v29 = vrot.slane %v18498_v41, 1  ;;  %v26067_v34 = vrot.slane %v18530_v0, 2  ;;  %912 = vperm.xlu1 %17806, %v425_v1  }
  0xe5   : > { %v2939_v23 = vadd.f32 %v2692_v51, %v2379_v59  ;;  %v3250_v46 = vrot.slane %v3043_v8, 2  ;;  %v4583_v3 = vrot.slane %v4379_v58, 2  ;;  %v1875_v36 = vrot.slane %v18483_v28, 2  ;;  %v424_v28 = vld [vmem:[%s18053_s25 + $0x2f0] sm:$0xff] }
  0xe6   : > { %v4025_v45 = vsel %vm1313_vm0, %v4023_v10, %v26481_v29  ;;  %v26068_v20 = vrot.slane %v18502_v4, 1  ;;  %v26069_v52 = vrot.slane %v18553_v37, 1  ;;  %v18575_v59 = vmul.f32 %v18179_v32, %v18130_v9  ;;  %907 = vperm.xlu0 %17805, %v424_v28  }
  0xe7   : > { %v4275_v18 = vadd.f32 %v4025_v45, %v3715_v50  ;;  %v18579_v10 = vmul.f32 %v18184_v33, %v18126_v6  ;;  %v18583_v29 = vmul.f32 %v18305_v54, %v18126_v6  ;;  %v4585_v50 = vsel %vm1874_vm1, %v4583_v3, %v26065_v15  ;;  %v18604_v3 = vpop.permute.xlu0 %577 }
  0xe8   : > { %v18590_v8 = vmul.f32 %v18207_v47, %v18567_v13  ;;  %v18599_v58 = vmul.f32 %v18488_v22, %v18567_v13  ;;  %v1919_v45 = vsel %vm1874_vm1, %v1917_v31, %v26066_v48  ;;  %v3252_v60 = vsel %vm1874_vm1, %v3250_v46, %v26067_v34  ;;  %v426_v34 = vld [vmem:[%s18053_s25 + $0x300] sm:$0xff] }
  0xe9   : > { %v18595_v51 = vadd.f32 %v4585_v50, %v4275_v18  ;;  %v1124_v18 = vmul.f32 %v18158_v24, %v18133_v11  ;;  %v2163_v50 = vadd.f32 %v1919_v45, %v1602_v42  ;;  %v26484_v31 = vrot.slane %v18438_v61, 1 }
  0xea   : > { %v26485_v1 = vrot.slane %v18459_v17, 1  ;;  %v18626_v46 = vmul.f32 %v18518_v56, %v18567_v13  ;;  %v2287_v61 = vmul.f32 %v18226_v53, %v18604_v3  ;;  %v2487_v45 = vmul.f32 %v18207_v47, %v18604_v3  ;;  %2239 = vperm.xlu0 %17805, %v426_v34  }
  0xeb   : > { %26483 = vst [vmem:[#allocation32_spill] sm:$0xff] %v18595_v51  ;;  %v1323_v48 = vsel %vm1313_vm0, %v26484_v31, %v26068_v20  ;;  %v3499_v51 = vadd.f32 %v3252_v60, %v2939_v23  ;;  %v427_v31 = vld [vmem:[%s18053_s25 + $0x308] sm:$0xff]  ;;  %v924_v17 = vmul.f32 %v18184_v33, %v18133_v11  ;;  %v3623_v23 = vmul.f32 %v18540_v40, %v18604_v3 }
  0xec   : > { %v1316_v28 = vsel %vm1313_vm0, %v26485_v1, %v26069_v52  ;;  %v3823_v60 = vmul.f32 %v18488_v22, %v18604_v3  ;;  %2244 = vperm.xlu1 %17806, %v427_v31   ;;  %v1319_v20 = vrot.slane %v1124_v18, 1  ;;  %v1685_v52 = vmul.f32 %v18179_v32, %v18133_v11 }
  0xed   : > { %v2383_v15 = vadd.f32 %v2287_v61, %v2163_v50  ;;  %v2697_v42 = vrot.slane %v2487_v45, 1  ;;  %v1578_v55 = vadd.f32 %v1316_v28, %v18471_v35  ;;  %v1123_v13 = vmul.f32 %v18158_v24, %v18137_v14 }
  0xee   : > { %v3719_v1 = vadd.f32 %v3623_v23, %v3499_v51  ;;  %v4030_v49 = vrot.slane %v3823_v60, 1  ;;  %v18648_v41 = vmul.f32 %v18305_v54, %v18291_v26  ;;  %v26486_v34 = vrot.slane %v18590_v8, 1 }
  0xef   : > { %v4383_v11 = vmul.f32 %v18518_v56, %v18604_v3  ;;  %v1582_v35 = vadd.f32 %v1323_v48, %v18413_v30  ;;  %v26076_v50 = vrot.slane %v18583_v29, 2  ;;  %v26487_v51 = vrot.slane %v18599_v58, 1 }
  0xf0   : > { %v2699_v18 = vsel %vm1313_vm0, %v2697_v42, %v26486_v34  ;;  %v26488_v45 = vrot.slane %v18575_v59, 2  ;;  %v1581_v60 = vadd.f32 %v1319_v20, %v924_v17  ;;  %v18668_v34 = vmul.f32 %v18226_v53, %v18126_v6 }
  0xf1   : > { %v18658_v28 = vadd.f32 %v2699_v18, %v2383_v15  ;;  %v4032_v61 = vsel %vm1313_vm0, %v4030_v49, %v26487_v51  ;;  %v4590_v42 = vrot.slane %v4383_v11, 2  ;;  %v1317_v48 = vrot.slane %v1123_v13, 1 }
  0xf2   : > { %v1877_v23 = vsel %vm1874_vm1, %v1875_v36, %v26488_v45  ;;  %v4279_v31 = vadd.f32 %v4032_v61, %v3719_v1  ;;  %v1684_v15 = vmul.f32 %v18179_v32, %v18137_v14  ;;  %v922_v49 = vmul.f32 %v18184_v33, %v18130_v9 }
  0xf3   : > { %v2139_v30 = vadd.f32 %v1877_v23, %v1578_v55  ;;  %v1880_v18 = vrot.slane %v1685_v52, 2  ;;  %v26075_v36 = vrot.slane %v18648_v41, 2  ;;  %v26489_v17 = vrot.slane %v18626_v46, 2 }
  0xf4   : > { %v26490_v6 = vrot.slane %v18506_v12, 2  ;;  %v26491_v55 = vrot.slane %v18442_v57, 2  ;;  %v26492_v11 = vrot.slane %v18510_v2, 1  ;;  %v26493_v51 = vrot.slane %v18446_v5, 1  ;;  %v18701_v5 = vpop.permute.xlu0 %527 }
  0xf5   : > { %v4592_v1 = vsel %vm1874_vm1, %v4590_v42, %v26489_v17  ;;  %v1128_v9 = vmul.f32 %v18158_v24, %v18140_v16  ;;  %v26494_v23 = vrot.slane %v18455_v62, 2  ;;  %v2142_v42 = vadd.f32 %v1880_v18, %v1581_v60 }
  0xf6   : > { %v1884_v13 = vsel %vm1874_vm1, %v26491_v55, %v26490_v6  ;;  %v2657_v61 = vsel %vm1313_vm0, %v26493_v51, %v26492_v11  ;;  %v18690_v52 = vadd.f32 %v4592_v1, %v4279_v31  ;;  %v923_v17 = vmul.f32 %v18184_v33, %v18137_v14  ;;  %v429_v6 = vld [vmem:[%s18053_s25 + $0x318] sm:$0xf]  ;;  %v428_v55 = vld [vmem:[%s18053_s25 + $0x310] sm:$0xff] }
  0xf7   : > { %v18692_v45 = vadd.f32 %v1884_v13, %v1582_v35  ;;  %v3217_v57 = vsel %vm1874_vm1, %v26494_v23, %v26076_v50  ;;  %v2359_v11 = vadd.f32 %v18466_v25, %v2139_v30  ;;  %v26495_v31 = vrot.slane %v18553_v37, 1  ;;  %2254 = vperm.xlu1 %17806, %v429_v6   ;;  %2249 = vperm.xlu0 %17805, %v428_v55  }
  0xf8   : > { %v1320_v1 = vsel %vm1313_vm0, %v1317_v48, %v1319_v20  ;;  %v1878_v13 = vrot.slane %v1684_v15, 2  ;;  %v928_v62 = vmul.f32 %v18184_v33, %v18140_v16  ;;  %v2266_v14 = vmul.f32 %v18226_v53, %v18140_v16 }
  0xf9   : > { %v1318_v35 = vsel %vm1313_vm0, %v26495_v31, %v1317_v48  ;;  %v2466_v60 = vmul.f32 %v18207_v47, %v18140_v16  ;;  %v26496_v25 = vrot.slane %v18324_v63, 2  ;;  %v1326_v30 = vrot.slane %v1128_v9, 1 }
  0xfa   : > { %v1127_v20 = vmul.f32 %v18158_v24, %v18144_v19  ;;  %v18728_v15 = vmul.f32 %v18158_v24, %v18701_v5  ;;  %v1579_v51 = vadd.f32 %v1318_v35, %v922_v49  ;;  %v1580_v23 = vadd.f32 %v1320_v1, %v923_v17 }
  0xfb   : > { %v3235_v37 = vsel %vm1874_vm1, %v26496_v25, %v26075_v36  ;;  %v1689_v6 = vmul.f32 %v18179_v32, %v18140_v16  ;;  %v2362_v63 = vadd.f32 %v2266_v14, %v2142_v42  ;;  %v2919_v31 = vadd.f32 %v2657_v61, %v2359_v11 }
  0xfc   : > { %v18724_v48 = vadd.f32 %v3235_v37, %v18350_v38  ;;  %26498 = vst [vmem:[#allocation34_spill] sm:$0xff] %v18728_v15  ;;  %v26499_v55 = vrot.slane %v18575_v59, 2  ;;  %v26077_v25 = vrot.slane %v18728_v15, 1  ;;  %v18738_v38 = vmul.f32 %v18179_v32, %v18701_v5 }
  0xfd   : > { %v1881_v37 = vsel %vm1874_vm1, %v1878_v13, %v1880_v18  ;;  %v2660_v36 = vrot.slane %v2466_v60, 1  ;;  %v3026_v49 = vmul.f32 %v18305_v54, %v18140_v16  ;;  %v1688_v42 = vmul.f32 %v18179_v32, %v18144_v19 }
  0xfe   : > { %26497 = vst [vmem:[#allocation33_spill] sm:$0xff] %v18724_v48  ;;  %v1879_v9 = vsel %vm1874_vm1, %v26499_v55, %v1878_v13  ;;  %26500 = vst [vmem:[#allocation35_spill] sm:$0xff] %v18738_v38  ;;  %v1585_v61 = vadd.f32 %v1326_v30, %v928_v62  ;;  %v1324_v17 = vrot.slane %v1127_v20, 1  ;;  %v2465_v59 = vmul.f32 %v18207_v47, %v18144_v19 }
  0xff   : > { %v26501_v11 = vrot.slane %v18361_v44, 1  ;;  %v2140_v1 = vadd.f32 %v1879_v9, %v1579_v51  ;;  %v2141_v18 = vadd.f32 %v1881_v37, %v1580_v23  ;;  %v2922_v13 = vadd.f32 %v2660_v36, %v2362_v63 }
 0x100   : > { %v938_v16 = vmul.f32 %v18184_v33, %v18352_v39  ;;  %v3479_v14 = vadd.f32 %v3217_v57, %v2919_v31  ;;  %v1887_v60 = vrot.slane %v1689_v6, 2  ;;  %v3025_v62 = vmul.f32 %v18305_v54, %v18144_v19 }
 0x101   : > { %v1346_v35 = vsel %vm1313_vm0, %v26501_v11, %v26077_v25  ;;  %v26078_v20 = vrot.slane %v18738_v38, 2  ;;  %v3220_v55 = vrot.slane %v3026_v49, 2  ;;  %v1885_v50 = vrot.slane %v1688_v42, 2  ;;  %v431_v11 = vld [vmem:[%s18053_s25 + $0x328] sm:$0xff]  ;;  %v430_v25 = vld [vmem:[%s18053_s25 + $0x320] sm:$0xff] }
 0x102   : > { %v2265_v44 = vmul.f32 %v18226_v53, %v18144_v19  ;;  %v1595_v51 = vadd.f32 %v1346_v35, %v938_v16  ;;  %v18759_v23 = vadd.f32 %v1887_v60, %v1585_v61  ;;  %v927_v63 = vmul.f32 %v18184_v33, %v18144_v19  ;;  %3584 = vperm.xlu1 %17806, %v431_v11   ;;  %v18813_v11 = vpop.permute.xlu0 %547 }
 0x103   : > { %v26502_v57 = vrot.slane %v18502_v4, 1  ;;  %v2658_v31 = vrot.slane %v2465_v59, 1  ;;  %v2360_v9 = vadd.f32 %v18668_v34, %v2140_v1  ;;  %v18767_v37 = vadd.f32 %v3220_v55, %v2922_v13  ;;  %3579 = vperm.xlu0 %17805, %v430_v25  }
 0x104   : > { %v1327_v49 = vsel %vm1313_vm0, %v1324_v17, %v1326_v30  ;;  %v2361_v42 = vadd.f32 %v2265_v44, %v2141_v18  ;;  %v3218_v35 = vrot.slane %v3025_v62, 2  ;;  %v18774_v61 = vmul.f32 %v18207_v47, %v18147_v21 }
 0x105   : > { %v1325_v6 = vsel %vm1313_vm0, %v26502_v57, %v1324_v17  ;;  %v2467_v19 = vmul.f32 %v18207_v47, %v18168_v27  ;;  %v26503_v4 = vrot.slane %v18383_v7, 2  ;;  %v26504_v17 = vrot.slane %v18506_v12, 2 }
 0x106   : > { %v1583_v30 = vadd.f32 %v1325_v6, %v18579_v10  ;;  %v1888_v1 = vsel %vm1874_vm1, %v1885_v50, %v1887_v60  ;;  %v1584_v13 = vadd.f32 %v1327_v49, %v927_v63  ;;  %v26505_v16 = vrot.slane %v18510_v2, 1 }
 0x107   : > { %v1907_v34 = vsel %vm1874_vm1, %v26503_v4, %v26078_v20  ;;  %v1886_v59 = vsel %vm1874_vm1, %v26504_v17, %v1885_v50  ;;  %v18793_v7 = vmul.f32 %v18488_v22, %v18147_v21  ;;  %v3803_v25 = vmul.f32 %v18488_v22, %v18168_v27  ;;  %v26506_v50 = vld [vmem:[#allocation20_spill] sm:$0xff] }
 0x108   : > { %v2156_v18 = vadd.f32 %v1907_v34, %v1595_v51  ;;  %v2659_v62 = vsel %vm1313_vm0, %v26505_v16, %v2658_v31  ;;  %v2661_v10 = vsel %vm1313_vm0, %v2658_v31, %v2660_v36  ;;  %v2267_v44 = vmul.f32 %v18226_v53, %v18168_v27  ;;  %26508 = vst [vmem:[#allocation20_spill] sm:$0xff] %v18813_v11 }
 0x109   : > { %v2920_v12 = vadd.f32 %v2659_v62, %v2360_v9  ;;  %v2280_v60 = vmul.f32 %v18226_v53, %v26506_v50  ;;  %v2921_v51 = vadd.f32 %v2661_v10, %v2361_v42  ;;  %v26507_v2 = vrot.slane %v18583_v29, 2 }
 0x10a   : > { %v26080_v57 = vrot.slane %v18774_v61, 1  ;;  %v2662_v6 = vrot.slane %v2467_v19, 1  ;;  %v3221_v49 = vsel %vm1874_vm1, %v3218_v35, %v3220_v55  ;;  %v18809_v36 = vmul.f32 %v18305_v54, %v18147_v21 }
 0x10b   : > { %v3219_v63 = vsel %vm1874_vm1, %v26507_v2, %v3218_v35  ;;  %v3603_v31 = vmul.f32 %v18540_v40, %v18168_v27  ;;  %v2376_v9 = vadd.f32 %v2280_v60, %v2156_v18  ;;  %v2144_v42 = vadd.f32 %v1886_v59, %v1583_v30 }
 0x10c   : > { %v26079_v29 = vrot.slane %v18793_v7, 1  ;;  %v3027_v4 = vmul.f32 %v18305_v54, %v18168_v27  ;;  %v3995_v34 = vrot.slane %v3803_v25, 1  ;;  %v18818_v19 = vadd.f32 %v1888_v1, %v1584_v13 }
 0x10d   : > { %v3480_v55 = vadd.f32 %v3219_v63, %v2920_v12  ;;  %v18822_v35 = vmul.f32 %v18518_v56, %v18147_v21  ;;  %v2363_v17 = vadd.f32 %v2267_v44, %v18692_v45  ;;  %v2664_v18 = vsel %vm1313_vm0, %v2662_v6, %v26080_v57  ;;  %v26513_v63 = vld [vmem:[#allocation21_spill] sm:$0xff]  ;;  %v26518_v57 = vld [vmem:[#allocation8_spill] sm:$0xff] }
 0x10e   : > { %v4363_v30 = vmul.f32 %v18518_v56, %v18168_v27  ;;  %v18832_v59 = vmul.f32 %v18158_v24, %v18813_v11  ;;  %v18836_v1 = vmul.f32 %v18207_v47, %v18813_v11  ;;  %v26083_v13 = vrot.slane %v18809_v36, 2 }
 0x10f   : > { %v3699_v16 = vadd.f32 %v3603_v31, %v3479_v14  ;;  %v18841_v45 = vmul.f32 %v18179_v32, %v18813_v11  ;;  %v18845_v62 = vmul.f32 %v18305_v54, %v18813_v11  ;;  %v3222_v27 = vrot.slane %v3027_v4, 2  ;;  %v26515_v4 = vld [vmem:[#allocation22_spill] sm:$0xff]  ;;  %v433_v11 = vld [vmem:[%s18053_s25 + $0x338] sm:$0xf] }
 0x110   : > { %26509 = vst [vmem:[#allocation36_spill] sm:$0xff] %v18832_v59  ;;  %26510 = vst [vmem:[#allocation37_spill] sm:$0xff] %v18836_v1  ;;  %v3997_v24 = vsel %vm1313_vm0, %v3995_v34, %v26079_v29  ;;  %v26081_v25 = vrot.slane %v18832_v59, 1  ;;  %v26082_v10 = vrot.slane %v18836_v1, 1  ;;  %v2268_v14 = vmul.f32 %v18226_v53, %v18147_v21  ;;  %3594 = vperm.xlu1 %17806, %v433_v11  }
 0x111   : > { %26511 = vst [vmem:[#allocation38_spill] sm:$0xff] %v18841_v45  ;;  %26512 = vst [vmem:[#allocation39_spill] sm:$0xff] %v18845_v62  ;;  %v2923_v32 = vadd.f32 %v2664_v18, %v2363_v17  ;;  %v26085_v44 = vrot.slane %v18845_v62, 2  ;;  %v4555_v60 = vrot.slane %v4363_v30, 2  ;;  %v942_v2 = vmul.f32 %v18184_v33, %v26506_v50  ;;  %v26517_v17 = vld [vmem:[#allocation5_spill] sm:$0xff]  ;;  %v26521_v30 = vld [vmem:[#allocation6_spill] sm:$0xff] }
 0x112   : > { %v26514_v6 = vrot.slane %v26513_v63, 1  ;;  %v26516_v34 = vrot.slane %v26515_v4, 1  ;;  %v4259_v29 = vadd.f32 %v3997_v24, %v3699_v16  ;;  %v18870_v18 = vmul.f32 %v18488_v22, %v26517_v17  ;;  %v26519_v4 = vld [vmem:[#allocation25_spill] sm:$0xff] }
 0x113   : > { %v3224_v63 = vsel %vm1874_vm1, %v3222_v27, %v26083_v13  ;;  %v3604_v24 = vmul.f32 %v18540_v40, %v18147_v21  ;;  %v3481_v12 = vadd.f32 %v3221_v49, %v2921_v51  ;;  %v2364_v27 = vadd.f32 %v2268_v14, %v2144_v42  ;;  %v18904_v49 = vld [vmem:[%s26018_s2] ss:$0 sm:$0xff] }
 0x114   : > { %v1353_v31 = vsel %vm1313_vm0, %v26514_v6, %v26081_v25  ;;  %v2687_v20 = vsel %vm1313_vm0, %v26516_v34, %v26082_v10  ;;  %v2469_v6 = vmul.f32 %v18207_v47, %v26518_v57  ;;  %v26520_v34 = vrot.slane %v26519_v4, 2 }
 0x115   : > { %v2936_v33 = vadd.f32 %v2687_v20, %v2376_v9  ;;  %v1599_v25 = vadd.f32 %v1353_v31, %v942_v2  ;;  %v3483_v10 = vadd.f32 %v3224_v63, %v2923_v32  ;;  %v3807_v20 = vmul.f32 %v18488_v22, %v26521_v30  ;;  %v26523_v31 = vld [vmem:[#allocation7_spill] sm:$0xff]  ;;  %v26525_v63 = vld [vmem:[#allocation24_spill] sm:$0xff] }
 0x116   : > { %v3247_v16 = vsel %vm1874_vm1, %v26520_v34, %v26085_v44  ;;  %v26522_v13 = vrot.slane %v18822_v35, 2  ;;  %v2470_v59 = vmul.f32 %v18207_v47, %v26523_v31  ;;  %v18892_v4 = vadd.f32 %v3604_v24, %v3480_v55 }
 0x117   : > { %v3496_v9 = vadd.f32 %v3247_v16, %v2936_v33  ;;  %v3607_v21 = vmul.f32 %v18540_v40, %v26521_v30  ;;  %v26524_v32 = vrot.slane %v18841_v45, 2  ;;  %v26526_v44 = vrot.slane %v26525_v63, 2 }
 0x118   : > { %v4557_v2 = vsel %vm1874_vm1, %v4555_v60, %v26522_v13  ;;  %v4003_v42 = vrot.slane %v18870_v18, 1  ;;  %v18909_v55 = vmul.f32 %v18518_v56, %v26517_v17  ;;  %v4002_v60 = vrot.slane %v3807_v20, 1  ;;  %v432_v20 = vld [vmem:[%s18053_s25 + $0x330] sm:$0xff]  ;;  %s17884_s25 = scalar_lea.vmem %s15922_s22, 16 }
 0x119   : > { %v4819_v34 = vadd.f32 %v4557_v2, %v4259_v29  ;;  %v1914_v51 = vsel %vm1874_vm1, %v26526_v44, %v26524_v32  ;;  %v2665_v29 = vrot.slane %v2469_v6, 1  ;;  %v3703_v14 = vadd.f32 %v3607_v21, %v3483_v10  ;;  %v26527_v32 = vld [vmem:[#allocation26_spill] sm:$0xff]  ;;  %3589 = vperm.xlu0 %17805, %v432_v20   ;;  %p17885_p11 = scmp.ne.s32.totalorder %s15922_s22, %s17884_s25  ;;  %p17892_p1 = scmp.lt.s32.totalorder %s17890_s14, %s17884_s25 }
 0x11a   : > { %v2160_v13 = vadd.f32 %v1914_v51, %v1599_v25  ;;  %v4367_v33 = vmul.f32 %v18518_v56, %v26521_v30  ;;  %v2269_v44 = vmul.f32 %v18226_v53, %v26518_v57  ;;  %v2270_v16 = vmul.f32 %v18226_v53, %v26523_v31  ;;  %v18938_v51 = vpop.permute.xlu0 %567 }
 0x11b   : > { %v2667_v24 = vrot.slane %v2470_v59, 1  ;;  %v3029_v2 = vmul.f32 %v18305_v54, %v26518_v57  ;;  %v2284_v25 = vmul.f32 %v18226_v53, %v26527_v32  ;;  %v18922_v10 = vadd.f32 %v18904_v49, %v4819_v34  ;;  %p17886_p12 = pnand %p17885_p11, %p18038_p5  ;;  %p17893_p2 = por %p17892_p1, %p17891_p0 }
 0x11c   : > { %v3608_v30 = vmul.f32 %v18540_v40, %v26517_v17  ;;  %v18928_v6 = vmul.f32 %v18488_v22, %v26518_v57  ;;  %v3620_v59 = vmul.f32 %v18540_v40, %v26527_v32  ;;  %v3030_v21 = vmul.f32 %v18305_v54, %v26523_v31 }
 0x11d   : > { %v26528_v53 = vrot.slane %v18774_v61, 1  ;;  %v2380_v63 = vadd.f32 %v2284_v25, %v2160_v13  ;;  %v4004_v17 = vsel %vm1313_vm0, %v4002_v60, %v4003_v42  ;;  %v4562_v45 = vrot.slane %v4367_v33, 2  ;;  %p17887_p13 = pneg %p17886_p12 }
 0x11e   : > { %v2365_v62 = vadd.f32 %v2269_v44, %v18818_v19  ;;  %v3716_v1 = vadd.f32 %v3620_v59, %v3496_v9  ;;  %v4263_v38 = vadd.f32 %v4004_v17, %v3703_v14  ;;  %v2366_v48 = vadd.f32 %v2270_v16, %v18759_v23 }
 0x11f   : > { %v2666_v34 = vsel %vm1313_vm0, %v26528_v53, %v2665_v29  ;;  %v2668_v61 = vsel %vm1313_vm0, %v2665_v29, %v2667_v24  ;;  %v3225_v15 = vrot.slane %v3029_v2, 2  ;;  %v3605_v25 = vmul.f32 %v18540_v40, %v26518_v57  ;;  %p17894_p3 = pnand %p17893_p2, %p17887_p13 }
 0x120   : > { %v2924_v13 = vadd.f32 %v2666_v34, %v2364_v27  ;;  %v3998_v53 = vrot.slane %v18928_v6, 1  ;;  %v18953_v60 = vmul.f32 %v18207_v47, %v18938_v51  ;;  %v3227_v19 = vrot.slane %v3030_v21, 2  ;;  %v26533_v21 = vld [vmem:[#allocation12_spill] sm:$0xff] }
 0x121   : > { %v4365_v9 = vmul.f32 %v18518_v56, %v26518_v57  ;;  %v18959_v23 = vmul.f32 %v18305_v54, %v18938_v51  ;;  %v18963_v11 = vmul.f32 %v18488_v22, %v18938_v51  ;;  %v26530_v27 = vrot.slane %v18909_v55, 2 }
 0x122   : > { %v3606_v47 = vmul.f32 %v18540_v40, %v26523_v31  ;;  %v2925_v14 = vadd.f32 %v2668_v61, %v2365_v62  ;;  %v26094_v33 = vrot.slane %v18953_v60, 1  ;;  %v2926_v57 = vadd.f32 %v2667_v24, %v2366_v48 }
 0x123   : > { %26529 = vst [vmem:[#allocation21_spill] sm:$0xff] %v18959_v23  ;;  %v4564_v29 = vsel %vm1874_vm1, %v4562_v45, %v26530_v27  ;;  %v26531_v16 = vrot.slane %v18809_v36, 2  ;;  %v26093_v2 = vrot.slane %v18959_v23, 2  ;;  %v3701_v59 = vadd.f32 %v3605_v25, %v3481_v12 }
 0x124   : > { %v4823_v44 = vadd.f32 %v4564_v29, %v4263_v38  ;;  %v26532_v20 = vrot.slane %v18793_v7, 1  ;;  %v3809_v34 = vmul.f32 %v18488_v22, %v26533_v21  ;;  %v4558_v62 = vrot.slane %v4365_v9, 2 }
 0x125   : > { %v3226_v54 = vsel %vm1874_vm1, %v26531_v16, %v3225_v15  ;;  %v3228_v17 = vsel %vm1874_vm1, %v3225_v15, %v3227_v19  ;;  %v26534_v48 = vrot.slane %v18494_v43, 1  ;;  %v26098_v36 = vrot.slane %v18963_v11, 1  ;;  %v26536_v43 = vld [vmem:[#allocation28_spill] sm:$0xff] }
 0x126   : > { %v3484_v6 = vadd.f32 %v3226_v54, %v2924_v13  ;;  %v3999_v45 = vsel %vm1313_vm0, %v26532_v20, %v3998_v53  ;;  %v3610_v12 = vmul.f32 %v18540_v40, %v18291_v26  ;;  %v3485_v7 = vadd.f32 %v3228_v17, %v2925_v14 }
 0x127   : > { %v2694_v38 = vsel %vm1313_vm0, %v26534_v48, %v26094_v33  ;;  %v4369_v24 = vmul.f32 %v18518_v56, %v26533_v21  ;;  %v26535_v15 = vrot.slane %v18530_v0, 2  ;;  %v26537_v25 = vrot.slane %v26536_v43, 1 }
 0x128   : > { %v2940_v61 = vadd.f32 %v2694_v38, %v2380_v63  ;;  %v19003_v27 = vmul.f32 %v18518_v56, %v18938_v51  ;;  %v3486_v29 = vadd.f32 %v3227_v19, %v2926_v57  ;;  %v3609_v63 = vmul.f32 %v18540_v40, %v26533_v21 }
 0x129   : > { %v3254_v13 = vsel %vm1874_vm1, %v26535_v15, %v26093_v2  ;;  %v4027_v9 = vsel %vm1313_vm0, %v26537_v25, %v26098_v36  ;;  %v4005_v14 = vrot.slane %v3809_v34, 1  ;;  %v3702_v20 = vadd.f32 %v3606_v47, %v18767_v37  ;;  %v26538_v34 = vld [vmem:[#allocation30_spill] sm:$0xff] }
 0x12a   : > { %v19007_v16 = vadd.f32 %v3254_v13, %v2940_v61  ;;  %v4276_v0 = vadd.f32 %v4027_v9, %v3716_v1  ;;  %v26097_v54 = vrot.slane %v19003_v27, 2  ;;  %v3704_v17 = vadd.f32 %v3608_v30, %v3484_v6 }
 0x12b   : > { %v3806_v48 = vmul.f32 %v18488_v22, %v26523_v31  ;;  %v3705_v38 = vadd.f32 %v3609_v63, %v3485_v7  ;;  %v4565_v15 = vrot.slane %v4369_v24, 2  ;;  %v3810_v19 = vmul.f32 %v18488_v22, %v18291_v26 }
 0x12c   : > { %v4366_v57 = vmul.f32 %v18518_v56, %v26523_v31  ;;  %v26539_v1 = vrot.slane %v26538_v34, 2  ;;  %v3706_v13 = vadd.f32 %v3610_v12, %v3486_v29  ;;  %v4370_v30 = vmul.f32 %v18518_v56, %v18291_v26 }
 0x12d   : > { %v4000_v37 = vrot.slane %v3806_v48, 1  ;;  %v4006_v47 = vsel %vm1313_vm0, %v4003_v42, %v4005_v14  ;;  %v4007_v7 = vrot.slane %v3810_v19, 1  ;;  %v4260_v24 = vadd.f32 %v3999_v45, %v18892_v4 }
 0x12e   : > { %v4587_v61 = vsel %vm1874_vm1, %v26539_v1, %v26097_v54  ;;  %v4264_v9 = vadd.f32 %v4006_v47, %v3704_v17  ;;  %v4560_v63 = vrot.slane %v4366_v57, 2  ;;  %v4926_v12 = vadd.f32 %v18904_v49, %v4823_v44 }
 0x12f   : > { %v19027_v6 = vadd.f32 %v4587_v61, %v4276_v0  ;;  %v4001_v43 = vsel %vm1313_vm0, %v3998_v53, %v4000_v37  ;;  %v4262_v25 = vadd.f32 %v4000_v37, %v3702_v20  ;;  %v4008_v29 = vsel %vm1313_vm0, %v4005_v14, %v4007_v7 }
 0x130   : > { %v4261_v48 = vadd.f32 %v4001_v43, %v3701_v59  ;;  %v26540_v34 = vrot.slane %v18822_v35, 2  ;;  %v4265_v42 = vadd.f32 %v4008_v29, %v3705_v38  ;;  %v4266_v0 = vadd.f32 %v4007_v7, %v3706_v13 }
 0x131   : > { %v4561_v19 = vsel %vm1874_vm1, %v4558_v62, %v4560_v63  ;;  %v4567_v1 = vrot.slane %v4370_v30, 2  ;;  %v5018_v4 = vmax.f32 %v18922_v10, 0.0  ;;  %v26541_v53 = vrot.slane %v18909_v55, 2 }
 0x132   : > { %v4559_v18 = vsel %vm1874_vm1, %v26540_v34, %v4558_v62  ;;  %v4821_v44 = vadd.f32 %v4561_v19, %v4261_v48  ;;  %v4822_v59 = vadd.f32 %v4560_v63, %v4262_v25  ;;  %v5022_v57 = vmax.f32 %v4926_v12, 0.0 }
 0x133   : > { %v4566_v45 = vsel %vm1874_vm1, %v26541_v53, %v4565_v15  ;;  %v4820_v20 = vadd.f32 %v4559_v18, %v4260_v24  ;;  %v4568_v14 = vsel %vm1874_vm1, %v4565_v15, %v4567_v1  ;;  %v4826_v35 = vadd.f32 %v4567_v1, %v4266_v0 }
 0x134   : > { %v4824_v17 = vadd.f32 %v4566_v45, %v4264_v9  ;;  %v4825_v61 = vadd.f32 %v4568_v14, %v4265_v42  ;;  %v4924_v62 = vadd.f32 %v18904_v49, %v4821_v44  ;;  %v4925_v13 = vadd.f32 %v18904_v49, %v4822_v59  ;;  %v19051_v42 = vld [vmem:[%s26017_s1 + $0x1] ss:$0 sm:$0xff] }
 0x135   : > { %v4923_v38 = vadd.f32 %v18904_v49, %v4820_v20  ;;  %v4929_v55 = vadd.f32 %v18904_v49, %v4826_v35  ;;  %v5138_v47 = vrot.slane %v5018_v4, 1  ;;  %v5139_v9 = vrot.slane %v5022_v57, 1 }
 0x136   : > { %v4927_v10 = vadd.f32 %v18904_v49, %v4824_v17  ;;  %v4928_v37 = vadd.f32 %v18904_v49, %v4825_v61  ;;  %v5020_v15 = vmax.f32 %v4924_v62, 0.0  ;;  %v5021_v7 = vmax.f32 %v4925_v13, 0.0 }
 0x137   : > { %v5019_v30 = vmax.f32 %v4923_v38, 0.0  ;;  %v5025_v43 = vmax.f32 %v4929_v55, 0.0  ;;  %v5186_v63 = vmax.f32 %v5018_v4, %v5138_v47  ;;  %v19055_v0 = vmul.f32 %v19051_v42, %v18938_v51 }
 0x138   : > { %v5023_v24 = vmax.f32 %v4927_v10, 0.0  ;;  %v5024_v25 = vmax.f32 %v4928_v37, 0.0  ;;  %v5330_v48 = vrot.slane %v5020_v15, 1  ;;  %v5426_v34 = vrot.slane %v5021_v7, 1 }
 0x139   : > { %v5234_v12 = vrot.slane %v5019_v30, 1  ;;  %v5427_v18 = vrot.slane %v5025_v43, 1  ;;  %v5187_v19 = vmax.f32 %v5022_v57, %v5139_v9  ;;  %v5522_v44 = vrot.slane %v5186_v63, 1 }
 0x13a   : > { %v5235_v29 = vrot.slane %v5023_v24, 1  ;;  %v5331_v53 = vrot.slane %v5024_v25, 1  ;;  %v5378_v20 = vmax.f32 %v5020_v15, %v5330_v48  ;;  %v5474_v4 = vmax.f32 %v5021_v7, %v5426_v34 }
 0x13b   : > { %v5282_v1 = vmax.f32 %v5019_v30, %v5234_v12  ;;  %v5475_v59 = vmax.f32 %v5025_v43, %v5427_v18  ;;  %v5523_v17 = vrot.slane %v5187_v19, 1  ;;  %v5570_v35 = vrot.slane %v5186_v63, 2 }
 0x13c   : > { %v5283_v45 = vmax.f32 %v5023_v24, %v5235_v29  ;;  %v5379_v14 = vmax.f32 %v5024_v25, %v5331_v53  ;;  %v5571_v61 = vrot.slane %v5187_v19, 2  ;;  %v5618_v38 = vrot.slane %v5186_v63, 3 }
 0x13d   : > { %v5619_v62 = vrot.slane %v5187_v19, 3  ;;  %v5690_v13 = vrot.slane %v5282_v1, 4  ;;  %v5738_v55 = vrot.slane %v5282_v1, 5  ;;  %v5786_v47 = vrot.slane %v5282_v1, 6 }
 0x13e   : > { %v5691_v10 = vrot.slane %v5283_v45, 4  ;;  %v5739_v37 = vrot.slane %v5283_v45, 5  ;;  %v5787_v2 = vrot.slane %v5283_v45, 6  ;;  %v5834_v57 = vrot.slane %v5282_v1, 7 }
 0x13f   : > { %v5906_v30 = vrot.slane %v5378_v20, 1  ;;  %v5907_v9 = vrot.slane %v5379_v14, 1  ;;  %v5954_v24 = vrot.slane %v5378_v20, 2  ;;  %v5955_v15 = vrot.slane %v5379_v14, 2 }
 0x140   : > { %v6002_v7 = vrot.slane %v5378_v20, 3  ;;  %v6003_v12 = vrot.slane %v5379_v14, 3  ;;  %v6074_v25 = vrot.slane %v5474_v4, 4  ;;  %v6075_v43 = vrot.slane %v5475_v59, 4 }
 0x141   : > { %v6123_v29 = vsel %vm6122_vm2, %v5186_v63, %v5522_v44  ;;  %v6124_v48 = vsel %vm6122_vm2, %v5187_v19, %v5523_v17  ;;  %v6295_v1 = vsel %vm6122_vm2, %v5378_v20, %v5906_v30  ;;  %v6296_v59 = vsel %vm6122_vm2, %v5379_v14, %v5907_v9 }
 0x142   : > { %v6148_v34 = vsel %vm6147_vm3, %v6123_v29, %v5570_v35  ;;  %v6149_v18 = vsel %vm6147_vm3, %v6124_v48, %v5571_v61  ;;  %v6319_v33 = vsel %vm6147_vm3, %v6295_v1, %v5954_v24  ;;  %v6320_v44 = vsel %vm6147_vm3, %v6296_v59, %v5955_v15  ;;  %v26544_v24 = vld [vmem:[#allocation16_spill] sm:$0xff]  ;;  %v19113_v48 = vld [vmem:[%s26017_s1 + $0x3] ss:$0 sm:$0xff]  ;;  %v19124_v59 = vpop.permute.xlu0 %587 }
 0x143   : > { %v6173_v53 = vsel %vm6172_vm4, %v6148_v34, %v5618_v38  ;;  %v6174_v4 = vsel %vm6172_vm4, %v6149_v18, %v5619_v62  ;;  %v6343_v17 = vsel %vm6172_vm4, %v6319_v33, %v6002_v7  ;;  %v5835_v35 = vrot.slane %v5283_v45, 7  ;;  %v26545_v7 = vld [vmem:[#allocation31_spill] sm:$0xff]  ;;  %26549 = vst [vmem:[#allocation25_spill] sm:$0xff] %v19124_v59 }
 0x144   : > { %v6198_v63 = vsel %vm6197_vm5, %v6173_v53, %v5690_v13  ;;  %v6199_v19 = vsel %vm6197_vm5, %v6174_v4, %v5691_v10  ;;  %v6344_v38 = vsel %vm6172_vm4, %v6320_v44, %v6003_v12  ;;  %v6367_v30 = vsel %vm6197_vm5, %v6343_v17, %v6074_v25  ;;  %v19102_v25 = vld [vmem:[%s26017_s1 + $0x2] ss:$0 sm:$0xff]  ;;  %v26547_v18 = vld [vmem:[#allocation27_spill] sm:$0xff] }
 0x145   : > { %v6223_v61 = vsel %vm6222_vm6, %v6198_v63, %v5738_v55  ;;  %v6224_v20 = vsel %vm6222_vm6, %v6199_v19, %v5739_v37  ;;  %v6368_v13 = vsel %vm6197_vm5, %v6344_v38, %v6075_v43  ;;  %v26096_v37 = vrot.slane %v19055_v0, 1  ;;  %v19130_v19 = vld [vmem:[%s26017_s1 + $0x5] ss:$0 sm:$0xff]  ;;  %v19153_v38 = vld [vmem:[%s26019_s3 + $0x10] sm:$0xff] }
 0x146   : > { %v6247_v62 = vsel %vm1874_vm1, %v6223_v61, %v5786_v47  ;;  %v6248_v14 = vsel %vm1874_vm1, %v6224_v20, %v5787_v2  ;;  %v19079_v33 = vmax.f32 %v6367_v30, %v6368_v13  ;;  %v19089_v2 = vld [vmem:[%s26017_s1 + $0x4] ss:$0 sm:$0xff]  ;;  %v3624_v12 = vmul.f32 %v18540_v40, %v26545_v7  ;;  %v19146_v61 = vld [vmem:[%s26019_s3 + $0x18] sm:$0xff]  ;;  %26551 = vst [vmem:[#allocation7_spill] sm:$0xff] %v19153_v38  ;;  %v26553_v30 = vld [vmem:[#allocation18_spill] sm:$0xff] }
 0x147   : > { %v6271_v10 = vsel %vm1313_vm0, %v6247_v62, %v5834_v57  ;;  %v6272_v9 = vsel %vm1313_vm0, %v6248_v14, %v5835_v35  ;;  %v19093_v57 = vmul.f32 %v19089_v2, %v18352_v39  ;;  %v2475_v15 = vmul.f32 %v19089_v2, %v26544_v24  ;;  %v19139_v35 = vld [vmem:[%s26017_s1] ss:$0 sm:$0xff]  ;;  %26550 = vst [vmem:[#allocation6_spill] sm:$0xff] %v19146_v61 }
 0x148   : > { %26542 = vst [vmem:[#allocation22_spill] sm:$0xff] %v19079_v33  ;;  %v19081_v45 = vmax.f32 %v6271_v10, %v6272_v9  ;;  %v6423_v55 = vrot.slane %v19079_v33, 1  ;;  %v19106_v43 = vmul.f32 %v19102_v25, %v18938_v51  ;;  %v2275_v34 = vmul.f32 %v19113_v48, %v26544_v24 }
 0x149   : > { %v26548_v1 = vrot.slane %v26547_v18, 1  ;;  %v3720_v4 = vadd.f32 %v3624_v12, %v19007_v16  ;;  %v26100_v63 = vrot.slane %v19093_v57, 1  ;;  %v19134_v44 = vmul.f32 %v19130_v19, %v18352_v39 }
 0x14a   : > { %26543 = vst [vmem:[#allocation5_spill] sm:$0xff] %v19081_v45  ;;  %v6422_v47 = vrot.slane %v19081_v45, 1  ;;  %26546 = vst [vmem:[#allocation8_spill] sm:$0xff] %v19106_v43  ;;  %v2676_v17 = vrot.slane %v2475_v15, 1  ;;  %v946_v16 = vmul.f32 %v19139_v35, %v26527_v32  ;;  %v26095_v20 = vrot.slane %v19106_v43, 2  ;;  %v26555_v15 = vld [vmem:[#allocation29_spill] sm:$0xff] }
 0x14b   : > { %v1360_v53 = vsel %vm1313_vm0, %v26548_v1, %v26096_v37  ;;  %v3035_v62 = vmul.f32 %v19130_v19, %v26544_v24  ;;  %v19160_v14 = vmul.f32 %v18488_v22, %v19124_v59  ;;  %v2371_v13 = vadd.f32 %v2275_v34, %v26553_v30 }
 0x14c   : > { %v6424_v29 = vsel %vm1313_vm0, %v6422_v47, %v6423_v55  ;;  %v1603_v32 = vadd.f32 %v1360_v53, %v946_v16  ;;  %v19166_v10 = vmul.f32 %v19089_v2, %v19124_v59  ;;  %v26106_v9 = vrot.slane %v19134_v44, 2 }
 0x14d   : > { %16826 = vmatprep.mubr.msk.f32.mxu0 %vm6425_vm7, %v6424_v29  ;;  %26552 = vst [vmem:[#allocation24_spill] sm:$0xff] %v19160_v14  ;;  %v19175_v47 = vmul.f32 %v18488_v22, %v18352_v39  ;;  %v26556_v12 = vrot.slane %v26555_v15, 2  ;;  %v19184_v34 = vmul.f32 %v19130_v19, %v19124_v59  ;;  %v26099_v18 = vrot.slane %v19160_v14, 1 }
 0x14e   : > { %16827 = vmatmul.mubr.msk.f32.vlgmr.msra.gmra.mxu0 %vm6425_vm7, %v6423_v55  ;;  %26554 = vst [vmem:[#allocation26_spill] sm:$0xff] %v19166_v10  ;;  %v2678_v55 = vsel %vm1313_vm0, %v2676_v17, %v26100_v63  ;;  %v3236_v1 = vrot.slane %v3035_v62, 2  ;;  %v3811_v53 = vmul.f32 %v18488_v22, %v26544_v24  ;;  %v19191_v16 = vmul.f32 %v18518_v56, %v19124_v59  ;;  %v26561_v63 = vld [vmem:[#allocation23_spill] sm:$0xff] }
 0x14f   : > { %16830 = vmatpush3.msra.mxu0 %v19146_v61  ;;  %v1921_v29 = vsel %vm1874_vm1, %v26556_v12, %v26095_v20  ;;  %26557 = vst [vmem:[#allocation12_spill] sm:$0xff] %v19184_v34  ;;  %v2931_v30 = vadd.f32 %v2678_v55, %v2371_v13  ;;  %v3048_v15 = vmul.f32 %v19130_v19, %v26545_v7  ;;  %v26559_v20 = vrot.slane %v18599_v58, 1 }
 0x150   : > { %16831 = vmatprep.subr.mxu0 %v19153_v38  ;;  %v2164_v17 = vadd.f32 %v1921_v29, %v1603_v32  ;;  %26558 = vst [vmem:[#allocation28_spill] sm:$0xff] %v19191_v16  ;;  %v2288_v37 = vmul.f32 %v19113_v48, %v26545_v7  ;;  %v3047_v32 = vmul.f32 %v19130_v19, %v18604_v3  ;;  %v26110_v13 = vrot.slane %v19191_v16, 2 }
 0x151   : > { %16832 = vmatpush3.msra.mxu0 %v19153_v38  ;;  %v4034_v62 = vsel %vm1313_vm0, %v26559_v20, %v26099_v18  ;;  %v3611_v54 = vmul.f32 %v18540_v40, %v26544_v24  ;;  %v19212_v58 = vmul.f32 %v18488_v22, %v26506_v50  ;;  %v3238_v20 = vsel %vm1874_vm1, %v3236_v1, %v26106_v9 }
 0x152   : > { %16836 = vmatprep.subr.mxu0 %v19146_v61  ;;  %v4280_v29 = vadd.f32 %v4034_v62, %v3720_v4  ;;  %v26560_v4 = vrot.slane %v18626_v46, 2  ;;  %v2384_v18 = vadd.f32 %v2288_v37, %v2164_v17  ;;  %v3815_v55 = vmul.f32 %v18488_v22, %v26561_v63  ;;  %v26566_v17 = vld [vmem:[#allocation19_spill] sm:$0xff] }
 0x153   : > { %v3258_v12 = vrot.slane %v3048_v15, 2  ;;  %v26562_v36 = vrot.slane %v19166_v10, 1  ;;  %v26563_v33 = vrot.slane %v18590_v8, 1  ;;  %v4009_v1 = vrot.slane %v3811_v53, 1 }
 0x154   : > { %v4594_v62 = vsel %vm1874_vm1, %v26560_v4, %v26110_v13  ;;  %v3491_v9 = vadd.f32 %v3238_v20, %v2931_v30  ;;  %v3257_v16 = vrot.slane %v3047_v32, 2  ;;  %v19233_v46 = vmul.f32 %v18518_v56, %v18352_v39 }
 0x155   : > { %v2701_v45 = vsel %vm1313_vm0, %v26563_v33, %v26562_v36  ;;  %v19229_v14 = vadd.f32 %v4594_v62, %v4280_v29  ;;  %v26565_v37 = vrot.slane %v19184_v34, 2  ;;  %v3707_v15 = vadd.f32 %v3611_v54, %v26566_v17 }
 0x156   : > { %v2944_v38 = vadd.f32 %v2701_v45, %v2384_v18  ;;  %v4371_v8 = vmul.f32 %v18518_v56, %v26544_v24  ;;  %v3615_v36 = vmul.f32 %v18540_v40, %v26561_v63  ;;  %v26113_v45 = vrot.slane %v19212_v58, 1 }
 0x157   : > { %26564 = vst [vmem:[#allocation30_spill] sm:$0xff] %v19229_v14  ;;  %v3261_v22 = vsel %vm1874_vm1, %v3258_v12, %v26565_v37  ;;  %v19248_v18 = vmul.f32 %v18518_v56, %v26506_v50  ;;  %v4016_v53 = vrot.slane %v3815_v55, 1  ;;  %v4375_v30 = vmul.f32 %v18518_v56, %v26561_v63 }
 0x158   : > { %v19243_v33 = vadd.f32 %v3261_v22, %v2944_v38  ;;  %v26568_v54 = vrot.slane %v19175_v47, 1  ;;  %v3711_v24 = vadd.f32 %v3615_v36, %v3491_v9  ;;  %v3259_v29 = vsel %vm1874_vm1, %v3257_v16, %v3258_v12 }
 0x159   : > { %v19257_v40 = vadd.f32 %v3259_v29, %v18658_v28  ;;  %v932_v38 = vmul.f32 %v19139_v35, %v26523_v31  ;;  %v26114_v20 = vrot.slane %v19233_v46, 2  ;;  %v4569_v4 = vrot.slane %v4371_v8, 2 }
 0x15a   : > { %26567 = vst [vmem:[#allocation16_spill] sm:$0xff] %v19243_v33  ;;  %v4011_v32 = vsel %vm1313_vm0, %v4009_v1, %v26568_v54  ;;  %v26111_v62 = vrot.slane %v19248_v18, 2  ;;  %v4018_v56 = vsel %vm1313_vm0, %v4016_v53, %v26113_v45  ;;  %v4576_v63 = vrot.slane %v4375_v30, 2  ;;  %v26570_v1 = vld [vmem:[#allocation9_spill] sm:$0xff]  ;;  %v26587_v45 = vld [vmem:[#allocation14_spill] sm:$0xff] }
 0x15b   : > { %26569 = vst [vmem:[#allocation31_spill] sm:$0xff] %v19257_v40  ;;  %v4267_v55 = vadd.f32 %v4011_v32, %v3707_v15  ;;  %v4271_v9 = vadd.f32 %v4018_v56, %v3711_v24  ;;  %v26571_v16 = vrot.slane %v26570_v1, 1  ;;  %v4571_v28 = vsel %vm1874_vm1, %v4569_v4, %v26114_v20  ;;  %v26572_v15 = vld [vmem:[#allocation10_spill] sm:$0xff] }
 0x15c   : > { %v1136_v31 = vmul.f32 %v19051_v42, %v18291_v26  ;;  %v4578_v22 = vsel %vm1874_vm1, %v4576_v63, %v26111_v62  ;;  %v26573_v8 = vrot.slane %v26572_v15, 2  ;;  %v2274_v30 = vmul.f32 %v19113_v48, %v18291_v26  ;;  %v26578_v15 = vld [vmem:[#allocation13_spill] sm:$0xff] }
 0x15d   : > { %v1589_v12 = vadd.f32 %v26571_v16, %v932_v38  ;;  %v4827_v37 = vadd.f32 %v4571_v28, %v4267_v55  ;;  %v4831_v17 = vadd.f32 %v4578_v22, %v4271_v9  ;;  %v936_v24 = vmul.f32 %v19139_v35, %v18291_v26  ;;  %v26575_v16 = vld [vmem:[#allocation11_spill] sm:$0xff]  ;;  %v533_v22 = vpop.permute.xlu1 %532 }
 0x15e   : > { %v1340_v53 = vrot.slane %v1136_v31, 1  ;;  %v1697_v29 = vmul.f32 %v19102_v25, %v18291_v26  ;;  %v19288_v63 = vmul.f32 %v19051_v42, %v26545_v7  ;;  %v1149_v9 = vmul.f32 %v19051_v42, %v18604_v3  ;;  %v26577_v31 = vld [vmem:[#allocation32_spill] sm:$0xff] }
 0x15f   : > { %v2150_v36 = vadd.f32 %v26573_v8, %v1589_v12  ;;  %v4930_v54 = vadd.f32 %v18904_v49, %v4827_v37  ;;  %v4934_v32 = vadd.f32 %v18904_v49, %v4831_v17  ;;  %v26576_v12 = vrot.slane %v26575_v16, 1 }
 0x160   : > { %v1593_v4 = vadd.f32 %v1340_v53, %v936_v24  ;;  %26574 = vst [vmem:[#allocation27_spill] sm:$0xff] %v19288_v63  ;;  %v1901_v1 = vrot.slane %v1697_v29, 2  ;;  %v4938_v37 = vadd.f32 %v18904_v49, %v26577_v31  ;;  %v935_v17 = vmul.f32 %v19139_v35, %v26533_v21 }
 0x161   : > { %v2370_v38 = vadd.f32 %v2274_v30, %v2150_v36  ;;  %v5026_v55 = vmax.f32 %v4930_v54, 0.0  ;;  %v5030_v56 = vmax.f32 %v4934_v32, 0.0  ;;  %v26579_v8 = vrot.slane %v26578_v15, 1  ;;  %v26582_v15 = vld [vmem:[#allocation15_spill] sm:$0xff] }
 0x162   : > { %v2154_v26 = vadd.f32 %v1901_v1, %v1593_v4  ;;  %v2276_v54 = vmul.f32 %v19113_v48, %v18352_v39  ;;  %v26112_v24 = vrot.slane %v19288_v63, 1  ;;  %v1363_v29 = vrot.slane %v1149_v9, 1  ;;  %v19309_v4 = vld [vmem:[%s26017_s1 + $0x6] ss:$0 sm:$0xff]  ;;  %v19377_v63 = vld [vmem:[%s26017_s1 + $0x8] ss:$0 sm:$0xff] }
 0x163   : > { %v2930_v28 = vadd.f32 %v26576_v12, %v2370_v38  ;;  %v1341_v36 = vsel %vm1313_vm0, %v26579_v8, %v1340_v53  ;;  %v5140_v30 = vrot.slane %v5026_v55, 1  ;;  %v5141_v32 = vrot.slane %v5030_v56, 1 }
 0x164   : > { %v26580_v38 = vrot.slane %v18648_v41, 2  ;;  %v3612_v21 = vmul.f32 %v19309_v4, %v18352_v39  ;;  %v19315_v53 = vmul.f32 %v19102_v25, %v26545_v7  ;;  %v1140_v12 = vmul.f32 %v19051_v42, %v533_v22 }
 0x165   : > { %v1592_v31 = vadd.f32 %v1341_v36, %v935_v17  ;;  %v2372_v9 = vadd.f32 %v2276_v54, %v26582_v15  ;;  %v5034_v8 = vmax.f32 %v4938_v37, 0.0  ;;  %v19321_v41 = vmul.f32 %v19102_v25, %v18604_v3 }
 0x166   : > { %v3490_v16 = vadd.f32 %v26580_v38, %v2930_v28  ;;  %26581 = vst [vmem:[#allocation18_spill] sm:$0xff] %v19315_v53  ;;  %v26584_v28 = vld [vmem:[#allocation17_spill] sm:$0xff]  ;;  %v19326_v13 = vmax.f32 %v5026_v55, %v5140_v30  ;;  %v19330_v39 = vmul.f32 %v19309_v4, %v26506_v50  ;;  %v19334_v62 = vmul.f32 %v19139_v35, %v26545_v7 }
 0x167   : > { %26583 = vst [vmem:[#allocation29_spill] sm:$0xff] %v19321_v41  ;;  %v19324_v38 = vadd.f32 %v3612_v21, %v26584_v28  ;;  %v19336_v17 = vmax.f32 %v5030_v56, %v5141_v32  ;;  %v1365_v37 = vsel %vm1313_vm0, %v1363_v29, %v26112_v24  ;;  %v2478_v36 = vmul.f32 %v19089_v2, %v533_v22  ;;  %v19353_v29 = vld [vmem:[%s26017_s1 + $0x7] ss:$0 sm:$0xff] }
 0x168   : > { %26585 = vst [vmem:[#allocation23_spill] sm:$0xff] %v19334_v62  ;;  %v2477_v55 = vmul.f32 %v19089_v2, %v18701_v5  ;;  %v949_v50 = vmul.f32 %v19139_v35, %v18604_v3  ;;  %v1347_v54 = vrot.slane %v1140_v12, 1  ;;  %v2278_v7 = vmul.f32 %v19113_v48, %v533_v22  ;;  %v26593_v41 = vld [vmem:[#allocation33_spill] sm:$0xff] }
 0x169   : > { %v5142_v21 = vrot.slane %v5034_v8, 1  ;;  %v3614_v32 = vmul.f32 %v19309_v4, %v533_v22  ;;  %v3814_v15 = vmul.f32 %v19353_v29, %v533_v22  ;;  %v940_v24 = vmul.f32 %v19139_v35, %v533_v22 }
 0x16a   : > { %v19356_v28 = vadd.f32 %v1365_v37, %v949_v50  ;;  %v1701_v3 = vmul.f32 %v19102_v25, %v533_v22  ;;  %v2277_v12 = vmul.f32 %v19113_v48, %v18701_v5  ;;  %v2681_v30 = vrot.slane %v2478_v36, 1 }
 0x16b   : > { %v19363_v56 = vmul.f32 %v19130_v19, %v533_v22  ;;  %v26588_v20 = vrot.slane %v26587_v45, 2  ;;  %v2679_v33 = vrot.slane %v2477_v55, 1  ;;  %v1597_v14 = vadd.f32 %v1347_v54, %v940_v24  ;;  %v26590_v24 = vld [vmem:[#allocation34_spill] sm:$0xff] }
 0x16c   : > { %26586 = vst [vmem:[#allocation19_spill] sm:$0xff] %v19356_v28  ;;  %v2374_v62 = vadd.f32 %v2278_v7, %v2154_v26  ;;  %v3037_v50 = vmul.f32 %v19130_v19, %v18701_v5  ;;  %v19372_v10 = vadd.f32 %v18904_v49, %v18690_v52  ;;  %v3710_v40 = vadd.f32 %v3614_v32, %v3490_v16 }
 0x16d   : > { %v1902_v34 = vsel %vm1874_vm1, %v26588_v20, %v1901_v1  ;;  %v4014_v36 = vrot.slane %v3814_v15, 1  ;;  %v19380_v45 = vmul.f32 %v19377_v63, %v533_v22  ;;  %v19382_v20 = vmax.f32 %v5034_v8, %v5142_v21  ;;  %v553_v22 = vpop.permute.xlu1 %552 }
 0x16e   : > { %v2153_v37 = vadd.f32 %v1902_v34, %v1592_v31  ;;  %v1908_v34 = vrot.slane %v1701_v3, 2  ;;  %v3813_v26 = vmul.f32 %v19353_v29, %v18701_v5  ;;  %v3241_v52 = vrot.slane %v19363_v56, 2 }
 0x16f   : > { %26589 = vst [vmem:[#allocation9_spill] sm:$0xff] %v19382_v20  ;;  %v26591_v16 = vrot.slane %v26590_v24, 1  ;;  %v2682_v55 = vsel %vm1313_vm0, %v2679_v33, %v2681_v30  ;;  %v3613_v7 = vmul.f32 %v19309_v4, %v18701_v5  ;;  %v939_v8 = vmul.f32 %v19139_v35, %v18701_v5 }
 0x170   : > { %v2373_v1 = vadd.f32 %v2277_v12, %v2153_v37  ;;  %v2158_v32 = vadd.f32 %v1908_v34, %v1597_v14  ;;  %v26592_v21 = vrot.slane %v19093_v57, 1  ;;  %v3239_v3 = vrot.slane %v3037_v50, 2 }
 0x171   : > { %v1348_v31 = vsel %vm1313_vm0, %v26591_v16, %v1347_v54  ;;  %v2934_v12 = vadd.f32 %v2681_v30, %v2374_v62  ;;  %v19399_v37 = vadd.f32 %v4014_v36, %v3710_v40  ;;  %v4574_v54 = vrot.slane %v19380_v45, 2  ;;  %v573_v43 = vpop.permute.xlu1 %572 }
 0x172   : > { %v2680_v15 = vsel %vm1313_vm0, %v26592_v21, %v2679_v33  ;;  %v1596_v24 = vadd.f32 %v1348_v31, %v939_v8  ;;  %v2933_v16 = vadd.f32 %v2682_v55, %v2373_v1  ;;  %v4012_v20 = vrot.slane %v3813_v26, 1  ;;  %v26597_v55 = vld [vmem:[#allocation20_spill] sm:$0xff] }
 0x173   : > { %v2282_v14 = vmul.f32 %v19113_v48, %v553_v22  ;;  %v2932_v28 = vadd.f32 %v2680_v15, %v2372_v9  ;;  %v3709_v53 = vadd.f32 %v3613_v7, %v26593_v41  ;;  %v4373_v57 = vmul.f32 %v19377_v63, %v18701_v5  ;;  %v26595_v9 = vld [vmem:[#allocation35_spill] sm:$0xff] }
 0x174   : > { %v2482_v33 = vmul.f32 %v19089_v2, %v553_v22  ;;  %v26594_v50 = vrot.slane %v19134_v44, 2  ;;  %v944_v62 = vmul.f32 %v19139_v35, %v553_v22  ;;  %v19412_v30 = vmul.f32 %v19051_v42, %v553_v22 }
 0x175   : > { %v2378_v1 = vadd.f32 %v2282_v14, %v2158_v32  ;;  %v3818_v26 = vmul.f32 %v19353_v29, %v553_v22  ;;  %v26596_v31 = vrot.slane %v26595_v9, 2  ;;  %v3242_v5 = vsel %vm1874_vm1, %v3239_v3, %v3241_v52 }
 0x176   : > { %v3240_v40 = vsel %vm1874_vm1, %v26594_v50, %v3239_v3  ;;  %v3817_v7 = vmul.f32 %v19353_v29, %v26597_v55  ;;  %v26598_v44 = vrot.slane %v19175_v47, 1  ;;  %v4015_v21 = vsel %vm1313_vm0, %v4012_v20, %v4014_v36 }
 0x177   : > { %v1909_v41 = vsel %vm1874_vm1, %v26596_v31, %v1908_v34  ;;  %v3493_v50 = vadd.f32 %v3242_v5, %v2933_v16  ;;  %v4572_v32 = vrot.slane %v4373_v57, 2  ;;  %v19426_v14 = vmul.f32 %v19102_v25, %v553_v22 }
 0x178   : > { %v4013_v8 = vsel %vm1313_vm0, %v26598_v44, %v4012_v20  ;;  %v2157_v15 = vadd.f32 %v1909_v41, %v1596_v24  ;;  %v2688_v9 = vrot.slane %v2482_v33, 1  ;;  %v3042_v34 = vmul.f32 %v19130_v19, %v553_v22 }
 0x179   : > { %v1354_v3 = vrot.slane %v19412_v30, 1  ;;  %v19431_v31 = vmul.f32 %v19377_v63, %v553_v22  ;;  %v2281_v47 = vmul.f32 %v19113_v48, %v26597_v55  ;;  %v3617_v36 = vmul.f32 %v19309_v4, %v26597_v55 }
 0x17a   : > { %v2938_v20 = vadd.f32 %v2688_v9, %v2378_v1  ;;  %v4021_v24 = vrot.slane %v3818_v26, 1  ;;  %v4019_v16 = vrot.slane %v3817_v7, 1  ;;  %v4377_v57 = vmul.f32 %v19377_v63, %v26597_v55 }
 0x17b   : > { %v3492_v33 = vadd.f32 %v3240_v40, %v2932_v28  ;;  %v4269_v41 = vadd.f32 %v4015_v21, %v3709_v53  ;;  %v2377_v5 = vadd.f32 %v2281_v47, %v2157_v15  ;;  %v3713_v44 = vadd.f32 %v3617_v36, %v3493_v50  ;;  %v26599_v53 = vld [vmem:[#allocation37_spill] sm:$0xff] }
 0x17c   : > { %v3494_v30 = vadd.f32 %v3241_v52, %v2934_v12  ;;  %v4268_v56 = vadd.f32 %v4013_v8, %v19324_v38  ;;  %v4575_v61 = vsel %vm1874_vm1, %v4572_v32, %v4574_v54  ;;  %v3248_v59 = vrot.slane %v3042_v34, 2 }
 0x17d   : > { %v1601_v23 = vadd.f32 %v1354_v3, %v944_v62  ;;  %v1915_v1 = vrot.slane %v19426_v14, 2  ;;  %v3618_v26 = vmul.f32 %v19309_v4, %v553_v22  ;;  %v4581_v7 = vrot.slane %v19431_v31, 2 }
 0x17e   : > { %v3498_v28 = vadd.f32 %v3248_v59, %v2938_v20  ;;  %v26600_v40 = vrot.slane %v26599_v53, 1  ;;  %v4022_v38 = vsel %vm1313_vm0, %v4019_v16, %v4021_v24  ;;  %v4579_v12 = vrot.slane %v4377_v57, 2 }
 0x17f   : > { %v4829_v8 = vadd.f32 %v4575_v61, %v4269_v41  ;;  %v3712_v21 = vadd.f32 %v19330_v39, %v3492_v33  ;;  %v4273_v62 = vadd.f32 %v4022_v38, %v3713_v44  ;;  %v26601_v50 = vmax.f32 %v19372_v10, 0.0 }
 0x180   : > { %v2689_v52 = vsel %vm1313_vm0, %v26600_v40, %v2688_v9  ;;  %v26602_v22 = vrot.slane %v19233_v46, 2  ;;  %v3622_v47 = vmul.f32 %v19309_v4, %v573_v43  ;;  %v3822_v36 = vmul.f32 %v19353_v29, %v573_v43 }
 0x181   : > { %v2937_v15 = vadd.f32 %v2689_v52, %v2377_v5  ;;  %v5143_v34 = vrot.slane %v26601_v50, 1  ;;  %v2162_v20 = vadd.f32 %v1915_v1, %v1601_v23  ;;  %v3714_v61 = vadd.f32 %v3618_v26, %v3494_v30 }
 0x182   : > { %v4573_v31 = vsel %vm1874_vm1, %v26602_v22, %v4572_v32  ;;  %v26603_v39 = vrot.slane %v19212_v58, 1  ;;  %v4582_v33 = vsel %vm1874_vm1, %v4579_v12, %v4581_v7  ;;  %v19465_v41 = vmul.f32 %v19051_v42, %v573_v43  ;;  %v26604_v32 = vld [vmem:[#allocation39_spill] sm:$0xff] }
 0x183   : > { %v4828_v9 = vadd.f32 %v4573_v31, %v4268_v56  ;;  %v3718_v46 = vadd.f32 %v3622_v47, %v3498_v28  ;;  %v26605_v5 = vrot.slane %v26604_v32, 2  ;;  %v19471_v56 = vadd.f32 %v18904_v49, %v4829_v8  ;;  %v26606_v28 = vld [vmem:[#allocation36_spill] sm:$0xff] }
 0x184   : > { %v4020_v57 = vsel %vm1313_vm0, %v26603_v39, %v4019_v16  ;;  %v4833_v23 = vadd.f32 %v4582_v33, %v4273_v62  ;;  %v2286_v58 = vmul.f32 %v19113_v48, %v573_v43  ;;  %v19475_v16 = vmul.f32 %v19089_v2, %v573_v43 }
 0x185   : > { %v3249_v44 = vsel %vm1874_vm1, %v26605_v5, %v3248_v59  ;;  %v4272_v53 = vadd.f32 %v4020_v57, %v3712_v21  ;;  %v4028_v26 = vrot.slane %v3822_v36, 1  ;;  %v4382_v40 = vmul.f32 %v19377_v63, %v573_v43 }
 0x186   : > { %v3497_v30 = vadd.f32 %v3249_v44, %v2937_v15  ;;  %v4274_v52 = vadd.f32 %v4021_v24, %v3714_v61  ;;  %v26607_v38 = vrot.slane %v26606_v28, 1  ;;  %v19482_v59 = vmul.f32 %v19102_v25, %v573_v43 }
 0x187   : > { %v3621_v8 = vmul.f32 %v19309_v4, %v18938_v51  ;;  %v26608_v21 = vrot.slane %v19248_v18, 2  ;;  %v1361_v62 = vrot.slane %v19465_v41, 1  ;;  %v2382_v22 = vadd.f32 %v2286_v58, %v2162_v20  ;;  %v26611_v58 = vld [vmem:[#allocation38_spill] sm:$0xff] }
 0x188   : > { %v1355_v50 = vsel %vm1313_vm0, %v26607_v38, %v1354_v3  ;;  %v4278_v31 = vadd.f32 %v4028_v26, %v3718_v46  ;;  %v943_v24 = vmul.f32 %v19139_v35, %v26597_v55  ;;  %v948_v3 = vmul.f32 %v19139_v35, %v573_v43 }
 0x189   : > { %v4580_v15 = vsel %vm1874_vm1, %v26608_v21, %v4579_v12  ;;  %v3717_v36 = vadd.f32 %v3621_v8, %v3497_v30  ;;  %v4936_v61 = vadd.f32 %v18904_v49, %v4833_v23  ;;  %v2695_v39 = vrot.slane %v19475_v16, 1 }
 0x18a   : > { %v4832_v47 = vadd.f32 %v4580_v15, %v4272_v53  ;;  %v19496_v57 = vmul.f32 %v19130_v19, %v573_v43  ;;  %v4588_v18 = vrot.slane %v4382_v40, 2  ;;  %v26609_v12 = vmax.f32 %v19372_v10, 0.0  ;;  %v19538_v15 = vpop.permute.xlu1 %592 }
 0x18b   : > { %v5028_v20 = vmax.f32 %v19471_v56, 0.0  ;;  %v1600_v41 = vadd.f32 %v1355_v50, %v943_v24  ;;  %v1922_v55 = vrot.slane %v19482_v59, 2  ;;  %v1605_v46 = vadd.f32 %v1361_v62, %v948_v3 }
 0x18c   : > { %v19500_v33 = vmax.f32 %v26609_v12, %v5143_v34  ;;  %v2942_v32 = vadd.f32 %v2695_v39, %v2382_v22  ;;  %v4838_v5 = vadd.f32 %v4588_v18, %v4278_v31  ;;  %v26610_v44 = vrot.slane %v18963_v11, 1 }
 0x18d   : > { %v4830_v10 = vadd.f32 %v4574_v54, %v19399_v37  ;;  %v4834_v34 = vadd.f32 %v4581_v7, %v4274_v52  ;;  %v4931_v56 = vadd.f32 %v18904_v49, %v4828_v9  ;;  %v5032_v23 = vmax.f32 %v4936_v61, 0.0 }
 0x18e   : > { %v4029_v43 = vsel %vm1313_vm0, %v26610_v44, %v4028_v26  ;;  %v3255_v30 = vrot.slane %v19496_v57, 2  ;;  %v26612_v40 = vrot.slane %v26611_v58, 2  ;;  %v4935_v11 = vadd.f32 %v18904_v49, %v4832_v47 }
 0x18f   : > { %v4277_v53 = vadd.f32 %v4029_v43, %v3717_v36  ;;  %v4933_v38 = vadd.f32 %v18904_v49, %v4830_v10  ;;  %v4937_v45 = vadd.f32 %v18904_v49, %v4834_v34  ;;  %v5027_v37 = vmax.f32 %v4931_v56, 0.0 }
 0x190   : > { %v1916_v28 = vsel %vm1874_vm1, %v26612_v40, %v1915_v1  ;;  %v19524_v54 = vadd.f32 %v1922_v55, %v1605_v46  ;;  %v19528_v7 = vadd.f32 %v3255_v30, %v2942_v32  ;;  %v19531_v14 = vadd.f32 %v18904_v49, %v4838_v5 }
 0x191   : > { %v2161_v26 = vadd.f32 %v1916_v28, %v1600_v41  ;;  %v26613_v1 = vrot.slane %v19003_v27, 2  ;;  %v2285_v52 = vmul.f32 %v19113_v48, %v18938_v51  ;;  %v5029_v8 = vmax.f32 %v4933_v38, 0.0 }
 0x192   : > { %v5031_v21 = vmax.f32 %v4935_v11, 0.0  ;;  %v5033_v22 = vmax.f32 %v4937_v45, 0.0  ;;  %v5236_v31 = vrot.slane %v5027_v37, 1  ;;  %v5332_v24 = vrot.slane %v5028_v20, 1 }
 0x193   : > { %v4589_v9 = vsel %vm1874_vm1, %v26613_v1, %v4588_v18  ;;  %v5333_v47 = vrot.slane %v5032_v23, 1  ;;  %v19542_v3 = vmul.f32 %v19139_v35, %v18938_v51  ;;  %v19544_v36 = vadd.f32 %v2285_v52, %v2161_v26 }
 0x194   : > { %v4837_v50 = vadd.f32 %v4589_v9, %v4277_v53  ;;  %v5237_v27 = vrot.slane %v5031_v21, 1  ;;  %v5428_v61 = vrot.slane %v5029_v8, 1  ;;  %v26130_v18 = vmax.f32 %v19531_v14, 0.0 }
 0x195   : > { %v26614_v12 = vrot.slane %v19055_v0, 1  ;;  %v5284_v46 = vmax.f32 %v5027_v37, %v5236_v31  ;;  %v5429_v32 = vrot.slane %v5033_v22, 1  ;;  %v19552_v5 = vadd.f32 %v18904_v49, %v19027_v6 }
 0x196   : > { %v19555_v44 = vadd.f32 %v18904_v49, %v4837_v50  ;;  %v19559_v51 = vmul.f32 %v19051_v42, %v19538_v15  ;;  %v5285_v43 = vmax.f32 %v5031_v21, %v5237_v27  ;;  %v5380_v53 = vmax.f32 %v5028_v20, %v5332_v24 }
 0x197   : > { %v1362_v41 = vsel %vm1313_vm0, %v26614_v12, %v1361_v62  ;;  %v5381_v10 = vmax.f32 %v5032_v23, %v5333_v47  ;;  %v5524_v0 = vrot.slane %v19326_v13, 1  ;;  %v5525_v62 = vrot.slane %v19336_v17, 1 }
 0x198   : > { %v5476_v34 = vmax.f32 %v5029_v8, %v5428_v61  ;;  %v5477_v56 = vmax.f32 %v5033_v22, %v5429_v32  ;;  %v5572_v58 = vrot.slane %v19326_v13, 2  ;;  %v5573_v6 = vrot.slane %v19336_v17, 2 }
 0x199   : > { %v5620_v49 = vrot.slane %v19326_v13, 3  ;;  %v5621_v40 = vrot.slane %v19336_v17, 3  ;;  %v5692_v28 = vrot.slane %v5284_v46, 4  ;;  %v5693_v11 = vrot.slane %v5285_v43, 4 }
 0x19a   : > { %v5740_v26 = vrot.slane %v5284_v46, 5  ;;  %v5741_v38 = vrot.slane %v5285_v43, 5  ;;  %v5788_v20 = vrot.slane %v5284_v46, 6  ;;  %v5789_v23 = vrot.slane %v5285_v43, 6 }
 0x19b   : > { %v5908_v45 = vrot.slane %v5380_v53, 1  ;;  %v5909_v37 = vrot.slane %v5381_v10, 1  ;;  %v5956_v1 = vrot.slane %v5380_v53, 2  ;;  %v5957_v9 = vrot.slane %v5381_v10, 2 }
 0x19c   : > { %v5836_v52 = vrot.slane %v5284_v46, 7  ;;  %v6004_v50 = vrot.slane %v5380_v53, 3  ;;  %v6005_v8 = vrot.slane %v5381_v10, 3  ;;  %v6076_v21 = vrot.slane %v5476_v34, 4 }
 0x19d   : > { %v6077_v22 = vrot.slane %v5477_v56, 4  ;;  %v6125_v31 = vsel %vm6122_vm2, %v19326_v13, %v5524_v0  ;;  %v6126_v24 = vsel %vm6122_vm2, %v19336_v17, %v5525_v62  ;;  %v6297_v47 = vsel %vm6122_vm2, %v5380_v53, %v5908_v45 }
 0x19e   : > { %v6150_v27 = vsel %vm6147_vm3, %v6125_v31, %v5572_v58  ;;  %v6151_v61 = vsel %vm6147_vm3, %v6126_v24, %v5573_v6  ;;  %v6298_v12 = vsel %vm6122_vm2, %v5381_v10, %v5909_v37  ;;  %v6321_v46 = vsel %vm6147_vm3, %v6297_v47, %v5956_v1 }
 0x19f   : > { %v6175_v32 = vsel %vm6172_vm4, %v6150_v27, %v5620_v49  ;;  %v6176_v34 = vsel %vm6172_vm4, %v6151_v61, %v5621_v40  ;;  %v6322_v56 = vsel %vm6147_vm3, %v6298_v12, %v5957_v9  ;;  %v6345_v13 = vsel %vm6172_vm4, %v6321_v46, %v6004_v50 }
 0x1a0   : > { %v5837_v0 = vrot.slane %v5285_v43, 7  ;;  %v6200_v17 = vsel %vm6197_vm5, %v6175_v32, %v5692_v28  ;;  %v6201_v53 = vsel %vm6197_vm5, %v6176_v34, %v5693_v11  ;;  %v6346_v62 = vsel %vm6172_vm4, %v6322_v56, %v6005_v8  ;;  %v19657_v34 = vpop.permute.xlu0 %597 }
 0x1a1   : > { %v6225_v58 = vsel %vm6222_vm6, %v6200_v17, %v5740_v26  ;;  %v6226_v10 = vsel %vm6222_vm6, %v6201_v53, %v5741_v38  ;;  %v6369_v6 = vsel %vm6197_vm5, %v6345_v13, %v6076_v21  ;;  %v6370_v49 = vsel %vm6197_vm5, %v6346_v62, %v6077_v22  ;;  %v26620_v17 = vld [vmem:[#allocation8_spill] sm:$0xff] }
 0x1a2   : > { %v5036_v40 = vmax.f32 %v19555_v44, 0.0  ;;  %v6249_v45 = vsel %vm1874_vm1, %v6225_v58, %v5788_v20  ;;  %v6250_v43 = vsel %vm1874_vm1, %v6226_v10, %v5789_v23  ;;  %v19590_v37 = vmax.f32 %v6369_v6, %v6370_v49  ;;  %v26622_v58 = vld [vmem:[#allocation21_spill] sm:$0xff] }
 0x1a3   : > { %v2290_v28 = vmul.f32 %v19113_v48, %v19538_v15  ;;  %v19596_v11 = vmul.f32 %v19089_v2, %v19538_v15  ;;  %v6273_v26 = vsel %vm1313_vm0, %v6249_v45, %v5836_v52  ;;  %v6274_v38 = vsel %vm1313_vm0, %v6250_v43, %v5837_v0  ;;  %v26624_v49 = vld [vmem:[#allocation25_spill] sm:$0xff]  ;;  %v26625_v45 = vld [vmem:[#allocation6_spill] sm:$0xff] }
 0x1a4   : > { %26615 = vst [vmem:[#allocation10_spill] sm:$0xff] %v19590_v37  ;;  %v1604_v1 = vadd.f32 %v1362_v41, %v19542_v3  ;;  %v26132_v44 = vmax.f32 %v19552_v5, 0.0  ;;  %v19602_v20 = vmax.f32 %v6273_v26, %v6274_v38  ;;  %v19605_v23 = vrot.slane %v19590_v37, 1  ;;  %v26627_v26 = vld [vmem:[#allocation7_spill] sm:$0xff] }
 0x1a5   : > { %v1368_v9 = vrot.slane %v19559_v51, 1  ;;  %v2386_v50 = vadd.f32 %v2290_v28, %v19524_v54  ;;  %v3626_v8 = vmul.f32 %v19309_v4, %v19538_v15  ;;  %v19613_v52 = vmul.f32 %v19353_v29, %v19538_v15  ;;  %v26638_v51 = vld [vmem:[#allocation27_spill] sm:$0xff] }
 0x1a6   : > { %26616 = vst [vmem:[#allocation11_spill] sm:$0xff] %v19602_v20  ;;  %26617 = vst [vmem:[#allocation32_spill] sm:$0xff] %v19605_v23  ;;  %v5334_v21 = vrot.slane %v5036_v40, 1  ;;  %v19617_v3 = vmul.f32 %v19102_v25, %v19538_v15  ;;  %v19621_v41 = vmul.f32 %v19130_v19, %v19538_v15  ;;  %v6507_v22 = vrot.slane %v19602_v20, 1  ;;  %v19958_v20 = vld [vmem:[%s26017_s1 + $0x5] ss:$0 sm:$0xff] }
 0x1a7   : > { %v26618_v54 = vrot.slane %v18953_v60, 1  ;;  %v952_v24 = vmul.f32 %v19139_v35, %v19538_v15  ;;  %v2702_v47 = vrot.slane %v19596_v11, 1  ;;  %v3722_v27 = vadd.f32 %v3626_v8, %v19528_v7 }
 0x1a8   : > { %v19635_v61 = vrot.slane %v26130_v18, 1  ;;  %v19640_v16 = vrot.slane %v26132_v44, 1  ;;  %v19644_v60 = vsel %vm1313_vm0, %v6507_v22, %v19605_v23  ;;  %v4035_v46 = vrot.slane %v19613_v52, 1 }
 0x1a9   : > { %v2696_v31 = vsel %vm1313_vm0, %v26618_v54, %v2695_v39  ;;  %26619 = vst [vmem:[#allocation13_spill] sm:$0xff] %v19644_v60  ;;  %v1609_v39 = vadd.f32 %v1368_v9, %v952_v24  ;;  %v2946_v7 = vadd.f32 %v2702_v47, %v2386_v50  ;;  %v19653_v32 = vmul.f32 %v19377_v63, %v19538_v15 }
 0x1aa   : > { %v2941_v12 = vadd.f32 %v2696_v31, %v19544_v36  ;;  %v19655_v36 = vpop.permute.xlu1 %602  ;;  %16833 = vmatprep.mubr.msk.f32.mxu0 %vm6425_vm7, %v19644_v60  ;;  %v19661_v56 = vmax.f32 %v5036_v40, %v5334_v21  ;;  %v26128_v13 = vrot.slane %v19617_v3, 2  ;;  %v26129_v0 = vrot.slane %v19621_v41, 2 }
 0x1ab   : > { %v26621_v53 = vrot.slane %v26620_v17, 2  ;;  %16834 = vmatmul.mubr.msk.f32.vlgmr.msra.gmra.mxu0 %vm6425_vm7, %v19605_v23  ;;  %v4282_v62 = vadd.f32 %v4035_v46, %v3722_v27  ;;  %v26623_v10 = vrot.slane %v26622_v58, 2  ;;  %v1151_v40 = vmul.f32 %v19051_v42, %v26624_v49  ;;  %v26630_v17 = vld [vmem:[#allocation29_spill] sm:$0xff] }
 0x1ac   : > { %v19681_v59 = vmul.f32 %v19102_v25, %v26624_v49  ;;  %16837 = vmatpush3.msra.mxu0 %v26625_v45  ;;  %v19686_v28 = vmul.f32 %v19089_v2, %v19655_v36  ;;  %v2491_v57 = vmul.f32 %v19089_v2, %v19657_v34  ;;  %v19697_v38 = vadd.f32 %v26129_v0, %v2946_v7  ;;  %v26628_v7 = vld [vmem:[#allocation18_spill] sm:$0xff] }
 0x1ad   : > { %v1923_v15 = vsel %vm1874_vm1, %v26621_v53, %v1922_v55  ;;  %v3256_v6 = vsel %vm1874_vm1, %v26623_v10, %v3255_v30  ;;  %16838 = vmatprep.subr.mxu0 %v26627_v26  ;;  %v19693_v30 = vadd.f32 %v26128_v13, %v1609_v39  ;;  %v951_v50 = vmul.f32 %v19139_v35, %v26624_v49 }
 0x1ae   : > { %v2165_v55 = vadd.f32 %v1923_v15, %v1604_v1  ;;  %v3501_v43 = vadd.f32 %v3256_v6, %v2941_v12  ;;  %26626 = vst [vmem:[#allocation15_spill] sm:$0xff] %v19686_v28  ;;  %v4595_v1 = vrot.slane %v19653_v32, 2  ;;  %16839 = vmatpush3.msra.mxu0 %v26627_v26  ;;  %v2289_v8 = vmul.f32 %v19113_v48, %v26624_v49  ;;  %v26634_v6 = vld [vmem:[#allocation19_spill] sm:$0xff] }
 0x1af   : > { %v3625_v52 = vmul.f32 %v19309_v4, %v26624_v49  ;;  %v19709_v21 = vmul.f32 %v19353_v29, %v19655_v36  ;;  %v3827_v22 = vmul.f32 %v19353_v29, %v19657_v34  ;;  %16850 = vmatprep.subr.mxu0 %v26625_v45  ;;  %v1366_v31 = vrot.slane %v1151_v40, 1 }
 0x1b0   : > { %v4842_v54 = vadd.f32 %v4595_v1, %v4282_v62  ;;  %v26136_v24 = vrot.slane %v19681_v59, 2  ;;  %v2291_v27 = vmul.f32 %v19113_v48, %v19657_v34  ;;  %v26131_v39 = vrot.slane %v19686_v28, 1 }
 0x1b1   : > { %v3721_v12 = vadd.f32 %v3625_v52, %v3501_v43  ;;  %v26629_v32 = vrot.slane %v26628_v7, 2  ;;  %v26631_v53 = vrot.slane %v26630_v17, 2  ;;  %v2704_v58 = vrot.slane %v2491_v57, 1  ;;  %v19742_v52 = vld [vmem:[%s26018_s2] ss:$0 sm:$0xff] }
 0x1b2   : > { %v19725_v10 = vmul.f32 %v19051_v42, %v19655_v36  ;;  %v19729_v62 = vmul.f32 %v19130_v19, %v19655_v36  ;;  %v3627_v40 = vmul.f32 %v19309_v4, %v19657_v34  ;;  %v26137_v45 = vrot.slane %v19709_v21, 1 }
 0x1b3   : > { %v1926_v15 = vsel %vm1874_vm1, %v26631_v53, %v26629_v32  ;;  %v1153_v43 = vmul.f32 %v19051_v42, %v19657_v34  ;;  %v3051_v57 = vmul.f32 %v19130_v19, %v19657_v34  ;;  %v4037_v26 = vrot.slane %v3827_v22, 1 }
 0x1b4   : > { %26632 = vst [vmem:[#allocation17_spill] sm:$0xff] %v19725_v10  ;;  %26633 = vst [vmem:[#allocation14_spill] sm:$0xff] %v19729_v62  ;;  %v2167_v49 = vadd.f32 %v1926_v15, %v26634_v6  ;;  %v19745_v32 = vadd.f32 %v19742_v52, %v4842_v54  ;;  %v1369_v17 = vsel %vm1313_vm0, %v1366_v31, %v1368_v9  ;;  %v26635_v6 = vld [vmem:[#allocation24_spill] sm:$0xff]  ;;  %v26639_v18 = vrot.slane %v26638_v51, 1  ;;  %v26641_v51 = vld [vmem:[#allocation26_spill] sm:$0xff] }
 0x1b5   : > { %v2385_v53 = vadd.f32 %v2289_v8, %v2165_v55  ;;  %v26636_v42 = vrot.slane %v26635_v6, 1  ;;  %v19755_v22 = vmul.f32 %v19377_v63, %v19655_v36  ;;  %v2706_v0 = vsel %vm1313_vm0, %v2704_v58, %v26131_v39 }
 0x1b6   : > { %v2387_v15 = vadd.f32 %v2291_v27, %v2167_v49  ;;  %v4387_v54 = vmul.f32 %v19377_v63, %v19657_v34  ;;  %v1367_v9 = vsel %vm1313_vm0, %v26639_v18, %v1366_v31  ;;  %v26135_v8 = vrot.slane %v19725_v10, 1  ;;  %v26640_v27 = vld [vmem:[#allocation31_spill] sm:$0xff] }
 0x1b7   : > { %v4036_v13 = vsel %vm1313_vm0, %v26636_v42, %v4035_v46  ;;  %26637 = vst [vmem:[#allocation34_spill] sm:$0xff] %v19755_v22  ;;  %v3723_v46 = vadd.f32 %v3627_v40, %v26640_v27  ;;  %v26133_v49 = vrot.slane %v19729_v62, 2  ;;  %v1370_v6 = vrot.slane %v1153_v43, 1  ;;  %v19784_v40 = vpop.permute.xlu0 %617  ;;  %v26644_v43 = vld [vmem:[#allocation28_spill] sm:$0xff] }
 0x1b8   : > { %v4281_v55 = vadd.f32 %v4036_v13, %v3721_v12  ;;  %v3264_v42 = vrot.slane %v3051_v57, 2  ;;  %v4039_v58 = vsel %vm1313_vm0, %v4037_v26, %v26137_v45  ;;  %v19771_v39 = vadd.f32 %v1369_v17, %v951_v50  ;;  %v19782_v12 = vpop.permute.xlu1 %622 }
 0x1b9   : > { %v26642_v44 = vrot.slane %v26641_v51, 1  ;;  %v19780_v13 = vmul.f32 %v19102_v25, %v19655_v36  ;;  %v2947_v31 = vadd.f32 %v2706_v0, %v2387_v15  ;;  %v26645_v57 = vrot.slane %v26644_v43, 2 }
 0x1ba   : > { %v26134_v26 = vrot.slane %v19755_v22, 2  ;;  %v1714_v11 = vmul.f32 %v19102_v25, %v19657_v34  ;;  %v4597_v17 = vrot.slane %v4387_v54, 2  ;;  %v4283_v0 = vadd.f32 %v4039_v58, %v3723_v46 }
 0x1bb   : > { %v2703_v18 = vsel %vm1313_vm0, %v26642_v44, %v2702_v47  ;;  %26643 = vst [vmem:[#allocation33_spill] sm:$0xff] %v19780_v13  ;;  %v4596_v50 = vsel %vm1874_vm1, %v26645_v57, %v4595_v1  ;;  %v1372_v15 = vsel %vm1313_vm0, %v1370_v6, %v26135_v8  ;;  %v19800_v51 = vmul.f32 %v19353_v29, %v19782_v12  ;;  %v26653_v8 = vld [vmem:[#allocation30_spill] sm:$0xff] }
 0x1bc   : > { %v19793_v47 = vadd.f32 %v2703_v18, %v2385_v53  ;;  %v4841_v27 = vadd.f32 %v4596_v50, %v4281_v55  ;;  %v3266_v1 = vsel %vm1874_vm1, %v3264_v42, %v26133_v49  ;;  %v3831_v54 = vmul.f32 %v19353_v29, %v19784_v40  ;;  %v26648_v55 = vld [vmem:[#allocation23_spill] sm:$0xff] }
 0x1bd   : > { %26646 = vst [vmem:[#allocation35_spill] sm:$0xff] %v19800_v51  ;;  %v19809_v53 = vmul.f32 %v19139_v35, %v19655_v36  ;;  %v1607_v46 = vadd.f32 %v1367_v9, %v26648_v55  ;;  %v953_v6 = vmul.f32 %v19139_v35, %v19657_v34  ;;  %v3507_v58 = vadd.f32 %v3266_v1, %v2947_v31 }
 0x1be   : > { %v26649_v18 = vrot.slane %v26628_v7, 2  ;;  %v26138_v42 = vrot.slane %v19780_v13, 2  ;;  %v1931_v57 = vrot.slane %v1714_v11, 2  ;;  %v4599_v50 = vsel %vm1874_vm1, %v4597_v17, %v26134_v26 }
 0x1bf   : > { %26647 = vst [vmem:[#allocation20_spill] sm:$0xff] %v19809_v53  ;;  %v4944_v49 = vadd.f32 %v19742_v52, %v4841_v27  ;;  %v1610_v9 = vadd.f32 %v1372_v15, %v953_v6  ;;  %v4843_v55 = vadd.f32 %v4599_v50, %v4283_v0  ;;  %v3631_v34 = vmul.f32 %v19309_v4, %v19784_v40  ;;  %v19838_v27 = vld [vmem:[%s26017_s1 + $0x1] ss:$0 sm:$0xff] }
 0x1c0   : > { %v1928_v43 = vsel %vm1874_vm1, %v26649_v18, %v26136_v24  ;;  %v26140_v31 = vrot.slane %v19800_v51, 1  ;;  %v19829_v7 = vmul.f32 %v19377_v63, %v19782_v12  ;;  %v4044_v1 = vrot.slane %v3831_v54, 1 }
 0x1c1   : > { %v4391_v11 = vmul.f32 %v19377_v63, %v19784_v40  ;;  %v2292_v17 = vmul.f32 %v19113_v48, %v19655_v36  ;;  %v19842_v0 = vmul.f32 %v19838_v27, %v19782_v12  ;;  %v1157_v15 = vmul.f32 %v19838_v27, %v19784_v40 }
 0x1c2   : > { %26650 = vst [vmem:[#allocation37_spill] sm:$0xff] %v19829_v7  ;;  %v3727_v6 = vadd.f32 %v3631_v34, %v3507_v58  ;;  %v2168_v54 = vadd.f32 %v1928_v43, %v1607_v46  ;;  %v19848_v18 = vmul.f32 %v19089_v2, %v19782_v12  ;;  %v1933_v50 = vsel %vm1874_vm1, %v1931_v57, %v26138_v42 }
 0x1c3   : > { %26651 = vst [vmem:[#allocation39_spill] sm:$0xff] %v19842_v0  ;;  %v2495_v26 = vmul.f32 %v19089_v2, %v19784_v40  ;;  %v19857_v24 = vadd.f32 %v19742_v52, %v26653_v8  ;;  %v5040_v45 = vmax.f32 %v4944_v49, 0.0  ;;  %v3628_v58 = vmul.f32 %v19309_v4, %v19655_v36 }
 0x1c4   : > { %26652 = vst [vmem:[#allocation36_spill] sm:$0xff] %v19848_v18  ;;  %v2171_v46 = vadd.f32 %v1933_v50, %v1610_v9  ;;  %v4946_v43 = vadd.f32 %v19742_v52, %v4843_v55  ;;  %v26142_v34 = vrot.slane %v19829_v7, 2  ;;  %v4046_v57 = vsel %vm1313_vm0, %v4044_v1, %v26140_v31  ;;  %v26658_v1 = vld [vmem:[#allocation16_spill] sm:$0xff] }
 0x1c5   : > { %v4604_v42 = vrot.slane %v4391_v11, 2  ;;  %v26143_v2 = vrot.slane %v19842_v0, 1  ;;  %v1377_v44 = vrot.slane %v1157_v15, 1  ;;  %v2295_v8 = vmul.f32 %v19113_v48, %v19784_v40 }
 0x1c6   : > { %v4287_v49 = vadd.f32 %v4046_v57, %v3727_v6  ;;  %v19872_v36 = vmul.f32 %v19130_v19, %v19782_v12  ;;  %v2711_v9 = vrot.slane %v2495_v26, 1  ;;  %v3055_v55 = vmul.f32 %v19130_v19, %v19784_v40 }
 0x1c7   : > { %v19879_v11 = vmul.f32 %v19102_v25, %v19782_v12  ;;  %v1718_v48 = vmul.f32 %v19102_v25, %v19784_v40  ;;  %v2391_v15 = vadd.f32 %v2295_v8, %v2171_v46  ;;  %v26656_v6 = vmax.f32 %v19745_v32, 0.0  ;;  %v643_v8 = vpop.permute.xlu1 %642 }
 0x1c8   : > { %26654 = vst [vmem:[#allocation38_spill] sm:$0xff] %v19872_v36  ;;  %v5335_v57 = vrot.slane %v5040_v45, 1  ;;  %v5042_v31 = vmax.f32 %v4946_v43, 0.0  ;;  %v4606_v19 = vsel %vm1874_vm1, %v4604_v42, %v26142_v34  ;;  %v19890_v26 = vadd.f32 %v2292_v17, %v2168_v54 }
 0x1c9   : > { %26655 = vst [vmem:[#allocation8_spill] sm:$0xff] %v19879_v11  ;;  %v19885_v50 = vrot.slane %v26656_v6, 1  ;;  %v19893_v23 = vadd.f32 %v3628_v58, %v26658_v1  ;;  %v1379_v25 = vsel %vm1313_vm0, %v1377_v44, %v26143_v2  ;;  %v4847_v46 = vadd.f32 %v4606_v19, %v4287_v49  ;;  %v638_v49 = vpop.permute.xlu0 %637 }
 0x1ca   : > { %26657 = vst [vmem:[#allocation21_spill] sm:$0xff] %v19890_v26  ;;  %v957_v43 = vmul.f32 %v19139_v35, %v19784_v40  ;;  %v26660_v60 = vrot.slane %v19848_v18, 1  ;;  %v3271_v17 = vrot.slane %v3055_v55, 2  ;;  %v26661_v54 = vmax.f32 %v19857_v24, 0.0 }
 0x1cb   : > { %26659 = vst [vmem:[#allocation25_spill] sm:$0xff] %v19893_v23  ;;  %v26151_v1 = vrot.slane %v19879_v11, 2  ;;  %v1938_v34 = vrot.slane %v1718_v48, 2  ;;  %v19909_v19 = vmax.f32 %v5040_v45, %v5335_v57  ;;  %v5144_v2 = vrot.slane %v5042_v31, 1  ;;  %v19998_v51 = vpop.permute.xlu1 %662 }
 0x1cc   : > { %v2713_v42 = vsel %vm1313_vm0, %v2711_v9, %v26660_v60  ;;  %v19906_v58 = vrot.slane %v26661_v54, 1  ;;  %v1614_v6 = vadd.f32 %v1379_v25, %v957_v43  ;;  %v19912_v40 = vmul.f32 %v19838_v27, %v643_v8  ;;  %v19921_v9 = vld [vmem:[%s26017_s1 + $0x3] ss:$0 sm:$0xff] }
 0x1cd   : > { %v2951_v44 = vadd.f32 %v2713_v42, %v2391_v15  ;;  %v19916_v60 = vmul.f32 %v19139_v35, %v19782_v12  ;;  %v19925_v55 = vmul.f32 %v19921_v9, %v19782_v12  ;;  %v4950_v45 = vadd.f32 %v19742_v52, %v4847_v46  ;;  %v19943_v42 = vld [vmem:[%s26017_s1 + $0x4] ss:$0 sm:$0xff] }
 0x1ce   : > { %26662 = vst [vmem:[#allocation6_spill] sm:$0xff] %v19912_v40  ;;  %v19929_v48 = vmul.f32 %v19353_v29, %v643_v8  ;;  %v19933_v15 = vmul.f32 %v19309_v4, %v19782_v12  ;;  %v26667_v35 = vrot.slane %v19872_v36, 2  ;;  %v1161_v25 = vmul.f32 %v19838_v27, %v638_v49 }
 0x1cf   : > { %26663 = vst [vmem:[#allocation7_spill] sm:$0xff] %v19916_v60  ;;  %26664 = vst [vmem:[#allocation18_spill] sm:$0xff] %v19925_v55  ;;  %v3835_v43 = vmul.f32 %v19353_v29, %v638_v49  ;;  %v19946_v46 = vmul.f32 %v19943_v42, %v643_v8  ;;  %v1940_v12 = vsel %vm1874_vm1, %v1938_v34, %v26151_v1  ;;  %v5046_v60 = vmax.f32 %v4950_v45, 0.0  ;;  %v19975_v45 = vld [vmem:[%s26017_s1] ss:$0 sm:$0xff] }
 0x1d0   : > { %26665 = vst [vmem:[#allocation29_spill] sm:$0xff] %v19929_v48  ;;  %26666 = vst [vmem:[#allocation19_spill] sm:$0xff] %v19933_v15  ;;  %v3273_v57 = vsel %vm1874_vm1, %v3271_v17, %v26667_v35  ;;  %v2499_v37 = vmul.f32 %v19943_v42, %v638_v49  ;;  %v19952_v17 = vmax.f32 %v5042_v31, %v5144_v2  ;;  %v1384_v2 = vrot.slane %v1161_v25, 1  ;;  %v19983_v25 = vld [vmem:[%s26017_s1 + $0x2] ss:$0 sm:$0xff] }
 0x1d1   : > { %26668 = vst [vmem:[#allocation24_spill] sm:$0xff] %v19946_v46  ;;  %v3511_v54 = vadd.f32 %v3273_v57, %v2951_v44  ;;  %v19961_v36 = vmul.f32 %v19958_v20, %v643_v8  ;;  %v2175_v7 = vadd.f32 %v1940_v12, %v1614_v6  ;;  %v19965_v34 = vmul.f32 %v19377_v63, %v643_v8 }
 0x1d2   : > { %26669 = vst [vmem:[#allocation27_spill] sm:$0xff] %v19952_v17  ;;  %v3635_v31 = vmul.f32 %v19309_v4, %v638_v49  ;;  %v2299_v44 = vmul.f32 %v19921_v9, %v638_v49  ;;  %v4051_v57 = vrot.slane %v3835_v43, 1  ;;  %v4395_v1 = vmul.f32 %v19377_v63, %v638_v49 }
 0x1d3   : > { %26670 = vst [vmem:[#allocation31_spill] sm:$0xff] %v19961_v36  ;;  %26671 = vst [vmem:[#allocation26_spill] sm:$0xff] %v19965_v34  ;;  %v2718_v17 = vrot.slane %v2499_v37, 1  ;;  %v3059_v18 = vmul.f32 %v19958_v20, %v638_v49  ;;  %v19978_v12 = vmul.f32 %v19975_v45, %v643_v8  ;;  %v19986_v43 = vmul.f32 %v19983_v25, %v643_v8 }
 0x1d4   : > { %v3731_v6 = vadd.f32 %v3635_v31, %v3511_v54  ;;  %v19989_v37 = vmul.f32 %v19983_v25, %v638_v49  ;;  %v2395_v54 = vadd.f32 %v2299_v44, %v2175_v7  ;;  %v5145_v31 = vrot.slane %v5046_v60, 1 }
 0x1d5   : > { %26672 = vst [vmem:[#allocation28_spill] sm:$0xff] %v19978_v12  ;;  %v19992_v35 = vmul.f32 %v19921_v9, %v643_v8  ;;  %v19996_v12 = vmul.f32 %v19309_v4, %v643_v8  ;;  %v26675_v15 = vrot.slane %v19912_v40, 1  ;;  %v26676_v62 = vrot.slane %v19929_v48, 1 }
 0x1d6   : > { %v4611_v44 = vrot.slane %v4395_v1, 2  ;;  %v26677_v11 = vrot.slane %v19946_v46, 1  ;;  %v3278_v8 = vrot.slane %v3059_v18, 2  ;;  %v20023_v1 = vmul.f32 %v19975_v45, %v19998_v51 }
 0x1d7   : > { %26673 = vst [vmem:[#allocation23_spill] sm:$0xff] %v19992_v35  ;;  %26674 = vst [vmem:[#allocation30_spill] sm:$0xff] %v19996_v12  ;;  %v1386_v55 = vsel %vm1313_vm0, %v1384_v2, %v26675_v15  ;;  %v4053_v7 = vsel %vm1313_vm0, %v4051_v57, %v26676_v62  ;;  %v961_v35 = vmul.f32 %v19975_v45, %v638_v49  ;;  %v6006_v48 = vrot.slane %v19661_v56, 3 }
 0x1d8   : > { %v2720_v4 = vsel %vm1313_vm0, %v2718_v17, %v26677_v11  ;;  %v4291_v12 = vadd.f32 %v4053_v7, %v3731_v6  ;;  %v20015_v15 = vmul.f32 %v19353_v29, %v19998_v51  ;;  %v20017_v2 = vmax.f32 %v5046_v60, %v5145_v31  ;;  %26679 = vst [vmem:[#allocation40_spill] sm:$0xff] %v20023_v1 }
 0x1d9   : > { %v2955_v40 = vadd.f32 %v2720_v4, %v2395_v54  ;;  %v20019_v62 = vadd.f32 %v1386_v55, %v961_v35  ;;  %v20027_v18 = vmul.f32 %v19838_v27, %v19998_v51  ;;  %v26680_v11 = vrot.slane %v19965_v34, 2  ;;  %v20044_v35 = vpop.permute.xlu0 %657 }
 0x1da   : > { %26678 = vst [vmem:[#allocation16_spill] sm:$0xff] %v20017_v2  ;;  %v20034_v17 = vmul.f32 %v19983_v25, %v19998_v51  ;;  %v20038_v60 = vmul.f32 %v19921_v9, %v19998_v51  ;;  %v20042_v55 = vmul.f32 %v19943_v42, %v19998_v51  ;;  %v20050_v6 = vmul.f32 %v19958_v20, %v19998_v51 }
 0x1db   : > { %v4613_v49 = vsel %vm1874_vm1, %v4611_v44, %v26680_v11  ;;  %v26685_v54 = vrot.slane %v19961_v36, 2  ;;  %v26686_v7 = vmax.f32 %v19552_v5, 0.0  ;;  %v20061_v11 = vmul.f32 %v19377_v63, %v19998_v51 }
 0x1dc   : > { %26681 = vst [vmem:[#allocation41_spill] sm:$0xff] %v20034_v17  ;;  %26682 = vst [vmem:[#allocation42_spill] sm:$0xff] %v20038_v60  ;;  %v20046_v57 = vadd.f32 %v4613_v49, %v4291_v12  ;;  %v26688_v49 = vmax.f32 %v19857_v24, 0.0  ;;  %v20068_v26 = vmul.f32 %v19353_v29, %v20044_v35  ;;  %v5575_v24 = vrot.slane %v19500_v33, 2 }
 0x1dd   : > { %26683 = vst [vmem:[#allocation43_spill] sm:$0xff] %v20042_v55  ;;  %26684 = vst [vmem:[#allocation44_spill] sm:$0xff] %v20050_v6  ;;  %v3280_v31 = vsel %vm1874_vm1, %v3278_v8, %v26685_v54  ;;  %v5286_v44 = vmax.f32 %v26686_v7, %v19640_v16  ;;  %v26689_v8 = vmax.f32 %v19531_v14, 0.0  ;;  %v26690_v16 = vmax.f32 %v19745_v32, 0.0  ;;  %v26691_v7 = vld [vmem:[#allocation9_spill] sm:$0xff] }
 0x1de   : > { %26687 = vst [vmem:[#allocation45_spill] sm:$0xff] %v20061_v11  ;;  %v3515_v12 = vadd.f32 %v3280_v31, %v2955_v40  ;;  %v5287_v0 = vmax.f32 %v26688_v49, %v19906_v58  ;;  %v5526_v4 = vrot.slane %v26691_v7, 1  ;;  %v5527_v40 = vrot.slane %v19500_v33, 1 }
 0x1df   : > { %v5478_v5 = vmax.f32 %v26689_v8, %v19635_v61  ;;  %v5479_v54 = vmax.f32 %v26690_v16, %v19885_v50  ;;  %v5574_v31 = vrot.slane %v26691_v7, 2  ;;  %v5622_v58 = vrot.slane %v26691_v7, 3 }
 0x1e0   : > { %v5623_v29 = vrot.slane %v19500_v33, 3  ;;  %v5694_v49 = vrot.slane %v5286_v44, 4  ;;  %v5910_v14 = vrot.slane %v19661_v56, 1  ;;  %v5911_v61 = vrot.slane %v19909_v19, 1 }
 0x1e1   : > { %v5695_v8 = vrot.slane %v5287_v0, 4  ;;  %v5742_v32 = vrot.slane %v5286_v44, 5  ;;  %v5743_v50 = vrot.slane %v5287_v0, 5  ;;  %v5790_v16 = vrot.slane %v5286_v44, 6 }
 0x1e2   : > { %v5791_v1 = vrot.slane %v5287_v0, 6  ;;  %v5838_v60 = vrot.slane %v5286_v44, 7  ;;  %v5958_v2 = vrot.slane %v19661_v56, 2  ;;  %v5959_v34 = vrot.slane %v19909_v19, 2 }
 0x1e3   : > { %v5839_v36 = vrot.slane %v5287_v0, 7  ;;  %v6127_v46 = vsel %vm6122_vm2, %v26691_v7, %v5526_v4  ;;  %v6128_v13 = vsel %vm6122_vm2, %v19500_v33, %v5527_v40  ;;  %v6299_v44 = vsel %vm6122_vm2, %v19661_v56, %v5910_v14 }
 0x1e4   : > { %v6152_v53 = vsel %vm6147_vm3, %v6127_v46, %v5574_v31  ;;  %v6153_v22 = vsel %vm6147_vm3, %v6128_v13, %v5575_v24  ;;  %v6300_v28 = vsel %vm6122_vm2, %v19909_v19, %v5911_v61  ;;  %v6007_v0 = vrot.slane %v19909_v19, 3 }
 0x1e5   : > { %v6078_v10 = vrot.slane %v5478_v5, 4  ;;  %v6177_v23 = vsel %vm6172_vm4, %v6152_v53, %v5622_v58  ;;  %v6178_v4 = vsel %vm6172_vm4, %v6153_v22, %v5623_v29  ;;  %v6323_v46 = vsel %vm6147_vm3, %v6299_v44, %v5958_v2  ;;  %v20110_v53 = vld [vmem:[%s26017_s1 + $0x6] ss:$0 sm:$0xff]  ;;  %v20119_v5 = vpop.permute.xlu0 %607 }
 0x1e6   : > { %v6202_v7 = vsel %vm6197_vm5, %v6177_v23, %v5694_v49  ;;  %v6203_v33 = vsel %vm6197_vm5, %v6178_v4, %v5695_v8  ;;  %v6324_v13 = vsel %vm6147_vm3, %v6300_v28, %v5959_v34  ;;  %v6079_v40 = vrot.slane %v5479_v54, 4  ;;  %v20117_v34 = vpop.permute.xlu1 %612 }
 0x1e7   : > { %v6227_v56 = vsel %vm6222_vm6, %v6202_v7, %v5742_v32  ;;  %v6228_v31 = vsel %vm6222_vm6, %v6203_v33, %v5743_v50  ;;  %v6347_v19 = vsel %vm6172_vm4, %v6323_v46, %v6006_v48  ;;  %v3639_v23 = vmul.f32 %v20110_v53, %v20044_v35 }
 0x1e8   : > { %v6251_v22 = vsel %vm1874_vm1, %v6227_v56, %v5790_v16  ;;  %v6252_v2 = vsel %vm1874_vm1, %v6228_v31, %v5791_v1  ;;  %v6348_v28 = vsel %vm6172_vm4, %v6324_v13, %v6007_v0  ;;  %v6371_v24 = vsel %vm6197_vm5, %v6347_v19, %v6078_v10 }
 0x1e9   : > { %v6275_v48 = vsel %vm1313_vm0, %v6251_v22, %v5838_v60  ;;  %v6276_v54 = vsel %vm1313_vm0, %v6252_v2, %v5839_v36  ;;  %v6372_v58 = vsel %vm6197_vm5, %v6348_v28, %v6079_v40  ;;  %v4058_v29 = vrot.slane %v20068_v26, 1  ;;  %v20144_v26 = vld [vmem:[%s26017_s1 + $0x7] ss:$0 sm:$0xff]  ;;  %v26701_v28 = vld [vmem:[#allocation12_spill] sm:$0xff] }
 0x1ea   : > { %v4399_v49 = vmul.f32 %v19377_v63, %v20044_v35  ;;  %v20128_v1 = vmax.f32 %v6275_v48, %v6276_v54  ;;  %v20130_v14 = vmax.f32 %v6371_v24, %v6372_v58  ;;  %v20134_v61 = vadd.f32 %v19742_v52, %v20046_v57  ;;  %26694 = vst [vmem:[#allocation47_spill] sm:$0xff] %v20144_v26 }
 0x1eb   : > { %v26169_v60 = vrot.slane %v20027_v18, 1  ;;  %v20139_v10 = vmul.f32 %v20110_v53, %v19998_v51  ;;  %v3735_v36 = vadd.f32 %v3639_v23, %v3515_v12  ;;  %v3830_v63 = vmul.f32 %v20144_v26, %v20117_v34 }
 0x1ec   : > { %26692 = vst [vmem:[#allocation9_spill] sm:$0xff] %v20128_v1  ;;  %26693 = vst [vmem:[#allocation46_spill] sm:$0xff] %v20130_v14  ;;  %v20150_v8 = vmul.f32 %v20144_v26, %v20119_v5  ;;  %v6591_v57 = vrot.slane %v20128_v1, 1  ;;  %v20154_v32 = vrot.slane %v20130_v14, 1  ;;  %v26167_v12 = vrot.slane %v20042_v55, 1  ;;  %v26727_v1 = vld [vmem:[#allocation18_spill] sm:$0xff] }
 0x1ed   : > { %v1165_v16 = vmul.f32 %v19838_v27, %v20044_v35  ;;  %v26168_v44 = vrot.slane %v20061_v11, 2  ;;  %v26696_v0 = vrot.slane %v20015_v15, 1  ;;  %v4618_v7 = vrot.slane %v4399_v49, 2 }
 0x1ee   : > { %26695 = vst [vmem:[#allocation48_spill] sm:$0xff] %v20154_v32  ;;  %v20167_v33 = vsel %vm1313_vm0, %v6591_v57, %v20154_v32  ;;  %v5050_v46 = vmax.f32 %v20134_v61, 0.0  ;;  %v26698_v13 = vrot.slane %v19986_v43, 2  ;;  %v26699_v40 = vrot.slane %v19989_v37, 2 }
 0x1ef   : > { %v4060_v4 = vsel %vm1313_vm0, %v4058_v29, %v26696_v0  ;;  %26697 = vst [vmem:[#allocation49_spill] sm:$0xff] %v20167_v33  ;;  %v3629_v19 = vmul.f32 %v20110_v53, %v20119_v5  ;;  %16840 = vmatprep.mubr.msk.f32.mxu0 %vm6425_vm7, %v20167_v33  ;;  %v3630_v23 = vmul.f32 %v20110_v53, %v20117_v34  ;;  %v4042_v22 = vrot.slane %v3830_v63, 1 }
 0x1f0   : > { %v1947_v56 = vsel %vm1874_vm1, %v26699_v40, %v26698_v13  ;;  %v4295_v31 = vadd.f32 %v4060_v4, %v3735_v36  ;;  %v26700_v2 = vrot.slane %v19621_v41, 2  ;;  %v26702_v48 = vrot.slane %v26701_v28, 2  ;;  %16841 = vmatmul.mubr.msk.f32.vlgmr.msra.gmra.mxu0 %vm6425_vm7, %v20154_v32  ;;  %v20198_v41 = vld [vmem:[%s26019_s3 + $0x18] sm:$0xff]  ;;  %v20209_v36 = vld [vmem:[%s26017_s1 + $0x8] ss:$0 sm:$0xff] }
 0x1f1   : > { %v4040_v37 = vrot.slane %v20150_v8, 1  ;;  %v2179_v24 = vadd.f32 %v1947_v56, %v20019_v62  ;;  %v1391_v58 = vrot.slane %v1165_v16, 1  ;;  %v20192_v29 = vmul.f32 %v19983_v25, %v20044_v35  ;;  %16851 = vmatpush3.msra.mxu0 %v20198_v41  ;;  %v20220_v8 = vld [vmem:[%s26019_s3 + $0x10] sm:$0xff] }
 0x1f2   : > { %v3263_v54 = vsel %vm1874_vm1, %v26702_v48, %v26700_v2  ;;  %v2303_v61 = vmul.f32 %v19921_v9, %v20044_v35  ;;  %v4620_v62 = vsel %vm1874_vm1, %v4618_v7, %v26168_v44  ;;  %v20215_v63 = vmul.f32 %v20209_v36, %v20119_v5  ;;  %16852 = vmatprep.subr.mxu0 %v20220_v8 }
 0x1f3   : > { %26703 = vst [vmem:[#allocation12_spill] sm:$0xff] %v20192_v29  ;;  %v3505_v49 = vadd.f32 %v3263_v54, %v19793_v47  ;;  %v4390_v47 = vmul.f32 %v20209_v36, %v20117_v34  ;;  %v2503_v57 = vmul.f32 %v19943_v42, %v20044_v35  ;;  %v4855_v16 = vadd.f32 %v4620_v62, %v4295_v31 }
 0x1f4   : > { %v1156_v0 = vmul.f32 %v19838_v27, %v20117_v34  ;;  %16853 = vmatpush3.msra.mxu0 %v20220_v8  ;;  %v5146_v7 = vrot.slane %v5050_v46, 1  ;;  %v20230_v13 = vmul.f32 %v19958_v20, %v20044_v35  ;;  %v3726_v40 = vadd.f32 %v3630_v23, %v19697_v38 }
 0x1f5   : > { %v3725_v4 = vadd.f32 %v3629_v19, %v3505_v49  ;;  %v4043_v56 = vsel %vm1313_vm0, %v4040_v37, %v4042_v22  ;;  %16864 = vmatprep.subr.mxu0 %v20198_v41  ;;  %v965_v31 = vmul.f32 %v19975_v45, %v20044_v35  ;;  %v1393_v19 = vsel %vm1313_vm0, %v1391_v58, %v26169_v60 }
 0x1f6   : > { %26704 = vst [vmem:[#allocation50_spill] sm:$0xff] %v20230_v13  ;;  %v2399_v28 = vadd.f32 %v2303_v61, %v2179_v24  ;;  %v2294_v48 = vmul.f32 %v19921_v9, %v20117_v34  ;;  %v2494_v38 = vmul.f32 %v19943_v42, %v20117_v34  ;;  %v4602_v23 = vrot.slane %v4390_v47, 2 }
 0x1f7   : > { %v4600_v54 = vrot.slane %v20215_v63, 2  ;;  %v2725_v49 = vrot.slane %v2503_v57, 1  ;;  %v4958_v62 = vadd.f32 %v19742_v52, %v4855_v16  ;;  %v1375_v35 = vrot.slane %v1156_v0, 1 }
 0x1f8   : > { %v4285_v50 = vadd.f32 %v4043_v56, %v3725_v4  ;;  %v20247_v51 = vmax.f32 %v5050_v46, %v5146_v7  ;;  %v4286_v2 = vadd.f32 %v4042_v22, %v3726_v40  ;;  %v1155_v24 = vmul.f32 %v19838_v27, %v20119_v5 }
 0x1f9   : > { %v20252_v61 = vadd.f32 %v1393_v19, %v965_v31  ;;  %v956_v47 = vmul.f32 %v19975_v45, %v20117_v34  ;;  %v20258_v63 = vmul.f32 %v19983_v25, %v20117_v34  ;;  %v20262_v57 = vmul.f32 %v19958_v20, %v20117_v34 }
 0x1fa   : > { %26705 = vst [vmem:[#allocation51_spill] sm:$0xff] %v20247_v51  ;;  %v2390_v46 = vadd.f32 %v2294_v48, %v19693_v30  ;;  %v2709_v16 = vrot.slane %v2494_v38, 1  ;;  %v2493_v22 = vmul.f32 %v19943_v42, %v20119_v5  ;;  %v4603_v0 = vsel %vm1874_vm1, %v4600_v54, %v4602_v23 }
 0x1fb   : > { %26706 = vst [vmem:[#allocation52_spill] sm:$0xff] %v20252_v61  ;;  %v2727_v4 = vsel %vm1313_vm0, %v2725_v49, %v26167_v12  ;;  %v5054_v7 = vmax.f32 %v4958_v62, 0.0  ;;  %v1613_v40 = vadd.f32 %v1375_v35, %v956_v47  ;;  %v4845_v56 = vadd.f32 %v4603_v0, %v4285_v50  ;;  %v26711_v0 = vld [vmem:[#allocation25_spill] sm:$0xff]  ;;  %v633_v12 = vpop.permute.xlu1 %632 }
 0x1fc   : > { %v4846_v31 = vadd.f32 %v4602_v23, %v4286_v2  ;;  %v1373_v19 = vrot.slane %v1155_v24, 1  ;;  %v20273_v34 = vmul.f32 %v19983_v25, %v20119_v5  ;;  %v26707_v30 = vrot.slane %v19709_v21, 1 }
 0x1fd   : > { %v20278_v38 = vadd.f32 %v2727_v4, %v2399_v28  ;;  %v26170_v58 = vrot.slane %v20258_v63, 2  ;;  %v2293_v49 = vmul.f32 %v19921_v9, %v20119_v5  ;;  %v3053_v50 = vmul.f32 %v19958_v20, %v20119_v5 }
 0x1fe   : > { %v4041_v48 = vsel %vm1313_vm0, %v26707_v30, %v4040_v37  ;;  %v2950_v2 = vadd.f32 %v2709_v16, %v2390_v46  ;;  %v3269_v23 = vrot.slane %v20262_v57, 2  ;;  %v26709_v62 = vrot.slane %v19617_v3, 2  ;;  %v26712_v3 = vld [vmem:[#allocation17_spill] sm:$0xff] }
 0x1ff   : > { %26708 = vst [vmem:[#allocation53_spill] sm:$0xff] %v20278_v38  ;;  %v26710_v24 = vrot.slane %v19681_v59, 2  ;;  %v2707_v37 = vrot.slane %v2493_v22, 1  ;;  %v2174_v28 = vadd.f32 %v26170_v58, %v1613_v40  ;;  %v4284_v4 = vadd.f32 %v4041_v48, %v26711_v0  ;;  %v26716_v0 = vld [vmem:[#allocation34_spill] sm:$0xff]  ;;  %v26718_v58 = vld [vmem:[#allocation20_spill] sm:$0xff] }
 0x200   : > { %v4948_v30 = vadd.f32 %v19742_v52, %v4845_v56  ;;  %v5147_v46 = vrot.slane %v5054_v7, 1  ;;  %v20297_v57 = vadd.f32 %v19742_v52, %v4846_v31  ;;  %v26713_v44 = vrot.slane %v26712_v3, 1 }
 0x201   : > { %v1930_v21 = vsel %vm1874_vm1, %v26710_v24, %v26709_v62  ;;  %v1934_v22 = vrot.slane %v20273_v34, 2  ;;  %v955_v40 = vmul.f32 %v19975_v45, %v20119_v5  ;;  %v3267_v48 = vrot.slane %v3053_v50, 2  ;;  %v26714_v24 = vld [vmem:[#allocation15_spill] sm:$0xff] }
 0x202   : > { %v2169_v47 = vadd.f32 %v1930_v21, %v19771_v39  ;;  %v1374_v59 = vsel %vm1313_vm0, %v26713_v44, %v1373_v19  ;;  %v1376_v39 = vsel %vm1313_vm0, %v1373_v19, %v1375_v35  ;;  %v26715_v56 = vrot.slane %v26714_v24, 1 }
 0x203   : > { %v2710_v31 = vsel %vm1313_vm0, %v2707_v37, %v2709_v16  ;;  %v26717_v60 = vrot.slane %v26716_v0, 2  ;;  %v20314_v44 = vmul.f32 %v19838_v27, %v633_v12  ;;  %v3510_v34 = vadd.f32 %v3269_v23, %v2950_v2  ;;  %v26723_v0 = vld [vmem:[#allocation14_spill] sm:$0xff] }
 0x204   : > { %v2389_v62 = vadd.f32 %v2293_v49, %v2169_v47  ;;  %v2708_v21 = vsel %vm1313_vm0, %v26715_v56, %v2707_v37  ;;  %v1611_v5 = vadd.f32 %v1374_v59, %v26718_v58  ;;  %v5044_v35 = vmax.f32 %v4948_v30, 0.0  ;;  %v26720_v47 = vld [vmem:[#allocation33_spill] sm:$0xff]  ;;  %v628_v59 = vpop.permute.xlu0 %627 }
 0x205   : > { %v4601_v3 = vsel %vm1874_vm1, %v26717_v60, %v4600_v54  ;;  %v20317_v19 = vmax.f32 %v5054_v7, %v5147_v46  ;;  %v1612_v50 = vadd.f32 %v1376_v39, %v955_v40  ;;  %v26721_v24 = vrot.slane %v26720_v47, 2  ;;  %v26722_v37 = vld [vmem:[#allocation21_spill] sm:$0xff] }
 0x206   : > { %v4844_v32 = vadd.f32 %v4601_v3, %v4284_v4  ;;  %v2948_v56 = vadd.f32 %v2708_v21, %v26722_v37  ;;  %v2949_v60 = vadd.f32 %v2710_v31, %v2389_v62  ;;  %v3634_v54 = vmul.f32 %v20110_v53, %v633_v12 }
 0x207   : > { %26719 = vst [vmem:[#allocation25_spill] sm:$0xff] %v20317_v19  ;;  %v1935_v16 = vsel %vm1874_vm1, %v26721_v24, %v1934_v22  ;;  %v3834_v2 = vmul.f32 %v20144_v26, %v633_v12  ;;  %v26724_v58 = vrot.slane %v26723_v0, 2  ;;  %v1382_v7 = vrot.slane %v20314_v44, 1 }
 0x208   : > { %v2298_v30 = vmul.f32 %v19921_v9, %v633_v12  ;;  %v20332_v46 = vmul.f32 %v19943_v42, %v633_v12  ;;  %v2172_v40 = vadd.f32 %v1935_v16, %v1611_v5  ;;  %v20335_v39 = vadd.f32 %v19742_v52, %v4844_v32 }
 0x209   : > { %v3268_v4 = vsel %vm1874_vm1, %v26724_v58, %v3267_v48  ;;  %v5336_v62 = vrot.slane %v5044_v35, 1  ;;  %v3730_v21 = vadd.f32 %v3634_v54, %v3510_v34  ;;  %v960_v31 = vmul.f32 %v19975_v45, %v633_v12 }
 0x20a   : > { %v20339_v3 = vmul.f32 %v19983_v25, %v633_v12  ;;  %v2394_v47 = vadd.f32 %v2298_v30, %v2174_v28  ;;  %v20342_v44 = vmul.f32 %v19958_v20, %v633_v12  ;;  %v4049_v24 = vrot.slane %v3834_v2, 1 }
 0x20b   : > { %v4394_v37 = vmul.f32 %v20209_v36, %v633_v12  ;;  %v3270_v0 = vsel %vm1874_vm1, %v3267_v48, %v3269_v23  ;;  %v3833_v5 = vmul.f32 %v20144_v26, %v628_v59  ;;  %v3508_v32 = vadd.f32 %v3268_v4, %v2948_v56 }
 0x20c   : > { %v1617_v16 = vadd.f32 %v1382_v7, %v960_v31  ;;  %v26173_v34 = vrot.slane %v20332_v46, 1  ;;  %v3509_v54 = vadd.f32 %v3270_v0, %v2949_v60  ;;  %v20349_v49 = vmax.f32 %v5044_v35, %v5336_v62 }
 0x20d   : > { %v4290_v28 = vadd.f32 %v4049_v24, %v3730_v21  ;;  %v1159_v30 = vmul.f32 %v19838_v27, %v628_v59  ;;  %v26180_v2 = vrot.slane %v20339_v3, 2  ;;  %v3633_v48 = vmul.f32 %v20110_v53, %v628_v59 }
 0x20e   : > { %v2954_v12 = vadd.f32 %v26173_v34, %v2394_v47  ;;  %v4609_v56 = vrot.slane %v4394_v37, 2  ;;  %v2497_v4 = vmul.f32 %v19943_v42, %v628_v59  ;;  %v4047_v60 = vrot.slane %v3833_v5, 1  ;;  %v653_v5 = vpop.permute.xlu1 %652 }
 0x20f   : > { %v4393_v31 = vmul.f32 %v20209_v36, %v628_v59  ;;  %v2178_v35 = vadd.f32 %v26180_v2, %v1617_v16  ;;  %v26725_v62 = vrot.slane %v20258_v63, 2  ;;  %v20365_v0 = vmul.f32 %v19983_v25, %v628_v59  ;;  %v26728_v2 = vld [vmem:[#allocation19_spill] sm:$0xff] }
 0x210   : > { %v3729_v47 = vadd.f32 %v3633_v48, %v3509_v54  ;;  %v4850_v58 = vadd.f32 %v4609_v56, %v4290_v28  ;;  %v1380_v23 = vrot.slane %v1159_v30, 1  ;;  %v20368_v37 = vmul.f32 %v19958_v20, %v628_v59 }
 0x211   : > { %v1937_v21 = vsel %vm1874_vm1, %v1934_v22, %v26725_v62  ;;  %v26726_v33 = vrot.slane %v20342_v44, 2  ;;  %v2392_v16 = vadd.f32 %v26727_v1, %v2172_v40  ;;  %v3728_v63 = vadd.f32 %v26728_v2, %v3508_v32 }
 0x212   : > { %v2173_v34 = vadd.f32 %v1937_v21, %v1612_v50  ;;  %v959_v22 = vmul.f32 %v19975_v45, %v628_v59  ;;  %v2297_v62 = vmul.f32 %v19921_v9, %v628_v59  ;;  %v2714_v19 = vrot.slane %v2497_v4, 1 }
 0x213   : > { %v3514_v14 = vadd.f32 %v26726_v33, %v2954_v12  ;;  %v4050_v54 = vsel %vm1313_vm0, %v4047_v60, %v4049_v24  ;;  %v4607_v50 = vrot.slane %v4393_v31, 2  ;;  %v1941_v28 = vrot.slane %v20365_v0, 2  ;;  %v26729_v33 = vld [vmem:[#allocation39_spill] sm:$0xff] }
 0x214   : > { %v4289_v30 = vadd.f32 %v4050_v54, %v3729_v47  ;;  %v3638_v48 = vmul.f32 %v20110_v53, %v653_v5  ;;  %v20380_v21 = vmul.f32 %v20144_v26, %v653_v5  ;;  %v20383_v1 = vadd.f32 %v19742_v52, %v4850_v58  ;;  %v26731_v12 = vld [vmem:[#allocation35_spill] sm:$0xff]  ;;  %v26733_v54 = vld [vmem:[#allocation36_spill] sm:$0xff] }
 0x215   : > { %v26730_v40 = vrot.slane %v26729_v33, 1  ;;  %v2393_v59 = vadd.f32 %v2297_v62, %v2173_v34  ;;  %v3274_v2 = vrot.slane %v20368_v37, 2  ;;  %v1383_v24 = vsel %vm1313_vm0, %v1380_v23, %v1382_v7  ;;  %v26735_v62 = vld [vmem:[#allocation7_spill] sm:$0xff] }
 0x216   : > { %v26732_v4 = vrot.slane %v26731_v12, 1  ;;  %v20394_v0 = vmul.f32 %v19838_v27, %v653_v5  ;;  %v3734_v47 = vadd.f32 %v3638_v48, %v3514_v14  ;;  %v26734_v58 = vrot.slane %v26733_v54, 1  ;;  %v26736_v12 = vld [vmem:[#allocation8_spill] sm:$0xff]  ;;  %v26738_v54 = vld [vmem:[#allocation37_spill] sm:$0xff] }
 0x217   : > { %v1381_v32 = vsel %vm1313_vm0, %v26730_v40, %v1380_v23  ;;  %v4610_v40 = vsel %vm1874_vm1, %v4607_v50, %v4609_v56  ;;  %v2302_v34 = vmul.f32 %v19921_v9, %v653_v5  ;;  %v20402_v7 = vmul.f32 %v19943_v42, %v653_v5 }
 0x218   : > { %v4048_v31 = vsel %vm1313_vm0, %v26732_v4, %v4047_v60  ;;  %v2715_v51 = vsel %vm1313_vm0, %v26734_v58, %v2714_v19  ;;  %v4849_v37 = vadd.f32 %v4610_v40, %v4289_v30  ;;  %v20406_v60 = vmul.f32 %v20209_v36, %v653_v5 }
 0x219   : > { %v4288_v33 = vadd.f32 %v4048_v31, %v3728_v63  ;;  %v1615_v48 = vadd.f32 %v1381_v32, %v26735_v62  ;;  %v26737_v4 = vrot.slane %v26736_v12, 2  ;;  %v2952_v56 = vadd.f32 %v2715_v51, %v2392_v16  ;;  %v648_v31 = vpop.permute.xlu0 %647 }
 0x21a   : > { %v26739_v30 = vrot.slane %v26738_v54, 2  ;;  %v1389_v40 = vrot.slane %v20394_v0, 1  ;;  %v2398_v23 = vadd.f32 %v2302_v34, %v2178_v35  ;;  %v26740_v55 = vrot.slane %v20380_v21, 1 }
 0x21b   : > { %v1942_v63 = vsel %vm1874_vm1, %v26737_v4, %v1941_v28  ;;  %v964_v14 = vmul.f32 %v19975_v45, %v653_v5  ;;  %v20421_v32 = vmul.f32 %v19983_v25, %v653_v5  ;;  %v20424_v62 = vmul.f32 %v19958_v20, %v653_v5 }
 0x21c   : > { %v4608_v58 = vsel %vm1874_vm1, %v26739_v30, %v4607_v50  ;;  %v4294_v38 = vadd.f32 %v26740_v55, %v3734_v47  ;;  %v4952_v51 = vadd.f32 %v19742_v52, %v4849_v37  ;;  %v2723_v16 = vrot.slane %v20402_v7, 1 }
 0x21d   : > { %v4848_v13 = vadd.f32 %v4608_v58, %v4288_v33  ;;  %v26187_v50 = vrot.slane %v20406_v60, 2  ;;  %v1163_v35 = vmul.f32 %v19838_v27, %v648_v31  ;;  %v1616_v0 = vadd.f32 %v1383_v24, %v959_v22  ;;  %v26742_v33 = vld [vmem:[#allocation38_spill] sm:$0xff] }
 0x21e   : > { %v2176_v34 = vadd.f32 %v1942_v63, %v1615_v48  ;;  %v26741_v55 = vrot.slane %v20332_v46, 1  ;;  %v26743_v12 = vrot.slane %v26742_v33, 2  ;;  %v1621_v54 = vadd.f32 %v1389_v40, %v964_v14 }
 0x21f   : > { %v2958_v30 = vadd.f32 %v2723_v16, %v2398_v23  ;;  %v4854_v37 = vadd.f32 %v26187_v50, %v4294_v38  ;;  %v20439_v58 = vadd.f32 %v19742_v52, %v4848_v13  ;;  %v26185_v22 = vrot.slane %v20421_v32, 2  ;;  %v26745_v38 = vld [vmem:[#allocation23_spill] sm:$0xff]  ;;  %v26752_v50 = vld [vmem:[#allocation24_spill] sm:$0xff] }
 0x220   : > { %v2717_v47 = vsel %vm1313_vm0, %v2714_v19, %v26741_v55  ;;  %v3275_v4 = vsel %vm1874_vm1, %v26743_v12, %v3274_v2  ;;  %v2501_v46 = vmul.f32 %v19943_v42, %v648_v31  ;;  %v5048_v24 = vmax.f32 %v4952_v51, 0.0  ;;  %v26748_v12 = vld [vmem:[#allocation6_spill] sm:$0xff] }
 0x221   : > { %v2953_v5 = vadd.f32 %v2717_v47, %v2393_v59  ;;  %v3512_v7 = vadd.f32 %v3275_v4, %v2952_v56  ;;  %v26186_v19 = vrot.slane %v20424_v62, 2  ;;  %v1387_v48 = vrot.slane %v1163_v35, 1 }
 0x222   : > { %v20445_v63 = vmul.f32 %v19983_v25, %v648_v31  ;;  %v26744_v59 = vrot.slane %v20339_v3, 2  ;;  %v2396_v14 = vadd.f32 %v26745_v38, %v2176_v34  ;;  %v26746_v13 = vrot.slane %v20342_v44, 2  ;;  %v26750_v38 = vld [vmem:[#allocation30_spill] sm:$0xff] }
 0x223   : > { %v3837_v55 = vmul.f32 %v20144_v26, %v648_v31  ;;  %v2182_v51 = vadd.f32 %v26185_v22, %v1621_v54  ;;  %v3518_v35 = vadd.f32 %v26186_v19, %v2958_v30  ;;  %v20460_v47 = vadd.f32 %v19742_v52, %v4854_v37 }
 0x224   : > { %v1944_v23 = vsel %vm1874_vm1, %v1941_v28, %v26744_v59  ;;  %v3277_v56 = vsel %vm1874_vm1, %v3274_v2, %v26746_v13  ;;  %v5047_v28 = vmax.f32 %v20439_v58, 0.0  ;;  %v2721_v34 = vrot.slane %v2501_v46, 1  ;;  %v673_v58 = vpop.permute.xlu1 %672 }
 0x225   : > { %26747 = vst [vmem:[#allocation17_spill] sm:$0xff] %v20460_v47  ;;  %v3513_v3 = vadd.f32 %v3277_v56, %v2953_v5  ;;  %v2177_v33 = vadd.f32 %v1944_v23, %v1616_v0  ;;  %v20464_v44 = vmul.f32 %v19958_v20, %v648_v31  ;;  %v5337_v2 = vrot.slane %v5048_v24, 1 }
 0x226   : > { %v26749_v4 = vrot.slane %v26748_v12, 1  ;;  %v3637_v30 = vmul.f32 %v20110_v53, %v648_v31  ;;  %v3732_v37 = vadd.f32 %v26750_v38, %v3512_v7  ;;  %v2301_v5 = vmul.f32 %v19921_v9, %v648_v31 }
 0x227   : > { %v4054_v13 = vrot.slane %v3837_v55, 1  ;;  %v4397_v0 = vmul.f32 %v20209_v36, %v648_v31  ;;  %v963_v23 = vmul.f32 %v19975_v45, %v648_v31  ;;  %v1390_v56 = vsel %vm1313_vm0, %v1387_v48, %v1389_v40 }
 0x228   : > { %v1388_v59 = vsel %vm1313_vm0, %v26749_v4, %v1387_v48  ;;  %v3733_v12 = vadd.f32 %v3637_v30, %v3513_v3  ;;  %v26751_v4 = vld [vmem:[#allocation28_spill] sm:$0xff]  ;;  %v2397_v19 = vadd.f32 %v2301_v5, %v2177_v33  ;;  %v26753_v54 = vrot.slane %v26752_v50, 1  ;;  %v26757_v3 = vld [vmem:[#allocation29_spill] sm:$0xff]  ;;  %v26763_v5 = vld [vmem:[#allocation31_spill] sm:$0xff] }
 0x229   : > { %v1619_v22 = vadd.f32 %v1388_v59, %v26751_v4  ;;  %v3281_v38 = vrot.slane %v20464_v44, 2  ;;  %v20482_v55 = vmax.f32 %v5048_v24, %v5337_v2  ;;  %v26754_v6 = vrot.slane %v20445_v63, 2 }
 0x22a   : > { %v2722_v7 = vsel %vm1313_vm0, %v26753_v54, %v2721_v34  ;;  %v26755_v46 = vrot.slane %v19986_v43, 2  ;;  %v20490_v40 = vmul.f32 %v19838_v27, %v673_v58  ;;  %v20492_v48 = vadd.f32 %v1390_v56, %v963_v23 }
 0x22b   : > { %v2956_v61 = vadd.f32 %v2722_v7, %v2396_v14  ;;  %v26758_v50 = vrot.slane %v26757_v3, 1  ;;  %v26759_v44 = vrot.slane %v20380_v21, 1  ;;  %v4614_v2 = vrot.slane %v4397_v0, 2 }
 0x22c   : > { %v1949_v31 = vsel %vm1874_vm1, %v26755_v46, %v26754_v6  ;;  %26756 = vst [vmem:[#allocation15_spill] sm:$0xff] %v20490_v40  ;;  %v26760_v59 = vmax.f32 %v20460_v47, 0.0  ;;  %v2724_v6 = vsel %vm1313_vm0, %v2721_v34, %v2723_v16  ;;  %v26764_v46 = vrot.slane %v26763_v5, 2  ;;  %v20548_v5 = vpop.permute.xlu0 %667 }
 0x22d   : > { %v4055_v33 = vsel %vm1313_vm0, %v26758_v50, %v4054_v13  ;;  %v4057_v24 = vsel %vm1313_vm0, %v4054_v13, %v26759_v44  ;;  %v20505_v54 = vadd.f32 %v1949_v31, %v1619_v22  ;;  %v20507_v30 = vadd.f32 %v2724_v6, %v2397_v19  ;;  %v26765_v22 = vld [vmem:[#allocation26_spill] sm:$0xff] }
 0x22e   : > { %v20502_v43 = vrot.slane %v26760_v59, 1  ;;  %v4292_v14 = vadd.f32 %v4055_v33, %v3732_v37  ;;  %v4293_v27 = vadd.f32 %v4057_v24, %v3733_v12  ;;  %v3282_v23 = vsel %vm1874_vm1, %v26764_v46, %v3281_v38 }
 0x22f   : > { %26762 = vst [vmem:[#allocation20_spill] sm:$0xff] %v20505_v54  ;;  %v20513_v21 = vmul.f32 %v19983_v25, %v673_v58  ;;  %v20515_v13 = vadd.f32 %v3282_v23, %v2956_v61  ;;  %v968_v0 = vmul.f32 %v19975_v45, %v673_v58  ;;  %v26190_v56 = vrot.slane %v20490_v40, 1 }
 0x230   : > { %26761 = vst [vmem:[#allocation34_spill] sm:$0xff] %v20502_v43  ;;  %v20520_v16 = vmul.f32 %v19943_v42, %v673_v58  ;;  %v26766_v34 = vrot.slane %v26765_v22, 2  ;;  %v26767_v37 = vrot.slane %v20406_v60, 2  ;;  %v26768_v4 = vmax.f32 %v20335_v39, 0.0 }
 0x231   : > { %v5241_v61 = vrot.slane %v5047_v28, 1  ;;  %v2306_v50 = vmul.f32 %v19921_v9, %v673_v58  ;;  %v20532_v33 = vmul.f32 %v20144_v26, %v673_v58  ;;  %v20536_v24 = vmul.f32 %v19958_v20, %v673_v58 }
 0x232   : > { %v4615_v19 = vsel %vm1874_vm1, %v26766_v34, %v4614_v2  ;;  %v4617_v12 = vsel %vm1874_vm1, %v4614_v2, %v26767_v37  ;;  %v5240_v7 = vrot.slane %v26768_v4, 1  ;;  %v3642_v60 = vmul.f32 %v20110_v53, %v673_v58 }
 0x233   : > { %v4852_v31 = vadd.f32 %v4615_v19, %v4292_v14  ;;  %v4853_v3 = vadd.f32 %v4617_v12, %v4293_v27  ;;  %v26769_v2 = vmax.f32 %v20297_v57, 0.0  ;;  %v20543_v6 = vadd.f32 %v26190_v56, %v968_v0 }
 0x234   : > { %v20545_v14 = vadd.f32 %v2306_v50, %v2182_v51  ;;  %v26770_v46 = vmax.f32 %v20383_v1, 0.0  ;;  %v3738_v22 = vadd.f32 %v3642_v60, %v3518_v35  ;;  %v20553_v34 = vmul.f32 %v20209_v36, %v673_v58 }
 0x235   : > { %v5432_v59 = vrot.slane %v26769_v2, 1  ;;  %v26771_v19 = vmov %v26768_v4  ;;  %v5289_v12 = vmax.f32 %v5047_v28, %v5241_v61  ;;  %v20558_v0 = vadd.f32 %v19742_v52, %v4852_v31  ;;  %v26774_v28 = vld [vmem:[#allocation27_spill] sm:$0xff]  ;;  %v26775_v61 = vld [vmem:[#allocation16_spill] sm:$0xff] }
 0x236   : > { %v5433_v23 = vrot.slane %v26770_v46, 1  ;;  %v5288_v37 = vmax.f32 %v26771_v19, %v5240_v7  ;;  %v20561_v51 = vadd.f32 %v19742_v52, %v4853_v3  ;;  %v26772_v50 = vrot.slane %v20424_v62, 2 }
 0x237   : > { %v20569_v35 = vmul.f32 %v20144_v26, %v20548_v5  ;;  %v26773_v39 = vmax.f32 %v20297_v57, 0.0  ;;  %v5528_v7 = vrot.slane %v26774_v28, 1  ;;  %v5529_v31 = vrot.slane %v26775_v61, 1 }
 0x238   : > { %v3284_v2 = vsel %vm1874_vm1, %v3281_v38, %v26772_v50  ;;  %v26776_v52 = vmov %v26770_v46  ;;  %v5576_v60 = vrot.slane %v26774_v28, 2  ;;  %v5577_v62 = vrot.slane %v26775_v61, 2 }
 0x239   : > { %v5480_v58 = vmax.f32 %v26773_v39, %v5432_v59  ;;  %v5481_v3 = vmax.f32 %v26776_v52, %v5433_v23  ;;  %v5624_v38 = vrot.slane %v26774_v28, 3  ;;  %v5625_v46 = vrot.slane %v26775_v61, 3 }
 0x23a   : > { %v5696_v19 = vrot.slane %v5288_v37, 4  ;;  %v5697_v50 = vrot.slane %v5289_v12, 4  ;;  %v5744_v56 = vrot.slane %v5288_v37, 5  ;;  %v5745_v57 = vrot.slane %v5289_v12, 5 }
 0x23b   : > { %v5792_v59 = vrot.slane %v5288_v37, 6  ;;  %v5912_v39 = vrot.slane %v20349_v49, 1  ;;  %v5913_v44 = vrot.slane %v20482_v55, 1  ;;  %v5793_v27 = vrot.slane %v5289_v12, 6 }
 0x23c   : > { %v5840_v1 = vrot.slane %v5288_v37, 7  ;;  %v5841_v23 = vrot.slane %v5289_v12, 7  ;;  %v5960_v52 = vrot.slane %v20349_v49, 2  ;;  %v5961_v4 = vrot.slane %v20482_v55, 2 }
 0x23d   : > { %v6008_v47 = vrot.slane %v20349_v49, 3  ;;  %v6129_v43 = vsel %vm6122_vm2, %v26774_v28, %v5528_v7  ;;  %v6130_v54 = vsel %vm6122_vm2, %v26775_v61, %v5529_v31  ;;  %v6009_v29 = vrot.slane %v20482_v55, 3 }
 0x23e   : > { %v6080_v17 = vrot.slane %v5480_v58, 4  ;;  %v6154_v26 = vsel %vm6147_vm3, %v6129_v43, %v5576_v60  ;;  %v6155_v37 = vsel %vm6147_vm3, %v6130_v54, %v5577_v62  ;;  %v6301_v40 = vsel %vm6122_vm2, %v20349_v49, %v5912_v39 }
 0x23f   : > { %v6179_v12 = vsel %vm6172_vm4, %v6154_v26, %v5624_v38  ;;  %v6180_v11 = vsel %vm6172_vm4, %v6155_v37, %v5625_v46  ;;  %v6302_v28 = vsel %vm6122_vm2, %v20482_v55, %v5913_v44  ;;  %v6081_v7 = vrot.slane %v5481_v3, 4 }
 0x240   : > { %v6204_v61 = vsel %vm6197_vm5, %v6179_v12, %v5696_v19  ;;  %v6205_v31 = vsel %vm6197_vm5, %v6180_v11, %v5697_v50  ;;  %v6325_v58 = vsel %vm6147_vm3, %v6301_v40, %v5960_v52  ;;  %v6326_v26 = vsel %vm6147_vm3, %v6302_v28, %v5961_v4 }
 0x241   : > { %v6229_v43 = vsel %vm6222_vm6, %v6204_v61, %v5744_v56  ;;  %v6230_v54 = vsel %vm6222_vm6, %v6205_v31, %v5745_v57  ;;  %v6349_v60 = vsel %vm6172_vm4, %v6325_v58, %v6008_v47  ;;  %v3517_v49 = vadd.f32 %v3284_v2, %v20507_v30  ;;  %v20669_v58 = vpop.permute.xlu1 %682 }
 0x242   : > { %v6253_v62 = vsel %vm1874_vm1, %v6229_v43, %v5792_v59  ;;  %v6254_v55 = vsel %vm1874_vm1, %v6230_v54, %v5793_v27  ;;  %v6350_v44 = vsel %vm6172_vm4, %v6326_v26, %v6009_v29  ;;  %v6373_v56 = vsel %vm6197_vm5, %v6349_v60, %v6080_v17 }
 0x243   : > { %v6277_v11 = vsel %vm1313_vm0, %v6253_v62, %v5840_v1  ;;  %v6278_v40 = vsel %vm1313_vm0, %v6254_v55, %v5841_v23  ;;  %v6374_v3 = vsel %vm6197_vm5, %v6350_v44, %v6081_v7  ;;  %v26777_v4 = vrot.slane %v20532_v33, 1  ;;  %v20699_v62 = vld [vmem:[%s26018_s2] ss:$0 sm:$0xff] }
 0x244   : > { %v3641_v47 = vmul.f32 %v20110_v53, %v20548_v5  ;;  %v20618_v30 = vmax.f32 %v6277_v11, %v6278_v40  ;;  %v20620_v2 = vmax.f32 %v6373_v56, %v6374_v3  ;;  %v26780_v29 = vrot.slane %v20520_v16, 1 }
 0x245   : > { %v4298_v38 = vadd.f32 %v26777_v4, %v3738_v22  ;;  %v4623_v46 = vrot.slane %v20553_v34, 2  ;;  %v4061_v17 = vrot.slane %v20569_v35, 1  ;;  %v4401_v19 = vmul.f32 %v20209_v36, %v20548_v5 }
 0x246   : > { %26778 = vst [vmem:[#allocation33_spill] sm:$0xff] %v20618_v30  ;;  %26779 = vst [vmem:[#allocation21_spill] sm:$0xff] %v20620_v2  ;;  %v2962_v27 = vadd.f32 %v26780_v29, %v20545_v14  ;;  %v5052_v22 = vmax.f32 %v20561_v51, 0.0  ;;  %v3737_v50 = vadd.f32 %v3641_v47, %v3517_v49  ;;  %v6675_v57 = vrot.slane %v20618_v30, 1  ;;  %v20648_v51 = vld [vmem:[%s26017_s1 + $0x1] ss:$0 sm:$0xff] }
 0x247   : > { %v20632_v59 = vrot.slane %v20620_v2, 1  ;;  %v26782_v39 = vrot.slane %v20513_v21, 2  ;;  %v26200_v14 = vrot.slane %v20536_v24, 2  ;;  %v26783_v34 = vrot.slane %v20421_v32, 2  ;;  %v26791_v29 = vld [vmem:[#allocation15_spill] sm:$0xff] }
 0x248   : > { %v26784_v35 = vrot.slane %v20445_v63, 2  ;;  %v1167_v52 = vmul.f32 %v20648_v51, %v20548_v5  ;;  %v26201_v37 = vmax.f32 %v20558_v0, 0.0  ;;  %v20655_v12 = vmul.f32 %v19983_v25, %v20548_v5 }
 0x249   : > { %26781 = vst [vmem:[#allocation14_spill] sm:$0xff] %v20632_v59  ;;  %v20637_v1 = vadd.f32 %v26782_v39, %v20543_v6  ;;  %v4858_v6 = vadd.f32 %v4623_v46, %v4298_v38  ;;  %v20659_v32 = vsel %vm1313_vm0, %v6675_v57, %v20632_v59  ;;  %v20663_v63 = vadd.f32 %v26200_v14, %v2962_v27  ;;  %v26796_v39 = vld [vmem:[#allocation47_spill] sm:$0xff]  ;;  %v20817_v14 = vpop.permute.xlu1 %702 }
 0x24a   : > { %v1951_v23 = vsel %vm1874_vm1, %v26784_v35, %v26783_v34  ;;  %26785 = vst [vmem:[#allocation18_spill] sm:$0xff] %v20655_v12  ;;  %26786 = vst [vmem:[#allocation19_spill] sm:$0xff] %v20659_v32  ;;  %v26787_v7 = vmov %v26777_v4  ;;  %v4621_v31 = vrot.slane %v4401_v19, 2  ;;  %16847 = vmatprep.mubr.msk.f32.mxu1 %vm6425_vm7, %v20659_v32  ;;  %v5338_v25 = vrot.slane %v5052_v22, 1  ;;  %v26797_v35 = vld [vmem:[#allocation41_spill] sm:$0xff] }
 0x24b   : > { %v2181_v28 = vadd.f32 %v1951_v23, %v20492_v48  ;;  %v4064_v61 = vsel %vm1313_vm0, %v4061_v17, %v26787_v7  ;;  %v3736_v43 = vadd.f32 %v20139_v10, %v20515_v13  ;;  %v20677_v54 = vmul.f32 %v19943_v42, %v20548_v5  ;;  %v20679_v48 = vpop.permute.xlu0 %677  ;;  %16848 = vmatmul.mubr.msk.f32.vlgmr.msra.gmra.mxu1 %vm6425_vm7, %v20632_v59 }
 0x24c   : > { %v4297_v26 = vadd.f32 %v4064_v61, %v3737_v50  ;;  %v967_v33 = vmul.f32 %v19975_v45, %v20548_v5  ;;  %v1394_v60 = vrot.slane %v1167_v52, 1  ;;  %v2305_v49 = vmul.f32 %v19921_v9, %v20548_v5  ;;  %16858 = vmatpush3.msra.mxu1 %v20198_v41  ;;  %v20743_v50 = vld [vmem:[%s26017_s1 + $0x3] ss:$0 sm:$0xff]  ;;  %v26799_v52 = vld [vmem:[#allocation12_spill] sm:$0xff] }
 0x24d   : > { %v20689_v10 = vmul.f32 %v19958_v20, %v20548_v5  ;;  %v20694_v13 = vrot.slane %v26201_v37, 1  ;;  %v20702_v45 = vadd.f32 %v20699_v62, %v4858_v6  ;;  %v20707_v20 = vmul.f32 %v19943_v42, %v20669_v58  ;;  %16859 = vmatprep.subr.mxu1 %v20220_v8 }
 0x24e   : > { %v2401_v5 = vadd.f32 %v2305_v49, %v2181_v28  ;;  %v26789_v55 = vrot.slane %v20015_v15, 1  ;;  %v4624_v11 = vsel %vm1874_vm1, %v4621_v31, %v4623_v46  ;;  %v2507_v40 = vmul.f32 %v19943_v42, %v20679_v48  ;;  %16860 = vmatpush3.msra.mxu1 %v20220_v8  ;;  %v20767_v49 = vld [vmem:[%s26017_s1 + $0x5] ss:$0 sm:$0xff] }
 0x24f   : > { %26788 = vst [vmem:[#allocation39_spill] sm:$0xff] %v20707_v20  ;;  %v20717_v56 = vmax.f32 %v5052_v22, %v5338_v25  ;;  %v2728_v3 = vrot.slane %v20677_v54, 1  ;;  %v4857_v38 = vadd.f32 %v4624_v11, %v4297_v26  ;;  %16871 = vmatprep.subr.mxu1 %v20198_v41  ;;  %v26790_v47 = vrot.slane %v20027_v18, 1  ;;  %v26801_v54 = vld [vmem:[#allocation52_spill] sm:$0xff]  ;;  %v20819_v37 = vpop.permute.xlu0 %697 }
 0x250   : > { %v4062_v44 = vsel %vm1313_vm0, %v26789_v55, %v4061_v17  ;;  %v26792_v27 = vrot.slane %v26791_v29, 1  ;;  %v20732_v8 = vmul.f32 %v20648_v51, %v20669_v58  ;;  %v26794_v17 = vld [vmem:[#allocation45_spill] sm:$0xff]  ;;  %v26199_v41 = vrot.slane %v20707_v20, 1 }
 0x251   : > { %v4296_v4 = vadd.f32 %v4062_v44, %v3736_v43  ;;  %v20724_v15 = vsel %vm1313_vm0, %v26790_v47, %v1394_v60  ;;  %v26795_v19 = vrot.slane %v26794_v17, 2  ;;  %v1169_v18 = vmul.f32 %v20648_v51, %v20679_v48 }
 0x252   : > { %v1397_v46 = vsel %vm1313_vm0, %v1394_v60, %v26792_v27  ;;  %26793 = vst [vmem:[#allocation35_spill] sm:$0xff] %v20732_v8  ;;  %v2307_v57 = vmul.f32 %v20743_v50, %v20679_v48  ;;  %v20749_v34 = vmul.f32 %v26796_v39, %v20669_v58  ;;  %v26798_v23 = vrot.slane %v26797_v35, 2 }
 0x253   : > { %v4622_v22 = vsel %vm1874_vm1, %v26795_v19, %v4621_v31  ;;  %v26800_v6 = vrot.slane %v26799_v52, 2  ;;  %v2732_v7 = vrot.slane %v2507_v40, 1  ;;  %v3843_v61 = vmul.f32 %v26796_v39, %v20679_v48  ;;  %v26803_v40 = vld [vmem:[#allocation44_spill] sm:$0xff] }
 0x254   : > { %v26205_v31 = vmax.f32 %v20702_v45, 0.0  ;;  %v4856_v25 = vadd.f32 %v4622_v22, %v4296_v4  ;;  %v20760_v43 = vadd.f32 %v20699_v62, %v4857_v38  ;;  %v26202_v60 = vrot.slane %v20732_v8, 1  ;;  %v26805_v38 = vld [vmem:[#allocation50_spill] sm:$0xff] }
 0x255   : > { %v1954_v28 = vsel %vm1874_vm1, %v26800_v6, %v26798_v23  ;;  %v20771_v55 = vmul.f32 %v20767_v49, %v20669_v58  ;;  %v20775_v44 = vmul.f32 %v20209_v36, %v20669_v58  ;;  %v3067_v11 = vmul.f32 %v20767_v49, %v20679_v48 }
 0x256   : > { %v2183_v26 = vadd.f32 %v1954_v28, %v26801_v54  ;;  %v26804_v4 = vrot.slane %v26803_v40, 2  ;;  %v26806_v47 = vrot.slane %v26805_v38, 2  ;;  %v1398_v27 = vrot.slane %v1169_v18, 1  ;;  %v20797_v18 = vld [vmem:[%s26017_s1 + $0x2] ss:$0 sm:$0xff] }
 0x257   : > { %26802 = vst [vmem:[#allocation36_spill] sm:$0xff] %v20771_v55  ;;  %v3643_v19 = vmul.f32 %v20110_v53, %v20679_v48  ;;  %v26204_v22 = vrot.slane %v20749_v34, 1  ;;  %v2734_v23 = vsel %vm1313_vm0, %v2732_v7, %v26199_v41  ;;  %v4065_v52 = vrot.slane %v3843_v61, 1  ;;  %v26809_v54 = vld [vmem:[#allocation53_spill] sm:$0xff] }
 0x258   : > { %v3287_v29 = vsel %vm1874_vm1, %v26806_v47, %v26804_v4  ;;  %v2403_v17 = vadd.f32 %v2307_v57, %v2183_v26  ;;  %v4403_v6 = vmul.f32 %v20209_v36, %v20679_v48  ;;  %v20792_v28 = vadd.f32 %v1397_v46, %v967_v33 }
 0x259   : > { %v20801_v57 = vmul.f32 %v20797_v18, %v20669_v58  ;;  %v3519_v26 = vadd.f32 %v3287_v29, %v26809_v54  ;;  %v1730_v7 = vmul.f32 %v20797_v18, %v20679_v48  ;;  %v26810_v61 = vrot.slane %v20520_v16, 1 }
 0x25a   : > { %26807 = vst [vmem:[#allocation7_spill] sm:$0xff] %v20792_v28  ;;  %v20810_v33 = vadd.f32 %v20699_v62, %v4856_v25  ;;  %v26203_v46 = vrot.slane %v20771_v55, 2  ;;  %v3292_v38 = vrot.slane %v3067_v11, 2  ;;  %v26206_v47 = vmax.f32 %v20760_v43, 0.0  ;;  %v20825_v25 = vld [vmem:[%s26017_s1] ss:$0 sm:$0xff] }
 0x25b   : > { %26808 = vst [vmem:[#allocation8_spill] sm:$0xff] %v20801_v57  ;;  %v2731_v4 = vsel %vm1313_vm0, %v2728_v3, %v26810_v61  ;;  %v1400_v41 = vsel %vm1313_vm0, %v1398_v27, %v26202_v60  ;;  %v2963_v29 = vadd.f32 %v2734_v23, %v2403_v17  ;;  %v3739_v54 = vadd.f32 %v3643_v19, %v3519_v26  ;;  %v26811_v19 = vld [vmem:[#allocation43_spill] sm:$0xff] }
 0x25c   : > { %v969_v11 = vmul.f32 %v20825_v25, %v20679_v48  ;;  %v4067_v27 = vsel %vm1313_vm0, %v4065_v52, %v26204_v22  ;;  %v4625_v17 = vrot.slane %v4403_v6, 2  ;;  %v26812_v23 = vrot.slane %v26811_v19, 1 }
 0x25d   : > { %v20835_v61 = vadd.f32 %v2731_v4, %v2401_v5  ;;  %v26207_v60 = vrot.slane %v20801_v57, 2  ;;  %v1959_v42 = vrot.slane %v1730_v7, 2  ;;  %v20840_v16 = vmul.f32 %v26796_v39, %v20817_v14  ;;  %v26814_v4 = vld [vmem:[#allocation20_spill] sm:$0xff] }
 0x25e   : > { %v2729_v26 = vsel %vm1313_vm0, %v26812_v23, %v2728_v3  ;;  %v1626_v9 = vadd.f32 %v1400_v41, %v969_v11  ;;  %v3294_v48 = vsel %vm1874_vm1, %v3292_v38, %v26203_v46  ;;  %v3847_v52 = vmul.f32 %v26796_v39, %v20819_v37  ;;  %v26815_v11 = vld [vmem:[#allocation42_spill] sm:$0xff]  ;;  %v20862_v46 = vld [vmem:[%s26017_s1 + $0x4] ss:$0 sm:$0xff] }
 0x25f   : > { %26813 = vst [vmem:[#allocation37_spill] sm:$0xff] %v20840_v16  ;;  %v20849_v3 = vrot.slane %v26205_v31, 1  ;;  %v4299_v6 = vadd.f32 %v4067_v27, %v3739_v54  ;;  %v3523_v7 = vadd.f32 %v3294_v48, %v2963_v29  ;;  %v5339_v41 = vrot.slane %v26206_v47, 1  ;;  %v26819_v31 = vld [vmem:[#allocation40_spill] sm:$0xff] }
 0x260   : > { %v2400_v19 = vadd.f32 %v26815_v11, %v26814_v4  ;;  %v26816_v23 = vrot.slane %v20775_v44, 2  ;;  %v20866_v22 = vmul.f32 %v20862_v46, %v20817_v14  ;;  %v20870_v29 = vmul.f32 %v20209_v36, %v20817_v14 }
 0x261   : > { %v1961_v54 = vsel %vm1874_vm1, %v1959_v42, %v26207_v60  ;;  %v2511_v27 = vmul.f32 %v20862_v46, %v20819_v37  ;;  %v4072_v11 = vrot.slane %v3847_v52, 1  ;;  %v1623_v47 = vadd.f32 %v20724_v15, %v26819_v31 }
 0x262   : > { %v4627_v38 = vsel %vm1874_vm1, %v4625_v17, %v26816_v23  ;;  %26817 = vst [vmem:[#allocation38_spill] sm:$0xff] %v20866_v22  ;;  %26818 = vst [vmem:[#allocation23_spill] sm:$0xff] %v20870_v29  ;;  %v3647_v17 = vmul.f32 %v20110_v53, %v20819_v37  ;;  %v2187_v4 = vadd.f32 %v1961_v54, %v1626_v9  ;;  %v26820_v5 = vrot.slane %v20655_v12, 2 }
 0x263   : > { %v4407_v23 = vmul.f32 %v20209_v36, %v20819_v37  ;;  %v26821_v42 = vrot.slane %v26797_v35, 2  ;;  %v4859_v59 = vadd.f32 %v4627_v38, %v4299_v6  ;;  %v2960_v2 = vadd.f32 %v2729_v26, %v2400_v19 }
 0x264   : > { %v3743_v32 = vadd.f32 %v3647_v17, %v3523_v7  ;;  %v20891_v48 = vmul.f32 %v20648_v51, %v20817_v14  ;;  %v1173_v9 = vmul.f32 %v20648_v51, %v20819_v37  ;;  %v2311_v52 = vmul.f32 %v20743_v50, %v20819_v37 }
 0x265   : > { %v1956_v60 = vsel %vm1874_vm1, %v26821_v42, %v26820_v5  ;;  %v20900_v35 = vmul.f32 %v20767_v49, %v20817_v14  ;;  %v2739_v31 = vrot.slane %v2511_v27, 1  ;;  %v3071_v26 = vmul.f32 %v20767_v49, %v20819_v37 }
 0x266   : > { %26822 = vst [vmem:[#allocation6_spill] sm:$0xff] %v20891_v48  ;;  %v2407_v6 = vadd.f32 %v2311_v52, %v2187_v4  ;;  %v26824_v7 = vrot.slane %v20840_v16, 1  ;;  %v4632_v38 = vrot.slane %v4407_v23, 2  ;;  %v2308_v54 = vmul.f32 %v20743_v50, %v20669_v58 }
 0x267   : > { %26823 = vst [vmem:[#allocation30_spill] sm:$0xff] %v20900_v35  ;;  %v26825_v17 = vrot.slane %v20689_v10, 2  ;;  %v26826_v42 = vrot.slane %v26803_v40, 2  ;;  %v4962_v15 = vadd.f32 %v20699_v62, %v4859_v59  ;;  %v2184_v55 = vadd.f32 %v1956_v60, %v1623_v47  ;;  %v718_v47 = vpop.permute.xlu0 %717 }
 0x268   : > { %v4074_v19 = vsel %vm1313_vm0, %v4072_v11, %v26824_v7  ;;  %v26219_v4 = vrot.slane %v20891_v48, 1  ;;  %v1405_v52 = vrot.slane %v1173_v9, 1  ;;  %v3644_v11 = vmul.f32 %v20110_v53, %v20669_v58  ;;  %v723_v53 = vpop.permute.xlu1 %722 }
 0x269   : > { %v3289_v27 = vsel %vm1874_vm1, %v26826_v42, %v26825_v17  ;;  %v4303_v30 = vadd.f32 %v4074_v19, %v3743_v32  ;;  %v26218_v23 = vrot.slane %v20900_v35, 2  ;;  %v26827_v7 = vrot.slane %v20866_v22, 1 }
 0x26a   : > { %v3520_v5 = vadd.f32 %v3289_v27, %v2960_v2  ;;  %v3299_v40 = vrot.slane %v3071_v26, 2  ;;  %v20925_v17 = vmul.f32 %v20797_v18, %v20817_v14  ;;  %v1734_v2 = vmul.f32 %v20797_v18, %v20819_v37 }
 0x26b   : > { %v2741_v16 = vsel %vm1313_vm0, %v2739_v31, %v26827_v7  ;;  %v26829_v32 = vrot.slane %v20870_v29, 2  ;;  %v26830_v9 = vmax.f32 %v20810_v33, 0.0  ;;  %v26831_v31 = vmax.f32 %v20760_v43, 0.0 }
 0x26c   : > { %26828 = vst [vmem:[#allocation28_spill] sm:$0xff] %v20925_v17  ;;  %v2967_v59 = vadd.f32 %v2741_v16, %v2407_v6  ;;  %v5058_v42 = vmax.f32 %v4962_v15, 0.0  ;;  %v20942_v7 = vmul.f32 %v20825_v25, %v20669_v58  ;;  %v20944_v16 = vadd.f32 %v2308_v54, %v2184_v55 }
 0x26d   : > { %v4634_v60 = vsel %vm1874_vm1, %v4632_v38, %v26829_v32  ;;  %v20934_v19 = vrot.slane %v26830_v9, 1  ;;  %v20938_v26 = vmax.f32 %v26831_v31, %v5339_v41  ;;  %v20946_v6 = vadd.f32 %v3644_v11, %v3520_v5 }
 0x26e   : > { %v4863_v27 = vadd.f32 %v4634_v60, %v4303_v30  ;;  %26832 = vst [vmem:[#allocation24_spill] sm:$0xff] %v20942_v7  ;;  %26833 = vst [vmem:[#allocation29_spill] sm:$0xff] %v20944_v16  ;;  %v1407_v38 = vsel %vm1313_vm0, %v1405_v52, %v26219_v4  ;;  %v973_v32 = vmul.f32 %v20825_v25, %v20819_v37  ;;  %v26224_v41 = vrot.slane %v20925_v17, 2 }
 0x26f   : > { %v20954_v43 = vmul.f32 %v26796_v39, %v723_v53  ;;  %v3301_v30 = vsel %vm1874_vm1, %v3299_v40, %v26218_v23  ;;  %v3851_v58 = vmul.f32 %v26796_v39, %v718_v47  ;;  %v20962_v55 = vmul.f32 %v20825_v25, %v20817_v14 }
 0x270   : > { %v1966_v15 = vrot.slane %v1734_v2, 2  ;;  %v3527_v5 = vadd.f32 %v3301_v30, %v2967_v59  ;;  %v5148_v54 = vrot.slane %v5058_v42, 1  ;;  %v20967_v37 = vmul.f32 %v20743_v50, %v20817_v14  ;;  %v20980_v2 = vld [vmem:[%s26017_s1 + $0x6] ss:$0 sm:$0xff] }
 0x271   : > { %26834 = vst [vmem:[#allocation31_spill] sm:$0xff] %v20954_v43  ;;  %26835 = vst [vmem:[#allocation26_spill] sm:$0xff] %v20962_v55  ;;  %v1630_v52 = vadd.f32 %v1407_v38, %v973_v32  ;;  %v4966_v11 = vadd.f32 %v20699_v62, %v4863_v27  ;;  %v20971_v40 = vmul.f32 %v20648_v51, %v723_v53  ;;  %v4079_v27 = vrot.slane %v3851_v58, 1 }
 0x272   : > { %26836 = vst [vmem:[#allocation27_spill] sm:$0xff] %v20967_v37  ;;  %v20974_v39 = vmul.f32 %v20862_v46, %v723_v53  ;;  %v1177_v60 = vmul.f32 %v20648_v51, %v718_v47  ;;  %v3651_v59 = vmul.f32 %v20980_v2, %v718_v47  ;;  %v20985_v31 = vmul.f32 %v20209_v36, %v723_v53 }
 0x273   : > { %26837 = vst [vmem:[#allocation16_spill] sm:$0xff] %v20971_v40  ;;  %v4411_v38 = vmul.f32 %v20209_v36, %v718_v47  ;;  %v20990_v32 = vmul.f32 %v20980_v2, %v20817_v14  ;;  %v1968_v30 = vsel %vm1874_vm1, %v1966_v15, %v26224_v41  ;;  %v2515_v23 = vmul.f32 %v20862_v46, %v718_v47 }
 0x274   : > { %26838 = vst [vmem:[#allocation15_spill] sm:$0xff] %v20974_v39  ;;  %26839 = vst [vmem:[#allocation45_spill] sm:$0xff] %v20985_v31  ;;  %v3747_v4 = vadd.f32 %v3651_v59, %v3527_v5  ;;  %v20996_v35 = vmax.f32 %v5058_v42, %v5148_v54  ;;  %v5062_v9 = vmax.f32 %v4966_v11, 0.0  ;;  %v20999_v29 = vmul.f32 %v20797_v18, %v723_v53  ;;  %v743_v11 = vpop.permute.xlu1 %742 }
 0x275   : > { %26840 = vst [vmem:[#allocation47_spill] sm:$0xff] %v20990_v32  ;;  %v2191_v58 = vadd.f32 %v1968_v30, %v1630_v52  ;;  %v21004_v14 = vmul.f32 %v20767_v49, %v723_v53  ;;  %v1412_v17 = vrot.slane %v1177_v60, 1  ;;  %v2315_v41 = vmul.f32 %v20743_v50, %v718_v47 }
 0x276   : > { %26841 = vst [vmem:[#allocation41_spill] sm:$0xff] %v20996_v35  ;;  %v26843_v42 = vrot.slane %v20954_v43, 1  ;;  %v4639_v54 = vrot.slane %v4411_v38, 2  ;;  %v21012_v52 = vmul.f32 %v20797_v18, %v718_v47  ;;  %v2746_v59 = vrot.slane %v2515_v23, 1 }
 0x277   : > { %26842 = vst [vmem:[#allocation12_spill] sm:$0xff] %v21004_v14  ;;  %v3075_v30 = vmul.f32 %v20767_v49, %v718_v47  ;;  %v5149_v36 = vrot.slane %v5062_v9, 1  ;;  %v21016_v60 = vmul.f32 %v20825_v25, %v723_v53  ;;  %v21019_v15 = vmul.f32 %v20743_v50, %v723_v53 }
 0x278   : > { %v4081_v5 = vsel %vm1313_vm0, %v4079_v27, %v26843_v42  ;;  %v2411_v35 = vadd.f32 %v2315_v41, %v2191_v58  ;;  %v21023_v27 = vmul.f32 %v20980_v2, %v723_v53  ;;  %v26847_v38 = vrot.slane %v20971_v40, 1 }
 0x279   : > { %v4307_v22 = vadd.f32 %v4081_v5, %v3747_v4  ;;  %26844 = vst [vmem:[#allocation52_spill] sm:$0xff] %v21016_v60  ;;  %26845 = vst [vmem:[#allocation44_spill] sm:$0xff] %v21019_v15  ;;  %v21029_v42 = vmul.f32 %v20648_v51, %v743_v11  ;;  %v977_v5 = vmul.f32 %v20825_v25, %v718_v47  ;;  %v26849_v60 = vrot.slane %v20985_v31, 2 }
 0x27a   : > { %26846 = vst [vmem:[#allocation50_spill] sm:$0xff] %v21023_v27  ;;  %v1414_v23 = vsel %vm1313_vm0, %v1412_v17, %v26847_v38  ;;  %v21037_v58 = vmul.f32 %v20797_v18, %v743_v11  ;;  %v26851_v43 = vrot.slane %v20974_v39, 1  ;;  %v3306_v38 = vrot.slane %v3075_v30, 2  ;;  %v26865_v39 = vld [vmem:[#allocation25_spill] sm:$0xff] }
 0x27b   : > { %26848 = vst [vmem:[#allocation53_spill] sm:$0xff] %v21029_v42  ;;  %v4641_v41 = vsel %vm1874_vm1, %v4639_v54, %v26849_v60  ;;  %v21043_v27 = vmax.f32 %v5062_v9, %v5149_v36  ;;  %v21045_v4 = vadd.f32 %v1414_v23, %v977_v5  ;;  %v21050_v54 = vld [vmem:[%s26017_s1 + $0x7] ss:$0 sm:$0xff]  ;;  %v21056_v53 = vmul.f32 %v20825_v25, %v743_v11 }
 0x27c   : > { %26850 = vst [vmem:[#allocation43_spill] sm:$0xff] %v21037_v58  ;;  %v2748_v17 = vsel %vm1313_vm0, %v2746_v59, %v26851_v43  ;;  %v4867_v40 = vadd.f32 %v4641_v41, %v4307_v22  ;;  %v21053_v60 = vmul.f32 %v21050_v54, %v743_v11  ;;  %v21060_v22 = vmul.f32 %v20743_v50, %v743_v11  ;;  %v26860_v58 = vld [vmem:[#allocation34_spill] sm:$0xff] }
 0x27d   : > { %26852 = vst [vmem:[#allocation20_spill] sm:$0xff] %v21043_v27  ;;  %v2971_v47 = vadd.f32 %v2748_v17, %v2411_v35  ;;  %26853 = vst [vmem:[#allocation42_spill] sm:$0xff] %v21056_v53  ;;  %v21063_v9 = vmul.f32 %v20862_v46, %v743_v11  ;;  %v21065_v35 = vpop.permute.xlu0 %737  ;;  %v21069_v59 = vmul.f32 %v20767_v49, %v743_v11  ;;  %v26857_v23 = vmax.f32 %v20558_v0, 0.0  ;;  %v21083_v17 = vld [vmem:[%s26017_s1 + $0x8] ss:$0 sm:$0xff] }
 0x27e   : > { %26854 = vst [vmem:[#allocation40_spill] sm:$0xff] %v21060_v22  ;;  %v21072_v30 = vmul.f32 %v20980_v2, %v743_v11  ;;  %v21078_v41 = vadd.f32 %v20699_v62, %v4867_v40  ;;  %v21086_v36 = vmul.f32 %v21083_v17, %v743_v11  ;;  %v26858_v43 = vrot.slane %v21004_v14, 2 }
 0x27f   : > { %26855 = vst [vmem:[#allocation54_spill] sm:$0xff] %v21063_v9  ;;  %v5290_v5 = vmax.f32 %v26857_v23, %v20694_v13  ;;  %v26859_v22 = vmax.f32 %v20810_v33, 0.0  ;;  %v21097_v23 = vmul.f32 %v21050_v54, %v21065_v35  ;;  %v26863_v14 = vmax.f32 %v20702_v45, 0.0 }
 0x280   : > { %26856 = vst [vmem:[#allocation55_spill] sm:$0xff] %v21072_v30  ;;  %v3308_v53 = vsel %vm1874_vm1, %v3306_v38, %v26858_v43  ;;  %v26861_v30 = vld [vmem:[#allocation17_spill] sm:$0xff]  ;;  %v26864_v38 = vld [vmem:[#allocation51_spill] sm:$0xff]  ;;  %v5531_v33 = vrot.slane %v26865_v39, 1  ;;  %v5915_v45 = vrot.slane %v20938_v26, 1  ;;  %v5962_v48 = vrot.slane %v20717_v56, 2 }
 0x281   : > { %v5291_v0 = vmax.f32 %v26859_v22, %v20934_v19  ;;  %v3531_v40 = vadd.f32 %v3308_v53, %v2971_v47  ;;  %v26862_v27 = vmax.f32 %v26861_v30, 0.0  ;;  %v5483_v31 = vmax.f32 %v26863_v14, %v20849_v3 }
 0x282   : > { %v5530_v43 = vrot.slane %v26864_v38, 1  ;;  %v5578_v19 = vrot.slane %v26864_v38, 2  ;;  %v5579_v53 = vrot.slane %v26865_v39, 2  ;;  %v5626_v47 = vrot.slane %v26864_v38, 3 }
 0x283   : > { %v5482_v11 = vmax.f32 %v26862_v27, %v26860_v58  ;;  %v5627_v22 = vrot.slane %v26865_v39, 3  ;;  %v5698_v13 = vrot.slane %v5290_v5, 4  ;;  %v5699_v15 = vrot.slane %v5291_v0, 4 }
 0x284   : > { %v5746_v30 = vrot.slane %v5290_v5, 5  ;;  %v5914_v27 = vrot.slane %v20717_v56, 1  ;;  %v5747_v3 = vrot.slane %v5291_v0, 5  ;;  %v5794_v14 = vrot.slane %v5290_v5, 6 }
 0x285   : > { %v5795_v58 = vrot.slane %v5291_v0, 6  ;;  %v5842_v55 = vrot.slane %v5290_v5, 7  ;;  %v5963_v32 = vrot.slane %v20938_v26, 2  ;;  %v6131_v37 = vsel %vm6122_vm2, %v26864_v38, %v5530_v43 }
 0x286   : > { %v6132_v57 = vsel %vm6122_vm2, %v26865_v39, %v5531_v33  ;;  %v5843_v16 = vrot.slane %v5291_v0, 7  ;;  %v6010_v7 = vrot.slane %v20717_v56, 3  ;;  %v6156_v20 = vsel %vm6147_vm3, %v6131_v37, %v5578_v19 }
 0x287   : > { %v6157_v8 = vsel %vm6147_vm3, %v6132_v57, %v5579_v53  ;;  %v6181_v28 = vsel %vm6172_vm4, %v6156_v20, %v5626_v47  ;;  %v6303_v12 = vsel %vm6122_vm2, %v20717_v56, %v5914_v27  ;;  %v6304_v38 = vsel %vm6122_vm2, %v20938_v26, %v5915_v45 }
 0x288   : > { %v6182_v5 = vsel %vm6172_vm4, %v6157_v8, %v5627_v22  ;;  %v6011_v43 = vrot.slane %v20938_v26, 3  ;;  %v6082_v39 = vrot.slane %v5482_v11, 4  ;;  %v6206_v0 = vsel %vm6197_vm5, %v6181_v28, %v5698_v13  ;;  %v21140_v13 = vpop.permute.xlu1 %692 }
 0x289   : > { %v6207_v33 = vsel %vm6197_vm5, %v6182_v5, %v5699_v15  ;;  %v6231_v37 = vsel %vm6222_vm6, %v6206_v0, %v5746_v30  ;;  %v6327_v20 = vsel %vm6147_vm3, %v6303_v12, %v5962_v48  ;;  %v6328_v8 = vsel %vm6147_vm3, %v6304_v38, %v5963_v32  ;;  %v21142_v15 = vpop.permute.xlu0 %687 }
 0x28a   : > { %v6232_v57 = vsel %vm6222_vm6, %v6207_v33, %v5747_v3  ;;  %v6083_v19 = vrot.slane %v5483_v31, 4  ;;  %v6255_v56 = vsel %vm1874_vm1, %v6231_v37, %v5794_v14  ;;  %v6351_v26 = vsel %vm6172_vm4, %v6327_v20, %v6010_v7 }
 0x28b   : > { %v6256_v53 = vsel %vm1874_vm1, %v6232_v57, %v5795_v58  ;;  %v3655_v28 = vmul.f32 %v20980_v2, %v21065_v35  ;;  %v6279_v11 = vsel %vm1313_vm0, %v6255_v56, %v5842_v55  ;;  %v6352_v48 = vsel %vm6172_vm4, %v6328_v8, %v6011_v43 }
 0x28c   : > { %v6280_v12 = vsel %vm1313_vm0, %v6256_v53, %v5843_v16  ;;  %v4086_v31 = vrot.slane %v21097_v23, 1  ;;  %v6375_v32 = vsel %vm6197_vm5, %v6351_v26, %v6082_v39  ;;  %v6376_v47 = vsel %vm6197_vm5, %v6352_v48, %v6083_v19 }
 0x28d   : > { %v21150_v7 = vmax.f32 %v6279_v11, %v6280_v12  ;;  %v26239_v22 = vrot.slane %v21063_v9, 1  ;;  %v26867_v30 = vrot.slane %v20999_v29, 2  ;;  %v26868_v27 = vrot.slane %v21012_v52, 2  ;;  %v26912_v9 = vld [vmem:[#allocation44_spill] sm:$0xff] }
 0x28e   : > { %v4415_v16 = vmul.f32 %v21083_v17, %v21065_v35  ;;  %v21160_v45 = vmax.f32 %v6375_v32, %v6376_v47  ;;  %v3751_v23 = vadd.f32 %v3655_v28, %v3531_v40  ;;  %v3846_v3 = vmul.f32 %v21050_v54, %v21140_v13 }
 0x28f   : > { %26866 = vst [vmem:[#allocation34_spill] sm:$0xff] %v21150_v7  ;;  %v1975_v55 = vsel %vm1874_vm1, %v26868_v27, %v26867_v30  ;;  %v3845_v14 = vmul.f32 %v21050_v54, %v21142_v15  ;;  %v6759_v58 = vrot.slane %v21150_v7, 1  ;;  %v1181_v38 = vmul.f32 %v20648_v51, %v21065_v35 }
 0x290   : > { %26869 = vst [vmem:[#allocation17_spill] sm:$0xff] %v21160_v45  ;;  %v2195_v52 = vadd.f32 %v1975_v55, %v21045_v4  ;;  %v21172_v43 = vrot.slane %v21160_v45, 1  ;;  %v5066_v40 = vmax.f32 %v21078_v41, 0.0  ;;  %v26240_v39 = vrot.slane %v21086_v36, 2 }
 0x291   : > { %v21178_v0 = vmul.f32 %v20797_v18, %v21065_v35  ;;  %v26871_v33 = vrot.slane %v21053_v60, 1  ;;  %v4646_v57 = vrot.slane %v4415_v16, 2  ;;  %v3646_v4 = vmul.f32 %v20980_v2, %v21140_v13  ;;  %v21229_v16 = vld [vmem:[%s26019_s3 + $0x10] sm:$0xff] }
 0x292   : > { %26870 = vst [vmem:[#allocation51_spill] sm:$0xff] %v21172_v43  ;;  %v3645_v20 = vmul.f32 %v20980_v2, %v21142_v15  ;;  %v21189_v41 = vsel %vm1313_vm0, %v6759_v58, %v21172_v43  ;;  %v4070_v19 = vrot.slane %v3846_v3, 1  ;;  %v26873_v56 = vrot.slane %v20536_v24, 2 }
 0x293   : > { %v4088_v37 = vsel %vm1313_vm0, %v4086_v31, %v26871_v33  ;;  %26872 = vst [vmem:[#allocation25_spill] sm:$0xff] %v21189_v41  ;;  %v26874_v53 = vrot.slane %v20689_v10, 2  ;;  %v4068_v28 = vrot.slane %v3845_v14, 1  ;;  %16854 = vmatprep.mubr.msk.f32.mxu0 %vm6425_vm7, %v21189_v41  ;;  %v981_v11 = vmul.f32 %v20825_v25, %v21065_v35 }
 0x294   : > { %v4311_v8 = vadd.f32 %v4088_v37, %v3751_v23  ;;  %v1419_v12 = vrot.slane %v1181_v38, 1  ;;  %v2519_v48 = vmul.f32 %v20862_v46, %v21065_v35  ;;  %16855 = vmatmul.mubr.msk.f32.vlgmr.msra.gmra.mxu0 %vm6425_vm7, %v21172_v43  ;;  %v2319_v24 = vmul.f32 %v20743_v50, %v21065_v35 }
 0x295   : > { %v3291_v26 = vsel %vm1874_vm1, %v26874_v53, %v26873_v56  ;;  %v21209_v10 = vmul.f32 %v20767_v49, %v21065_v35  ;;  %v4406_v32 = vmul.f32 %v21083_v17, %v21140_v13  ;;  %v4405_v47 = vmul.f32 %v21083_v17, %v21142_v15  ;;  %v26889_v53 = vld [vmem:[#allocation29_spill] sm:$0xff] }
 0x296   : > { %v3521_v31 = vadd.f32 %v3291_v26, %v20835_v61  ;;  %v21218_v61 = vld [vmem:[%s26019_s3 + $0x18] sm:$0xff]  ;;  %v4648_v35 = vsel %vm1874_vm1, %v4646_v57, %v26240_v39  ;;  %v3742_v27 = vadd.f32 %v3646_v4, %v20663_v63  ;;  %v5150_v23 = vrot.slane %v5066_v40, 1 }
 0x297   : > { %16865 = vmatpush3.msra.mxu0 %v21218_v61  ;;  %v2415_v3 = vadd.f32 %v2319_v24, %v2195_v52  ;;  %v4871_v14 = vadd.f32 %v4648_v35, %v4311_v8  ;;  %v4071_v58 = vsel %vm1313_vm0, %v4068_v28, %v4070_v19  ;;  %v26875_v38 = vrot.slane %v21029_v42, 1 }
 0x298   : > { %v3741_v55 = vadd.f32 %v3645_v20, %v3521_v31  ;;  %16866 = vmatprep.subr.mxu0 %v21229_v16  ;;  %v2753_v63 = vrot.slane %v2519_v48, 1  ;;  %v1172_v37 = vmul.f32 %v20648_v51, %v21140_v13  ;;  %v2310_v57 = vmul.f32 %v20743_v50, %v21140_v13 }
 0x299   : > { %16867 = vmatpush3.msra.mxu0 %v21229_v16  ;;  %v1421_v33 = vsel %vm1313_vm0, %v1419_v12, %v26875_v38  ;;  %v2510_v52 = vmul.f32 %v20862_v46, %v21140_v13  ;;  %v4630_v4 = vrot.slane %v4406_v32, 2  ;;  %v26876_v20 = vrot.slane %v20749_v34, 1 }
 0x29a   : > { %16878 = vmatprep.subr.mxu0 %v21218_v61  ;;  %v4628_v56 = vrot.slane %v4405_v47, 2  ;;  %v4302_v26 = vadd.f32 %v4070_v19, %v3742_v27  ;;  %v1171_v12 = vmul.f32 %v20648_v51, %v21142_v15  ;;  %v4301_v48 = vadd.f32 %v4071_v58, %v3741_v55 }
 0x29b   : > { %v4069_v8 = vsel %vm1313_vm0, %v26876_v20, %v4068_v28  ;;  %v21250_v31 = vmax.f32 %v5066_v40, %v5150_v23  ;;  %v21252_v24 = vadd.f32 %v1421_v33, %v981_v11  ;;  %v4974_v35 = vadd.f32 %v20699_v62, %v4871_v14 }
 0x29c   : > { %v2509_v32 = vmul.f32 %v20862_v46, %v21142_v15  ;;  %v2755_v34 = vsel %vm1313_vm0, %v2753_v63, %v26239_v22  ;;  %v972_v19 = vmul.f32 %v20825_v25, %v21140_v13  ;;  %v1403_v28 = vrot.slane %v1172_v37, 1 }
 0x29d   : > { %26877 = vst [vmem:[#allocation56_spill] sm:$0xff] %v21250_v31  ;;  %v4300_v47 = vadd.f32 %v4069_v8, %v20946_v6  ;;  %v21265_v40 = vmul.f32 %v20797_v18, %v21140_v13  ;;  %v2406_v11 = vadd.f32 %v2310_v57, %v20637_v1  ;;  %v2737_v27 = vrot.slane %v2510_v52, 1 }
 0x29e   : > { %v4631_v55 = vsel %vm1874_vm1, %v4628_v56, %v4630_v4  ;;  %v3070_v23 = vmul.f32 %v20767_v49, %v21140_v13  ;;  %v4862_v14 = vadd.f32 %v4630_v4, %v4302_v26  ;;  %v1401_v58 = vrot.slane %v1171_v12, 1  ;;  %v26881_v12 = vld [vmem:[#allocation18_spill] sm:$0xff] }
 0x29f   : > { %v4861_v38 = vadd.f32 %v4631_v55, %v4301_v48  ;;  %v5070_v33 = vmax.f32 %v4974_v35, 0.0  ;;  %v21273_v63 = vmul.f32 %v20797_v18, %v21142_v15  ;;  %v2735_v6 = vrot.slane %v2509_v32, 1 }
 0x2a0   : > { %v26878_v37 = vrot.slane %v20775_v44, 2  ;;  %v21278_v1 = vadd.f32 %v2755_v34, %v2415_v3  ;;  %v1629_v57 = vadd.f32 %v1403_v28, %v972_v19  ;;  %v2309_v52 = vmul.f32 %v20743_v50, %v21142_v15  ;;  %v26884_v34 = vld [vmem:[#allocation35_spill] sm:$0xff] }
 0x2a1   : > { %v1964_v4 = vrot.slane %v21265_v40, 2  ;;  %v2966_v8 = vadd.f32 %v2737_v27, %v2406_v11  ;;  %v26880_v26 = vrot.slane %v20513_v21, 2  ;;  %v26882_v48 = vrot.slane %v26881_v12, 2  ;;  %v26896_v40 = vld [vmem:[#allocation47_spill] sm:$0xff] }
 0x2a2   : > { %v4629_v20 = vsel %vm1874_vm1, %v26878_v37, %v4628_v56  ;;  %26879 = vst [vmem:[#allocation57_spill] sm:$0xff] %v21278_v1  ;;  %v3069_v44 = vmul.f32 %v20767_v49, %v21142_v15  ;;  %v21291_v3 = vadd.f32 %v20699_v62, %v4862_v14  ;;  %v26883_v56 = vld [vmem:[#allocation7_spill] sm:$0xff]  ;;  %v26885_v19 = vrot.slane %v26884_v34, 1  ;;  %v713_v34 = vpop.permute.xlu1 %712 }
 0x2a3   : > { %v4860_v13 = vadd.f32 %v4629_v20, %v4300_v47  ;;  %v1958_v35 = vsel %vm1874_vm1, %v26882_v48, %v26880_v26  ;;  %v4964_v11 = vadd.f32 %v20699_v62, %v4861_v38  ;;  %v5151_v55 = vrot.slane %v5070_v33, 1  ;;  %v26886_v20 = vld [vmem:[#allocation39_spill] sm:$0xff] }
 0x2a4   : > { %v2185_v32 = vadd.f32 %v1958_v35, %v26883_v56  ;;  %v1402_v47 = vsel %vm1313_vm0, %v26885_v19, %v1401_v58  ;;  %v3297_v21 = vrot.slane %v3070_v23, 2  ;;  %v1962_v37 = vrot.slane %v21273_v63, 2  ;;  %v26888_v23 = vld [vmem:[#allocation24_spill] sm:$0xff] }
 0x2a5   : > { %v26887_v26 = vrot.slane %v26886_v20, 1  ;;  %v2190_v14 = vadd.f32 %v1964_v4, %v1629_v57  ;;  %v1404_v48 = vsel %vm1313_vm0, %v1401_v58, %v1403_v28  ;;  %v21306_v56 = vadd.f32 %v20699_v62, %v4860_v13 }
 0x2a6   : > { %v2405_v35 = vadd.f32 %v2309_v52, %v2185_v32  ;;  %v971_v38 = vmul.f32 %v20825_v25, %v21142_v15  ;;  %v1627_v19 = vadd.f32 %v1402_v47, %v26888_v23  ;;  %v2738_v63 = vsel %vm1313_vm0, %v2735_v6, %v2737_v27  ;;  %v26891_v52 = vld [vmem:[#allocation8_spill] sm:$0xff] }
 0x2a7   : > { %v2736_v12 = vsel %vm1313_vm0, %v26887_v26, %v2735_v6  ;;  %v3295_v20 = vrot.slane %v3069_v44, 2  ;;  %v3526_v22 = vadd.f32 %v3297_v21, %v2966_v8  ;;  %v26241_v26 = vmax.f32 %v21291_v3, 0.0  ;;  %v708_v8 = vpop.permute.xlu0 %707 }
 0x2a8   : > { %v2964_v57 = vadd.f32 %v2736_v12, %v26889_v53  ;;  %v5060_v5 = vmax.f32 %v4964_v11, 0.0  ;;  %v21314_v28 = vmax.f32 %v5070_v33, %v5151_v55  ;;  %v1628_v58 = vadd.f32 %v1404_v48, %v971_v38  ;;  %v26893_v53 = vld [vmem:[#allocation36_spill] sm:$0xff] }
 0x2a9   : > { %v26892_v13 = vrot.slane %v26891_v52, 2  ;;  %v1176_v15 = vmul.f32 %v20648_v51, %v713_v34  ;;  %v2965_v30 = vadd.f32 %v2738_v63, %v2405_v35  ;;  %v26242_v47 = vmax.f32 %v21306_v56, 0.0 }
 0x2aa   : > { %26890 = vst [vmem:[#allocation18_spill] sm:$0xff] %v21314_v28  ;;  %v3650_v27 = vmul.f32 %v20980_v2, %v713_v34  ;;  %v3850_v6 = vmul.f32 %v21050_v54, %v713_v34  ;;  %v26894_v11 = vrot.slane %v26893_v53, 2  ;;  %v2314_v55 = vmul.f32 %v20743_v50, %v713_v34 }
 0x2ab   : > { %v1963_v32 = vsel %vm1874_vm1, %v26892_v13, %v1962_v37  ;;  %v21328_v12 = vmul.f32 %v20862_v46, %v713_v34  ;;  %v21332_v48 = vrot.slane %v26241_v26, 1  ;;  %v5340_v38 = vrot.slane %v5060_v5, 1 }
 0x2ac   : > { %v2188_v44 = vadd.f32 %v1963_v32, %v1627_v19  ;;  %v3296_v33 = vsel %vm1874_vm1, %v26894_v11, %v3295_v20  ;;  %v3746_v23 = vadd.f32 %v3650_v27, %v3526_v22  ;;  %v1410_v63 = vrot.slane %v1176_v15, 1 }
 0x2ad   : > { %v3524_v35 = vadd.f32 %v3296_v33, %v2964_v57  ;;  %v2410_v52 = vadd.f32 %v2314_v55, %v2190_v14  ;;  %v3298_v19 = vsel %vm1874_vm1, %v3295_v20, %v3297_v21  ;;  %v3849_v13 = vmul.f32 %v21050_v54, %v708_v8 }
 0x2ae   : > { %v21338_v32 = vrot.slane %v26242_v47, 1  ;;  %v4077_v53 = vrot.slane %v3850_v6, 1  ;;  %v4410_v11 = vmul.f32 %v21083_v17, %v713_v34  ;;  %v3525_v39 = vadd.f32 %v3298_v19, %v2965_v30 }
 0x2af   : > { %v976_v26 = vmul.f32 %v20825_v25, %v713_v34  ;;  %v21343_v57 = vmul.f32 %v20797_v18, %v713_v34  ;;  %v2744_v22 = vrot.slane %v21328_v12, 1  ;;  %v1175_v14 = vmul.f32 %v20648_v51, %v708_v8 }
 0x2b0   : > { %v21347_v21 = vmax.f32 %v5060_v5, %v5340_v38  ;;  %v21350_v20 = vmul.f32 %v20767_v49, %v713_v34  ;;  %v4306_v15 = vadd.f32 %v4077_v53, %v3746_v23  ;;  %v3649_v27 = vmul.f32 %v20980_v2, %v708_v8 }
 0x2b1   : > { %v1633_v6 = vadd.f32 %v1410_v63, %v976_v26  ;;  %v2970_v33 = vadd.f32 %v2744_v22, %v2410_v52  ;;  %v4075_v30 = vrot.slane %v3849_v13, 1  ;;  %v4409_v55 = vmul.f32 %v21083_v17, %v708_v8  ;;  %v26895_v13 = vld [vmem:[#allocation27_spill] sm:$0xff] }
 0x2b2   : > { %v4637_v19 = vrot.slane %v4410_v11, 2  ;;  %v1965_v12 = vsel %vm1874_vm1, %v1962_v37, %v1964_v4  ;;  %v21358_v47 = vmul.f32 %v20797_v18, %v708_v8  ;;  %v3745_v5 = vadd.f32 %v3649_v27, %v3525_v39 }
 0x2b3   : > { %v26252_v34 = vrot.slane %v21343_v57, 2  ;;  %v2189_v38 = vadd.f32 %v1965_v12, %v1628_v58  ;;  %v1408_v23 = vrot.slane %v1175_v14, 1  ;;  %v2513_v43 = vmul.f32 %v20862_v46, %v708_v8 }
 0x2b4   : > { %v3304_v26 = vrot.slane %v21350_v20, 2  ;;  %v4866_v52 = vadd.f32 %v4637_v19, %v4306_v15  ;;  %v2408_v41 = vadd.f32 %v26895_v13, %v2188_v44  ;;  %v3073_v11 = vmul.f32 %v20767_v49, %v708_v8  ;;  %v733_v20 = vpop.permute.xlu1 %732  ;;  %v26897_v44 = vld [vmem:[#allocation6_spill] sm:$0xff] }
 0x2b5   : > { %v3744_v45 = vadd.f32 %v26896_v40, %v3524_v35  ;;  %v2313_v4 = vmul.f32 %v20743_v50, %v708_v8  ;;  %v4078_v37 = vsel %vm1313_vm0, %v4075_v30, %v4077_v53  ;;  %v4635_v39 = vrot.slane %v4409_v55, 2 }
 0x2b6   : > { %v2194_v58 = vadd.f32 %v26252_v34, %v1633_v6  ;;  %v3530_v14 = vadd.f32 %v3304_v26, %v2970_v33  ;;  %v1969_v27 = vrot.slane %v21358_v47, 2  ;;  %v4305_v12 = vadd.f32 %v4078_v37, %v3745_v5  ;;  %v26899_v6 = vld [vmem:[#allocation37_spill] sm:$0xff] }
 0x2b7   : > { %v975_v15 = vmul.f32 %v20825_v25, %v708_v8  ;;  %v26898_v13 = vrot.slane %v26897_v44, 1  ;;  %v2409_v35 = vadd.f32 %v2313_v4, %v2189_v38  ;;  %v2742_v40 = vrot.slane %v2513_v43, 1  ;;  %v26902_v43 = vld [vmem:[#allocation28_spill] sm:$0xff] }
 0x2b8   : > { %v21376_v28 = vadd.f32 %v20699_v62, %v4866_v52  ;;  %v1411_v53 = vsel %vm1313_vm0, %v1408_v23, %v1410_v63  ;;  %v3302_v55 = vrot.slane %v3073_v11, 2  ;;  %v26900_v33 = vrot.slane %v26899_v6, 1  ;;  %v753_v47 = vpop.permute.xlu1 %752 }
 0x2b9   : > { %v1409_v7 = vsel %vm1313_vm0, %v26898_v13, %v1408_v23  ;;  %v4638_v37 = vsel %vm1874_vm1, %v4635_v39, %v4637_v19  ;;  %v3654_v8 = vmul.f32 %v20980_v2, %v733_v20  ;;  %v3854_v44 = vmul.f32 %v21050_v54, %v733_v20  ;;  %v26901_v13 = vld [vmem:[#allocation26_spill] sm:$0xff] }
 0x2ba   : > { %v4076_v34 = vsel %vm1313_vm0, %v26900_v33, %v4075_v30  ;;  %v1631_v38 = vadd.f32 %v1409_v7, %v26901_v13  ;;  %v26903_v52 = vrot.slane %v26902_v43, 2  ;;  %v4865_v23 = vadd.f32 %v4638_v37, %v4305_v12  ;;  %v26906_v13 = vld [vmem:[#allocation23_spill] sm:$0xff] }
 0x2bb   : > { %v4304_v5 = vadd.f32 %v4076_v34, %v3744_v45  ;;  %v21392_v11 = vmul.f32 %v20648_v51, %v733_v20  ;;  %v1632_v30 = vadd.f32 %v1411_v53, %v975_v15  ;;  %v26904_v45 = vld [vmem:[#allocation38_spill] sm:$0xff]  ;;  %v2745_v4 = vsel %vm1313_vm0, %v2742_v40, %v2744_v22 }
 0x2bc   : > { %v1970_v63 = vsel %vm1874_vm1, %v26903_v52, %v1969_v27  ;;  %v26905_v34 = vrot.slane %v26904_v45, 1  ;;  %v3750_v6 = vadd.f32 %v3654_v8, %v3530_v14  ;;  %v26254_v7 = vmax.f32 %v21376_v28, 0.0  ;;  %v728_v45 = vpop.permute.xlu0 %727  ;;  %v26908_v14 = vld [vmem:[#allocation30_spill] sm:$0xff] }
 0x2bd   : > { %v2969_v33 = vadd.f32 %v2745_v4, %v2409_v35  ;;  %v26907_v31 = vrot.slane %v26906_v13, 2  ;;  %v2318_v12 = vmul.f32 %v20743_v50, %v733_v20  ;;  %v21404_v52 = vmul.f32 %v20862_v46, %v733_v20 }
 0x2be   : > { %v2743_v19 = vsel %vm1313_vm0, %v26905_v34, %v2742_v40  ;;  %v4084_v15 = vrot.slane %v3854_v44, 1  ;;  %v21407_v53 = vmul.f32 %v21083_v17, %v733_v20  ;;  %v26909_v40 = vrot.slane %v26908_v14, 2 }
 0x2bf   : > { %v4636_v43 = vsel %vm1874_vm1, %v26907_v31, %v4635_v39  ;;  %v2968_v22 = vadd.f32 %v2743_v19, %v2408_v41  ;;  %v4968_v8 = vadd.f32 %v20699_v62, %v4865_v23  ;;  %v1417_v31 = vrot.slane %v21392_v11, 1 }
 0x2c0   : > { %v4864_v37 = vadd.f32 %v4636_v43, %v4304_v5  ;;  %v3303_v35 = vsel %vm1874_vm1, %v26909_v40, %v3302_v55  ;;  %v2192_v39 = vadd.f32 %v1970_v63, %v1631_v38  ;;  %v980_v5 = vmul.f32 %v20825_v25, %v733_v20 }
 0x2c1   : > { %v2414_v34 = vadd.f32 %v2318_v12, %v2194_v58  ;;  %v4310_v4 = vadd.f32 %v4084_v15, %v3750_v6  ;;  %v21416_v44 = vmul.f32 %v20797_v18, %v733_v20  ;;  %v21419_v13 = vmul.f32 %v20767_v49, %v733_v20 }
 0x2c2   : > { %v3305_v41 = vsel %vm1874_vm1, %v3302_v55, %v3304_v26  ;;  %v3853_v19 = vmul.f32 %v21050_v54, %v728_v45  ;;  %v21424_v43 = vadd.f32 %v20699_v62, %v4864_v37  ;;  %v2751_v23 = vrot.slane %v21404_v52, 1 }
 0x2c3   : > { %v4644_v38 = vrot.slane %v21407_v53, 2  ;;  %v3529_v63 = vadd.f32 %v3305_v41, %v2969_v33  ;;  %v21430_v58 = vrot.slane %v26254_v7, 1  ;;  %v5064_v11 = vmax.f32 %v4968_v8, 0.0 }
 0x2c4   : > { %v1637_v6 = vadd.f32 %v1417_v31, %v980_v5  ;;  %v1179_v20 = vmul.f32 %v20648_v51, %v728_v45  ;;  %v3528_v12 = vadd.f32 %v3303_v35, %v2968_v22  ;;  %v2974_v26 = vadd.f32 %v2751_v23, %v2414_v34 }
 0x2c5   : > { %v4870_v55 = vadd.f32 %v4644_v38, %v4310_v4  ;;  %v3653_v14 = vmul.f32 %v20980_v2, %v728_v45  ;;  %v26257_v37 = vrot.slane %v21416_v44, 2  ;;  %v26258_v52 = vrot.slane %v21419_v13, 2 }
 0x2c6   : > { %v4082_v40 = vrot.slane %v3853_v19, 1  ;;  %v4413_v33 = vmul.f32 %v21083_v17, %v728_v45  ;;  %v21439_v41 = vmul.f32 %v20797_v18, %v728_v45  ;;  %v2517_v8 = vmul.f32 %v20862_v46, %v728_v45 }
 0x2c7   : > { %v3749_v51 = vadd.f32 %v3653_v14, %v3529_v63  ;;  %v5341_v22 = vrot.slane %v5064_v11, 1  ;;  %v2198_v35 = vadd.f32 %v26257_v37, %v1637_v6  ;;  %v26910_v5 = vrot.slane %v21343_v57, 2  ;;  %v26913_v14 = vld [vmem:[#allocation50_spill] sm:$0xff] }
 0x2c8   : > { %v1415_v4 = vrot.slane %v1179_v20, 1  ;;  %v3534_v19 = vadd.f32 %v26258_v52, %v2974_v26  ;;  %v21452_v7 = vadd.f32 %v20699_v62, %v4870_v55  ;;  %v2412_v63 = vadd.f32 %v26912_v9, %v2192_v39  ;;  %v26915_v9 = vld [vmem:[#allocation16_spill] sm:$0xff] }
 0x2c9   : > { %v1972_v34 = vsel %vm1874_vm1, %v1969_v27, %v26910_v5  ;;  %v3748_v42 = vadd.f32 %v26913_v14, %v3528_v12  ;;  %v3077_v6 = vmul.f32 %v20767_v49, %v728_v45  ;;  %v4085_v57 = vsel %vm1313_vm0, %v4082_v40, %v4084_v15 }
 0x2ca   : > { %26911 = vst [vmem:[#allocation7_spill] sm:$0xff] %v21452_v7  ;;  %v2193_v53 = vadd.f32 %v1972_v34, %v1632_v30  ;;  %v4642_v37 = vrot.slane %v4413_v33, 2  ;;  %v26914_v27 = vmax.f32 %v21424_v43, 0.0  ;;  %v26260_v5 = vrot.slane %v21439_v41, 2  ;;  %v26917_v34 = vld [vmem:[#allocation31_spill] sm:$0xff] }
 0x2cb   : > { %v2749_v26 = vrot.slane %v2517_v8, 1  ;;  %v4309_v52 = vadd.f32 %v4085_v57, %v3749_v51  ;;  %v21461_v62 = vmax.f32 %v5064_v11, %v5341_v22  ;;  %v979_v30 = vmul.f32 %v20825_v25, %v728_v45  ;;  %v21476_v11 = vld [vmem:[%s26017_s1 + $0x1] ss:$0 sm:$0xff] }
 0x2cc   : > { %v5245_v20 = vrot.slane %v26914_v27, 1  ;;  %v26916_v39 = vrot.slane %v26915_v9, 1  ;;  %v2317_v55 = vmul.f32 %v20743_v50, %v728_v45  ;;  %v1418_v33 = vsel %vm1313_vm0, %v1415_v4, %v1417_v31  ;;  %v26919_v9 = vld [vmem:[#allocation52_spill] sm:$0xff] }
 0x2cd   : > { %v26918_v14 = vrot.slane %v26917_v34, 1  ;;  %v21479_v8 = vmul.f32 %v21476_v11, %v753_v47  ;;  %v3309_v22 = vrot.slane %v3077_v6, 2  ;;  %v4645_v45 = vsel %vm1874_vm1, %v4642_v37, %v4644_v38 }
 0x2ce   : > { %v1416_v12 = vsel %vm1313_vm0, %v26916_v39, %v1415_v4  ;;  %v2413_v51 = vadd.f32 %v2317_v55, %v2193_v53  ;;  %v26920_v31 = vrot.slane %v20999_v29, 2  ;;  %v26921_v4 = vld [vmem:[#allocation15_spill] sm:$0xff]  ;;  %v4869_v15 = vadd.f32 %v4645_v45, %v4309_v52  ;;  %v26926_v29 = vld [vmem:[#allocation45_spill] sm:$0xff] }
 0x2cf   : > { %v4083_v27 = vsel %vm1313_vm0, %v26918_v14, %v4082_v40  ;;  %v1635_v39 = vadd.f32 %v1416_v12, %v26919_v9  ;;  %v26922_v34 = vrot.slane %v26921_v4, 1  ;;  %v21491_v1 = vadd.f32 %v1418_v33, %v979_v30 }
 0x2d0   : > { %v4308_v57 = vadd.f32 %v4083_v27, %v3748_v42  ;;  %v1977_v40 = vsel %vm1874_vm1, %v26920_v31, %v26260_v5  ;;  %v2752_v53 = vsel %vm1313_vm0, %v2749_v26, %v2751_v23  ;;  %v21495_v38 = vmul.f32 %v20797_v18, %v753_v47  ;;  %v26928_v23 = vld [vmem:[#allocation12_spill] sm:$0xff] }
 0x2d1   : > { %v2750_v14 = vsel %vm1313_vm0, %v26922_v34, %v2749_v26  ;;  %v26924_v6 = vmax.f32 %v21452_v7, 0.0  ;;  %v26927_v55 = vrot.slane %v26926_v29, 2  ;;  %v26259_v9 = vrot.slane %v21479_v8, 1 }
 0x2d2   : > { %v2972_v42 = vadd.f32 %v2750_v14, %v2412_v63  ;;  %26923 = vst [vmem:[#allocation35_spill] sm:$0xff] %v21495_v38  ;;  %v21506_v52 = vmul.f32 %v20862_v46, %v753_v47  ;;  %v21508_v30 = vadd.f32 %v2752_v53, %v2413_v51  ;;  %v26929_v63 = vrot.slane %v26928_v23, 2 }
 0x2d3   : > { %v21499_v12 = vrot.slane %v26924_v6, 1  ;;  %v4643_v27 = vsel %vm1874_vm1, %v26927_v55, %v4642_v37  ;;  %v2322_v33 = vmul.f32 %v20743_v50, %v753_v47  ;;  %v21514_v45 = vadd.f32 %v1977_v40, %v1635_v39  ;;  %v21519_v37 = vld [vmem:[%s26018_s2] ss:$0 sm:$0xff] }
 0x2d4   : > { %v3310_v18 = vsel %vm1874_vm1, %v26929_v63, %v3309_v22  ;;  %v4868_v26 = vadd.f32 %v4643_v27, %v4308_v57  ;;  %v21522_v31 = vadd.f32 %v21519_v37, %v4869_v15  ;;  %v984_v46 = vmul.f32 %v20825_v25, %v753_v47  ;;  %v26935_v63 = vld [vmem:[#allocation41_spill] sm:$0xff] }
 0x2d5   : > { %26925 = vst [vmem:[#allocation39_spill] sm:$0xff] %v21499_v12  ;;  %v21526_v51 = vmul.f32 %v21050_v54, %v753_v47  ;;  %v21528_v4 = vadd.f32 %v3310_v18, %v2972_v42  ;;  %v21531_v50 = vadd.f32 %v2322_v33, %v2198_v35  ;;  %v3658_v39 = vmul.f32 %v20980_v2, %v753_v47 }
 0x2d6   : > { %v1641_v40 = vadd.f32 %v26259_v9, %v984_v46  ;;  %v21538_v15 = vmul.f32 %v20767_v49, %v753_v47  ;;  %v26930_v25 = vmax.f32 %v21306_v56, 0.0  ;;  %v21544_v53 = vadd.f32 %v21519_v37, %v4868_v26 }
 0x2d7   : > { %v3754_v42 = vadd.f32 %v3658_v39, %v3534_v19  ;;  %v21547_v35 = vmul.f32 %v21083_v17, %v753_v47  ;;  %v26931_v6 = vmax.f32 %v21424_v43, 0.0  ;;  %v26932_v49 = vrot.slane %v21419_v13, 2  ;;  %v26936_v43 = vld [vmem:[#allocation20_spill] sm:$0xff] }
 0x2d8   : > { %v5292_v14 = vmax.f32 %v26930_v25, %v21338_v32  ;;  %v26933_v56 = vmax.f32 %v21291_v3, 0.0  ;;  %v26934_v19 = vmax.f32 %v21376_v28, 0.0  ;;  %v5532_v18 = vrot.slane %v26935_v63, 1 }
 0x2d9   : > { %v5293_v29 = vmax.f32 %v26931_v6, %v5245_v20  ;;  %v3312_v23 = vsel %vm1874_vm1, %v3309_v22, %v26932_v49  ;;  %v5533_v20 = vrot.slane %v26936_v43, 1  ;;  %v5580_v26 = vrot.slane %v26935_v63, 2 }
 0x2da   : > { %v5484_v32 = vmax.f32 %v26933_v56, %v21332_v48  ;;  %v5485_v47 = vmax.f32 %v26934_v19, %v21430_v58  ;;  %v5581_v33 = vrot.slane %v26936_v43, 2  ;;  %v5628_v13 = vrot.slane %v26935_v63, 3 }
 0x2db   : > { %v5629_v22 = vrot.slane %v26936_v43, 3  ;;  %v5700_v46 = vrot.slane %v5292_v14, 4  ;;  %v5701_v39 = vrot.slane %v5293_v29, 4  ;;  %v5748_v3 = vrot.slane %v5292_v14, 5 }
 0x2dc   : > { %v5916_v48 = vrot.slane %v21347_v21, 1  ;;  %v5917_v28 = vrot.slane %v21461_v62, 1  ;;  %v5749_v58 = vrot.slane %v5293_v29, 5  ;;  %v5796_v25 = vrot.slane %v5292_v14, 6 }
 0x2dd   : > { %v5797_v6 = vrot.slane %v5293_v29, 6  ;;  %v5844_v49 = vrot.slane %v5292_v14, 7  ;;  %v5964_v56 = vrot.slane %v21347_v21, 2  ;;  %v5965_v19 = vrot.slane %v21461_v62, 2 }
 0x2de   : > { %v6133_v9 = vsel %vm6122_vm2, %v26935_v63, %v5532_v18  ;;  %v6134_v5 = vsel %vm6122_vm2, %v26936_v43, %v5533_v20  ;;  %v5845_v55 = vrot.slane %v5293_v29, 7  ;;  %v6012_v27 = vrot.slane %v21347_v21, 3  ;;  %v21585_v18 = vpop.permute.xlu0 %747 }
 0x2df   : > { %v6158_v34 = vsel %vm6147_vm3, %v6133_v9, %v5580_v26  ;;  %v6159_v57 = vsel %vm6147_vm3, %v6134_v5, %v5581_v33  ;;  %v6305_v12 = vsel %vm6122_vm2, %v21347_v21, %v5916_v48  ;;  %v6306_v63 = vsel %vm6122_vm2, %v21461_v62, %v5917_v28 }
 0x2e0   : > { %v6183_v7 = vsel %vm6172_vm4, %v6158_v34, %v5628_v13  ;;  %v6184_v14 = vsel %vm6172_vm4, %v6159_v57, %v5629_v22  ;;  %v6013_v29 = vrot.slane %v21461_v62, 3  ;;  %v6084_v43 = vrot.slane %v5484_v32, 4 }
 0x2e1   : > { %v6208_v20 = vsel %vm6197_vm5, %v6183_v7, %v5700_v46  ;;  %v6209_v9 = vsel %vm6197_vm5, %v6184_v14, %v5701_v39  ;;  %v6329_v57 = vsel %vm6147_vm3, %v6305_v12, %v5964_v56  ;;  %v6330_v21 = vsel %vm6147_vm3, %v6306_v63, %v5965_v19 }
 0x2e2   : > { %v6233_v5 = vsel %vm6222_vm6, %v6208_v20, %v5748_v3  ;;  %v6234_v34 = vsel %vm6222_vm6, %v6209_v9, %v5749_v58  ;;  %v6085_v26 = vrot.slane %v5485_v47, 4  ;;  %v6353_v62 = vsel %vm6172_vm4, %v6329_v57, %v6012_v27  ;;  %v26946_v20 = vld [vmem:[#allocation55_spill] sm:$0xff] }
 0x2e3   : > { %v6257_v33 = vsel %vm1874_vm1, %v6233_v5, %v5796_v25  ;;  %v6258_v13 = vsel %vm1874_vm1, %v6234_v34, %v5797_v6  ;;  %v3857_v7 = vmul.f32 %v21050_v54, %v21585_v18  ;;  %v6354_v46 = vsel %vm6172_vm4, %v6330_v21, %v6013_v29  ;;  %v21658_v21 = vld [vmem:[%s26017_s1] ss:$0 sm:$0xff] }
 0x2e4   : > { %v6281_v32 = vsel %vm1313_vm0, %v6257_v33, %v5844_v49  ;;  %v6282_v22 = vsel %vm1313_vm0, %v6258_v13, %v5845_v55  ;;  %v3533_v12 = vadd.f32 %v3312_v23, %v21508_v30  ;;  %v6377_v39 = vsel %vm6197_vm5, %v6353_v62, %v6084_v43  ;;  %v21673_v13 = vpop.permute.xlu1 %762  ;;  %v21675_v62 = vpop.permute.xlu0 %757 }
 0x2e5   : > { %v6378_v47 = vsel %vm6197_vm5, %v6354_v46, %v6085_v26  ;;  %v21605_v3 = vmax.f32 %v6281_v32, %v6282_v22  ;;  %v26938_v48 = vrot.slane %v21495_v38, 2  ;;  %v26939_v28 = vrot.slane %v21506_v52, 1  ;;  %v21667_v26 = vld [vmem:[%s26017_s1 + $0x2] ss:$0 sm:$0xff] }
 0x2e6   : > { %v26262_v55 = vrot.slane %v21538_v15, 2  ;;  %v21615_v25 = vmax.f32 %v6377_v39, %v6378_v47  ;;  %v26263_v30 = vmax.f32 %v21544_v53, 0.0  ;;  %v26941_v23 = vrot.slane %v21526_v51, 1 }
 0x2e7   : > { %26937 = vst [vmem:[#allocation24_spill] sm:$0xff] %v21605_v3  ;;  %v21609_v27 = vadd.f32 %v26938_v48, %v1641_v40  ;;  %v2978_v58 = vadd.f32 %v26939_v28, %v21531_v50  ;;  %v3657_v49 = vmul.f32 %v20980_v2, %v21585_v18  ;;  %v6843_v56 = vrot.slane %v21605_v3, 1 }
 0x2e8   : > { %26940 = vst [vmem:[#allocation29_spill] sm:$0xff] %v21615_v25  ;;  %v4314_v6 = vadd.f32 %v26941_v23, %v3754_v42  ;;  %v4651_v40 = vrot.slane %v21547_v35, 2  ;;  %v4089_v19 = vrot.slane %v3857_v7, 1  ;;  %v4417_v50 = vmul.f32 %v21083_v17, %v21585_v18  ;;  %v21682_v7 = vld [vmem:[%s26017_s1 + $0x4] ss:$0 sm:$0xff] }
 0x2e9   : > { %v21627_v14 = vrot.slane %v21615_v25, 1  ;;  %v26943_v63 = vmax.f32 %v21522_v31, 0.0  ;;  %v26944_v43 = vrot.slane %v21416_v44, 2  ;;  %v26945_v42 = vrot.slane %v21439_v41, 2  ;;  %v21712_v31 = vld [vmem:[%s26017_s1 + $0x5] ss:$0 sm:$0xff] }
 0x2ea   : > { %v3752_v9 = vadd.f32 %v26946_v20, %v21528_v4  ;;  %v3753_v35 = vadd.f32 %v3657_v49, %v3533_v12  ;;  %v21640_v5 = vadd.f32 %v26262_v55, %v2978_v58  ;;  %v21645_v57 = vmul.f32 %v21476_v11, %v21585_v18  ;;  %v21703_v58 = vld [vmem:[%s26017_s1 + $0x3] ss:$0 sm:$0xff] }
 0x2eb   : > { %26942 = vst [vmem:[#allocation8_spill] sm:$0xff] %v21627_v14  ;;  %v5342_v29 = vrot.slane %v26943_v63, 1  ;;  %v1979_v2 = vsel %vm1874_vm1, %v26945_v42, %v26944_v43  ;;  %v21649_v44 = vsel %vm1313_vm0, %v6843_v56, %v21627_v14  ;;  %v21653_v41 = vrot.slane %v26263_v30, 1 }
 0x2ec   : > { %v2197_v34 = vadd.f32 %v1979_v2, %v21491_v1  ;;  %26947 = vst [vmem:[#allocation36_spill] sm:$0xff] %v21649_v44  ;;  %v4874_v4 = vadd.f32 %v4651_v40, %v4314_v6  ;;  %v21662_v1 = vmul.f32 %v21658_v21, %v21585_v18  ;;  %v21671_v33 = vmul.f32 %v21667_v26, %v21585_v18 }
 0x2ed   : > { %16861 = vmatprep.mubr.msk.f32.mxu1 %vm6425_vm7, %v21649_v44  ;;  %v21686_v32 = vmul.f32 %v21682_v7, %v21585_v18  ;;  %v26949_v22 = vrot.slane %v21053_v60, 1  ;;  %v26950_v12 = vmov %v26941_v23  ;;  %v4649_v47 = vrot.slane %v4417_v50, 2 }
 0x2ee   : > { %26948 = vst [vmem:[#allocation27_spill] sm:$0xff] %v21671_v33  ;;  %v4092_v39 = vsel %vm1313_vm0, %v4089_v19, %v26950_v12  ;;  %16862 = vmatmul.mubr.msk.f32.vlgmr.msra.gmra.mxu1 %vm6425_vm7, %v21627_v14  ;;  %v26951_v48 = vmov %v26943_v63  ;;  %v2321_v60 = vmul.f32 %v21703_v58, %v21585_v18  ;;  %v1422_v6 = vrot.slane %v21645_v57, 1 }
 0x2ef   : > { %v4090_v46 = vsel %vm1313_vm0, %v26949_v22, %v4089_v19  ;;  %v21698_v28 = vmax.f32 %v26951_v48, %v5342_v29  ;;  %v4313_v51 = vadd.f32 %v4092_v39, %v3753_v35  ;;  %16872 = vmatpush3.msra.mxu1 %v21218_v61  ;;  %v21716_v49 = vmul.f32 %v21712_v31, %v21585_v18 }
 0x2f0   : > { %v4312_v23 = vadd.f32 %v4090_v46, %v3752_v9  ;;  %v21720_v56 = vmul.f32 %v21682_v7, %v21673_v13  ;;  %v2523_v19 = vmul.f32 %v21682_v7, %v21675_v62  ;;  %16873 = vmatprep.subr.mxu1 %v21229_v16  ;;  %v21726_v50 = vadd.f32 %v21519_v37, %v4874_v4 }
 0x2f1   : > { %v21731_v29 = vmul.f32 %v21050_v54, %v21673_v13  ;;  %v3859_v18 = vmul.f32 %v21050_v54, %v21675_v62  ;;  %16874 = vmatpush3.msra.mxu1 %v21229_v16  ;;  %v2417_v43 = vadd.f32 %v2321_v60, %v2197_v34  ;;  %v2756_v42 = vrot.slane %v21686_v32, 1  ;;  %v26955_v32 = vld [vmem:[#allocation43_spill] sm:$0xff] }
 0x2f2   : > { %26952 = vst [vmem:[#allocation47_spill] sm:$0xff] %v21720_v56  ;;  %v26953_v2 = vrot.slane %v21086_v36, 2  ;;  %v4652_v9 = vsel %vm1874_vm1, %v4649_v47, %v4651_v40  ;;  %16885 = vmatprep.subr.mxu1 %v21218_v61  ;;  %v21744_v4 = vmul.f32 %v21476_v11, %v21673_v13  ;;  %v2323_v16 = vmul.f32 %v21703_v58, %v21675_v62  ;;  %v21757_v61 = vld [vmem:[%s26017_s1 + $0x6] ss:$0 sm:$0xff] }
 0x2f3   : > { %v4873_v57 = vadd.f32 %v4652_v9, %v4313_v51  ;;  %v26264_v34 = vrot.slane %v21720_v56, 1  ;;  %v26956_v22 = vrot.slane %v26955_v32, 2  ;;  %v26957_v36 = vrot.slane %v21178_v0, 2 }
 0x2f4   : > { %v4650_v20 = vsel %vm1874_vm1, %v26953_v2, %v4649_v47  ;;  %26954 = vst [vmem:[#allocation6_spill] sm:$0xff] %v21744_v4  ;;  %v2760_v40 = vrot.slane %v2523_v19, 1  ;;  %v3659_v12 = vmul.f32 %v21757_v61, %v21675_v62  ;;  %v26265_v39 = vrot.slane %v21731_v29, 1  ;;  %v26961_v19 = vld [vmem:[#allocation57_spill] sm:$0xff] }
 0x2f5   : > { %v4872_v35 = vadd.f32 %v4650_v20, %v4312_v23  ;;  %v1982_v46 = vsel %vm1874_vm1, %v26957_v36, %v26956_v22  ;;  %v26958_v48 = vrot.slane %v21069_v59, 2  ;;  %v26959_v60 = vrot.slane %v21209_v10, 2 }
 0x2f6   : > { %v2199_v47 = vadd.f32 %v1982_v46, %v21252_v24  ;;  %v4093_v23 = vrot.slane %v3859_v18, 1  ;;  %v21770_v51 = vmul.f32 %v21712_v31, %v21673_v13  ;;  %v1185_v20 = vmul.f32 %v21476_v11, %v21675_v62 }
 0x2f7   : > { %v3315_v0 = vsel %vm1874_vm1, %v26959_v60, %v26958_v48  ;;  %v3083_v9 = vmul.f32 %v21712_v31, %v21675_v62  ;;  %v26962_v24 = vrot.slane %v21479_v8, 1  ;;  %v21782_v10 = vmul.f32 %v21083_v17, %v21673_v13 }
 0x2f8   : > { %26960 = vst [vmem:[#allocation37_spill] sm:$0xff] %v21770_v51  ;;  %v3535_v2 = vadd.f32 %v3315_v0, %v26961_v19  ;;  %v2419_v18 = vadd.f32 %v2323_v16, %v2199_v47  ;;  %v4419_v36 = vmul.f32 %v21083_v17, %v21675_v62  ;;  %v21787_v46 = vadd.f32 %v21519_v37, %v4872_v35  ;;  %v26964_v19 = vld [vmem:[#allocation53_spill] sm:$0xff]  ;;  %v26968_v47 = vld [vmem:[#allocation54_spill] sm:$0xff] }
 0x2f9   : > { %v1425_v22 = vsel %vm1313_vm0, %v1422_v6, %v26962_v24  ;;  %26963 = vst [vmem:[#allocation26_spill] sm:$0xff] %v21782_v10  ;;  %v21790_v48 = vadd.f32 %v21519_v37, %v4873_v57  ;;  %v2762_v8 = vsel %vm1313_vm0, %v2760_v40, %v26264_v34  ;;  %v26269_v0 = vmax.f32 %v21726_v50, 0.0 }
 0x2fa   : > { %v3755_v60 = vadd.f32 %v3659_v12, %v3535_v2  ;;  %v26965_v24 = vrot.slane %v26964_v19, 1  ;;  %v4095_v17 = vsel %vm1313_vm0, %v4093_v23, %v26265_v39  ;;  %v26267_v35 = vrot.slane %v21744_v4, 1 }
 0x2fb   : > { %v26266_v57 = vrot.slane %v21770_v51, 2  ;;  %v1426_v55 = vrot.slane %v1185_v20, 1  ;;  %v3320_v30 = vrot.slane %v3083_v9, 2  ;;  %v21806_v40 = vadd.f32 %v1425_v22, %v21662_v1 }
 0x2fc   : > { %v1423_v16 = vsel %vm1313_vm0, %v26965_v24, %v1422_v6  ;;  %v26268_v12 = vrot.slane %v21782_v10, 2  ;;  %v2979_v2 = vadd.f32 %v2762_v8, %v2419_v18  ;;  %v4653_v19 = vrot.slane %v4419_v36, 2  ;;  %v21809_v6 = vpop.permute.xlu1 %782  ;;  %v21811_v24 = vpop.permute.xlu0 %777 }
 0x2fd   : > { %26966 = vst [vmem:[#allocation28_spill] sm:$0xff] %v21806_v40  ;;  %v26967_v34 = vrot.slane %v21506_v52, 1  ;;  %v26270_v39 = vmax.f32 %v21787_v46, 0.0  ;;  %v5072_v20 = vmax.f32 %v21790_v48, 0.0  ;;  %v4315_v9 = vadd.f32 %v4095_v17, %v3755_v60  ;;  %v26972_v48 = vld [vmem:[#allocation40_spill] sm:$0xff] }
 0x2fe   : > { %v26969_v1 = vrot.slane %v26968_v47, 1  ;;  %v21825_v18 = vmul.f32 %v21667_v26, %v21673_v13  ;;  %v1746_v52 = vmul.f32 %v21667_v26, %v21675_v62  ;;  %v21834_v36 = vmul.f32 %v21050_v54, %v21809_v6 }
 0x2ff   : > { %v2759_v23 = vsel %vm1313_vm0, %v2756_v42, %v26967_v34  ;;  %v1428_v34 = vsel %vm1313_vm0, %v1426_v55, %v26267_v35  ;;  %v2416_v8 = vadd.f32 %v26972_v48, %v21514_v45  ;;  %v985_v60 = vmul.f32 %v21658_v21, %v21675_v62 }
 0x300   : > { %v2757_v22 = vsel %vm1313_vm0, %v26969_v1, %v2756_v42  ;;  %v21821_v63 = vadd.f32 %v2759_v23, %v2417_v43  ;;  %26970 = vst [vmem:[#allocation38_spill] sm:$0xff] %v21825_v18  ;;  %26971 = vst [vmem:[#allocation23_spill] sm:$0xff] %v21834_v36  ;;  %v3322_v43 = vsel %vm1874_vm1, %v3320_v30, %v26266_v57  ;;  %v21850_v17 = vrot.slane %v26269_v0, 1 }
 0x301   : > { %v3863_v42 = vmul.f32 %v21050_v54, %v21811_v24  ;;  %v4655_v55 = vsel %vm1874_vm1, %v4653_v19, %v26268_v12  ;;  %v3539_v47 = vadd.f32 %v3322_v43, %v2979_v2  ;;  %v21854_v30 = vrot.slane %v26270_v39, 1  ;;  %v21863_v2 = vld [vmem:[%s26017_s1 + $0x8] ss:$0 sm:$0xff] }
 0x302   : > { %v5343_v54 = vrot.slane %v5072_v20, 1  ;;  %v4875_v23 = vadd.f32 %v4655_v55, %v4315_v9  ;;  %v26279_v45 = vrot.slane %v21825_v18, 2  ;;  %v1642_v1 = vadd.f32 %v1428_v34, %v985_v60  ;;  %v26974_v34 = vld [vmem:[#allocation42_spill] sm:$0xff] }
 0x303   : > { %v1987_v48 = vrot.slane %v1746_v52, 2  ;;  %v3663_v62 = vmul.f32 %v21757_v61, %v21811_v24  ;;  %v21867_v43 = vmul.f32 %v21863_v2, %v21809_v6  ;;  %v4100_v57 = vrot.slane %v3863_v42, 1 }
 0x304   : > { %v4423_v9 = vmul.f32 %v21863_v2, %v21811_v24  ;;  %v1639_v52 = vadd.f32 %v1423_v16, %v26974_v34  ;;  %v26975_v60 = vrot.slane %v21671_v33, 2  ;;  %v26976_v55 = vrot.slane %v26955_v32, 2 }
 0x305   : > { %26973 = vst [vmem:[#allocation30_spill] sm:$0xff] %v21867_v43  ;;  %v2976_v12 = vadd.f32 %v2757_v22, %v2416_v8  ;;  %v3759_v0 = vadd.f32 %v3663_v62, %v3539_v47  ;;  %v2324_v39 = vmul.f32 %v21703_v58, %v21673_v13  ;;  %v4978_v19 = vadd.f32 %v21519_v37, %v4875_v23 }
 0x306   : > { %v1984_v35 = vsel %vm1874_vm1, %v26976_v55, %v26975_v60  ;;  %v21882_v42 = vmul.f32 %v21476_v11, %v21809_v6  ;;  %v1189_v16 = vmul.f32 %v21476_v11, %v21811_v24  ;;  %v26978_v34 = vrot.slane %v21716_v49, 2 }
 0x307   : > { %v26979_v32 = vrot.slane %v21069_v59, 2  ;;  %v21893_v22 = vmul.f32 %v21682_v7, %v21809_v6  ;;  %v1989_v8 = vsel %vm1874_vm1, %v1987_v48, %v26279_v45  ;;  %v2527_v47 = vmul.f32 %v21682_v7, %v21811_v24 }
 0x308   : > { %26977 = vst [vmem:[#allocation44_spill] sm:$0xff] %v21882_v42  ;;  %v26281_v23 = vrot.slane %v21867_v43, 2  ;;  %v2203_v62 = vadd.f32 %v1989_v8, %v1642_v1  ;;  %v26981_v55 = vrot.slane %v21834_v36, 1  ;;  %v4660_v14 = vrot.slane %v4423_v9, 2 }
 0x309   : > { %v3317_v60 = vsel %vm1874_vm1, %v26979_v32, %v26978_v34  ;;  %26980 = vst [vmem:[#allocation50_spill] sm:$0xff] %v21893_v22  ;;  %v2200_v34 = vadd.f32 %v1984_v35, %v1639_v52  ;;  %v3660_v44 = vmul.f32 %v21757_v61, %v21673_v13  ;;  %v5074_v3 = vmax.f32 %v4978_v19, 0.0 }
 0x30a   : > { %v4102_v59 = vsel %vm1313_vm0, %v4100_v57, %v26981_v55  ;;  %v3536_v32 = vadd.f32 %v3317_v60, %v2976_v12  ;;  %v26282_v48 = vrot.slane %v21882_v42, 1  ;;  %v1433_v45 = vrot.slane %v1189_v16, 1 }
 0x30b   : > { %v4319_v25 = vadd.f32 %v4102_v59, %v3759_v0  ;;  %v2327_v51 = vmul.f32 %v21703_v58, %v21811_v24  ;;  %v21912_v8 = vmul.f32 %v21712_v31, %v21809_v6  ;;  %v2767_v57 = vrot.slane %v2527_v47, 1 }
 0x30c   : > { %v3087_v35 = vmul.f32 %v21712_v31, %v21811_v24  ;;  %v21918_v0 = vmul.f32 %v21667_v26, %v21809_v6  ;;  %v1750_v12 = vmul.f32 %v21667_v26, %v21811_v24  ;;  %v4662_v9 = vsel %vm1874_vm1, %v4660_v14, %v26281_v23 }
 0x30d   : > { %26982 = vst [vmem:[#allocation16_spill] sm:$0xff] %v21912_v8  ;;  %v2423_v19 = vadd.f32 %v2327_v51, %v2203_v62  ;;  %v21925_v52 = vmax.f32 %v5072_v20, %v5343_v54  ;;  %v21929_v16 = vmul.f32 %v21658_v21, %v21673_v13  ;;  %v21931_v60 = vadd.f32 %v2324_v39, %v2200_v34  ;;  %v803_v51 = vpop.permute.xlu1 %802  ;;  %v798_v54 = vpop.permute.xlu0 %797 }
 0x30e   : > { %26983 = vst [vmem:[#allocation31_spill] sm:$0xff] %v21918_v0  ;;  %v4879_v47 = vadd.f32 %v4662_v9, %v4319_v25  ;;  %v21933_v55 = vadd.f32 %v3660_v44, %v3536_v32  ;;  %v5152_v59 = vrot.slane %v5074_v3, 1  ;;  %v21937_v1 = vmul.f32 %v21658_v21, %v21809_v6 }
 0x30f   : > { %26984 = vst [vmem:[#allocation52_spill] sm:$0xff] %v21929_v16  ;;  %26985 = vst [vmem:[#allocation15_spill] sm:$0xff] %v21931_v60  ;;  %v1435_v14 = vsel %vm1313_vm0, %v1433_v45, %v26282_v48  ;;  %v26286_v20 = vrot.slane %v21912_v8, 2  ;;  %v989_v13 = vmul.f32 %v21658_v21, %v21811_v24  ;;  %v26988_v39 = vrot.slane %v21893_v22, 1 }
 0x310   : > { %26986 = vst [vmem:[#allocation45_spill] sm:$0xff] %v21933_v55  ;;  %26987 = vst [vmem:[#allocation12_spill] sm:$0xff] %v21937_v1  ;;  %v3327_v44 = vrot.slane %v3087_v35, 2  ;;  %v26289_v62 = vrot.slane %v21918_v0, 2  ;;  %v21951_v34 = vmul.f32 %v21703_v58, %v21809_v6  ;;  %v1994_v32 = vrot.slane %v1750_v12, 2 }
 0x311   : > { %v2769_v25 = vsel %vm1313_vm0, %v2767_v57, %v26988_v39  ;;  %v21955_v9 = vmul.f32 %v21757_v61, %v21809_v6  ;;  %v1646_v23 = vadd.f32 %v1435_v14, %v989_v13  ;;  %v4982_v24 = vadd.f32 %v21519_v37, %v4879_v47  ;;  %v21969_v12 = vld [vmem:[%s26017_s1 + $0x7] ss:$0 sm:$0xff] }
 0x312   : > { %26989 = vst [vmem:[#allocation41_spill] sm:$0xff] %v21951_v34  ;;  %v2983_v45 = vadd.f32 %v2769_v25, %v2423_v19  ;;  %v21959_v48 = vmul.f32 %v21476_v11, %v803_v51  ;;  %v21961_v57 = vmax.f32 %v5074_v3, %v5152_v59  ;;  %v21964_v35 = vmul.f32 %v21658_v21, %v803_v51 }
 0x313   : > { %26990 = vst [vmem:[#allocation20_spill] sm:$0xff] %v21955_v9  ;;  %v21972_v19 = vmul.f32 %v21969_v12, %v803_v51  ;;  %v1193_v6 = vmul.f32 %v21476_v11, %v798_v54  ;;  %v21976_v47 = vmul.f32 %v21667_v26, %v803_v51  ;;  %v21979_v14 = vmul.f32 %v21703_v58, %v803_v51 }
 0x314   : > { %26991 = vst [vmem:[#allocation55_spill] sm:$0xff] %v21959_v48  ;;  %26992 = vst [vmem:[#allocation43_spill] sm:$0xff] %v21961_v57  ;;  %v3329_v3 = vsel %vm1874_vm1, %v3327_v44, %v26286_v20  ;;  %v3867_v59 = vmul.f32 %v21969_v12, %v798_v54  ;;  %v21986_v13 = vmul.f32 %v21682_v7, %v803_v51  ;;  %v823_v44 = vpop.permute.xlu1 %822  ;;  %v5967_v18 = vrot.slane %v21925_v52, 2 }
 0x315   : > { %26993 = vst [vmem:[#allocation57_spill] sm:$0xff] %v21964_v35  ;;  %26994 = vst [vmem:[#allocation53_spill] sm:$0xff] %v21972_v19  ;;  %v1996_v39 = vsel %vm1874_vm1, %v1994_v32, %v26289_v62  ;;  %v3543_v25 = vadd.f32 %v3329_v3, %v2983_v45  ;;  %v2531_v57 = vmul.f32 %v21682_v7, %v798_v54  ;;  %v5078_v35 = vmax.f32 %v4982_v24, 0.0 }
 0x316   : > { %26995 = vst [vmem:[#allocation54_spill] sm:$0xff] %v21979_v14  ;;  %26996 = vst [vmem:[#allocation40_spill] sm:$0xff] %v21986_v13  ;;  %v21994_v14 = vmul.f32 %v21712_v31, %v803_v51  ;;  %v2207_v8 = vadd.f32 %v1996_v39, %v1646_v23  ;;  %v21998_v20 = vmul.f32 %v21863_v2, %v803_v51  ;;  %v1440_v22 = vrot.slane %v1193_v6, 1 }
 0x317   : > { %v3667_v0 = vmul.f32 %v21757_v61, %v798_v54  ;;  %v22002_v32 = vmul.f32 %v21667_v26, %v798_v54  ;;  %v2331_v45 = vmul.f32 %v21703_v58, %v798_v54  ;;  %v4107_v24 = vrot.slane %v3867_v59, 1 }
 0x318   : > { %26997 = vst [vmem:[#allocation42_spill] sm:$0xff] %v21994_v14  ;;  %26998 = vst [vmem:[#allocation58_spill] sm:$0xff] %v21998_v20  ;;  %v4427_v3 = vmul.f32 %v21863_v2, %v798_v54  ;;  %v2774_v43 = vrot.slane %v2531_v57, 1  ;;  %v3091_v23 = vmul.f32 %v21712_v31, %v798_v54  ;;  %v5153_v36 = vrot.slane %v5078_v35, 1 }
 0x319   : > { %v3763_v39 = vadd.f32 %v3667_v0, %v3543_v25  ;;  %v22010_v1 = vmul.f32 %v21757_v61, %v803_v51  ;;  %v2427_v34 = vadd.f32 %v2331_v45, %v2207_v8  ;;  %v993_v9 = vmul.f32 %v21658_v21, %v798_v54  ;;  %v22025_v8 = vpop.permute.xlu0 %817 }
 0x31a   : > { %v27000_v62 = vrot.slane %v21959_v48, 1  ;;  %v27001_v25 = vrot.slane %v21972_v19, 1  ;;  %v4667_v60 = vrot.slane %v4427_v3, 2  ;;  %v22023_v51 = vmul.f32 %v21476_v11, %v823_v44 }
 0x31b   : > { %26999 = vst [vmem:[#allocation59_spill] sm:$0xff] %v22010_v1  ;;  %v27002_v45 = vrot.slane %v21986_v13, 1  ;;  %v3334_v42 = vrot.slane %v3091_v23, 2  ;;  %v22038_v3 = vmul.f32 %v21969_v12, %v823_v44  ;;  %v22044_v19 = vmul.f32 %v21703_v58, %v823_v44 }
 0x31c   : > { %v1442_v57 = vsel %vm1313_vm0, %v1440_v22, %v27000_v62  ;;  %v4109_v6 = vsel %vm1313_vm0, %v4107_v24, %v27001_v25  ;;  %v22031_v22 = vmul.f32 %v21658_v21, %v823_v44  ;;  %v22033_v62 = vmax.f32 %v5078_v35, %v5153_v36 }
 0x31d   : > { %v2776_v54 = vsel %vm1313_vm0, %v2774_v43, %v27002_v45  ;;  %v4323_v59 = vadd.f32 %v4109_v6, %v3763_v39  ;;  %v22035_v0 = vadd.f32 %v1442_v57, %v993_v9  ;;  %v22041_v25 = vmul.f32 %v21667_v26, %v823_v44  ;;  %27005 = vst [vmem:[#allocation62_spill] sm:$0xff] %v22044_v19 }
 0x31e   : > { %27003 = vst [vmem:[#allocation60_spill] sm:$0xff] %v22031_v22  ;;  %27004 = vst [vmem:[#allocation61_spill] sm:$0xff] %v22033_v62  ;;  %v2987_v24 = vadd.f32 %v2776_v54, %v2427_v34  ;;  %v22047_v43 = vmul.f32 %v21682_v7, %v823_v44  ;;  %v22051_v23 = vmul.f32 %v21969_v12, %v22025_v8  ;;  %v27006_v36 = vrot.slane %v21998_v20, 2 }
 0x31f   : > { %v22058_v35 = vmul.f32 %v21712_v31, %v823_v44  ;;  %v22061_v39 = vmul.f32 %v21757_v61, %v823_v44  ;;  %v27009_v57 = vrot.slane %v21994_v14, 2  ;;  %v27010_v54 = vmax.f32 %v21544_v53, 0.0 }
 0x320   : > { %v4669_v34 = vsel %vm1874_vm1, %v4667_v60, %v27006_v36  ;;  %v27011_v60 = vmax.f32 %v21787_v46, 0.0  ;;  %v22076_v19 = vmul.f32 %v21863_v2, %v823_v44  ;;  %v5966_v48 = vrot.slane %v21698_v28, 2 }
 0x321   : > { %27007 = vst [vmem:[#allocation63_spill] sm:$0xff] %v22058_v35  ;;  %27008 = vst [vmem:[#allocation64_spill] sm:$0xff] %v22061_v39  ;;  %v22063_v6 = vadd.f32 %v4669_v34, %v4323_v59  ;;  %v3336_v45 = vsel %vm1874_vm1, %v3334_v42, %v27009_v57  ;;  %v5294_v22 = vmax.f32 %v27010_v54, %v21653_v41  ;;  %v27012_v42 = vld [vmem:[#allocation39_spill] sm:$0xff]  ;;  %v27015_v41 = vmax.f32 %v21726_v50, 0.0 }
 0x322   : > { %v5295_v36 = vmax.f32 %v27011_v60, %v21854_v30  ;;  %v3547_v62 = vadd.f32 %v3336_v45, %v2987_v24  ;;  %v3671_v59 = vmul.f32 %v21757_v61, %v22025_v8  ;;  %v27013_v57 = vld [vmem:[#allocation7_spill] sm:$0xff]  ;;  %v27016_v30 = vld [vmem:[#allocation56_spill] sm:$0xff]  ;;  %v27017_v60 = vld [vmem:[#allocation18_spill] sm:$0xff]  ;;  %v5918_v50 = vrot.slane %v21698_v28, 1 }
 0x323   : > { %v27014_v39 = vmax.f32 %v27013_v57, 0.0  ;;  %v5487_v46 = vmax.f32 %v27015_v41, %v21850_v17  ;;  %v5534_v54 = vrot.slane %v27016_v30, 1  ;;  %v5535_v9 = vrot.slane %v27017_v60, 1 }
 0x324   : > { %v5582_v44 = vrot.slane %v27016_v30, 2  ;;  %v5583_v24 = vrot.slane %v27017_v60, 2  ;;  %v5630_v45 = vrot.slane %v27016_v30, 3  ;;  %v5631_v34 = vrot.slane %v27017_v60, 3 }
 0x325   : > { %v5486_v53 = vmax.f32 %v27014_v39, %v27012_v42  ;;  %v5702_v20 = vrot.slane %v5294_v22, 4  ;;  %v5703_v14 = vrot.slane %v5295_v36, 4  ;;  %v5750_v57 = vrot.slane %v5294_v22, 5 }
 0x326   : > { %v5751_v39 = vrot.slane %v5295_v36, 5  ;;  %v5798_v42 = vrot.slane %v5294_v22, 6  ;;  %v5919_v17 = vrot.slane %v21925_v52, 1  ;;  %v5799_v41 = vrot.slane %v5295_v36, 6 }
 0x327   : > { %v5846_v1 = vrot.slane %v5294_v22, 7  ;;  %v5847_v13 = vrot.slane %v5295_v36, 7  ;;  %v6014_v16 = vrot.slane %v21698_v28, 3  ;;  %v6135_v56 = vsel %vm6122_vm2, %v27016_v30, %v5534_v54 }
 0x328   : > { %v6136_v4 = vsel %vm6122_vm2, %v27017_v60, %v5535_v9  ;;  %v6015_v40 = vrot.slane %v21925_v52, 3  ;;  %v6086_v10 = vrot.slane %v5486_v53, 4  ;;  %v6160_v33 = vsel %vm6147_vm3, %v6135_v56, %v5582_v44  ;;  %v22120_v44 = vpop.permute.xlu1 %772 }
 0x329   : > { %v6161_v22 = vsel %vm6147_vm3, %v6136_v4, %v5583_v24  ;;  %v6185_v36 = vsel %vm6172_vm4, %v6160_v33, %v5630_v45  ;;  %v6307_v55 = vsel %vm6122_vm2, %v21698_v28, %v5918_v50  ;;  %v6308_v30 = vsel %vm6122_vm2, %v21925_v52, %v5919_v17 }
 0x32a   : > { %v6186_v38 = vsel %vm6172_vm4, %v6161_v22, %v5631_v34  ;;  %v6087_v54 = vrot.slane %v5487_v46, 4  ;;  %v6210_v9 = vsel %vm6197_vm5, %v6185_v36, %v5702_v20  ;;  %v6331_v53 = vsel %vm6147_vm3, %v6307_v55, %v5966_v48  ;;  %v22125_v48 = vpop.permute.xlu0 %767 }
 0x32b   : > { %v6211_v60 = vsel %vm6197_vm5, %v6186_v38, %v5703_v14  ;;  %v6235_v56 = vsel %vm6222_vm6, %v6210_v9, %v5750_v57  ;;  %v6332_v33 = vsel %vm6147_vm3, %v6308_v30, %v5967_v18  ;;  %v6355_v34 = vsel %vm6172_vm4, %v6331_v53, %v6014_v16 }
 0x32c   : > { %v6236_v4 = vsel %vm6222_vm6, %v6211_v60, %v5751_v39  ;;  %v4431_v28 = vmul.f32 %v21863_v2, %v22025_v8  ;;  %v6259_v52 = vsel %vm1874_vm1, %v6235_v56, %v5798_v42  ;;  %v6356_v38 = vsel %vm6172_vm4, %v6332_v33, %v6015_v40 }
 0x32d   : > { %v6260_v20 = vsel %vm1874_vm1, %v6236_v4, %v5799_v41  ;;  %v6283_v55 = vsel %vm1313_vm0, %v6259_v52, %v5846_v1  ;;  %v6379_v18 = vsel %vm6197_vm5, %v6355_v34, %v6086_v10  ;;  %v6380_v16 = vsel %vm6197_vm5, %v6356_v38, %v6087_v54 }
 0x32e   : > { %v6284_v14 = vsel %vm1313_vm0, %v6260_v20, %v5847_v13  ;;  %v3767_v24 = vadd.f32 %v3671_v59, %v3547_v62  ;;  %v22134_v57 = vmax.f32 %v6379_v18, %v6380_v16  ;;  %v26304_v39 = vrot.slane %v22047_v43, 1 }
 0x32f   : > { %v22132_v45 = vmax.f32 %v6283_v55, %v6284_v14  ;;  %v27020_v42 = vrot.slane %v21976_v47, 2  ;;  %v27021_v1 = vrot.slane %v22002_v32, 2  ;;  %v3662_v10 = vmul.f32 %v21757_v61, %v22120_v44 }
 0x330   : > { %27019 = vst [vmem:[#allocation7_spill] sm:$0xff] %v22134_v57  ;;  %v3862_v62 = vmul.f32 %v21969_v12, %v22120_v44  ;;  %v3861_v59 = vmul.f32 %v21969_v12, %v22125_v48  ;;  %v22151_v17 = vrot.slane %v22134_v57, 1  ;;  %v4986_v41 = vadd.f32 %v21519_v37, %v22063_v6 }
 0x331   : > { %27018 = vst [vmem:[#allocation39_spill] sm:$0xff] %v22132_v45  ;;  %v2003_v13 = vsel %vm1874_vm1, %v27021_v1, %v27020_v42  ;;  %v6927_v50 = vrot.slane %v22132_v45, 1  ;;  %v26305_v32 = vrot.slane %v22076_v19, 2  ;;  %v27023_v22 = vrot.slane %v22038_v3, 1  ;;  %v22214_v1 = vld [vmem:[%s26019_s3 + $0x10] sm:$0xff] }
 0x332   : > { %27022 = vst [vmem:[#allocation56_spill] sm:$0xff] %v22151_v17  ;;  %v27024_v36 = vrot.slane %v22051_v23, 1  ;;  %v4674_v54 = vrot.slane %v4431_v28, 2  ;;  %v2211_v9 = vadd.f32 %v2003_v13, %v22035_v0  ;;  %v1197_v60 = vmul.f32 %v21476_v11, %v22025_v8 }
 0x333   : > { %v22166_v56 = vsel %vm1313_vm0, %v6927_v50, %v22151_v17  ;;  %v22170_v6 = vmul.f32 %v21667_v26, %v22025_v8  ;;  %v2335_v23 = vmul.f32 %v21703_v58, %v22025_v8  ;;  %v2535_v4 = vmul.f32 %v21682_v7, %v22025_v8 }
 0x334   : > { %v4116_v30 = vsel %vm1313_vm0, %v27024_v36, %v27023_v22  ;;  %27025 = vst [vmem:[#allocation18_spill] sm:$0xff] %v22166_v56  ;;  %v3661_v0 = vmul.f32 %v21757_v61, %v22125_v48  ;;  %16868 = vmatprep.mubr.msk.f32.mxu0 %vm6425_vm7, %v22166_v56  ;;  %v3758_v33 = vadd.f32 %v3662_v10, %v21640_v5  ;;  %v4098_v34 = vrot.slane %v3862_v62, 1 }
 0x335   : > { %v4327_v53 = vadd.f32 %v4116_v30, %v3767_v24  ;;  %27026 = vst [vmem:[#allocation65_spill] sm:$0xff] %v22170_v6  ;;  %v27027_v28 = vrot.slane %v21538_v15, 2  ;;  %v27028_v52 = vrot.slane %v21716_v49, 2  ;;  %v4096_v38 = vrot.slane %v3861_v59, 1  ;;  %16869 = vmatmul.mubr.msk.f32.vlgmr.msra.gmra.mxu0 %vm6425_vm7, %v22151_v17  ;;  %v22199_v15 = vld [vmem:[%s26019_s3 + $0x18] sm:$0xff]  ;;  %v22205_v49 = vld [vmem:[%s26019_s3 + $0x8] sm:$0xff] }
 0x336   : > { %v5082_v55 = vmax.f32 %v4986_v41, 0.0  ;;  %v22190_v14 = vmul.f32 %v21712_v31, %v22025_v8  ;;  %v4676_v5 = vsel %vm1874_vm1, %v4674_v54, %v26305_v32  ;;  %16879 = vmatpush3.msra.mxu0 %v22199_v15  ;;  %27030 = vst [vmem:[#allocation67_spill] sm:$0xff] %v22205_v49  ;;  %v1447_v16 = vrot.slane %v1197_v60, 1 }
 0x337   : > { %v3319_v20 = vsel %vm1874_vm1, %v27028_v52, %v27027_v28  ;;  %v4887_v24 = vadd.f32 %v4676_v5, %v4327_v53  ;;  %v4422_v42 = vmul.f32 %v21863_v2, %v22120_v44  ;;  %16880 = vmatprep.subr.mxu0 %v22214_v1  ;;  %v997_v13 = vmul.f32 %v21658_v21, %v22025_v8 }
 0x338   : > { %27029 = vst [vmem:[#allocation66_spill] sm:$0xff] %v22190_v14  ;;  %v3537_v18 = vadd.f32 %v3319_v20, %v21821_v63  ;;  %v4421_v63 = vmul.f32 %v21863_v2, %v22125_v48  ;;  %v2781_v62 = vrot.slane %v2535_v4, 1  ;;  %16881 = vmatpush3.msra.mxu0 %v22214_v1  ;;  %v2431_v50 = vadd.f32 %v2335_v23, %v2211_v9 }
 0x339   : > { %v1188_v41 = vmul.f32 %v21476_v11, %v22120_v44  ;;  %v4318_v22 = vadd.f32 %v4098_v34, %v3758_v33  ;;  %v4099_v36 = vsel %vm1313_vm0, %v4096_v38, %v4098_v34  ;;  %16892 = vmatprep.subr.mxu0 %v22205_v49  ;;  %v5154_v30 = vrot.slane %v5082_v55, 1 }
 0x33a   : > { %v3757_v59 = vadd.f32 %v3661_v0, %v3537_v18  ;;  %v2326_v8 = vmul.f32 %v21703_v58, %v22120_v44  ;;  %v2526_v60 = vmul.f32 %v21682_v7, %v22120_v44  ;;  %v27031_v53 = vrot.slane %v22023_v51, 1 }
 0x33b   : > { %v4990_v23 = vadd.f32 %v21519_v37, %v4887_v24  ;;  %v4658_v4 = vrot.slane %v4422_v42, 2  ;;  %v4656_v0 = vrot.slane %v4421_v63, 2  ;;  %v2783_v33 = vsel %vm1313_vm0, %v2781_v62, %v26304_v39 }
 0x33c   : > { %v1449_v9 = vsel %vm1313_vm0, %v1447_v16, %v27031_v53  ;;  %v988_v34 = vmul.f32 %v21658_v21, %v22120_v44  ;;  %v27032_v28 = vrot.slane %v21731_v29, 1  ;;  %v4317_v20 = vadd.f32 %v4099_v36, %v3757_v59  ;;  %v27035_v59 = vld [vmem:[#allocation45_spill] sm:$0xff] }
 0x33d   : > { %v1431_v5 = vrot.slane %v1188_v41, 1  ;;  %v22244_v18 = vmul.f32 %v21667_v26, %v22120_v44  ;;  %v4878_v16 = vadd.f32 %v4658_v4, %v4318_v22  ;;  %v1187_v24 = vmul.f32 %v21476_v11, %v22125_v48 }
 0x33e   : > { %v4097_v52 = vsel %vm1313_vm0, %v27032_v28, %v4096_v38  ;;  %v22248_v42 = vmax.f32 %v5082_v55, %v5154_v30  ;;  %v22250_v63 = vadd.f32 %v1449_v9, %v997_v13  ;;  %v2422_v62 = vadd.f32 %v2326_v8, %v21609_v27 }
 0x33f   : > { %v2765_v53 = vrot.slane %v2526_v60, 1  ;;  %v5086_v29 = vmax.f32 %v4990_v23, 0.0  ;;  %v2525_v38 = vmul.f32 %v21682_v7, %v22125_v48  ;;  %v4316_v41 = vadd.f32 %v4097_v52, %v27035_v59  ;;  %v27037_v23 = vld [vmem:[#allocation35_spill] sm:$0xff]  ;;  %v27041_v59 = vld [vmem:[#allocation26_spill] sm:$0xff] }
 0x340   : > { %27033 = vst [vmem:[#allocation68_spill] sm:$0xff] %v22248_v42  ;;  %27034 = vst [vmem:[#allocation69_spill] sm:$0xff] %v22250_v63  ;;  %v4659_v36 = vsel %vm1874_vm1, %v4656_v0, %v4658_v4  ;;  %v22257_v28 = vadd.f32 %v2783_v33, %v2431_v50  ;;  %v3086_v22 = vmul.f32 %v21712_v31, %v22120_v44  ;;  %v26306_v30 = vrot.slane %v22244_v18, 2  ;;  %v27039_v50 = vld [vmem:[#allocation27_spill] sm:$0xff] }
 0x341   : > { %v22263_v55 = vmul.f32 %v21667_v26, %v22125_v48  ;;  %v4877_v13 = vadd.f32 %v4659_v36, %v4317_v20  ;;  %v1645_v27 = vadd.f32 %v1431_v5, %v988_v34  ;;  %v22267_v8 = vadd.f32 %v21519_v37, %v4878_v16  ;;  %v793_v20 = vpop.permute.xlu1 %792 }
 0x342   : > { %27036 = vst [vmem:[#allocation45_spill] sm:$0xff] %v22257_v28  ;;  %v1429_v60 = vrot.slane %v1187_v24, 1  ;;  %v2982_v9 = vadd.f32 %v2765_v53, %v2422_v62  ;;  %v27038_v4 = vrot.slane %v27037_v23, 2  ;;  %v27040_v33 = vrot.slane %v27039_v50, 2  ;;  %v27043_v23 = vld [vmem:[#allocation28_spill] sm:$0xff] }
 0x343   : > { %v2325_v44 = vmul.f32 %v21703_v58, %v22125_v48  ;;  %v27042_v54 = vrot.slane %v27041_v59, 2  ;;  %v5155_v36 = vrot.slane %v5086_v29, 1  ;;  %v2763_v10 = vrot.slane %v2525_v38, 1 }
 0x344   : > { %v1986_v52 = vsel %vm1874_vm1, %v27040_v33, %v27038_v4  ;;  %v3085_v16 = vmul.f32 %v21712_v31, %v22125_v48  ;;  %v3325_v62 = vrot.slane %v3086_v22, 2  ;;  %v1990_v50 = vrot.slane %v22263_v55, 2 }
 0x345   : > { %v4657_v34 = vsel %vm1874_vm1, %v27042_v54, %v4656_v0  ;;  %v2201_v40 = vadd.f32 %v1986_v52, %v27043_v23  ;;  %v4980_v4 = vadd.f32 %v21519_v37, %v4877_v13  ;;  %v2206_v33 = vadd.f32 %v26306_v30, %v1645_v27  ;;  %v27044_v54 = vld [vmem:[#allocation6_spill] sm:$0xff] }
 0x346   : > { %v4876_v24 = vadd.f32 %v4657_v34, %v4316_v41  ;;  %v27045_v0 = vrot.slane %v27044_v54, 1  ;;  %v22291_v46 = vmul.f32 %v21476_v11, %v793_v20  ;;  %v3542_v41 = vadd.f32 %v3325_v62, %v2982_v9  ;;  %v27047_v34 = vld [vmem:[#allocation47_spill] sm:$0xff]  ;;  %v27050_v30 = vld [vmem:[#allocation38_spill] sm:$0xff] }
 0x347   : > { %v987_v22 = vmul.f32 %v21658_v21, %v22125_v48  ;;  %v1432_v55 = vsel %vm1313_vm0, %v1429_v60, %v1431_v5  ;;  %v2421_v52 = vadd.f32 %v2325_v44, %v2201_v40  ;;  %v22296_v13 = vmax.f32 %v5086_v29, %v5155_v36 }
 0x348   : > { %v1430_v38 = vsel %vm1313_vm0, %v27045_v0, %v1429_v60  ;;  %v27048_v27 = vrot.slane %v27047_v34, 1  ;;  %v3323_v39 = vrot.slane %v3085_v16, 2  ;;  %v22302_v54 = vadd.f32 %v21519_v37, %v4876_v24  ;;  %v27049_v0 = vld [vmem:[#allocation52_spill] sm:$0xff]  ;;  %v27053_v37 = vld [vmem:[#allocation15_spill] sm:$0xff] }
 0x349   : > { %27046 = vst [vmem:[#allocation35_spill] sm:$0xff] %v22296_v13  ;;  %v1643_v32 = vadd.f32 %v1430_v38, %v27049_v0  ;;  %v27051_v9 = vrot.slane %v27050_v30, 2  ;;  %v2766_v48 = vsel %vm1313_vm0, %v2763_v10, %v2765_v53  ;;  %v5076_v5 = vmax.f32 %v4980_v4, 0.0  ;;  %v27054_v4 = vld [vmem:[#allocation37_spill] sm:$0xff]  ;;  %v27064_v13 = vld [vmem:[#allocation23_spill] sm:$0xff] }
 0x34a   : > { %v2764_v23 = vsel %vm1313_vm0, %v27048_v27, %v2763_v10  ;;  %v27052_v40 = vmax.f32 %v22267_v8, 0.0  ;;  %v1644_v60 = vadd.f32 %v1432_v55, %v987_v22  ;;  %v1438_v44 = vrot.slane %v22291_v46, 1  ;;  %v788_v10 = vpop.permute.xlu0 %787 }
 0x34b   : > { %v1991_v59 = vsel %vm1874_vm1, %v27051_v9, %v1990_v50  ;;  %v22315_v36 = vmul.f32 %v21682_v7, %v793_v20  ;;  %v2980_v16 = vadd.f32 %v2764_v23, %v27053_v37  ;;  %v2330_v24 = vmul.f32 %v21703_v58, %v793_v20 }
 0x34c   : > { %v22311_v29 = vrot.slane %v27052_v40, 1  ;;  %v3666_v30 = vmul.f32 %v21757_v61, %v793_v20  ;;  %v3866_v38 = vmul.f32 %v21969_v12, %v793_v20  ;;  %v2981_v53 = vadd.f32 %v2766_v48, %v2421_v52 }
 0x34d   : > { %v27055_v34 = vrot.slane %v27054_v4, 2  ;;  %v992_v46 = vmul.f32 %v21658_v21, %v793_v20  ;;  %v5344_v55 = vrot.slane %v5076_v5, 1  ;;  %v22327_v0 = vmul.f32 %v21667_v26, %v793_v20 }
 0x34e   : > { %v2426_v23 = vadd.f32 %v2330_v24, %v2206_v33  ;;  %v3762_v9 = vadd.f32 %v3666_v30, %v3542_v41  ;;  %v26314_v37 = vrot.slane %v22315_v36, 1  ;;  %v22331_v17 = vmul.f32 %v21712_v31, %v793_v20 }
 0x34f   : > { %v3324_v27 = vsel %vm1874_vm1, %v27055_v34, %v3323_v39  ;;  %v1649_v40 = vadd.f32 %v1438_v44, %v992_v46  ;;  %v1191_v52 = vmul.f32 %v21476_v11, %v788_v10  ;;  %v4105_v48 = vrot.slane %v3866_v38, 1 }
 0x350   : > { %v4426_v4 = vmul.f32 %v21863_v2, %v793_v20  ;;  %v3326_v34 = vsel %vm1874_vm1, %v3323_v39, %v3325_v62  ;;  %v3865_v22 = vmul.f32 %v21969_v12, %v788_v10  ;;  %v2204_v56 = vadd.f32 %v1991_v59, %v1643_v32 }
 0x351   : > { %v3540_v57 = vadd.f32 %v3324_v27, %v2980_v16  ;;  %v27056_v33 = vmax.f32 %v22302_v54, 0.0  ;;  %v3541_v24 = vadd.f32 %v3326_v34, %v2981_v53  ;;  %v22341_v30 = vmax.f32 %v5076_v5, %v5344_v55 }
 0x352   : > { %v26313_v46 = vrot.slane %v22327_v0, 2  ;;  %v2986_v11 = vadd.f32 %v26314_v37, %v2426_v23  ;;  %v4322_v38 = vadd.f32 %v4105_v48, %v3762_v9  ;;  %v26315_v20 = vrot.slane %v22331_v17, 2 }
 0x353   : > { %v22339_v41 = vrot.slane %v27056_v33, 1  ;;  %v27057_v39 = vrot.slane %v22244_v18, 2  ;;  %v1436_v62 = vrot.slane %v1191_v52, 1  ;;  %v3665_v59 = vmul.f32 %v21757_v61, %v788_v10  ;;  %v813_v18 = vpop.permute.xlu1 %812  ;;  %v27058_v33 = vld [vmem:[#allocation20_spill] sm:$0xff] }
 0x354   : > { %v2210_v16 = vadd.f32 %v26313_v46, %v1649_v40  ;;  %v4665_v5 = vrot.slane %v4426_v4, 2  ;;  %v4103_v53 = vrot.slane %v3865_v22, 1  ;;  %v4425_v27 = vmul.f32 %v21863_v2, %v788_v10  ;;  %v27059_v4 = vld [vmem:[#allocation44_spill] sm:$0xff] }
 0x355   : > { %v1993_v32 = vsel %vm1874_vm1, %v1990_v50, %v27057_v39  ;;  %v22355_v23 = vmul.f32 %v21667_v26, %v788_v10  ;;  %v2529_v9 = vmul.f32 %v21682_v7, %v788_v10  ;;  %v3761_v34 = vadd.f32 %v3665_v59, %v3541_v24 }
 0x356   : > { %v2205_v55 = vadd.f32 %v1993_v32, %v1644_v60  ;;  %v3546_v50 = vadd.f32 %v26315_v20, %v2986_v11  ;;  %v4882_v52 = vadd.f32 %v4665_v5, %v4322_v38  ;;  %v3760_v39 = vadd.f32 %v27058_v33, %v3540_v57 }
 0x357   : > { %v991_v40 = vmul.f32 %v21658_v21, %v788_v10  ;;  %v27060_v22 = vrot.slane %v27059_v4, 1  ;;  %v1439_v60 = vsel %vm1313_vm0, %v1436_v62, %v1438_v44  ;;  %v2329_v32 = vmul.f32 %v21703_v58, %v788_v10  ;;  %v22379_v44 = vld [vmem:[%s26017_s1 + $0x1] ss:$0 sm:$0xff] }
 0x358   : > { %v22368_v37 = vmul.f32 %v21712_v31, %v788_v10  ;;  %v4106_v24 = vsel %vm1313_vm0, %v4103_v53, %v4105_v48  ;;  %v4663_v59 = vrot.slane %v4425_v27, 2  ;;  %v3670_v11 = vmul.f32 %v21757_v61, %v813_v18  ;;  %v22387_v48 = vld [vmem:[%s26018_s2] ss:$0 sm:$0xff]  ;;  %v27062_v27 = vld [vmem:[#allocation41_spill] sm:$0xff] }
 0x359   : > { %v1437_v46 = vsel %vm1313_vm0, %v27060_v22, %v1436_v62  ;;  %v22373_v57 = vmul.f32 %v21969_v12, %v813_v18  ;;  %v1997_v38 = vrot.slane %v22355_v23, 2  ;;  %v2770_v33 = vrot.slane %v2529_v9, 1  ;;  %27061 = vst [vmem:[#allocation27_spill] sm:$0xff] %v22387_v48  ;;  %v27063_v22 = vld [vmem:[#allocation12_spill] sm:$0xff] }
 0x35a   : > { %v4321_v4 = vadd.f32 %v4106_v24, %v3761_v34  ;;  %v22382_v10 = vmul.f32 %v22379_v44, %v813_v18  ;;  %v22390_v62 = vadd.f32 %v22387_v48, %v4882_v52  ;;  %v2424_v23 = vadd.f32 %v27062_v27, %v2204_v56  ;;  %v27066_v56 = vld [vmem:[#allocation31_spill] sm:$0xff] }
 0x35b   : > { %v2425_v9 = vadd.f32 %v2329_v32, %v2205_v55  ;;  %v3766_v34 = vadd.f32 %v3670_v11, %v3546_v50  ;;  %v1647_v24 = vadd.f32 %v1437_v46, %v27063_v22  ;;  %v1648_v20 = vadd.f32 %v1439_v60, %v991_v40  ;;  %v27068_v46 = vld [vmem:[#allocation50_spill] sm:$0xff] }
 0x35c   : > { %v3330_v45 = vrot.slane %v22368_v37, 2  ;;  %v27065_v42 = vrot.slane %v27064_v13, 1  ;;  %v4666_v63 = vsel %vm1874_vm1, %v4663_v59, %v4665_v5  ;;  %v4112_v6 = vrot.slane %v22373_v57, 1  ;;  %v27071_v11 = vld [vmem:[#allocation30_spill] sm:$0xff]  ;;  %v27089_v57 = vld [vmem:[#allocation53_spill] sm:$0xff] }
 0x35d   : > { %v22401_v52 = vmul.f32 %v21863_v2, %v813_v18  ;;  %v27067_v55 = vrot.slane %v27066_v56, 2  ;;  %v27069_v40 = vrot.slane %v27068_v46, 1  ;;  %v4881_v60 = vadd.f32 %v4666_v63, %v4321_v4 }
 0x35e   : > { %v4104_v28 = vsel %vm1313_vm0, %v27065_v42, %v4103_v53  ;;  %v1445_v13 = vrot.slane %v22382_v10, 1  ;;  %v808_v42 = vpop.permute.xlu0 %807  ;;  %v27070_v5 = vrot.slane %v22315_v36, 1  ;;  %v4326_v32 = vadd.f32 %v4112_v6, %v3766_v34  ;;  %v27073_v34 = vld [vmem:[#allocation16_spill] sm:$0xff] }
 0x35f   : > { %v4320_v14 = vadd.f32 %v4104_v28, %v3760_v39  ;;  %v1998_v50 = vsel %vm1874_vm1, %v27067_v55, %v1997_v38  ;;  %v2771_v37 = vsel %vm1313_vm0, %v27069_v40, %v2770_v33  ;;  %v26322_v28 = vmax.f32 %v22390_v62, 0.0 }
 0x360   : > { %v2773_v53 = vsel %vm1313_vm0, %v2770_v33, %v27070_v5  ;;  %v2984_v39 = vadd.f32 %v2771_v37, %v2424_v23  ;;  %v27072_v27 = vrot.slane %v27071_v11, 2  ;;  %v996_v56 = vmul.f32 %v21658_v21, %v813_v18 }
 0x361   : > { %v22421_v63 = vmul.f32 %v21667_v26, %v813_v18  ;;  %v2534_v4 = vmul.f32 %v21682_v7, %v813_v18  ;;  %v2334_v36 = vmul.f32 %v21703_v58, %v813_v18  ;;  %v4672_v33 = vrot.slane %v22401_v52, 2 }
 0x362   : > { %v4664_v22 = vsel %vm1874_vm1, %v27072_v27, %v4663_v59  ;;  %v1195_v23 = vmul.f32 %v22379_v44, %v808_v42  ;;  %v2208_v55 = vadd.f32 %v1998_v50, %v1647_v24  ;;  %v27074_v46 = vrot.slane %v27073_v34, 2 }
 0x363   : > { %v4880_v10 = vadd.f32 %v4664_v22, %v4320_v14  ;;  %v4984_v59 = vadd.f32 %v22387_v48, %v4881_v60  ;;  %v1653_v21 = vadd.f32 %v1445_v13, %v996_v56  ;;  %v22433_v37 = vrot.slane %v26322_v28, 1 }
 0x364   : > { %v3331_v40 = vsel %vm1874_vm1, %v27074_v46, %v3330_v45  ;;  %v2985_v5 = vadd.f32 %v2773_v53, %v2425_v9  ;;  %v2430_v14 = vadd.f32 %v2334_v36, %v2210_v16  ;;  %v4886_v11 = vadd.f32 %v4672_v33, %v4326_v32 }
 0x365   : > { %v3544_v27 = vadd.f32 %v3331_v40, %v2984_v39  ;;  %v26323_v22 = vrot.slane %v22421_v63, 2  ;;  %v2779_v24 = vrot.slane %v2534_v4, 1  ;;  %v2533_v50 = vmul.f32 %v21682_v7, %v808_v42 }
 0x366   : > { %v22440_v34 = vadd.f32 %v22387_v48, %v4880_v10  ;;  %v3094_v60 = vmul.f32 %v21712_v31, %v813_v18  ;;  %v27075_v56 = vrot.slane %v22327_v0, 2  ;;  %v1443_v9 = vrot.slane %v1195_v23, 1 }
 0x367   : > { %v5080_v16 = vmax.f32 %v4984_v59, 0.0  ;;  %v22448_v53 = vadd.f32 %v26323_v22, %v1653_v21  ;;  %v22451_v32 = vmul.f32 %v21667_v26, %v808_v42  ;;  %v2990_v7 = vadd.f32 %v2779_v24, %v2430_v14  ;;  %v27078_v59 = vld [vmem:[#allocation54_spill] sm:$0xff]  ;;  %v27079_v14 = vld [vmem:[#allocation55_spill] sm:$0xff] }
 0x368   : > { %v2000_v46 = vsel %vm1874_vm1, %v1997_v38, %v27075_v56  ;;  %v22454_v4 = vadd.f32 %v22387_v48, %v4886_v11  ;;  %v27077_v18 = vrot.slane %v22331_v17, 2  ;;  %v3869_v38 = vmul.f32 %v21969_v12, %v808_v42 }
 0x369   : > { %v2209_v39 = vadd.f32 %v2000_v46, %v1648_v20  ;;  %v2333_v36 = vmul.f32 %v21703_v58, %v808_v42  ;;  %v2777_v23 = vrot.slane %v2533_v50, 1  ;;  %v3093_v40 = vmul.f32 %v21712_v31, %v808_v42 }
 0x36a   : > { %27076 = vst [vmem:[#allocation26_spill] sm:$0xff] %v22454_v4  ;;  %v3333_v0 = vsel %vm1874_vm1, %v3330_v45, %v27077_v18  ;;  %v5079_v20 = vmax.f32 %v22440_v34, 0.0  ;;  %v3339_v26 = vrot.slane %v3094_v60, 2  ;;  %v2428_v21 = vadd.f32 %v27078_v59, %v2208_v55  ;;  %v27081_v60 = vld [vmem:[#allocation57_spill] sm:$0xff]  ;;  %v27082_v55 = vld [vmem:[#allocation40_spill] sm:$0xff] }
 0x36b   : > { %v3545_v10 = vadd.f32 %v3333_v0, %v2985_v5  ;;  %v27080_v11 = vrot.slane %v27079_v14, 1  ;;  %v5345_v17 = vrot.slane %v5080_v16, 1  ;;  %v2004_v45 = vrot.slane %v22451_v32, 2 }
 0x36c   : > { %v2429_v46 = vadd.f32 %v2333_v36, %v2209_v39  ;;  %v3669_v5 = vmul.f32 %v21757_v61, %v808_v42  ;;  %v26324_v58 = vmax.f32 %v22454_v4, 0.0  ;;  %v1446_v50 = vsel %vm1313_vm0, %v1443_v9, %v1445_v13  ;;  %v22479_v39 = vld [vmem:[%s26017_s1] ss:$0 sm:$0xff] }
 0x36d   : > { %v1444_v56 = vsel %vm1313_vm0, %v27080_v11, %v1443_v9  ;;  %v4110_v31 = vrot.slane %v3869_v38, 1  ;;  %v4429_v18 = vmul.f32 %v21863_v2, %v808_v42  ;;  %v27083_v59 = vrot.slane %v27082_v55, 1 }
 0x36e   : > { %v1651_v0 = vadd.f32 %v1444_v56, %v27081_v60  ;;  %v3337_v11 = vrot.slane %v3093_v40, 2  ;;  %v3765_v28 = vadd.f32 %v3669_v5, %v3545_v10  ;;  %v3550_v22 = vadd.f32 %v3339_v26, %v2990_v7  ;;  %v27084_v60 = vld [vmem:[#allocation59_spill] sm:$0xff]  ;;  %v833_v7 = vpop.permute.xlu1 %832  ;;  %v22490_v5 = vpop.permute.xlu0 %827 }
 0x36f   : > { %v2778_v14 = vsel %vm1313_vm0, %v27083_v59, %v2777_v23  ;;  %v995_v36 = vmul.f32 %v22479_v39, %v808_v42  ;;  %v2780_v13 = vsel %vm1313_vm0, %v2777_v23, %v2779_v24  ;;  %v22485_v38 = vrot.slane %v5079_v20, 1 }
 0x370   : > { %v2988_v9 = vadd.f32 %v2778_v14, %v2428_v21  ;;  %v22487_v56 = vmax.f32 %v5080_v16, %v5345_v17  ;;  %v3764_v40 = vadd.f32 %v27084_v60, %v3544_v27  ;;  %v2989_v10 = vadd.f32 %v2780_v13, %v2429_v46  ;;  %v27087_v17 = vld [vmem:[#allocation42_spill] sm:$0xff] }
 0x371   : > { %v22492_v55 = vadd.f32 %v1446_v50, %v995_v36  ;;  %v27085_v42 = vrot.slane %v21976_v47, 2  ;;  %v4113_v23 = vsel %vm1313_vm0, %v4110_v31, %v4112_v6  ;;  %v4670_v16 = vrot.slane %v4429_v18, 2 }
 0x372   : > { %v22504_v27 = vrot.slane %v26324_v58, 1  ;;  %v27088_v46 = vrot.slane %v27087_v17, 2  ;;  %v4325_v59 = vadd.f32 %v4113_v23, %v3765_v28  ;;  %v3874_v47 = vmul.f32 %v21969_v12, %v833_v7 }
 0x373   : > { %v2005_v24 = vsel %vm1874_vm1, %v27085_v42, %v2004_v45  ;;  %v3340_v36 = vsel %vm1874_vm1, %v3337_v11, %v3339_v26  ;;  %v3873_v6 = vmul.f32 %v21969_v12, %v22490_v5  ;;  %v27090_v18 = vrot.slane %v27089_v57, 1  ;;  %v22528_v26 = vld [vmem:[%s26017_s1 + $0x2] ss:$0 sm:$0xff] }
 0x374   : > { %27086 = vst [vmem:[#allocation28_spill] sm:$0xff] %v22504_v27  ;;  %v22506_v21 = vadd.f32 %v2005_v24, %v1651_v0  ;;  %v3338_v50 = vsel %vm1874_vm1, %v27088_v46, %v3337_v11  ;;  %v22519_v0 = vmul.f32 %v22379_v44, %v833_v7  ;;  %v3674_v60 = vmul.f32 %v21757_v61, %v833_v7 }
 0x375   : > { %v3548_v14 = vadd.f32 %v3338_v50, %v2988_v9  ;;  %v4111_v13 = vsel %vm1313_vm0, %v27090_v18, %v4110_v31  ;;  %v3549_v42 = vadd.f32 %v3340_v36, %v2989_v10  ;;  %v4673_v28 = vsel %vm1874_vm1, %v4670_v16, %v4672_v33  ;;  %v22536_v31 = vld [vmem:[%s26017_s1 + $0x4] ss:$0 sm:$0xff]  ;;  %v22547_v10 = vld [vmem:[%s26017_s1 + $0x3] ss:$0 sm:$0xff]  ;;  %v27091_v36 = vld [vmem:[#allocation58_spill] sm:$0xff] }
 0x376   : > { %v4324_v24 = vadd.f32 %v4111_v13, %v3764_v40  ;;  %v22531_v12 = vmul.f32 %v22528_v26, %v833_v7  ;;  %v22539_v11 = vmul.f32 %v22536_v31, %v833_v7  ;;  %v4885_v9 = vadd.f32 %v4673_v28, %v4325_v59  ;;  %v27093_v18 = vld [vmem:[#allocation64_spill] sm:$0xff] }
 0x377   : > { %v3770_v52 = vadd.f32 %v3674_v60, %v3550_v22  ;;  %v4434_v33 = vmul.f32 %v21863_v2, %v833_v7  ;;  %v3673_v40 = vmul.f32 %v21757_v61, %v22490_v5  ;;  %v2338_v23 = vmul.f32 %v22547_v10, %v833_v7 }
 0x378   : > { %v4119_v17 = vrot.slane %v3874_v47, 1  ;;  %v4117_v46 = vrot.slane %v3873_v6, 1  ;;  %v4433_v50 = vmul.f32 %v21863_v2, %v22490_v5  ;;  %v27092_v59 = vrot.slane %v27091_v36, 2  ;;  %v22562_v47 = vld [vmem:[%s26017_s1 + $0x5] ss:$0 sm:$0xff] }
 0x379   : > { %v26326_v57 = vrot.slane %v22519_v0, 1  ;;  %v3768_v61 = vadd.f32 %v27093_v18, %v3548_v14  ;;  %v3769_v13 = vadd.f32 %v3673_v40, %v3549_v42  ;;  %v1000_v28 = vmul.f32 %v22479_v39, %v833_v7 }
 0x37a   : > { %v4671_v22 = vsel %vm1874_vm1, %v27092_v59, %v4670_v16  ;;  %v2434_v58 = vadd.f32 %v2338_v23, %v22448_v53  ;;  %v22565_v2 = vmul.f32 %v22562_v47, %v833_v7  ;;  %v22568_v16 = vadd.f32 %v22387_v48, %v4885_v9 }
 0x37b   : > { %v4884_v60 = vadd.f32 %v4671_v22, %v4324_v24  ;;  %v26325_v6 = vrot.slane %v22539_v11, 1  ;;  %v4330_v14 = vadd.f32 %v4119_v17, %v3770_v52  ;;  %v4679_v42 = vrot.slane %v4434_v33, 2 }
 0x37c   : > { %v22573_v24 = vmul.f32 %v22379_v44, %v22490_v5  ;;  %v27094_v53 = vrot.slane %v22038_v3, 1  ;;  %v4120_v23 = vsel %vm1313_vm0, %v4117_v46, %v4119_v17  ;;  %v4677_v36 = vrot.slane %v4433_v50, 2 }
 0x37d   : > { %v22581_v7 = vadd.f32 %v26326_v57, %v1000_v28  ;;  %v4329_v52 = vadd.f32 %v4120_v23, %v3769_v13  ;;  %v22585_v33 = vadd.f32 %v22387_v48, %v4884_v60  ;;  %v22589_v22 = vadd.f32 %v26325_v6, %v2434_v58  ;;  %v27101_v23 = vld [vmem:[#allocation61_spill] sm:$0xff] }
 0x37e   : > { %v4118_v40 = vsel %vm1313_vm0, %v27094_v53, %v4117_v46  ;;  %v27095_v17 = vrot.slane %v22421_v63, 2  ;;  %v22598_v18 = vadd.f32 %v4679_v42, %v4330_v14  ;;  %v5297_v58 = vmax.f32 %v5079_v20, %v22485_v38  ;;  %v27100_v38 = vld [vmem:[#allocation43_spill] sm:$0xff] }
 0x37f   : > { %v4328_v59 = vadd.f32 %v4118_v40, %v3768_v61  ;;  %v27096_v61 = vmax.f32 %v22302_v54, 0.0  ;;  %v22609_v63 = vmul.f32 %v22536_v31, %v22490_v5  ;;  %v27097_v32 = vrot.slane %v22076_v19, 2 }
 0x380   : > { %v2007_v46 = vsel %vm1874_vm1, %v2004_v45, %v27095_v17  ;;  %v4680_v28 = vsel %vm1874_vm1, %v4677_v36, %v4679_v42  ;;  %v27098_v54 = vmax.f32 %v22267_v8, 0.0  ;;  %v27099_v34 = vmax.f32 %v22390_v62, 0.0 }
 0x381   : > { %v5296_v13 = vmax.f32 %v27096_v61, %v22339_v41  ;;  %v4678_v45 = vsel %vm1874_vm1, %v27097_v32, %v4677_v36  ;;  %v4889_v53 = vadd.f32 %v4680_v28, %v4329_v52  ;;  %v5536_v40 = vrot.slane %v27100_v38, 1 }
 0x382   : > { %v4888_v14 = vadd.f32 %v4678_v45, %v4328_v59  ;;  %v5488_v41 = vmax.f32 %v27098_v54, %v22311_v29  ;;  %v5489_v20 = vmax.f32 %v27099_v34, %v22433_v37  ;;  %v5537_v17 = vrot.slane %v27101_v23, 1 }
 0x383   : > { %v5584_v19 = vrot.slane %v27100_v38, 2  ;;  %v5585_v61 = vrot.slane %v27101_v23, 2  ;;  %v5632_v42 = vrot.slane %v27100_v38, 3  ;;  %v5633_v36 = vrot.slane %v27101_v23, 3 }
 0x384   : > { %v5704_v59 = vrot.slane %v5296_v13, 4  ;;  %v5705_v52 = vrot.slane %v5297_v58, 4  ;;  %v5752_v8 = vrot.slane %v5296_v13, 5  ;;  %v5753_v29 = vrot.slane %v5297_v58, 5 }
 0x385   : > { %v5800_v32 = vrot.slane %v5296_v13, 6  ;;  %v5801_v45 = vrot.slane %v5297_v58, 6  ;;  %v5848_v62 = vrot.slane %v5296_v13, 7  ;;  %v5920_v37 = vrot.slane %v22341_v30, 1 }
 0x386   : > { %v5921_v28 = vrot.slane %v22487_v56, 1  ;;  %v5968_v54 = vrot.slane %v22341_v30, 2  ;;  %v5969_v34 = vrot.slane %v22487_v56, 2  ;;  %v6016_v6 = vrot.slane %v22341_v30, 3 }
 0x387   : > { %v6017_v57 = vrot.slane %v22487_v56, 3  ;;  %v6088_v3 = vrot.slane %v5488_v41, 4  ;;  %v6089_v9 = vrot.slane %v5489_v20, 4  ;;  %v6137_v60 = vsel %vm6122_vm2, %v27100_v38, %v5536_v40 }
 0x388   : > { %v6138_v13 = vsel %vm6122_vm2, %v27101_v23, %v5537_v17  ;;  %v6309_v50 = vsel %vm6122_vm2, %v22341_v30, %v5920_v37  ;;  %v6162_v4 = vsel %vm6147_vm3, %v6137_v60, %v5584_v19  ;;  %v6310_v49 = vsel %vm6122_vm2, %v22487_v56, %v5921_v28 }
 0x389   : > { %v6163_v27 = vsel %vm6147_vm3, %v6138_v13, %v5585_v61  ;;  %v6333_v35 = vsel %vm6147_vm3, %v6309_v50, %v5968_v54  ;;  %v6187_v41 = vsel %vm6172_vm4, %v6162_v4, %v5632_v42  ;;  %v6334_v38 = vsel %vm6147_vm3, %v6310_v49, %v5969_v34 }
 0x38a   : > { %v6188_v20 = vsel %vm6172_vm4, %v6163_v27, %v5633_v36  ;;  %v6357_v40 = vsel %vm6172_vm4, %v6333_v35, %v6016_v6  ;;  %v5849_v23 = vrot.slane %v5297_v58, 7  ;;  %v6212_v30 = vsel %vm6197_vm5, %v6187_v41, %v5704_v59 }
 0x38b   : > { %v6213_v60 = vsel %vm6197_vm5, %v6188_v20, %v5705_v52  ;;  %v6358_v17 = vsel %vm6172_vm4, %v6334_v38, %v6017_v57  ;;  %v6237_v19 = vsel %vm6222_vm6, %v6212_v30, %v5752_v8  ;;  %v6381_v50 = vsel %vm6197_vm5, %v6357_v40, %v6088_v3  ;;  %v843_v38 = vpop.permute.xlu1 %842  ;;  %v27111_v40 = vld [vmem:[#allocation60_spill] sm:$0xff] }
 0x38c   : > { %v6238_v56 = vsel %vm6222_vm6, %v6213_v60, %v5753_v29  ;;  %v6382_v4 = vsel %vm6197_vm5, %v6358_v17, %v6089_v9  ;;  %v4992_v27 = vadd.f32 %v22387_v48, %v4889_v53  ;;  %v6261_v49 = vsel %vm1874_vm1, %v6237_v19, %v5800_v32 }
 0x38d   : > { %v6262_v35 = vsel %vm1874_vm1, %v6238_v56, %v5801_v45  ;;  %v22658_v6 = vmax.f32 %v6381_v50, %v6382_v4  ;;  %v2213_v58 = vadd.f32 %v2007_v46, %v22492_v55  ;;  %v22663_v57 = vmul.f32 %v22528_v26, %v22490_v5 }
 0x38e   : > { %v6285_v61 = vsel %vm1313_vm0, %v6261_v49, %v5848_v62  ;;  %v6286_v3 = vsel %vm1313_vm0, %v6262_v35, %v5849_v23  ;;  %v5083_v9 = vmax.f32 %v22585_v33, 0.0  ;;  %v27103_v53 = vmax.f32 %v22568_v16, 0.0  ;;  %v27144_v33 = vld [vmem:[#allocation26_spill] sm:$0xff] }
 0x38f   : > { %27102 = vst [vmem:[#allocation6_spill] sm:$0xff] %v22658_v6  ;;  %v22670_v36 = vmax.f32 %v6285_v61, %v6286_v3  ;;  %v22673_v59 = vrot.slane %v22658_v6, 1  ;;  %v22677_v55 = vadd.f32 %v22387_v48, %v22598_v18  ;;  %v27106_v46 = vrot.slane %v22573_v24, 1  ;;  %v838_v61 = vpop.permute.xlu0 %837 }
 0x390   : > { %v5346_v42 = vrot.slane %v27103_v53, 1  ;;  %v27107_v52 = vrot.slane %v22023_v51, 1  ;;  %v2337_v29 = vmul.f32 %v22547_v10, %v22490_v5  ;;  %v22687_v32 = vadd.f32 %v22387_v48, %v4888_v14 }
 0x391   : > { %27104 = vst [vmem:[#allocation47_spill] sm:$0xff] %v22670_v36  ;;  %27105 = vst [vmem:[#allocation52_spill] sm:$0xff] %v22673_v59  ;;  %v2784_v45 = vrot.slane %v22609_v63, 1  ;;  %v22692_v62 = vmul.f32 %v22562_v47, %v22490_v5  ;;  %v5088_v18 = vmax.f32 %v4992_v27, 0.0  ;;  %v7011_v37 = vrot.slane %v22670_v36, 1  ;;  %v27110_v63 = vld [vmem:[#allocation62_spill] sm:$0xff] }
 0x392   : > { %v1451_v8 = vsel %vm1313_vm0, %v27107_v52, %v27106_v46  ;;  %v27108_v51 = vrot.slane %v22531_v12, 2  ;;  %v27109_v54 = vrot.slane %v22565_v2, 2  ;;  %v26333_v14 = vrot.slane %v22663_v57, 2 }
 0x393   : > { %v2432_v13 = vadd.f32 %v27110_v63, %v22506_v21  ;;  %v999_v41 = vmul.f32 %v22479_v39, %v22490_v5  ;;  %v2433_v20 = vadd.f32 %v2337_v29, %v2213_v58  ;;  %v1655_v23 = vadd.f32 %v1451_v8, %v27111_v40 }
 0x394   : > { %v22698_v28 = vadd.f32 %v27108_v51, %v22581_v7  ;;  %v22703_v34 = vadd.f32 %v27109_v54, %v22589_v22  ;;  %v22713_v7 = vsel %vm1313_vm0, %v7011_v37, %v22673_v59  ;;  %v5250_v22 = vrot.slane %v5083_v9, 1  ;;  %v27123_v37 = vld [vmem:[#allocation63_spill] sm:$0xff] }
 0x395   : > { %27112 = vst [vmem:[#allocation38_spill] sm:$0xff] %v22713_v7  ;;  %v26334_v30 = vmax.f32 %v22677_v55, 0.0  ;;  %v27113_v60 = vrot.slane %v22519_v0, 1  ;;  %v27114_v21 = vmov %v27106_v46  ;;  %v5087_v5 = vmax.f32 %v22687_v32, 0.0  ;;  %16875 = vmatprep.mubr.msk.f32.mxu1 %vm6425_vm7, %v22713_v7 }
 0x396   : > { %v27115_v19 = vmov %v27103_v53  ;;  %v27116_v50 = vrot.slane %v22047_v43, 1  ;;  %v26332_v27 = vrot.slane %v22692_v62, 2  ;;  %v5347_v0 = vrot.slane %v5088_v18, 1  ;;  %16876 = vmatmul.mubr.msk.f32.vlgmr.msra.gmra.mxu1 %vm6425_vm7, %v22673_v59 }
 0x397   : > { %v1453_v17 = vsel %vm1313_vm0, %v27114_v21, %v27113_v60  ;;  %v22728_v56 = vmax.f32 %v27115_v19, %v5346_v42  ;;  %v27117_v24 = vrot.slane %v22539_v11, 1  ;;  %v22740_v35 = vmul.f32 %v22379_v44, %v843_v38  ;;  %16886 = vmatpush3.msra.mxu1 %v22199_v15  ;;  %v22764_v15 = vld [vmem:[%s26017_s1 + $0x7] ss:$0 sm:$0xff]  ;;  %v22793_v60 = vld [vmem:[%s26017_s1 + $0x6] ss:$0 sm:$0xff] }
 0x398   : > { %v2785_v4 = vsel %vm1313_vm0, %v27116_v50, %v2784_v45  ;;  %v27119_v16 = vrot.slane %v22041_v25, 2  ;;  %v22748_v3 = vadd.f32 %v1453_v17, %v999_v41  ;;  %v22753_v42 = vmul.f32 %v22536_v31, %v843_v38  ;;  %16887 = vmatprep.subr.mxu1 %v22214_v1  ;;  %27121 = vst [vmem:[#allocation20_spill] sm:$0xff] %v22764_v15  ;;  %v22799_v17 = vld [vmem:[%s26017_s1 + $0x8] ss:$0 sm:$0xff] }
 0x399   : > { %v2787_v49 = vsel %vm1313_vm0, %v2784_v45, %v27117_v24  ;;  %27118 = vst [vmem:[#allocation15_spill] sm:$0xff] %v22740_v35  ;;  %v2992_v58 = vadd.f32 %v2785_v4, %v2432_v13  ;;  %v5443_v46 = vrot.slane %v26334_v30, 1  ;;  %v5251_v52 = vrot.slane %v5087_v5, 1  ;;  %16888 = vmatpush3.msra.mxu1 %v22214_v1  ;;  %v27125_v13 = vld [vmem:[#allocation67_spill] sm:$0xff]  ;;  %27128 = vst [vmem:[#allocation23_spill] sm:$0xff] %v22793_v60  ;;  %v27131_v24 = vld [vmem:[#allocation65_spill] sm:$0xff] }
 0x39a   : > { %v2012_v43 = vsel %vm1874_vm1, %v27119_v16, %v26333_v14  ;;  %v22750_v53 = vadd.f32 %v2787_v49, %v2433_v20  ;;  %v22759_v8 = vmul.f32 %v22562_v47, %v843_v38  ;;  %v22767_v29 = vmul.f32 %v22764_v15, %v843_v38  ;;  %16899 = vmatprep.subr.mxu1 %v27125_v13  ;;  %v27140_v14 = vld [vmem:[#allocation45_spill] sm:$0xff] }
 0x39b   : > { %v2216_v11 = vadd.f32 %v2012_v43, %v1655_v23  ;;  %v22770_v32 = vmax.f32 %v5088_v18, %v5347_v0  ;;  %v2340_v45 = vmul.f32 %v22547_v10, %v843_v38  ;;  %v27124_v51 = vrot.slane %v27123_v37, 2  ;;  %27129 = vst [vmem:[#allocation31_spill] sm:$0xff] %v22799_v17 }
 0x39c   : > { %27120 = vst [vmem:[#allocation37_spill] sm:$0xff] %v22759_v8  ;;  %27122 = vst [vmem:[#allocation44_spill] sm:$0xff] %v22767_v29  ;;  %v3875_v63 = vmul.f32 %v22764_v15, %v838_v61  ;;  %v22781_v41 = vmul.f32 %v22479_v39, %v843_v38  ;;  %v22785_v1 = vmul.f32 %v22528_v26, %v843_v38  ;;  %v26335_v4 = vrot.slane %v22767_v29, 1 }
 0x39d   : > { %v3345_v54 = vsel %vm1874_vm1, %v27124_v51, %v26332_v27  ;;  %v22787_v40 = vadd.f32 %v2340_v45, %v2216_v11  ;;  %v3676_v21 = vmul.f32 %v22793_v60, %v843_v38  ;;  %v22802_v19 = vmul.f32 %v22799_v17, %v843_v38 }
 0x39e   : > { %27126 = vst [vmem:[#allocation41_spill] sm:$0xff] %v22781_v41  ;;  %27127 = vst [vmem:[#allocation12_spill] sm:$0xff] %v22785_v1  ;;  %v3552_v18 = vadd.f32 %v3345_v54, %v2992_v58  ;;  %v27130_v0 = vmov %v27119_v16  ;;  %v27132_v49 = vrot.slane %v27131_v24, 2  ;;  %v2339_v43 = vmul.f32 %v22547_v10, %v838_v61  ;;  %v27135_v54 = vld [vmem:[#allocation69_spill] sm:$0xff]  ;;  %v27137_v24 = vld [vmem:[#allocation66_spill] sm:$0xff] }
 0x39f   : > { %v22813_v58 = vmul.f32 %v22536_v31, %v838_v61  ;;  %v22816_v11 = vmul.f32 %v22562_v47, %v838_v61  ;;  %v3675_v38 = vmul.f32 %v22793_v60, %v838_v61  ;;  %v4121_v45 = vrot.slane %v3875_v63, 1 }
 0x3a0   : > { %v2010_v16 = vsel %vm1874_vm1, %v27132_v49, %v27130_v0  ;;  %v22819_v51 = vadd.f32 %v3676_v21, %v3552_v18  ;;  %v27136_v25 = vrot.slane %v27123_v37, 2  ;;  %v27138_v50 = vrot.slane %v27137_v24, 2  ;;  %v22838_v18 = vpop.permute.xlu1 %852 }
 0x3a1   : > { %27133 = vst [vmem:[#allocation50_spill] sm:$0xff] %v22816_v11  ;;  %v2215_v20 = vadd.f32 %v2010_v16, %v27135_v54  ;;  %v22828_v49 = vmul.f32 %v22479_v39, %v838_v61  ;;  %v22833_v30 = vmul.f32 %v22379_v44, %v838_v61  ;;  %v22836_v63 = vmul.f32 %v22528_v26, %v838_v61 }
 0x3a2   : > { %27134 = vst [vmem:[#allocation30_spill] sm:$0xff] %v22819_v51  ;;  %v3343_v0 = vsel %vm1874_vm1, %v27138_v50, %v27136_v25  ;;  %v22843_v21 = vmul.f32 %v22799_v17, %v838_v61  ;;  %v5298_v50 = vmax.f32 %v5083_v9, %v5250_v22  ;;  %v5299_v16 = vmax.f32 %v5087_v5, %v5251_v52 }
 0x3a3   : > { %27139 = vst [vmem:[#allocation16_spill] sm:$0xff] %v22828_v49  ;;  %v3551_v23 = vadd.f32 %v3343_v0, %v27140_v14  ;;  %27141 = vst [vmem:[#allocation54_spill] sm:$0xff] %v22833_v30  ;;  %v22840_v37 = vadd.f32 %v2339_v43, %v2215_v20  ;;  %v2788_v54 = vrot.slane %v22813_v58, 1  ;;  %v4123_v24 = vsel %vm1313_vm0, %v4121_v45, %v26335_v4  ;;  %v27143_v43 = vld [vmem:[#allocation28_spill] sm:$0xff] }
 0x3a4   : > { %27142 = vst [vmem:[#allocation55_spill] sm:$0xff] %v22836_v63  ;;  %v2342_v20 = vmul.f32 %v22547_v10, %v22838_v18  ;;  %v22856_v61 = vmul.f32 %v22536_v31, %v22838_v18  ;;  %v27145_v9 = vmax.f32 %v27144_v33, 0.0  ;;  %v27146_v5 = vmax.f32 %v22677_v55, 0.0  ;;  %v27147_v58 = vld [vmem:[#allocation68_spill] sm:$0xff] }
 0x3a5   : > { %v3771_v25 = vadd.f32 %v3675_v38, %v3551_v23  ;;  %v5538_v23 = vrot.slane %v27147_v58, 1  ;;  %v27148_v38 = vld [vmem:[#allocation35_spill] sm:$0xff]  ;;  %v5586_v45 = vrot.slane %v27147_v58, 2  ;;  %v5634_v14 = vrot.slane %v27147_v58, 3 }
 0x3a6   : > { %v5490_v22 = vmax.f32 %v27145_v9, %v27143_v43  ;;  %v5491_v52 = vmax.f32 %v27146_v5, %v5443_v46  ;;  %v5539_v0 = vrot.slane %v27148_v38, 1  ;;  %v5587_v4 = vrot.slane %v27148_v38, 2 }
 0x3a7   : > { %v5635_v27 = vrot.slane %v27148_v38, 3  ;;  %v5706_v59 = vrot.slane %v5298_v50, 4  ;;  %v5707_v7 = vrot.slane %v5299_v16, 4  ;;  %v5754_v6 = vrot.slane %v5298_v50, 5 }
 0x3a8   : > { %v5755_v33 = vrot.slane %v5299_v16, 5  ;;  %v5802_v43 = vrot.slane %v5298_v50, 6  ;;  %v5803_v9 = vrot.slane %v5299_v16, 6  ;;  %v5850_v55 = vrot.slane %v5298_v50, 7 }
 0x3a9   : > { %v5851_v46 = vrot.slane %v5299_v16, 7  ;;  %v5922_v5 = vrot.slane %v22728_v56, 1  ;;  %v5923_v36 = vrot.slane %v22770_v32, 1  ;;  %v5970_v49 = vrot.slane %v22728_v56, 2  ;;  %v22879_v16 = vpop.permute.xlu0 %847 }
 0x3aa   : > { %v5971_v41 = vrot.slane %v22770_v32, 2  ;;  %v6018_v63 = vrot.slane %v22728_v56, 3  ;;  %v6019_v35 = vrot.slane %v22770_v32, 3  ;;  %v6090_v1 = vrot.slane %v5490_v22, 4 }
 0x3ab   : > { %v6091_v30 = vrot.slane %v5491_v52, 4  ;;  %v6139_v51 = vsel %vm6122_vm2, %v27147_v58, %v5538_v23  ;;  %v6140_v50 = vsel %vm6122_vm2, %v27148_v38, %v5539_v0  ;;  %v6311_v11 = vsel %vm6122_vm2, %v22728_v56, %v5922_v5 }
 0x3ac   : > { %v6164_v48 = vsel %vm6147_vm3, %v6139_v51, %v5586_v45  ;;  %v6165_v29 = vsel %vm6147_vm3, %v6140_v50, %v5587_v4  ;;  %v6312_v8 = vsel %vm6122_vm2, %v22770_v32, %v5923_v36  ;;  %v6335_v58 = vsel %vm6147_vm3, %v6311_v11, %v5970_v49  ;;  %v22934_v50 = vpop.permute.xlu1 %862 }
 0x3ad   : > { %v6189_v22 = vsel %vm6172_vm4, %v6164_v48, %v5634_v14  ;;  %v6190_v52 = vsel %vm6172_vm4, %v6165_v29, %v5635_v27  ;;  %v6336_v23 = vsel %vm6147_vm3, %v6312_v8, %v5971_v41  ;;  %v6359_v4 = vsel %vm6172_vm4, %v6335_v58, %v6018_v63  ;;  %v22917_v49 = vpop.permute.xlu0 %857 }
 0x3ae   : > { %v6214_v38 = vsel %vm6197_vm5, %v6189_v22, %v5706_v59  ;;  %v6215_v51 = vsel %vm6197_vm5, %v6190_v52, %v5707_v7  ;;  %v6360_v0 = vsel %vm6172_vm4, %v6336_v23, %v6019_v35  ;;  %v6383_v48 = vsel %vm6197_vm5, %v6359_v4, %v6090_v1 }
 0x3af   : > { %v6239_v56 = vsel %vm6222_vm6, %v6214_v38, %v5754_v6  ;;  %v6240_v36 = vsel %vm6222_vm6, %v6215_v51, %v5755_v33  ;;  %v6384_v27 = vsel %vm6197_vm5, %v6360_v0, %v6091_v30  ;;  %v2541_v29 = vmul.f32 %v22536_v31, %v22879_v16  ;;  %v22970_v51 = vld [vmem:[%s26019_s3] sm:$0xff] }
 0x3b0   : > { %v6263_v8 = vsel %vm1874_vm1, %v6239_v56, %v5802_v43  ;;  %v6264_v59 = vsel %vm1874_vm1, %v6240_v36, %v5803_v9  ;;  %v22903_v7 = vmax.f32 %v6383_v48, %v6384_v27  ;;  %v3678_v35 = vmul.f32 %v22793_v60, %v22838_v18 }
 0x3b1   : > { %v22909_v6 = vmul.f32 %v22764_v15, %v22838_v18  ;;  %v6287_v32 = vsel %vm1313_vm0, %v6263_v8, %v5850_v55  ;;  %v6288_v30 = vsel %vm1313_vm0, %v6264_v59, %v5851_v46  ;;  %v27150_v41 = vrot.slane %v22753_v42, 1  ;;  %v27160_v59 = vld [vmem:[#allocation5_spill] sm:$0xff] }
 0x3b2   : > { %27149 = vst [vmem:[#allocation57_spill] sm:$0xff] %v22903_v7  ;;  %v4681_v11 = vrot.slane %v22843_v21, 2  ;;  %v22919_v63 = vmax.f32 %v6287_v32, %v6288_v30  ;;  %v22922_v14 = vrot.slane %v22903_v7, 1  ;;  %v4331_v45 = vadd.f32 %v4123_v24, %v3771_v25 }
 0x3b3   : > { %v2790_v1 = vsel %vm1313_vm0, %v2788_v54, %v27150_v41  ;;  %v2438_v33 = vadd.f32 %v2342_v20, %v22698_v28  ;;  %v2793_v43 = vrot.slane %v22856_v61, 1  ;;  %v27153_v9 = vrot.slane %v22531_v12, 2 }
 0x3b4   : > { %27151 = vst [vmem:[#allocation40_spill] sm:$0xff] %v22919_v63  ;;  %27152 = vst [vmem:[#allocation59_spill] sm:$0xff] %v22922_v14  ;;  %v27154_v55 = vrot.slane %v22663_v57, 2  ;;  %v2341_v46 = vmul.f32 %v22547_v10, %v22879_v16  ;;  %v2791_v5 = vrot.slane %v2541_v29, 1  ;;  %v7095_v25 = vrot.slane %v22919_v63, 1  ;;  %v22984_v29 = vpop.permute.xlu0 %867 }
 0x3b5   : > { %v22939_v28 = vmul.f32 %v22479_v39, %v22838_v18  ;;  %v3102_v12 = vmul.f32 %v22562_v47, %v22838_v18  ;;  %v3774_v57 = vadd.f32 %v3678_v35, %v22703_v34  ;;  %v4126_v24 = vrot.slane %v22909_v6, 1 }
 0x3b6   : > { %v2014_v54 = vsel %vm1874_vm1, %v27154_v55, %v27153_v9  ;;  %v22950_v61 = vmul.f32 %v22379_v44, %v22838_v18  ;;  %v3101_v22 = vmul.f32 %v22562_v47, %v22879_v16  ;;  %v22956_v52 = vsel %vm1313_vm0, %v7095_v25, %v22922_v14  ;;  %v27161_v9 = vld [vmem:[#allocation37_spill] sm:$0xff] }
 0x3b7   : > { %v2217_v21 = vadd.f32 %v2014_v54, %v22748_v3  ;;  %v27155_v3 = vrot.slane %v22802_v19, 2  ;;  %27156 = vst [vmem:[#allocation42_spill] sm:$0xff] %v22956_v52  ;;  %v2995_v58 = vadd.f32 %v2790_v1, %v22840_v37  ;;  %v22963_v23 = vmul.f32 %v22528_v26, %v22838_v18  ;;  %16882 = vmatprep.mubr.msk.f32.mxu0 %vm6425_vm7, %v22956_v52  ;;  %v27163_v54 = vld [vmem:[#allocation50_spill] sm:$0xff] }
 0x3b8   : > { %v2998_v38 = vadd.f32 %v2793_v43, %v2438_v33  ;;  %v22974_v4 = vmul.f32 %v22799_v17, %v22838_v18  ;;  %v27157_v37 = vrot.slane %v22565_v2, 2  ;;  %v27158_v0 = vrot.slane %v22692_v62, 2  ;;  %16883 = vmatmul.mubr.msk.f32.vlgmr.msra.gmra.mxu0 %vm6425_vm7, %v22922_v14 }
 0x3b9   : > { %v4683_v20 = vsel %vm1874_vm1, %v4681_v11, %v27155_v3  ;;  %v2437_v36 = vadd.f32 %v2341_v46, %v2217_v21  ;;  %v27159_v48 = vmov %v27150_v41  ;;  %v3353_v8 = vrot.slane %v3102_v12, 2  ;;  %16893 = vmatpush3.msra.mxu0 %v27125_v13  ;;  %16896 = vmatprep.mubr.msk.f32.mxu0 %vm6425_vm7, %v27160_v59  ;;  %v23003_v41 = vpop.permute.xlu1 %872 }
 0x3ba   : > { %v22959_v34 = vadd.f32 %v4683_v20, %v4331_v45  ;;  %v3347_v56 = vsel %vm1874_vm1, %v27158_v0, %v27157_v37  ;;  %v2792_v27 = vsel %vm1313_vm0, %v27159_v48, %v2791_v5  ;;  %v22990_v18 = vadd.f32 %v4126_v24, %v3774_v57  ;;  %16894 = vmatprep.subr.mxu0 %v22970_v51  ;;  %v27166_v20 = vld [vmem:[#allocation9_spill] sm:$0xff] }
 0x3bb   : > { %v3553_v2 = vadd.f32 %v3347_v56, %v22750_v53  ;;  %v2794_v62 = vsel %vm1313_vm0, %v2791_v5, %v2793_v43  ;;  %v3351_v42 = vrot.slane %v3101_v22, 2  ;;  %v3877_v35 = vmul.f32 %v22764_v15, %v22879_v16  ;;  %16895 = vmatpush3.msra.mxu0 %v22970_v51  ;;  %v27165_v5 = vld [vmem:[#allocation22_spill] sm:$0xff] }
 0x3bc   : > { %v3880_v32 = vmul.f32 %v22764_v15, %v22934_v50  ;;  %v3879_v30 = vmul.f32 %v22764_v15, %v22917_v49  ;;  %v3558_v53 = vadd.f32 %v3353_v8, %v2998_v38  ;;  %v23008_v13 = vmul.f32 %v22379_v44, %v22879_v16  ;;  %16897 = vmatmul.mubr.msk.f32.vlgmr.msra.gmra.mxu0 %vm6425_vm7, %v27165_v5 }
 0x3bd   : > { %v2996_v1 = vadd.f32 %v2792_v27, %v22787_v40  ;;  %v3881_v11 = vmul.f32 %v22764_v15, %v22984_v29  ;;  %v2997_v33 = vadd.f32 %v2794_v62, %v2437_v36  ;;  %v3677_v43 = vmul.f32 %v22793_v60, %v22879_v16  ;;  %v23027_v40 = vld [vmem:[%s26019_s3 + $0x8] sm:$0xff]  ;;  %16910 = vmatprep.mubr.msk.f32.mxu0 %vm6425_vm7, %v27166_v20 }
 0x3be   : > { %v27162_v55 = vrot.slane %v27161_v9, 2  ;;  %v27164_v21 = vrot.slane %v27163_v54, 2  ;;  %16906 = vmatprep.subr.mxu0 %v23027_v40  ;;  %v3679_v57 = vmul.f32 %v22793_v60, %v22917_v49  ;;  %v3882_v3 = vmul.f32 %v22764_v15, %v23003_v41  ;;  %v27170_v54 = vld [vmem:[#allocation44_spill] sm:$0xff] }
 0x3bf   : > { %16907 = vmatpush3.msra.mxu0 %v23027_v40  ;;  %v4124_v22 = vrot.slane %v3877_v35, 1  ;;  %v4129_v0 = vrot.slane %v3880_v32, 1  ;;  %v4128_v56 = vrot.slane %v3879_v30, 1  ;;  %v4440_v36 = vmul.f32 %v22799_v17, %v22934_v50  ;;  %v27168_v30 = vld [vmem:[#allocation46_spill] sm:$0xff] }
 0x3c0   : > { %v3350_v46 = vsel %vm1874_vm1, %v27164_v21, %v27162_v55  ;;  %v27167_v38 = vmov %v27162_v55  ;;  %16908 = vmatprep.subr.mxu0 %v22970_v51  ;;  %v3354_v48 = vsel %vm1874_vm1, %v3351_v42, %v3353_v8  ;;  %v4131_v27 = vrot.slane %v3881_v11, 1  ;;  %v27169_v55 = vld [vmem:[#allocation34_spill] sm:$0xff] }
 0x3c1   : > { %v3555_v12 = vadd.f32 %v3350_v46, %v2995_v58  ;;  %v3352_v37 = vsel %vm1874_vm1, %v27167_v38, %v3351_v42  ;;  %16909 = vmatpush3.msra.mxu0 %v22970_v51  ;;  %v4439_v62 = vmul.f32 %v22799_v17, %v22917_v49  ;;  %v3682_v35 = vmul.f32 %v22793_v60, %v23003_v41 }
 0x3c2   : > { %v3556_v58 = vadd.f32 %v3352_v37, %v2996_v1  ;;  %v3557_v9 = vadd.f32 %v3354_v48, %v2997_v33  ;;  %v3681_v32 = vmul.f32 %v22793_v60, %v22984_v29  ;;  %16911 = vmatmul.mubr.msk.f32.vlgmr.msra.gmra.mxu0 %vm6425_vm7, %v27168_v30  ;;  %v4437_v1 = vmul.f32 %v22799_v17, %v22879_v16 }
 0x3c3   : > { %v3775_v8 = vadd.f32 %v3679_v57, %v3555_v12  ;;  %v4133_v42 = vrot.slane %v3882_v3, 1  ;;  %v4441_v11 = vmul.f32 %v22799_v17, %v22984_v29  ;;  %16920 = vmatprep.subr.mxu0 %v23027_v40  ;;  %16924 = vmatprep.mubr.msk.f32.mxu0 %vm6425_vm7, %v27169_v55  ;;  %v3773_v33 = vadd.f32 %v3677_v43, %v3553_v2 }
 0x3c4   : > { %v27171_v21 = vrot.slane %v27170_v54, 1  ;;  %v3680_v38 = vmul.f32 %v22793_v60, %v22934_v50  ;;  %v4130_v37 = vsel %vm1313_vm0, %v4128_v56, %v4129_v0  ;;  %16921 = vmatpush3.msra.mxu0 %v23027_v40  ;;  %v4127_v12 = vsel %vm1313_vm0, %v4124_v22, %v4126_v24  ;;  %v27172_v24 = vld [vmem:[#allocation17_spill] sm:$0xff] }
 0x3c5   : > { %v4689_v57 = vrot.slane %v4440_v36, 2  ;;  %v4442_v3 = vmul.f32 %v22799_v17, %v23003_v41  ;;  %v4132_v2 = vsel %vm1313_vm0, %v4129_v0, %v4131_v27  ;;  %16922 = vmatprep.subr.mxu0 %v22970_v51  ;;  %v4688_v48 = vrot.slane %v4439_v62, 2 }
 0x3c6   : > { %v4125_v46 = vsel %vm1313_vm0, %v27171_v21, %v4124_v22  ;;  %v3776_v43 = vadd.f32 %v3680_v38, %v3556_v58  ;;  %v3778_v54 = vadd.f32 %v3682_v35, %v3558_v53  ;;  %v3777_v21 = vadd.f32 %v3681_v32, %v3557_v9  ;;  %16923 = vmatpush3.msra.mxu0 %v22970_v51  ;;  %v27173_v22 = vld [vmem:[#allocation27_spill] sm:$0xff]  ;;  %v27175_v53 = vld [vmem:[#allocation30_spill] sm:$0xff] }
 0x3c7   : > { %v4684_v56 = vrot.slane %v4437_v1, 2  ;;  %v4335_v25 = vadd.f32 %v4130_v37, %v3775_v8  ;;  %v4134_v6 = vsel %vm1313_vm0, %v4131_v27, %v4133_v42  ;;  %v4691_v45 = vrot.slane %v4441_v11, 2  ;;  %16925 = vmatmul.mubr.msk.f32.vlgmr.msra.gmra.mxu0 %vm6425_vm7, %v27172_v24  ;;  %16934 = vmatprep.subr.mxu0 %v23027_v40 }
 0x3c8   : > { %v23081_v36 = vadd.f32 %v27173_v22, %v22959_v34  ;;  %v27174_v0 = vrot.slane %v22950_v61, 1  ;;  %v4332_v62 = vadd.f32 %v4125_v46, %v27175_v53  ;;  %v4336_v35 = vadd.f32 %v4132_v2, %v3776_v43  ;;  %16935 = vmatpush3.msra.mxu0 %v23027_v40  ;;  %v27177_v34 = vld [vmem:[#allocation54_spill] sm:$0xff]  ;;  %v27178_v46 = vld [vmem:[#allocation39_spill] sm:$0xff] }
 0x3c9   : > { %v27176_v27 = vrot.slane %v22974_v4, 2  ;;  %v1457_v32 = vrot.slane %v23008_v13, 1  ;;  %v4333_v1 = vadd.f32 %v4127_v12, %v3773_v33  ;;  %v4693_v8 = vrot.slane %v4442_v3, 2  ;;  %16938 = vmatprep.mubr.msk.f32.mxu0 %vm6425_vm7, %v27178_v46  ;;  %16936 = vmatprep.subr.mxu0 %v22970_v51 }
 0x3ca   : > { %v1661_v58 = vadd.f32 %v27174_v0, %v22939_v28  ;;  %v1454_v11 = vrot.slane %v27177_v34, 1  ;;  %v4690_v38 = vsel %vm1874_vm1, %v4688_v48, %v4689_v57  ;;  %v4338_v28 = vadd.f32 %v4133_v42, %v3778_v54  ;;  %16937 = vmatpush3.msra.mxu0 %v22970_v51  ;;  %v27183_v0 = vld [vmem:[#allocation15_spill] sm:$0xff] }
 0x3cb   : > { %v4894_v9 = vadd.f32 %v27176_v27, %v22990_v18  ;;  %v4337_v37 = vadd.f32 %v4134_v6, %v3777_v21  ;;  %v23100_v18 = vmul.f32 %v22528_v26, %v22879_v16  ;;  %v27179_v13 = vrot.slane %v22802_v19, 2  ;;  %v27181_v21 = vld [vmem:[#allocation7_spill] sm:$0xff]  ;;  %v27182_v6 = vld [vmem:[#allocation12_spill] sm:$0xff]  ;;  %16948 = vmatprep.subr.mxu0 %v23027_v40 }
 0x3cc   : > { %v4895_v12 = vadd.f32 %v4690_v38, %v4335_v25  ;;  %v4692_v3 = vsel %vm1874_vm1, %v4689_v57, %v4691_v45  ;;  %v5090_v42 = vmax.f32 %v23081_v36, 0.0  ;;  %v27180_v2 = vmov %v27176_v27  ;;  %16939 = vmatmul.mubr.msk.f32.vlgmr.msra.gmra.mxu0 %vm6425_vm7, %v27181_v21  ;;  %v27186_v34 = vld [vmem:[#allocation55_spill] sm:$0xff] }
 0x3cd   : > { %v4685_v33 = vsel %vm1874_vm1, %v27179_v13, %v4684_v56  ;;  %v4687_v43 = vsel %vm1874_vm1, %v4684_v56, %v27180_v2  ;;  %v4896_v54 = vadd.f32 %v4692_v3, %v4336_v35  ;;  %v2016_v19 = vrot.slane %v27182_v6, 2  ;;  %16952 = vmatprep.mubr.msk.f32.mxu0 %vm6425_vm7, %v22919_v63  ;;  %16949 = vmatpush3.msra.mxu0 %v23027_v40  ;;  %v27189_v3 = vld [vmem:[#allocation16_spill] sm:$0xff] }
 0x3ce   : > { %v4892_v48 = vadd.f32 %v4685_v33, %v4332_v62  ;;  %v27184_v53 = vrot.slane %v27183_v0, 1  ;;  %v4893_v57 = vadd.f32 %v4687_v43, %v4333_v1  ;;  %v4694_v27 = vsel %vm1874_vm1, %v4691_v45, %v4693_v8  ;;  %16950 = vmatprep.subr.mxu0 %v22970_v51 }
 0x3cf   : > { %v23125_v36 = vadd.f32 %v27173_v22, %v4894_v9  ;;  %v4898_v62 = vadd.f32 %v4693_v8, %v4338_v28  ;;  %v4897_v35 = vadd.f32 %v4694_v27, %v4337_v37  ;;  %v2015_v1 = vrot.slane %v27186_v34, 2  ;;  %v27188_v28 = vld [vmem:[#allocation41_spill] sm:$0xff]  ;;  %16951 = vmatpush3.msra.mxu0 %v22970_v51 }
 0x3d0   : > { %v1458_v25 = vsel %vm1313_vm0, %v27184_v53, %v1457_v32  ;;  %v27185_v4 = vmov %v27184_v53  ;;  %v26354_v45 = vrot.slane %v22963_v23, 2  ;;  %v26353_v38 = vrot.slane %v23100_v18, 2  ;;  %16953 = vmatmul.mubr.msk.f32.vlgmr.msra.gmra.mxu0 %vm6425_vm7, %v22903_v7 }
 0x3d1   : > { %v1456_v56 = vsel %vm1313_vm0, %v1454_v11, %v27185_v4  ;;  %v4998_v13 = vadd.f32 %v27173_v22, %v4895_v12  ;;  %v23136_v11 = vld [vmem:[%s26019_s3 + $0x28] sm:$0xff]  ;;  %v5156_v9 = vrot.slane %v5090_v42, 1  ;;  %v4995_v8 = vadd.f32 %v27173_v22, %v4892_v48  ;;  %v23155_v48 = vld [vmem:[%s26019_s3 + $0x20] sm:$0xff] }
 0x3d2   : > { %27187 = vst [vmem:[#allocation53_spill] sm:$0xff] %v23136_v11  ;;  %v1659_v37 = vadd.f32 %v1458_v25, %v27188_v28  ;;  %v4999_v33 = vadd.f32 %v27173_v22, %v4896_v54  ;;  %v1658_v2 = vadd.f32 %v1456_v56, %v27189_v3  ;;  %v23145_v12 = vadd.f32 %v26354_v45, %v1661_v58 }
 0x3d3   : > { %v1003_v43 = vmul.f32 %v22479_v39, %v22879_v16  ;;  %v4996_v0 = vadd.f32 %v27173_v22, %v4893_v57  ;;  %27190 = vst [vmem:[#allocation58_spill] sm:$0xff] %v23155_v48  ;;  %v5093_v54 = vmax.f32 %v23125_v36, 0.0  ;;  %v27191_v53 = vrot.slane %v22950_v61, 1  ;;  %16962 = vmatprep.subr.mxu0 %v23136_v11 }
 0x3d4   : > { %v5001_v25 = vadd.f32 %v27173_v22, %v4898_v62  ;;  %v5000_v16 = vadd.f32 %v27173_v22, %v4897_v35  ;;  %v23166_v57 = vmul.f32 %v22379_v44, %v22934_v50  ;;  %v23170_v27 = vmul.f32 %v22528_v26, %v22934_v50  ;;  %16963 = vmatpush3.msra.mxu0 %v23136_v11 }
 0x3d5   : > { %v1460_v58 = vsel %vm1313_vm0, %v1457_v32, %v27191_v53  ;;  %v2019_v61 = vsel %vm1874_vm1, %v2016_v19, %v26353_v38  ;;  %v5094_v32 = vmax.f32 %v4998_v13, 0.0  ;;  %v23178_v22 = vmax.f32 %v5090_v42, %v5156_v9  ;;  %16964 = vmatprep.subr.mxu0 %v23155_v48  ;;  %v23206_v53 = vld [vmem:[%s26017_s1 + $0x1] ss:$0 sm:$0xff] }
 0x3d6   : > { %27192 = vst [vmem:[#allocation64_spill] sm:$0xff] %v23170_v27  ;;  %v5091_v4 = vmax.f32 %v4995_v8, 0.0  ;;  %v2220_v56 = vadd.f32 %v2019_v61, %v1659_v37  ;;  %v5095_v36 = vmax.f32 %v4999_v33, 0.0  ;;  %v23181_v44 = vadd.f32 %v1460_v58, %v1003_v43  ;;  %16965 = vmatpush3.msra.mxu0 %v23155_v48  ;;  %27195 = vst [vmem:[#allocation62_spill] sm:$0xff] %v23206_v53 }
 0x3d7   : > { %v5092_v62 = vmax.f32 %v4996_v0, 0.0  ;;  %v23185_v35 = vmul.f32 %v22479_v39, %v22934_v50  ;;  %v23189_v34 = vmul.f32 %v22536_v31, %v22934_v50  ;;  %v2344_v42 = vmul.f32 %v22547_v10, %v22934_v50  ;;  %16976 = vmatprep.subr.mxu0 %v23136_v11 }
 0x3d8   : > { %v23196_v13 = vmul.f32 %v22562_v47, %v22934_v50  ;;  %v5097_v9 = vmax.f32 %v5001_v25, 0.0  ;;  %v5096_v8 = vmax.f32 %v5000_v16, 0.0  ;;  %v5444_v28 = vrot.slane %v5093_v54, 1 }
 0x3d9   : > { %v5157_v3 = vrot.slane %v5094_v32, 1  ;;  %v5252_v43 = vrot.slane %v5091_v4, 1  ;;  %v23201_v0 = vadd.f32 %v2344_v42, %v2220_v56  ;;  %v23210_v50 = vmul.f32 %v23206_v53, %v22917_v49 }
 0x3da   : > { %27193 = vst [vmem:[#allocation43_spill] sm:$0xff] %v23196_v13  ;;  %v5253_v58 = vrot.slane %v5095_v36, 1  ;;  %v5348_v25 = vrot.slane %v5092_v62, 1  ;;  %v2017_v61 = vsel %vm1874_vm1, %v2015_v1, %v2016_v19  ;;  %v23218_v56 = vmul.f32 %v22536_v31, %v22917_v49 }
 0x3db   : > { %27194 = vst [vmem:[#allocation61_spill] sm:$0xff] %v23201_v0  ;;  %v23221_v33 = vadd.f32 %v2017_v61, %v1658_v2  ;;  %v5445_v38 = vrot.slane %v5097_v9, 1  ;;  %v5349_v45 = vrot.slane %v5096_v8, 1  ;;  %v23225_v37 = vmul.f32 %v22479_v39, %v22917_v49 }
 0x3dc   : > { %v23229_v16 = vmul.f32 %v22528_v26, %v22917_v49  ;;  %v23233_v6 = vmul.f32 %v22547_v10, %v22917_v49  ;;  %v5205_v19 = vmax.f32 %v5094_v32, %v5157_v3  ;;  %v1461_v1 = vrot.slane %v23210_v50, 1 }
 0x3dd   : > { %v23238_v2 = vmul.f32 %v22562_v47, %v22917_v49  ;;  %v5300_v61 = vmax.f32 %v5091_v4, %v5252_v43  ;;  %v5301_v42 = vmax.f32 %v5095_v36, %v5253_v58  ;;  %v5396_v14 = vmax.f32 %v5092_v62, %v5348_v25 }
 0x3de   : > { %v23243_v52 = vmul.f32 %v23206_v53, %v23003_v41  ;;  %v23247_v7 = vmul.f32 %v22536_v31, %v23003_v41  ;;  %v23251_v32 = vmul.f32 %v23206_v53, %v22984_v29  ;;  %v5397_v3 = vmax.f32 %v5096_v8, %v5349_v45 }
 0x3df   : > { %v5492_v49 = vmax.f32 %v5093_v54, %v5444_v28  ;;  %v5493_v50 = vmax.f32 %v5097_v9, %v5445_v38  ;;  %v5540_v4 = vrot.slane %v23178_v22, 1  ;;  %v5541_v36 = vrot.slane %v5205_v19, 1 }
 0x3e0   : > { %v5588_v62 = vrot.slane %v23178_v22, 2  ;;  %v5589_v43 = vrot.slane %v5205_v19, 2  ;;  %v5636_v58 = vrot.slane %v23178_v22, 3  ;;  %v5637_v25 = vrot.slane %v5205_v19, 3 }
 0x3e1   : > { %v5708_v39 = vrot.slane %v5300_v61, 4  ;;  %v5709_v63 = vrot.slane %v5301_v42, 4  ;;  %v5756_v21 = vrot.slane %v5300_v61, 5  ;;  %v5757_v46 = vrot.slane %v5301_v42, 5 }
 0x3e2   : > { %v5804_v24 = vrot.slane %v5300_v61, 6  ;;  %v5924_v55 = vrot.slane %v5396_v14, 1  ;;  %v5805_v53 = vrot.slane %v5301_v42, 6  ;;  %v5925_v48 = vrot.slane %v5397_v3, 1 }
 0x3e3   : > { %v5972_v45 = vrot.slane %v5396_v14, 2  ;;  %v5973_v54 = vrot.slane %v5397_v3, 2  ;;  %v5852_v38 = vrot.slane %v5300_v61, 7  ;;  %v6020_v9 = vrot.slane %v5396_v14, 3 }
 0x3e4   : > { %v6021_v8 = vrot.slane %v5397_v3, 3  ;;  %v6092_v28 = vrot.slane %v5492_v49, 4  ;;  %v6141_v11 = vsel %vm6122_vm2, %v23178_v22, %v5540_v4  ;;  %v6142_v30 = vsel %vm6122_vm2, %v5205_v19, %v5541_v36 }
 0x3e5   : > { %v6313_v20 = vsel %vm6122_vm2, %v5396_v14, %v5924_v55  ;;  %v6314_v60 = vsel %vm6122_vm2, %v5397_v3, %v5925_v48  ;;  %v6093_v17 = vrot.slane %v5493_v50, 4  ;;  %v6166_v13 = vsel %vm6147_vm3, %v6141_v11, %v5588_v62 }
 0x3e6   : > { %v6167_v15 = vsel %vm6147_vm3, %v6142_v30, %v5589_v43  ;;  %v6337_v0 = vsel %vm6147_vm3, %v6313_v20, %v5972_v45  ;;  %v6191_v61 = vsel %vm6172_vm4, %v6166_v13, %v5636_v58  ;;  %v6338_v27 = vsel %vm6147_vm3, %v6314_v60, %v5973_v54 }
 0x3e7   : > { %v6192_v49 = vsel %vm6172_vm4, %v6167_v15, %v5637_v25  ;;  %v6361_v22 = vsel %vm6172_vm4, %v6337_v0, %v6020_v9  ;;  %v5853_v19 = vrot.slane %v5301_v42, 7  ;;  %v6216_v14 = vsel %vm6197_vm5, %v6191_v61, %v5708_v39 }
 0x3e8   : > { %v6217_v55 = vsel %vm6197_vm5, %v6192_v49, %v5709_v63  ;;  %v6362_v48 = vsel %vm6172_vm4, %v6338_v27, %v6021_v8  ;;  %v6241_v11 = vsel %vm6222_vm6, %v6216_v14, %v5756_v21  ;;  %v6385_v20 = vsel %vm6197_vm5, %v6361_v22, %v6092_v28  ;;  %v23351_v22 = vpop.permute.xlu1 %882 }
 0x3e9   : > { %v6242_v30 = vsel %vm6222_vm6, %v6217_v55, %v5757_v46  ;;  %v6386_v13 = vsel %vm6197_vm5, %v6362_v48, %v6093_v17  ;;  %v2545_v15 = vmul.f32 %v22536_v31, %v22984_v29  ;;  %v6265_v60 = vsel %vm1874_vm1, %v6241_v11, %v5804_v24  ;;  %v23287_v46 = vld [vmem:[%s26017_s1] ss:$0 sm:$0xff]  ;;  %v27208_v55 = vld [vmem:[#allocation11_spill] sm:$0xff] }
 0x3ea   : > { %v6266_v0 = vsel %vm1874_vm1, %v6242_v30, %v5805_v53  ;;  %v23279_v42 = vmax.f32 %v6385_v20, %v6386_v13  ;;  %v27197_v63 = vrot.slane %v23166_v57, 1  ;;  %27198 = vst [vmem:[#allocation63_spill] sm:$0xff] %v23287_v46  ;;  %v1008_v17 = vmul.f32 %v23287_v46, %v23003_v41 }
 0x3eb   : > { %v6289_v31 = vsel %vm1313_vm0, %v6265_v60, %v5852_v38  ;;  %v6290_v24 = vsel %vm1313_vm0, %v6266_v0, %v5853_v19  ;;  %v1466_v21 = vrot.slane %v23243_v52, 1  ;;  %v27199_v53 = vrot.slane %v22963_v23, 2  ;;  %v27211_v60 = vld [vmem:[#allocation64_spill] sm:$0xff] }
 0x3ec   : > { %27196 = vst [vmem:[#allocation60_spill] sm:$0xff] %v23279_v42  ;;  %v1463_v27 = vsel %vm1313_vm0, %v1461_v1, %v27197_v63  ;;  %v27200_v39 = vrot.slane %v23100_v18, 2  ;;  %v23299_v3 = vmax.f32 %v6289_v31, %v6290_v24  ;;  %v23302_v50 = vrot.slane %v23279_v42, 1  ;;  %v27215_v24 = vld [vmem:[#allocation10_spill] sm:$0xff] }
 0x3ed   : > { %v23306_v4 = vmul.f32 %v22528_v26, %v23003_v41  ;;  %v1464_v62 = vrot.slane %v23251_v32, 1  ;;  %v2345_v52 = vmul.f32 %v22547_v10, %v22984_v29  ;;  %v26379_v23 = vrot.slane %v23247_v7, 1 }
 0x3ee   : > { %v2021_v1 = vsel %vm1874_vm1, %v27200_v39, %v27199_v53  ;;  %27201 = vst [vmem:[#allocation67_spill] sm:$0xff] %v23299_v3  ;;  %27202 = vst [vmem:[#allocation65_spill] sm:$0xff] %v23302_v50  ;;  %v23315_v18 = vmul.f32 %v22528_v26, %v22984_v29  ;;  %v2798_v43 = vrot.slane %v2545_v15, 1  ;;  %v7179_v58 = vrot.slane %v23299_v3, 1  ;;  %v27216_v53 = vld [vmem:[#allocation33_spill] sm:$0xff] }
 0x3ef   : > { %v2221_v36 = vadd.f32 %v2021_v1, %v23181_v44  ;;  %v2022_v25 = vrot.slane %v23229_v16, 2  ;;  %v2439_v45 = vadd.f32 %v23233_v6, %v23221_v33  ;;  %v27203_v44 = vrot.slane %v23189_v34, 1  ;;  %v23376_v34 = vpop.permute.xlu0 %877  ;;  %v27217_v1 = vld [vmem:[#allocation43_spill] sm:$0xff] }
 0x3f0   : > { %v27204_v32 = vrot.slane %v23218_v56, 1  ;;  %v3355_v38 = vrot.slane %v23238_v2, 2  ;;  %v1665_v9 = vadd.f32 %v1466_v21, %v1008_v17  ;;  %v2346_v26 = vmul.f32 %v22547_v10, %v23003_v41  ;;  %27209 = vst [vmem:[#allocation66_spill] sm:$0xff] %v23376_v34  ;;  %v27214_v17 = vld [vmem:[#allocation20_spill] sm:$0xff] }
 0x3f1   : > { %v23331_v8 = vmul.f32 %v22562_v47, %v22984_v29  ;;  %v23335_v16 = vsel %vm1313_vm0, %v7179_v58, %v23302_v50  ;;  %v1662_v33 = vadd.f32 %v1463_v27, %v23225_v37  ;;  %v26384_v56 = vrot.slane %v23306_v4, 2 }
 0x3f2   : > { %v2797_v54 = vsel %vm1313_vm0, %v27204_v32, %v27203_v44  ;;  %27205 = vst [vmem:[#allocation69_spill] sm:$0xff] %v23335_v16  ;;  %v1467_v6 = vsel %vm1313_vm0, %v1464_v62, %v1466_v21  ;;  %v2441_v28 = vadd.f32 %v2345_v52, %v2221_v36  ;;  %16889 = vmatprep.mubr.msk.f32.mxu1 %vm6425_vm7, %v23335_v16  ;;  %v26383_v49 = vrot.slane %v23315_v18, 2  ;;  %v27221_v32 = vld [vmem:[#allocation31_spill] sm:$0xff] }
 0x3f3   : > { %v1007_v10 = vmul.f32 %v23287_v46, %v22984_v29  ;;  %v27206_v2 = vmov %v27197_v63  ;;  %v2801_v37 = vsel %vm1313_vm0, %v2798_v43, %v26379_v23  ;;  %16890 = vmatmul.mubr.msk.f32.vlgmr.msra.gmra.mxu1 %vm6425_vm7, %v23302_v50  ;;  %v2999_v19 = vadd.f32 %v2797_v54, %v2439_v45 }
 0x3f4   : > { %v1465_v61 = vsel %vm1313_vm0, %v27206_v2, %v1464_v62  ;;  %v23357_v14 = vmul.f32 %v22562_v47, %v23003_v41  ;;  %v27207_v29 = vmov %v27203_v44  ;;  %16900 = vmatpush3.msra.mxu1 %v23027_v40  ;;  %16903 = vmatprep.mubr.msk.f32.mxu1 %vm6425_vm7, %v27208_v55  ;;  %v8054_v48 = vrot.slane %v27160_v59, 2  ;;  %v23385_v59 = vld [vmem:[%s26017_s1 + $0x4] ss:$0 sm:$0xff] }
 0x3f5   : > { %v2799_v57 = vsel %vm1313_vm0, %v27207_v29, %v2798_v43  ;;  %v23368_v11 = vadd.f32 %v26384_v56, %v1665_v9  ;;  %v23371_v30 = vadd.f32 %v2346_v26, %v23145_v12  ;;  %v23373_v47 = vadd.f32 %v1467_v6, %v1007_v10  ;;  %16901 = vmatprep.subr.mxu1 %v22970_v51 }
 0x3f6   : > { %v26380_v41 = vrot.slane %v23331_v8, 2  ;;  %v23379_v20 = vadd.f32 %v2801_v37, %v2441_v28  ;;  %v1663_v13 = vadd.f32 %v1465_v61, %v23185_v35  ;;  %27210 = vst [vmem:[#allocation45_spill] sm:$0xff] %v23385_v59  ;;  %v23389_v12 = vmul.f32 %v23385_v59, %v23351_v22  ;;  %16902 = vmatpush3.msra.mxu1 %v22970_v51  ;;  %v27213_v35 = vld [vmem:[#allocation61_spill] sm:$0xff]  ;;  %v27223_v28 = vld [vmem:[#allocation23_spill] sm:$0xff]  ;;  %v23447_v61 = vpop.permute.xlu0 %887 }
 0x3f7   : > { %v8055_v15 = vrot.slane %v27165_v5, 2  ;;  %v27212_v0 = vrot.slane %v27211_v60, 2  ;;  %v3000_v27 = vadd.f32 %v2799_v57, %v27213_v35  ;;  %v23401_v31 = vmul.f32 %v27214_v17, %v23351_v22  ;;  %16913 = vmatprep.subr.mxu1 %v23027_v40  ;;  %16904 = vmatmul.mubr.msk.f32.vlgmr.msra.gmra.mxu1 %vm6425_vm7, %v27215_v24  ;;  %v27224_v37 = vld [vmem:[#allocation21_spill] sm:$0xff]  ;;  %v27225_v57 = vld [vmem:[#allocation24_spill] sm:$0xff] }
 0x3f8   : > { %v2547_v5 = vmul.f32 %v23385_v59, %v23376_v34  ;;  %v3883_v21 = vmul.f32 %v27214_v17, %v23376_v34  ;;  %16914 = vmatpush3.msra.mxu1 %v23027_v40  ;;  %16917 = vmatprep.mubr.msk.f32.mxu1 %vm6425_vm7, %v27216_v53  ;;  %v27218_v36 = vrot.slane %v27217_v1, 2  ;;  %v26382_v44 = vrot.slane %v23389_v12, 1  ;;  %v23462_v1 = vld [vmem:[%s26017_s1 + $0x5] ss:$0 sm:$0xff] }
 0x3f9   : > { %v2026_v63 = vsel %vm1874_vm1, %v27212_v0, %v26383_v49  ;;  %v8056_v39 = vsel %vm1874_vm1, %v8054_v48, %v8055_v15  ;;  %v27219_v52 = vmov %v27212_v0  ;;  %16915 = vmatprep.subr.mxu1 %v22970_v51  ;;  %v23430_v54 = vmul.f32 %v27221_v32, %v23351_v22  ;;  %v27226_v48 = vld [vmem:[#allocation9_spill] sm:$0xff]  ;;  %v27227_v0 = vld [vmem:[#allocation46_spill] sm:$0xff]  ;;  %27229 = vst [vmem:[#allocation68_spill] sm:$0xff] %v23462_v1 }
 0x3fa   : > { %v3359_v62 = vsel %vm1874_vm1, %v27218_v36, %v26380_v41  ;;  %v2024_v43 = vsel %vm1874_vm1, %v2022_v25, %v27219_v52  ;;  %v27220_v58 = vmov %v27218_v36  ;;  %16966 = vmatprep.mubr.msk.f32.mxu0 %vm6425_vm7, %v8056_v39  ;;  %16916 = vmatpush3.msra.mxu1 %v22970_v51  ;;  %v26381_v25 = vrot.slane %v23401_v31, 1  ;;  %v27230_v52 = vld [vmem:[#allocation53_spill] sm:$0xff]  ;;  %v27232_v41 = vld [vmem:[#allocation47_spill] sm:$0xff] }
 0x3fb   : > { %v3357_v45 = vsel %vm1874_vm1, %v3355_v38, %v27220_v58  ;;  %v2223_v9 = vadd.f32 %v2024_v43, %v1662_v33  ;;  %v23437_v38 = vld [vmem:[%s26017_s1 + $0x3] ss:$0 sm:$0xff]  ;;  %v3683_v10 = vmul.f32 %v27223_v28, %v23376_v34  ;;  %v4443_v2 = vmul.f32 %v27221_v32, %v23376_v34  ;;  %v23445_v33 = vpop.permute.xlu1 %892  ;;  %16927 = vmatprep.subr.mxu1 %v23027_v40 }
 0x3fc   : > { %v3559_v26 = vadd.f32 %v3357_v45, %v2999_v19  ;;  %27222 = vst [vmem:[#allocation28_spill] sm:$0xff] %v23437_v38  ;;  %v2347_v6 = vmul.f32 %v23437_v38, %v23376_v34  ;;  %16918 = vmatmul.mubr.msk.f32.vlgmr.msra.gmra.mxu1 %vm6425_vm7, %v27224_v37  ;;  %v2802_v19 = vrot.slane %v2547_v5, 1  ;;  %v4135_v29 = vrot.slane %v3883_v21, 1  ;;  %16967 = vmatmul.mubr.msk.f32.vlgmr.msra.gmra.mxu0 %vm6425_vm7, %v8055_v15  ;;  %v27231_v15 = vld [vmem:[#allocation29_spill] sm:$0xff] }
 0x3fd   : > { %16928 = vmatpush3.msra.mxu1 %v23027_v40  ;;  %16931 = vmatprep.mubr.msk.f32.mxu1 %vm6425_vm7, %v27225_v57  ;;  %v8218_v60 = vrot.slane %v27226_v48, 2  ;;  %v23457_v35 = vrot.slane %v27227_v0, 2  ;;  %v2224_v39 = vadd.f32 %v2026_v63, %v1663_v13  ;;  %v23466_v5 = vmul.f32 %v23462_v1, %v23351_v22 }
 0x3fe   : > { %v3560_v21 = vadd.f32 %v3359_v62, %v3000_v27  ;;  %16929 = vmatprep.subr.mxu1 %v22970_v51  ;;  %v2348_v36 = vmul.f32 %v23437_v38, %v23351_v22  ;;  %v3684_v13 = vmul.f32 %v27223_v28, %v23351_v22  ;;  %v3107_v63 = vmul.f32 %v23462_v1, %v23376_v34 }
 0x3ff   : > { %27228 = vst [vmem:[#allocation26_spill] sm:$0xff] %v23457_v35  ;;  %16930 = vmatpush3.msra.mxu1 %v22970_v51  ;;  %16977 = vmatpush3.msra.mxu0 %v27230_v52  ;;  %v26391_v43 = vrot.slane %v23430_v54, 2  ;;  %v2443_v27 = vadd.f32 %v2347_v6, %v2223_v9  ;;  %v3779_v62 = vadd.f32 %v3683_v10, %v3559_v26  ;;  %v4695_v58 = vrot.slane %v4443_v2, 2 }
 0x400   : > { %16941 = vmatprep.subr.mxu1 %v23027_v40  ;;  %16932 = vmatmul.mubr.msk.f32.vlgmr.msra.gmra.mxu1 %vm6425_vm7, %v27231_v15  ;;  %v2804_v45 = vsel %vm1313_vm0, %v2802_v19, %v26382_v44  ;;  %v4137_v23 = vsel %vm1313_vm0, %v4135_v29, %v26381_v25  ;;  %v23493_v9 = vsel %vm1874_vm1, %v8218_v60, %v23457_v35  ;;  %v23504_v19 = vpop.permute.xlu1 %902  ;;  %v23506_v29 = vpop.permute.xlu0 %897  ;;  %v3362_v60 = vrot.slane %v3107_v63, 2  ;;  %v27237_v25 = vld [vmem:[#allocation17_spill] sm:$0xff] }
 0x401   : > { %16942 = vmatpush3.msra.mxu1 %v23027_v40  ;;  %16945 = vmatprep.mubr.msk.f32.mxu1 %vm6425_vm7, %v27232_v41  ;;  %27233 = vst [vmem:[#allocation35_spill] sm:$0xff] %v23493_v9  ;;  %v23495_v26 = vadd.f32 %v2348_v36, %v2224_v39  ;;  %v23498_v10 = vadd.f32 %v3684_v13, %v3560_v21  ;;  %27234 = vst [vmem:[#allocation5_spill] sm:$0xff] %v23506_v29  ;;  %v27235_v21 = vld [vmem:[#allocation58_spill] sm:$0xff]  ;;  %v23517_v44 = vrot.slane %v27237_v25, 2 }
 0x402   : > { %v23502_v2 = vmul.f32 %v23385_v59, %v23445_v33  ;;  %16943 = vmatprep.subr.mxu1 %v22970_v51  ;;  %16980 = vmatprep.mubr.msk.f32.mxu0 %vm6425_vm7, %v23493_v9  ;;  %v2549_v39 = vmul.f32 %v23385_v59, %v23447_v61  ;;  %v27236_v36 = vld [vmem:[#allocation34_spill] sm:$0xff]  ;;  %v3003_v6 = vadd.f32 %v2804_v45, %v2443_v27  ;;  %v27239_v63 = vrot.slane %v23306_v4, 2 }
 0x403   : > { %16944 = vmatpush3.msra.mxu1 %v22970_v51  ;;  %16978 = vmatprep.subr.mxu0 %v27235_v21  ;;  %v8382_v13 = vrot.slane %v27236_v36, 2  ;;  %27238 = vst [vmem:[#allocation37_spill] sm:$0xff] %v23517_v44  ;;  %v4339_v49 = vadd.f32 %v4137_v23, %v3779_v62  ;;  %v4697_v56 = vsel %vm1874_vm1, %v4695_v58, %v26391_v43  ;;  %v27240_v9 = vrot.slane %v23315_v18, 2  ;;  %v27241_v27 = vld [vmem:[#allocation6_spill] sm:$0xff] }
 0x404   : > { %16955 = vmatprep.subr.mxu1 %v23027_v40  ;;  %16979 = vmatpush3.msra.mxu0 %v27235_v21  ;;  %v23531_v16 = vmul.f32 %v27214_v17, %v23504_v19  ;;  %v3887_v23 = vmul.f32 %v27214_v17, %v23506_v29  ;;  %v23542_v4 = vmul.f32 %v23462_v1, %v23445_v33  ;;  %v2805_v45 = vrot.slane %v2549_v39, 1 }
 0x405   : > { %v2028_v50 = vsel %vm1874_vm1, %v27240_v9, %v27239_v63  ;;  %16946 = vmatmul.mubr.msk.f32.vlgmr.msra.gmra.mxu1 %vm6425_vm7, %v27241_v27  ;;  %16981 = vmatmul.mubr.msk.f32.vlgmr.msra.gmra.mxu0 %vm6425_vm7, %v23457_v35  ;;  %v2349_v58 = vmul.f32 %v23437_v38, %v23447_v61  ;;  %v23551_v9 = vmul.f32 %v23462_v1, %v23447_v61  ;;  %v27242_v63 = vrot.slane %v23466_v5, 2 }
 0x406   : > { %v2225_v18 = vadd.f32 %v2028_v50, %v23373_v47  ;;  %16956 = vmatpush3.msra.mxu1 %v23027_v40  ;;  %16990 = vmatprep.subr.mxu0 %v27230_v52  ;;  %v23561_v50 = vsel %vm1874_vm1, %v8382_v13, %v23517_v44  ;;  %v3687_v47 = vmul.f32 %v27223_v28, %v23506_v29  ;;  %v23570_v39 = vrot.slane %v27215_v24, 2  ;;  %v27246_v28 = vld [vmem:[#allocation7_spill] sm:$0xff] }
 0x407   : > { %v3364_v43 = vsel %vm1874_vm1, %v3362_v60, %v27242_v63  ;;  %16957 = vmatprep.subr.mxu1 %v22970_v51  ;;  %16959 = vmatprep.mubr.msk.f32.mxu1 %vm6425_vm7, %v23299_v3  ;;  %27243 = vst [vmem:[#allocation50_spill] sm:$0xff] %v23561_v50  ;;  %v8136_v60 = vrot.slane %v27208_v55, 2  ;;  %v4142_v62 = vrot.slane %v3887_v23, 1  ;;  %v23577_v13 = vrot.slane %v27246_v28, 2 }
 0x408   : > { %v3563_v40 = vadd.f32 %v3364_v43, %v3003_v6  ;;  %16991 = vmatpush3.msra.mxu0 %v27230_v52  ;;  %16994 = vmatprep.mubr.msk.f32.mxu0 %vm6425_vm7, %v23561_v50  ;;  %27244 = vst [vmem:[#allocation22_spill] sm:$0xff] %v23570_v39  ;;  %v27245_v43 = vld [vmem:[#allocation39_spill] sm:$0xff]  ;;  %v23579_v35 = vadd.f32 %v4697_v56, %v4339_v49  ;;  %v27248_v23 = vrot.slane %v23389_v12, 1  ;;  %v3365_v59 = vrot.slane %v23551_v9, 2 }
 0x409   : > { %16958 = vmatpush3.msra.mxu1 %v22970_v51  ;;  %16992 = vmatprep.subr.mxu0 %v27235_v21  ;;  %v8546_v6 = vrot.slane %v27245_v43, 2  ;;  %27247 = vst [vmem:[#allocation44_spill] sm:$0xff] %v23577_v13  ;;  %v23583_v50 = vmul.f32 %v23437_v38, %v23445_v33  ;;  %v23587_v1 = vmul.f32 %v27214_v17, %v23447_v61  ;;  %v23601_v38 = vpop.permute.xlu0 %907  ;;  %v27259_v34 = vrot.slane %v23466_v5, 2 }
 0x40a   : > { %16969 = vmatprep.subr.mxu1 %v27230_v52  ;;  %16993 = vmatpush3.msra.mxu0 %v27235_v21  ;;  %v2806_v63 = vsel %vm1313_vm0, %v27248_v23, %v2805_v45  ;;  %v23597_v56 = vmul.f32 %v27221_v32, %v23504_v19  ;;  %v4447_v49 = vmul.f32 %v27221_v32, %v23506_v29  ;;  %v27250_v32 = vrot.slane %v23502_v2, 1 }
 0x40b   : > { %16960 = vmatmul.mubr.msk.f32.vlgmr.msra.gmra.mxu1 %vm6425_vm7, %v23279_v42  ;;  %16995 = vmatmul.mubr.msk.f32.vlgmr.msra.gmra.mxu0 %vm6425_vm7, %v23517_v44  ;;  %v2445_v12 = vadd.f32 %v2349_v58, %v2225_v18  ;;  %v3783_v51 = vadd.f32 %v3687_v47, %v3563_v40  ;;  %v23612_v23 = vsel %vm1874_vm1, %v8136_v60, %v23570_v39  ;;  %v27251_v44 = vrot.slane %v23531_v16, 1  ;;  %v23646_v47 = vpop.permute.xlu1 %912  ;;  %v27254_v60 = vld [vmem:[#allocation40_spill] sm:$0xff] }
 0x40c   : > { %16970 = vmatpush3.msra.mxu1 %v27230_v52  ;;  %17004 = vmatprep.subr.mxu0 %v27230_v52  ;;  %27249 = vst [vmem:[#allocation27_spill] sm:$0xff] %v23612_v23  ;;  %v2808_v29 = vsel %vm1313_vm0, %v2805_v45, %v27250_v32  ;;  %v23626_v18 = vsel %vm1874_vm1, %v8546_v6, %v23577_v13  ;;  %v23632_v45 = vld [vmem:[%s26017_s1 + $0x7] ss:$0 sm:$0xff]  ;;  %v4702_v40 = vrot.slane %v4447_v49, 2  ;;  %v4138_v5 = vrot.slane %v23587_v1, 1 }
 0x40d   : > { %v4144_v17 = vsel %vm1313_vm0, %v4142_v62, %v27251_v44  ;;  %16971 = vmatprep.subr.mxu1 %v27235_v21  ;;  %16973 = vmatprep.mubr.msk.f32.mxu1 %vm6425_vm7, %v23612_v23  ;;  %27252 = vst [vmem:[#allocation30_spill] sm:$0xff] %v23626_v18  ;;  %v3004_v58 = vadd.f32 %v2806_v63, %v23495_v26  ;;  %27253 = vst [vmem:[#allocation54_spill] sm:$0xff] %v23632_v45  ;;  %v8300_v44 = vrot.slane %v27216_v53, 2  ;;  %v27255_v6 = vld [vmem:[#allocation57_spill] sm:$0xff] }
 0x40e   : > { %v23636_v9 = vmul.f32 %v23632_v45, %v23601_v38  ;;  %17005 = vmatpush3.msra.mxu0 %v27230_v52  ;;  %17008 = vmatprep.mubr.msk.f32.mxu0 %vm6425_vm7, %v23626_v18  ;;  %v23643_v62 = vrot.slane %v27224_v37, 2  ;;  %v8710_v63 = vrot.slane %v27254_v60, 2  ;;  %v23652_v32 = vrot.slane %v27255_v6, 2  ;;  %v23668_v6 = vld [vmem:[%s26017_s1 + $0x8] ss:$0 sm:$0xff] }
 0x40f   : > { %16972 = vmatpush3.msra.mxu1 %v27235_v21  ;;  %17006 = vmatprep.subr.mxu0 %v27235_v21  ;;  %v23656_v18 = vmul.f32 %v23632_v45, %v23445_v33  ;;  %v27257_v23 = vrot.slane %v23357_v14, 2  ;;  %v27258_v26 = vrot.slane %v23331_v8, 2  ;;  %v4343_v46 = vadd.f32 %v4144_v17, %v3783_v51 }
 0x410   : > { %27256 = vst [vmem:[#allocation12_spill] sm:$0xff] %v23652_v32  ;;  %16983 = vmatprep.subr.mxu1 %v27230_v52  ;;  %17007 = vmatpush3.msra.mxu0 %v27235_v21  ;;  %v3005_v28 = vadd.f32 %v2808_v29, %v2445_v12  ;;  %v23672_v60 = vmul.f32 %v23668_v6, %v23447_v61  ;;  %v4145_v17 = vrot.slane %v23636_v9, 1  ;;  %v27261_v12 = vrot.slane %v23597_v56, 2 }
 0x411   : > { %v3361_v49 = vsel %vm1874_vm1, %v27258_v26, %v27257_v23  ;;  %v3366_v8 = vsel %vm1874_vm1, %v27259_v34, %v3365_v59  ;;  %16974 = vmatmul.mubr.msk.f32.vlgmr.msra.gmra.mxu1 %vm6425_vm7, %v23570_v39  ;;  %17009 = vmatmul.mubr.msk.f32.vlgmr.msra.gmra.mxu0 %vm6425_vm7, %v23577_v13  ;;  %v23683_v51 = vmul.f32 %v23632_v45, %v23646_v47 }
 0x412   : > { %v3564_v29 = vadd.f32 %v3366_v8, %v3004_v58  ;;  %16984 = vmatpush3.msra.mxu1 %v27230_v52  ;;  %17018 = vmatprep.subr.mxu0 %v27230_v52  ;;  %v23690_v34 = vsel %vm1874_vm1, %v8300_v44, %v23643_v62  ;;  %v4704_v23 = vsel %vm1874_vm1, %v4702_v40, %v27261_v12  ;;  %v27262_v58 = vrot.slane %v23542_v4, 2 }
 0x413   : > { %27260 = vst [vmem:[#allocation15_spill] sm:$0xff] %v23690_v34  ;;  %16985 = vmatprep.subr.mxu1 %v27235_v21  ;;  %16987 = vmatprep.mubr.msk.f32.mxu1 %vm6425_vm7, %v23690_v34  ;;  %v23704_v9 = vsel %vm1874_vm1, %v8710_v63, %v23652_v32  ;;  %v4903_v44 = vadd.f32 %v4704_v23, %v4343_v46  ;;  %v23715_v40 = vrot.slane %v27231_v15, 2  ;;  %v23720_v63 = vld [vmem:[%s26017_s1 + $0x6] ss:$0 sm:$0xff]  ;;  %v23731_v23 = vld [vmem:[%s26019_s3 + $0x38] sm:$0xff]  ;;  %v26422_v13 = vrot.slane %v23683_v51, 1 }
 0x414   : > { %v3368_v26 = vsel %vm1874_vm1, %v3365_v59, %v27262_v58  ;;  %27263 = vst [vmem:[#allocation55_spill] sm:$0xff] %v23704_v9  ;;  %v23708_v1 = vmul.f32 %v23668_v6, %v23601_v38  ;;  %17019 = vmatpush3.msra.mxu0 %v27230_v52  ;;  %17022 = vmatprep.mubr.msk.f32.mxu0 %vm6425_vm7, %v23704_v9  ;;  %v8464_v59 = vrot.slane %v27225_v57, 2 }
 0x415   : > { %v3688_v46 = vmul.f32 %v23720_v63, %v23504_v19  ;;  %v3565_v8 = vadd.f32 %v3368_v26, %v3005_v28  ;;  %v3689_v12 = vmul.f32 %v23720_v63, %v23601_v38  ;;  %16986 = vmatpush3.msra.mxu1 %v27235_v21  ;;  %17020 = vmatprep.subr.mxu0 %v27235_v21  ;;  %v27264_v28 = vrot.slane %v23531_v16, 1 }
 0x416   : > { %v2446_v58 = vadd.f32 %v23583_v50, %v23368_v11  ;;  %v3561_v9 = vadd.f32 %v3361_v49, %v23379_v20  ;;  %16997 = vmatprep.subr.mxu1 %v27230_v52  ;;  %17021 = vmatpush3.msra.mxu0 %v27235_v21  ;;  %v3685_v39 = vmul.f32 %v23720_v63, %v23447_v61  ;;  %v4705_v16 = vrot.slane %v23708_v1, 2  ;;  %v23763_v50 = vld [vmem:[%s26019_s3 + $0x30] sm:$0xff]  ;;  %v23771_v1 = vld [vmem:[%s26018_s2] ss:$0 sm:$0xff] }
 0x417   : > { %v4146_v26 = vsel %vm1313_vm0, %v27264_v28, %v4145_v17  ;;  %v3784_v45 = vadd.f32 %v3688_v46, %v3564_v29  ;;  %v23747_v11 = vmul.f32 %v23668_v6, %v23646_v47  ;;  %16988 = vmatmul.mubr.msk.f32.vlgmr.msra.gmra.mxu1 %vm6425_vm7, %v23643_v62  ;;  %17023 = vmatmul.mubr.msk.f32.vlgmr.msra.gmra.mxu0 %vm6425_vm7, %v23652_v32  ;;  %v27265_v49 = vrot.slane %v23401_v31, 1 }
 0x418   : > { %16998 = vmatpush3.msra.mxu1 %v27230_v52  ;;  %17032 = vmatprep.subr.mxu0 %v23731_v23  ;;  %v23758_v20 = vsel %vm1874_vm1, %v8464_v59, %v23715_v40  ;;  %v23774_v46 = vadd.f32 %v23771_v1, %v4903_v44  ;;  %v23778_v59 = vmul.f32 %v23668_v6, %v23445_v33  ;;  %v4698_v28 = vrot.slane %v23672_v60, 2 }
 0x419   : > { %v4139_v29 = vsel %vm1313_vm0, %v27265_v49, %v4138_v5  ;;  %v3785_v34 = vadd.f32 %v3689_v12, %v3565_v8  ;;  %16999 = vmatprep.subr.mxu1 %v27235_v21  ;;  %17001 = vmatprep.mubr.msk.f32.mxu1 %vm6425_vm7, %v23758_v20  ;;  %v4344_v31 = vadd.f32 %v4146_v26, %v3784_v45  ;;  %v8628_v44 = vrot.slane %v27232_v41, 2 }
 0x41a   : > { %v4148_v49 = vsel %vm1313_vm0, %v4145_v17, %v26422_v13  ;;  %17033 = vmatpush3.msra.mxu0 %v23731_v23  ;;  %17036 = vmatprep.mubr.msk.f32.mxu0 %vm6425_vm7, %v27208_v55  ;;  %v23792_v60 = vrot.slane %v27241_v27, 2  ;;  %v5002_v8 = vadd.f32 %v23771_v1, %v23579_v35  ;;  %v27266_v45 = vrot.slane %v23247_v7, 1 }
 0x41b   : > { %v3781_v26 = vadd.f32 %v3685_v39, %v3561_v9  ;;  %17000 = vmatpush3.msra.mxu1 %v27235_v21  ;;  %17034 = vmatprep.subr.mxu0 %v23763_v50  ;;  %v4340_v17 = vadd.f32 %v4139_v29, %v23498_v10  ;;  %v27267_v55 = vrot.slane %v23656_v18, 1  ;;  %v27268_v35 = vrot.slane %v23597_v56, 2 }
 0x41c   : > { %v3002_v12 = vadd.f32 %v27266_v45, %v23371_v30  ;;  %17011 = vmatprep.subr.mxu1 %v27230_v52  ;;  %17035 = vmatpush3.msra.mxu0 %v23763_v50  ;;  %v5102_v30 = vmax.f32 %v23774_v46, 0.0  ;;  %v4707_v39 = vrot.slane %v23747_v11, 2  ;;  %v27269_v9 = vrot.slane %v23502_v2, 1 }
 0x41d   : > { %v4141_v13 = vsel %vm1313_vm0, %v4138_v5, %v27267_v55  ;;  %v4706_v7 = vsel %vm1874_vm1, %v27268_v35, %v4705_v16  ;;  %v4345_v10 = vadd.f32 %v4148_v49, %v3785_v34  ;;  %17002 = vmatmul.mubr.msk.f32.vlgmr.msra.gmra.mxu1 %vm6425_vm7, %v23715_v40  ;;  %17037 = vmatmul.mubr.msk.f32.vlgmr.msra.gmra.mxu0 %vm6425_vm7, %v27215_v24  ;;  %v27270_v29 = vrot.slane %v23430_v54, 2 }
 0x41e   : > { %v3006_v45 = vadd.f32 %v27269_v9, %v2446_v58  ;;  %v4904_v5 = vadd.f32 %v4706_v7, %v4344_v31  ;;  %17012 = vmatpush3.msra.mxu1 %v27230_v52  ;;  %17046 = vmatprep.subr.mxu0 %v23731_v23  ;;  %v23822_v56 = vsel %vm1874_vm1, %v8628_v44, %v23792_v60  ;;  %v5098_v34 = vmax.f32 %v5002_v8, 0.0 }
 0x41f   : > { %v4699_v2 = vsel %vm1874_vm1, %v27270_v29, %v4698_v28  ;;  %v4700_v58 = vrot.slane %v23778_v59, 2  ;;  %v4341_v46 = vadd.f32 %v4141_v13, %v3781_v26  ;;  %v3690_v24 = vmul.f32 %v23720_v63, %v23646_v47  ;;  %17013 = vmatprep.subr.mxu1 %v27235_v21  ;;  %17015 = vmatprep.mubr.msk.f32.mxu1 %vm6425_vm7, %v23822_v56 }
 0x420   : > { %v4900_v31 = vadd.f32 %v4699_v2, %v4340_v17  ;;  %17047 = vmatpush3.msra.mxu0 %v23731_v23  ;;  %17050 = vmatprep.mubr.msk.f32.mxu0 %vm6425_vm7, %v27216_v53  ;;  %v8792_v54 = vrot.slane %v23299_v3, 2  ;;  %v23838_v49 = vrot.slane %v23279_v42, 2  ;;  %v5159_v13 = vrot.slane %v5102_v30, 1 }
 0x421   : > { %v4708_v44 = vsel %vm1874_vm1, %v4705_v16, %v4707_v39  ;;  %17014 = vmatpush3.msra.mxu1 %v27235_v21  ;;  %17048 = vmatprep.subr.mxu0 %v23763_v50  ;;  %v5007_v8 = vadd.f32 %v23771_v1, %v4904_v5  ;;  %v27272_v17 = vrot.slane %v23542_v4, 2  ;;  %v3686_v35 = vmul.f32 %v23720_v63, %v23445_v33 }
 0x422   : > { %27271 = vst [vmem:[#allocation41_spill] sm:$0xff] %v23838_v49  ;;  %v4905_v26 = vadd.f32 %v4708_v44, %v4345_v10  ;;  %17025 = vmatprep.subr.mxu1 %v27230_v52  ;;  %17049 = vmatpush3.msra.mxu0 %v23763_v50  ;;  %v5158_v7 = vrot.slane %v5098_v34, 1  ;;  %v4701_v16 = vsel %vm1874_vm1, %v4698_v28, %v4700_v58  ;;  %v27273_v9 = vrot.slane %v23357_v14, 2 }
 0x423   : > { %v3566_v55 = vadd.f32 %v27272_v17, %v3006_v45  ;;  %17016 = vmatmul.mubr.msk.f32.vlgmr.msra.gmra.mxu1 %vm6425_vm7, %v23792_v60  ;;  %17051 = vmatmul.mubr.msk.f32.vlgmr.msra.gmra.mxu0 %vm6425_vm7, %v27224_v37  ;;  %v5003_v4 = vadd.f32 %v23771_v1, %v4900_v31  ;;  %v4901_v45 = vadd.f32 %v4701_v16, %v4341_v46  ;;  %v27274_v31 = vrot.slane %v23683_v51, 1  ;;  %v24197_v37 = vld [vmem:[%s26017_s1] ss:$0 sm:$0xff] }
 0x424   : > { %v3562_v29 = vadd.f32 %v27273_v9, %v3002_v12  ;;  %17026 = vmatpush3.msra.mxu1 %v27230_v52  ;;  %17060 = vmatprep.subr.mxu0 %v23731_v23  ;;  %v23866_v10 = vsel %vm1874_vm1, %v8792_v54, %v23838_v49  ;;  %v23868_v28 = vmax.f32 %v5102_v30, %v5159_v13  ;;  %v5103_v12 = vmax.f32 %v5007_v8, 0.0 }
 0x425   : > { %v3786_v14 = vadd.f32 %v3690_v24, %v3566_v55  ;;  %17027 = vmatprep.subr.mxu1 %v27235_v21  ;;  %17029 = vmatprep.mubr.msk.f32.mxu1 %vm6425_vm7, %v23866_v10  ;;  %v5008_v5 = vadd.f32 %v23771_v1, %v4905_v26  ;;  %v23877_v52 = vmax.f32 %v5098_v34, %v5158_v7  ;;  %v5099_v30 = vmax.f32 %v5003_v4, 0.0 }
 0x426   : > { %17061 = vmatpush3.msra.mxu0 %v23731_v23  ;;  %17064 = vmatprep.mubr.msk.f32.mxu0 %vm6425_vm7, %v27225_v57  ;;  %v3782_v2 = vadd.f32 %v3686_v35, %v3562_v29  ;;  %v5004_v46 = vadd.f32 %v23771_v1, %v4901_v45  ;;  %v5543_v24 = vrot.slane %v23868_v28, 1  ;;  %v27275_v44 = vrot.slane %v23656_v18, 1  ;;  %v27302_v57 = vld [vmem:[#allocation48_spill] sm:$0xff] }
 0x427   : > { %17028 = vmatpush3.msra.mxu1 %v27235_v21  ;;  %17062 = vmatprep.subr.mxu0 %v23763_v50  ;;  %v4346_v54 = vadd.f32 %v27274_v31, %v3786_v14  ;;  %v5255_v21 = vrot.slane %v5103_v12, 1  ;;  %v5104_v34 = vmax.f32 %v5008_v5, 0.0  ;;  %v5542_v13 = vrot.slane %v23877_v52, 1 }
 0x428   : > { %17039 = vmatprep.subr.mxu1 %v23731_v23  ;;  %17063 = vmatpush3.msra.mxu0 %v23763_v50  ;;  %v4342_v8 = vadd.f32 %v27275_v44, %v3782_v2  ;;  %v5254_v51 = vrot.slane %v5099_v30, 1  ;;  %v5591_v26 = vrot.slane %v23868_v28, 2  ;;  %v5100_v17 = vmax.f32 %v5004_v46, 0.0 }
 0x429   : > { %17030 = vmatmul.mubr.msk.f32.vlgmr.msra.gmra.mxu1 %vm6425_vm7, %v23838_v49  ;;  %17065 = vmatmul.mubr.msk.f32.vlgmr.msra.gmra.mxu0 %vm6425_vm7, %v27231_v15  ;;  %v6144_v55 = vsel %vm6122_vm2, %v23868_v28, %v5543_v24  ;;  %v4906_v18 = vadd.f32 %v4707_v39, %v4346_v54  ;;  %v23909_v35 = vmax.f32 %v5103_v12, %v5255_v21  ;;  %v5590_v7 = vrot.slane %v23877_v52, 2  ;;  %v27276_v21 = vld [vmem:[#allocation62_spill] sm:$0xff] }
 0x42a   : > { %17040 = vmatpush3.msra.mxu1 %v23731_v23  ;;  %17074 = vmatprep.subr.mxu0 %v23731_v23  ;;  %v5351_v16 = vrot.slane %v5104_v34, 1  ;;  %v6143_v9 = vsel %vm6122_vm2, %v23877_v52, %v5542_v13  ;;  %v4902_v11 = vadd.f32 %v4700_v58, %v4342_v8  ;;  %v23922_v39 = vmax.f32 %v5099_v30, %v5254_v51  ;;  %v23951_v30 = vld [vmem:[%s26019_s3 + $0x48] sm:$0xff]  ;;  %v23976_v8 = vld [vmem:[%s26019_s3 + $0x40] sm:$0xff] }
 0x42b   : > { %17041 = vmatprep.subr.mxu1 %v23763_v50  ;;  %17043 = vmatprep.mubr.msk.f32.mxu1 %vm6425_vm7, %v27226_v48  ;;  %v6169_v29 = vsel %vm6147_vm3, %v6144_v55, %v5591_v26  ;;  %v5350_v4 = vrot.slane %v5100_v17, 1  ;;  %v5639_v45 = vrot.slane %v23868_v28, 3  ;;  %v23929_v59 = vadd.f32 %v23771_v1, %v4906_v18 }
 0x42c   : > { %17075 = vmatpush3.msra.mxu0 %v23731_v23  ;;  %17078 = vmatprep.mubr.msk.f32.mxu0 %vm6425_vm7, %v27232_v41  ;;  %v5711_v58 = vrot.slane %v23909_v35, 4  ;;  %v6168_v14 = vsel %vm6147_vm3, %v6143_v9, %v5590_v7  ;;  %v23936_v12 = vmax.f32 %v5104_v34, %v5351_v16  ;;  %v5638_v28 = vrot.slane %v23877_v52, 3  ;;  %v27277_v7 = vld [vmem:[#allocation13_spill] sm:$0xff] }
 0x42d   : > { %17042 = vmatpush3.msra.mxu1 %v23763_v50  ;;  %17076 = vmatprep.subr.mxu0 %v23763_v50  ;;  %v6194_v5 = vsel %vm6172_vm4, %v6169_v29, %v5639_v45  ;;  %v23944_v2 = vadd.f32 %v23771_v1, %v4902_v11  ;;  %v5710_v46 = vrot.slane %v23922_v39, 4  ;;  %v23954_v24 = vmax.f32 %v5100_v17, %v5350_v4  ;;  %v27278_v29 = vld [vmem:[#allocation66_spill] sm:$0xff] }
 0x42e   : > { %17053 = vmatprep.subr.mxu1 %v23731_v23  ;;  %17077 = vmatpush3.msra.mxu0 %v23763_v50  ;;  %v5759_v52 = vrot.slane %v23909_v35, 5  ;;  %v6193_v31 = vsel %vm6172_vm4, %v6168_v14, %v5638_v28  ;;  %v5105_v54 = vmax.f32 %v23929_v59, 0.0  ;;  %v23963_v34 = vmul.f32 %v27276_v21, %v23447_v61  ;;  %v24005_v14 = vld [vmem:[%s26017_s1 + $0x2] ss:$0 sm:$0xff] }
 0x42f   : > { %17044 = vmatmul.mubr.msk.f32.vlgmr.msra.gmra.mxu1 %vm6425_vm7, %v27227_v0  ;;  %17079 = vmatmul.mubr.msk.f32.vlgmr.msra.gmra.mxu0 %vm6425_vm7, %v27241_v27  ;;  %v6219_v13 = vsel %vm6197_vm5, %v6194_v5, %v5711_v58  ;;  %v5927_v44 = vrot.slane %v23936_v12, 1  ;;  %v5758_v51 = vrot.slane %v23922_v39, 5  ;;  %v5101_v26 = vmax.f32 %v23944_v2, 0.0  ;;  %v27319_v0 = vld [vmem:[#allocation56_spill] sm:$0xff] }
 0x430   : > { %17054 = vmatpush3.msra.mxu1 %v23731_v23  ;;  %17088 = vmatprep.subr.mxu0 %v23731_v23  ;;  %v23982_v17 = vmul.f32 %v27276_v21, %v23351_v22  ;;  %v6218_v55 = vsel %vm6197_vm5, %v6193_v31, %v5710_v46  ;;  %v5926_v18 = vrot.slane %v23954_v24, 1  ;;  %v6244_v16 = vsel %vm6222_vm6, %v6219_v13, %v5759_v52  ;;  %v27279_v31 = vld [vmem:[#allocation7_spill] sm:$0xff] }
 0x431   : > { %17055 = vmatprep.subr.mxu1 %v23763_v50  ;;  %17057 = vmatprep.mubr.msk.f32.mxu1 %vm6425_vm7, %v27236_v36  ;;  %v5447_v9 = vrot.slane %v5105_v54, 1  ;;  %v5975_v11 = vrot.slane %v23936_v12, 2  ;;  %v1209_v4 = vmul.f32 %v27276_v21, %v27278_v29  ;;  %v5807_v59 = vrot.slane %v23909_v35, 6  ;;  %v27280_v21 = vld [vmem:[#allocation32_spill] sm:$0xff] }
 0x432   : > { %17089 = vmatpush3.msra.mxu0 %v23731_v23  ;;  %17092 = vmatprep.mubr.msk.f32.mxu0 %vm6425_vm7, %v23299_v3  ;;  %v6316_v58 = vsel %vm6122_vm2, %v23936_v12, %v5927_v44  ;;  %v24009_v28 = vmul.f32 %v24005_v14, %v23351_v22  ;;  %v6243_v5 = vsel %vm6222_vm6, %v6218_v55, %v5758_v51  ;;  %v5446_v2 = vrot.slane %v5101_v26, 1 }
 0x433   : > { %17056 = vmatpush3.msra.mxu1 %v23763_v50  ;;  %17090 = vmatprep.subr.mxu0 %v23763_v50  ;;  %v5974_v46 = vrot.slane %v23954_v24, 2  ;;  %v1469_v52 = vrot.slane %v23982_v17, 1  ;;  %v5806_v13 = vrot.slane %v23922_v39, 6  ;;  %v6268_v44 = vsel %vm1874_vm1, %v6244_v16, %v5807_v59 }
 0x434   : > { %17067 = vmatprep.subr.mxu1 %v23731_v23  ;;  %17091 = vmatpush3.msra.mxu0 %v23763_v50  ;;  %v24026_v51 = vmul.f32 %v24005_v14, %v23447_v61  ;;  %v5855_v17 = vrot.slane %v23909_v35, 7  ;;  %v5495_v55 = vmax.f32 %v5105_v54, %v5447_v9  ;;  %v1468_v45 = vrot.slane %v1209_v4, 1  ;;  %v27283_v35 = vld [vmem:[#allocation19_spill] sm:$0xff] }
 0x435   : > { %17058 = vmatmul.mubr.msk.f32.vlgmr.msra.gmra.mxu1 %vm6425_vm7, %v27237_v25  ;;  %17093 = vmatmul.mubr.msk.f32.vlgmr.msra.gmra.mxu0 %vm6425_vm7, %v23279_v42  ;;  %v27281_v42 = vrot.slane %v23963_v34, 1  ;;  %v6267_v59 = vsel %vm1874_vm1, %v6243_v5, %v5806_v13  ;;  %v6023_v3 = vrot.slane %v23936_v12, 3  ;;  %v5854_v54 = vrot.slane %v23922_v39, 7  ;;  %v27284_v4 = vld [vmem:[#allocation63_spill] sm:$0xff] }
 0x436   : > { %17068 = vmatpush3.msra.mxu1 %v23731_v23  ;;  %17102 = vmatprep.subr.mxu0 %v23951_v30  ;;  %v6292_v9 = vsel %vm1313_vm0, %v6268_v44, %v5855_v17  ;;  %v1770_v5 = vmul.f32 %v24005_v14, %v27278_v29  ;;  %v6022_v12 = vrot.slane %v23954_v24, 3  ;;  %v2030_v44 = vrot.slane %v24009_v28, 2  ;;  %v27286_v17 = vld [vmem:[#allocation57_spill] sm:$0xff] }
 0x437   : > { %17069 = vmatprep.subr.mxu1 %v23763_v50  ;;  %17071 = vmatprep.mubr.msk.f32.mxu1 %vm6425_vm7, %v27245_v43  ;;  %v1472_v16 = vsel %vm1313_vm0, %v1469_v52, %v27281_v42 }
 0x438   : > { %17103 = vmatpush3.msra.mxu0 %v23951_v30  ;;  %17106 = vmatprep.mubr.msk.f32.mxu0 %vm6425_vm7, %v27277_v7  ;;  %v6315_v7 = vsel %vm6122_vm2, %v23954_v24, %v5926_v18  ;;  %v27282_v18 = vld [vmem:[#allocation40_spill] sm:$0xff] }
 0x439   : > { %17070 = vmatpush3.msra.mxu1 %v23763_v50  ;;  %17104 = vmatprep.subr.mxu0 %v23976_v8  ;;  %v6339_v42 = vsel %vm6147_vm3, %v6315_v7, %v5974_v46  ;;  %v6095_v46 = vrot.slane %v5495_v55, 4 }
 0x43a   : > { %17081 = vmatprep.subr.mxu1 %v23731_v23  ;;  %17105 = vmatpush3.msra.mxu0 %v23976_v8 }
 0x43b   : > { %17072 = vmatmul.mubr.msk.f32.vlgmr.msra.gmra.mxu1 %vm6425_vm7, %v27279_v31  ;;  %17107 = vmatmul.mubr.msk.f32.vlgmr.msra.gmra.mxu0 %vm6425_vm7, %v27280_v21  ;;  %v6340_v21 = vsel %vm6147_vm3, %v6316_v58, %v5975_v11  ;;  %v5494_v11 = vmax.f32 %v5101_v26, %v5446_v2  ;;  %v1010_v58 = vmul.f32 %v27284_v4, %v23351_v22  ;;  %v27285_v26 = vld [vmem:[#allocation45_spill] sm:$0xff] }
 0x43c   : > { %17082 = vmatpush3.msra.mxu1 %v23731_v23  ;;  %17116 = vmatprep.subr.mxu0 %v23951_v30  ;;  %v6364_v13 = vsel %vm6172_vm4, %v6340_v21, %v6023_v3  ;;  %v24057_v2 = vmul.f32 %v27285_v26, %v23601_v38  ;;  %v6291_v22 = vsel %vm1313_vm0, %v6267_v59, %v5854_v54  ;;  %v27287_v3 = vld [vmem:[#allocation14_spill] sm:$0xff]  ;;  %v2029_v54 = vrot.slane %v1770_v5, 2 }
 0x43d   : > { %17083 = vmatprep.subr.mxu1 %v23763_v50  ;;  %17085 = vmatprep.mubr.msk.f32.mxu1 %vm6425_vm7, %v27282_v18  ;;  %v1667_v7 = vadd.f32 %v1472_v16, %v1010_v58  ;;  %v24067_v24 = vmax.f32 %v6291_v22, %v6292_v9  ;;  %v6363_v21 = vsel %vm6172_vm4, %v6339_v42, %v6022_v12  ;;  %v6094_v28 = vrot.slane %v5494_v11, 4  ;;  %v27290_v11 = vld [vmem:[#allocation68_spill] sm:$0xff] }
 0x43e   : > { %17117 = vmatpush3.msra.mxu0 %v23951_v30  ;;  %17120 = vmatprep.mubr.msk.f32.mxu0 %vm6425_vm7, %v27283_v35  ;;  %v24072_v39 = vmul.f32 %v27285_v26, %v23504_v19  ;;  %v1470_v59 = vsel %vm1313_vm0, %v1468_v45, %v1469_v52  ;;  %v6388_v55 = vsel %vm6197_vm5, %v6364_v13, %v6095_v46  ;;  %v27293_v46 = vld [vmem:[#allocation5_spill] sm:$0xff]  ;;  %v24109_v52 = vld [vmem:[%s26017_s1 + $0x1] ss:$0 sm:$0xff] }
 0x43f   : > { %17084 = vmatpush3.msra.mxu1 %v23763_v50  ;;  %17118 = vmatprep.subr.mxu0 %v23976_v8  ;;  %27288 = vst [vmem:[#allocation16_spill] sm:$0xff] %v24067_v24  ;;  %v1009_v16 = vmul.f32 %v27284_v4, %v27278_v29  ;;  %v24082_v9 = vmul.f32 %v27284_v4, %v23445_v33  ;;  %v27291_v29 = vld [vmem:[#allocation36_spill] sm:$0xff] }
 0x440   : > { %17095 = vmatprep.subr.mxu1 %v23731_v23  ;;  %17119 = vmatpush3.msra.mxu0 %v23976_v8  ;;  %v24093_v42 = vmul.f32 %v27290_v11, %v23601_v38  ;;  %v6387_v58 = vsel %vm6197_vm5, %v6363_v21, %v6094_v28  ;;  %v2810_v22 = vrot.slane %v24072_v39, 1  ;;  %v24121_v39 = vmul.f32 %v24109_v52, %v23445_v33  ;;  %v27294_v21 = vld [vmem:[#allocation28_spill] sm:$0xff] }
 0x441   : > { %17086 = vmatmul.mubr.msk.f32.vlgmr.msra.gmra.mxu1 %vm6425_vm7, %v27286_v17  ;;  %17121 = vmatmul.mubr.msk.f32.vlgmr.msra.gmra.mxu0 %vm6425_vm7, %v27287_v3  ;;  %v1666_v12 = vadd.f32 %v1470_v59, %v1009_v16  ;;  %v24101_v13 = vmax.f32 %v6387_v58, %v6388_v55  ;;  %v2352_v59 = vmul.f32 %v27294_v21, %v23504_v19  ;;  %v2245_v55 = vpop.permute.xlu1 %2244  ;;  %v27295_v16 = vld [vmem:[#allocation8_spill] sm:$0xff]  ;;  %v27296_v58 = vrot.slane %v24057_v2, 1 }
 0x442   : > { %17096 = vmatpush3.msra.mxu1 %v23731_v23  ;;  %17130 = vmatprep.subr.mxu0 %v23951_v30  ;;  %v27289_v23 = vrot.slane %v24026_v51, 2  ;;  %v24127_v28 = vmul.f32 %v27290_v11, %v23504_v19  ;;  %v2031_v3 = vsel %vm1874_vm1, %v2029_v54, %v2030_v44  ;;  %v3111_v27 = vmul.f32 %v27290_v11, %v27293_v46  ;;  %v27303_v17 = vld [vmem:[#allocation52_spill] sm:$0xff] }
 0x443   : > { %17097 = vmatprep.subr.mxu1 %v23763_v50  ;;  %17099 = vmatprep.mubr.msk.f32.mxu1 %vm6425_vm7, %v24067_v24  ;;  %27292 = vst [vmem:[#allocation11_spill] sm:$0xff] %v24101_v13  ;;  %v2227_v41 = vadd.f32 %v2031_v3, %v1666_v12  ;;  %v24158_v12 = vmul.f32 %v27285_v26, %v2245_v55 }
 0x444   : > { %v2033_v45 = vsel %vm1874_vm1, %v2030_v44, %v27289_v23  ;;  %17131 = vmatpush3.msra.mxu0 %v23951_v30  ;;  %17134 = vmatprep.mubr.msk.f32.mxu0 %vm6425_vm7, %v27291_v29  ;;  %v2551_v23 = vmul.f32 %v27285_v26, %v27293_v46  ;;  %v2813_v29 = vsel %vm1313_vm0, %v2810_v22, %v27296_v58  ;;  %v3370_v3 = vrot.slane %v24127_v28, 2 }
 0x445   : > { %v2228_v5 = vadd.f32 %v2033_v45, %v1667_v7  ;;  %17098 = vmatpush3.msra.mxu1 %v23763_v50  ;;  %17132 = vmatprep.subr.mxu0 %v23976_v8  ;;  %v24113_v7 = vmul.f32 %v24109_v52, %v23504_v19  ;;  %v1213_v50 = vmul.f32 %v24109_v52, %v27293_v46 }
 0x446   : > { %17109 = vmatprep.subr.mxu1 %v23951_v30  ;;  %17133 = vmatpush3.msra.mxu0 %v23976_v8  ;;  %v24135_v45 = vmul.f32 %v27284_v4, %v23447_v61  ;;  %v27297_v61 = vld [vmem:[#allocation49_spill] sm:$0xff]  ;;  %v24150_v4 = vmul.f32 %v27294_v21, %v2245_v55  ;;  %v2809_v44 = vrot.slane %v2551_v23, 1  ;;  %v27299_v23 = vld [vmem:[#allocation54_spill] sm:$0xff]  ;;  %v24169_v54 = vmul.f32 %v24005_v14, %v23504_v19 }
 0x447   : > { %17100 = vmatmul.mubr.msk.f32.vlgmr.msra.gmra.mxu1 %vm6425_vm7, %v24101_v13  ;;  %17135 = vmatmul.mubr.msk.f32.vlgmr.msra.gmra.mxu0 %vm6425_vm7, %v27295_v16  ;;  %v2448_v35 = vadd.f32 %v2352_v59, %v2228_v5  ;;  %v2351_v16 = vmul.f32 %v27294_v21, %v27293_v46  ;;  %v1475_v58 = vrot.slane %v1213_v50, 1  ;;  %v27298_v5 = vld [vmem:[#allocation38_spill] sm:$0xff]  ;;  %v24165_v50 = vmul.f32 %v27299_v23, %v2245_v55 }
 0x448   : > { %17110 = vmatpush3.msra.mxu1 %v23951_v30  ;;  %17144 = vmatprep.subr.mxu0 %v23951_v30  ;;  %v1774_v28 = vmul.f32 %v24005_v14, %v27293_v46  ;;  %v2811_v18 = vsel %vm1313_vm0, %v2809_v44, %v2810_v22  ;;  %v27304_v31 = vrot.slane %v24113_v7, 1  ;;  %v1013_v22 = vmul.f32 %v24197_v37, %v27293_v46  ;;  %v27305_v44 = vld [vmem:[#allocation25_spill] sm:$0xff] }
 0x449   : > { %17111 = vmatprep.subr.mxu1 %v23976_v8  ;;  %17113 = vmatprep.mubr.msk.f32.mxu1 %vm6425_vm7, %v27297_v61  ;;  %v3008_v59 = vadd.f32 %v2813_v29, %v2448_v35  ;;  %v2240_v61 = vpop.permute.xlu0 %2239  ;;  %v27300_v35 = vrot.slane %v24093_v42, 2  ;;  %v2447_v15 = vadd.f32 %v2351_v16, %v2227_v41  ;;  %v3369_v16 = vrot.slane %v3111_v27, 2 }
 0x44a   : > { %17145 = vmatpush3.msra.mxu0 %v23951_v30  ;;  %17148 = vmatprep.mubr.msk.f32.mxu0 %vm6425_vm7, %v27298_v5  ;;  %v24179_v5 = vmul.f32 %v23668_v6, %v2245_v55  ;;  %v3891_v53 = vmul.f32 %v27299_v23, %v2240_v61  ;;  %v3692_v27 = vmul.f32 %v23720_v63, %v2245_v55 }
 0x44b   : > { %17112 = vmatpush3.msra.mxu1 %v23976_v8  ;;  %17146 = vmatprep.subr.mxu0 %v23976_v8  ;;  %v3373_v29 = vsel %vm1874_vm1, %v3370_v3, %v27300_v35  ;;  %v1477_v35 = vsel %vm1313_vm0, %v1475_v58, %v27304_v31  ;;  %v24205_v31 = vmul.f32 %v27290_v11, %v2245_v55  ;;  %v24219_v55 = vld [vmem:[%s26019_s3 + $0x58] sm:$0xff] }
 0x44c   : > { %17123 = vmatprep.subr.mxu1 %v23951_v30  ;;  %17147 = vmatpush3.msra.mxu0 %v23976_v8  ;;  %27301 = vst [vmem:[#allocation64_spill] sm:$0xff] %v24179_v5  ;;  %v3568_v41 = vadd.f32 %v3373_v29, %v3008_v59  ;;  %v2036_v59 = vrot.slane %v1774_v28, 2  ;;  %v27306_v29 = vld [vmem:[#allocation69_spill] sm:$0xff]  ;;  %v3007_v43 = vadd.f32 %v2811_v18, %v2447_v15  ;;  %v4149_v46 = vrot.slane %v3891_v53, 1 }
 0x44d   : > { %17114 = vmatmul.mubr.msk.f32.vlgmr.msra.gmra.mxu1 %vm6425_vm7, %v27302_v57  ;;  %17149 = vmatmul.mubr.msk.f32.vlgmr.msra.gmra.mxu0 %vm6425_vm7, %v27303_v17  ;;  %v4451_v57 = vmul.f32 %v23668_v6, %v2240_v61  ;;  %v1670_v25 = vadd.f32 %v1477_v35, %v1013_v22  ;;  %v2355_v28 = vmul.f32 %v27294_v21, %v2240_v61  ;;  %v27308_v17 = vld [vmem:[#allocation51_spill] sm:$0xff] }
 0x44e   : > { %17124 = vmatpush3.msra.mxu1 %v23951_v30  ;;  %17158 = vmatprep.subr.mxu0 %v23951_v30  ;;  %v2555_v58 = vmul.f32 %v27285_v26, %v2240_v61  ;;  %v24228_v15 = vadd.f32 %v3692_v27, %v3568_v41  ;;  %v3371_v18 = vsel %vm1874_vm1, %v3369_v16, %v3370_v3  ;;  %v27310_v26 = vrot.slane %v24169_v54, 2  ;;  %v24257_v27 = vpop.permute.xlu1 %2254 }
 0x44f   : > { %17125 = vmatprep.subr.mxu1 %v23976_v8  ;;  %17127 = vmatprep.mubr.msk.f32.mxu1 %vm6425_vm7, %v27305_v44  ;;  %v3691_v35 = vmul.f32 %v23720_v63, %v2240_v61  ;;  %v4709_v22 = vrot.slane %v4451_v57, 2  ;;  %v27309_v44 = vld [vmem:[#allocation65_spill] sm:$0xff]  ;;  %v1215_v53 = vmul.f32 %v24109_v52, %v23601_v38  ;;  %v24243_v41 = vmul.f32 %v24109_v52, %v23646_v47  ;;  %v24250_v57 = vld [vmem:[%s26019_s3 + $0x50] sm:$0xff]  ;;  %v24259_v52 = vpop.permute.xlu0 %2249 }
 0x450   : > { %17159 = vmatpush3.msra.mxu0 %v23951_v30  ;;  %17162 = vmatprep.mubr.msk.f32.mxu0 %vm6425_vm7, %v27306_v29  ;;  %v24224_v29 = vmul.f32 %v27290_v11, %v2240_v61  ;;  %27307 = vst [vmem:[#allocation61_spill] sm:$0xff] %v24228_v15  ;;  %v2038_v32 = vsel %vm1874_vm1, %v2036_v59, %v27310_v26  ;;  %v27311_v26 = vld [vmem:[#allocation18_spill] sm:$0xff] }
 0x451   : > { %17126 = vmatpush3.msra.mxu1 %v23976_v8  ;;  %17160 = vmatprep.subr.mxu0 %v23976_v8  ;;  %v3567_v3 = vadd.f32 %v3371_v18, %v3007_v43  ;;  %v24255_v16 = vmul.f32 %v24005_v14, %v23445_v33  ;;  %v2231_v59 = vadd.f32 %v2038_v32, %v1670_v25  ;;  %v27313_v33 = vrot.slane %v24121_v39, 1  ;;  %v27314_v25 = vld [vmem:[#allocation27_spill] sm:$0xff] }
 0x452   : > { %17137 = vmatprep.subr.mxu1 %v23951_v30  ;;  %17161 = vmatpush3.msra.mxu0 %v23976_v8  ;;  %v24274_v18 = vmul.f32 %v27294_v21, %v23646_v47  ;;  %v27315_v32 = vrot.slane %v24179_v5, 2  ;;  %v24292_v21 = vmul.f32 %v27290_v11, %v23646_v47  ;;  %v24313_v5 = vmul.f32 %v23668_v6, %v24257_v27 }
 0x453   : > { %17128 = vmatmul.mubr.msk.f32.vlgmr.msra.gmra.mxu1 %vm6425_vm7, %v27308_v17  ;;  %17163 = vmatmul.mubr.msk.f32.vlgmr.msra.gmra.mxu0 %vm6425_vm7, %v27309_v44  ;;  %v2816_v44 = vrot.slane %v2555_v58, 1  ;;  %v27312_v17 = vrot.slane %v24165_v50, 1  ;;  %v1669_v43 = vadd.f32 %v27313_v33, %v24082_v9  ;;  %v24308_v11 = vadd.f32 %v3691_v35, %v3567_v3 }
 0x454   : > { %17138 = vmatpush3.msra.mxu1 %v23951_v30  ;;  %17172 = vmatprep.subr.mxu0 %v24219_v55  ;;  %v24282_v58 = vsel %vm1874_vm1, %v4709_v22, %v27315_v32  ;;  %v27316_v22 = vmov %v27313_v33  ;;  %v27317_v33 = vrot.slane %v23963_v34, 1  ;;  %v1478_v32 = vrot.slane %v1215_v53, 1  ;;  %27318 = vst [vmem:[#allocation20_spill] sm:$0xff] %v24313_v5  ;;  %v27320_v34 = vld [vmem:[#allocation22_spill] sm:$0xff]  ;;  %v24338_v53 = vpop.permute.xlu1 %3584  ;;  %v24373_v5 = vpop.f32.mrf.mxu0 }
 0x455   : > { %17139 = vmatprep.subr.mxu1 %v23976_v8  ;;  %17141 = vmatprep.mubr.msk.f32.mxu1 %vm6425_vm7, %v27311_v26  ;;  %v24267_v61 = vsel %vm1313_vm0, %v4149_v46, %v27312_v17  ;;  %v17877_v17 = vld [vmem:[%s26017_s1 + $0x4] ss:$0 sm:$0xff]  ;;  %v24298_v46 = vmul.f32 %v27299_v23, %v24257_v27  ;;  %v2034_v36 = vrot.slane %v24255_v16, 2  ;;  %v2451_v39 = vadd.f32 %v2355_v28, %v2231_v59 }
 0x456   : > { %17173 = vmatpush3.msra.mxu0 %v24219_v55  ;;  %17176 = vmatprep.mubr.msk.f32.mxu0 %vm6425_vm7, %v27314_v25  ;;  %v24288_v9 = vmul.f32 %v17877_v17, %v23646_v47  ;;  %v1474_v25 = vsel %vm1313_vm0, %v27317_v33, %v27316_v22  ;;  %v1776_v22 = vmul.f32 %v24005_v14, %v23601_v38  ;;  %v27321_v35 = vrot.slane %v24158_v12, 1 }
 0x457   : > { %17140 = vmatpush3.msra.mxu1 %v23976_v8  ;;  %17174 = vmatprep.subr.mxu0 %v24250_v57  ;;  %v24327_v16 = vmul.f32 %v24005_v14, %v23646_v47  ;;  %v3376_v28 = vrot.slane %v24224_v29, 2  ;;  %v24332_v59 = vadd.f32 %v2034_v36, %v1669_v43  ;;  %v1668_v33 = vadd.f32 %v1474_v25, %v24135_v45  ;;  %v27322_v14 = vld [vmem:[#allocation42_spill] sm:$0xff]  ;;  %v27325_v45 = vld [vmem:[#allocation15_spill] sm:$0xff] }
 0x458   : > { %17151 = vmatprep.subr.mxu1 %v23951_v30  ;;  %17175 = vmatpush3.msra.mxu0 %v24250_v57  ;;  %v2818_v3 = vsel %vm1313_vm0, %v2816_v44, %v27321_v35  ;;  %v3580_v44 = vpop.permute.xlu0 %3579  ;;  %v27323_v35 = vrot.slane %v24113_v7, 1  ;;  %v27324_v29 = vrot.slane %v24243_v41, 1  ;;  %v10351_v25 = vrot.slane %v24067_v24, 1 }
 0x459   : > { %17142 = vmatmul.mubr.msk.f32.vlgmr.msra.gmra.mxu1 %vm6425_vm7, %v27319_v0  ;;  %17177 = vmatmul.mubr.msk.f32.vlgmr.msra.gmra.mxu0 %vm6425_vm7, %v27320_v34  ;;  %v24336_v34 = vmul.f32 %v17877_v17, %v24259_v52  ;;  %v24354_v0 = vrot.slane %v24101_v13, 1  ;;  %v3011_v7 = vadd.f32 %v2818_v3, %v2451_v39  ;;  %v27328_v13 = vrot.slane %v24205_v31, 2 }
 0x45a   : > { %17152 = vmatpush3.msra.mxu1 %v23951_v30  ;;  %17186 = vmatprep.subr.mxu0 %v24219_v55  ;;  %v1479_v26 = vsel %vm1313_vm0, %v27323_v35, %v1478_v32  ;;  %v1481_v43 = vsel %vm1313_vm0, %v1478_v32, %v27324_v29  ;;  %v1015_v35 = vmul.f32 %v24197_v37, %v23601_v38  ;;  %v2039_v32 = vrot.slane %v1776_v22, 2  ;;  %v27327_v22 = vld [vmem:[#allocation59_spill] sm:$0xff] }
 0x45b   : > { %17153 = vmatprep.subr.mxu1 %v23976_v8  ;;  %17155 = vmatprep.mubr.msk.f32.mxu1 %vm6425_vm7, %v27322_v14  ;;  %v1014_v14 = vmul.f32 %v24197_v37, %v23504_v19  ;;  %v24364_v29 = vmul.f32 %v27299_v23, %v24338_v53  ;;  %v27326_v19 = vrot.slane %v24026_v51, 2  ;;  %v3378_v15 = vsel %vm1874_vm1, %v3376_v28, %v27328_v13 }
 0x45c   : > { %17187 = vmatpush3.msra.mxu0 %v24219_v55  ;;  %17190 = vmatprep.mubr.msk.f32.mxu0 %vm6425_vm7, %v27325_v45  ;;  %v3895_v45 = vmul.f32 %v27299_v23, %v3580_v44  ;;  %v1672_v24 = vadd.f32 %v1481_v43, %v1015_v35  ;;  %v24383_v48 = vmul.f32 %v17877_v17, %v24257_v27  ;;  %v2819_v51 = vrot.slane %v24336_v34, 1 }
 0x45d   : > { %17154 = vmatpush3.msra.mxu1 %v23976_v8  ;;  %17188 = vmatprep.subr.mxu0 %v24250_v57  ;;  %v2035_v39 = vsel %vm1874_vm1, %v27326_v19, %v2034_v36  ;;  %v1671_v3 = vadd.f32 %v1479_v26, %v1014_v14  ;;  %v24389_v36 = vsel %vm1313_vm0, %v10351_v25, %v24354_v0  ;;  %v17878_v26 = vld [vmem:[%s26017_s1 + $0x5] ss:$0 sm:$0xff]  ;;  %v27330_v25 = vrot.slane %v24327_v16, 2 }
 0x45e   : > { %17165 = vmatprep.subr.mxu1 %v23951_v30  ;;  %17189 = vmatpush3.msra.mxu0 %v24250_v57  ;;  %v24396_v14 = vmul.f32 %v17878_v26, %v24259_v52  ;;  %v3571_v13 = vadd.f32 %v3378_v15, %v3011_v7  ;;  %v3695_v17 = vmul.f32 %v23720_v63, %v3580_v44  ;;  %v4156_v43 = vrot.slane %v3895_v45, 1  ;;  %v24419_v45 = vpop.f32.mrf.mxu0 }
 0x45f   : > { %17156 = vmatmul.mubr.msk.f32.vlgmr.msra.gmra.mxu1 %vm6425_vm7, %v27327_v22  ;;  %17191 = vmatmul.mubr.msk.f32.vlgmr.msra.gmra.mxu0 %vm6425_vm7, %v23643_v62  ;;  %v2042_v35 = vsel %vm1874_vm1, %v2039_v32, %v27330_v25  ;;  %v2229_v25 = vadd.f32 %v2035_v39, %v1668_v33  ;;  %v24450_v33 = vmul.f32 %v17878_v26, %v24257_v27 }
 0x460   : > { %17166 = vmatpush3.msra.mxu1 %v23951_v30  ;;  %17200 = vmatprep.subr.mxu0 %v24219_v55  ;;  %v27329_v30 = vrot.slane %v24169_v54, 2  ;;  %v2233_v7 = vadd.f32 %v2042_v35, %v1672_v24  ;;  %v24415_v54 = vld [vmem:[%s26017_s1 + $0x3] ss:$0 sm:$0xff]  ;;  %v24427_v24 = vmul.f32 %v23668_v6, %v24338_v53  ;;  %v3791_v35 = vadd.f32 %v3695_v17, %v3571_v13  ;;  %v24436_v34 = vpop.f32.mrf.mxu0 }
 0x461   : > { %17167 = vmatprep.subr.mxu1 %v23976_v8  ;;  %17169 = vmatprep.mubr.msk.f32.mxu1 %vm6425_vm7, %v24389_v36  ;;  %v2357_v19 = vmul.f32 %v24415_v54, %v24259_v52  ;;  %v3379_v39 = vrot.slane %v24396_v14, 2  ;;  %v24457_v13 = vmul.f32 %v27299_v23, %v24259_v52 }
 0x462   : > { %v2040_v28 = vsel %vm1874_vm1, %v27329_v30, %v2039_v32  ;;  %17201 = vmatpush3.msra.mxu0 %v24219_v55  ;;  %17204 = vmatprep.mubr.msk.f32.mxu0 %vm6425_vm7, %v23758_v20  ;;  %v2353_v32 = vmul.f32 %v24415_v54, %v23601_v38  ;;  %v3590_v38 = vpop.permute.xlu0 %3589  ;;  %v26445_v26 = vrot.slane %v24427_v24, 2 }
 0x463   : > { %v2232_v15 = vadd.f32 %v2040_v28, %v1671_v3  ;;  %17168 = vmatpush3.msra.mxu1 %v23976_v8  ;;  %17202 = vmatprep.subr.mxu0 %v24250_v57  ;;  %v4455_v3 = vmul.f32 %v23668_v6, %v3580_v44  ;;  %v4347_v8 = vadd.f32 %v24267_v61, %v24308_v11  ;;  %v27331_v44 = vrot.slane %v24158_v12, 1  ;;  %v24475_v28 = vpop.f32.mrf.mxu0 }
 0x464   : > { %17179 = vmatprep.subr.mxu1 %v24219_v55  ;;  %17203 = vmatpush3.msra.mxu0 %v24250_v57  ;;  %v27332_v61 = vrot.slane %v24364_v29, 1  ;;  %v2453_v17 = vadd.f32 %v2357_v19, %v2233_v7  ;;  %v24468_v14 = vmul.f32 %v27299_v23, %v3590_v38  ;;  %v24473_v19 = vpop.permute.xlu1 %3594  ;;  %27335 = vst [vmem:[#allocation10_spill] sm:$0xff] %v24475_v28  ;;  %v27337_v23 = vrot.slane %v24057_v2, 1  ;;  %v27365_v28 = vld [vmem:[#allocation12_spill] sm:$0xff] }
 0x465   : > { %17170 = vmatmul.mubr.msk.f32.vlgmr.msra.gmra.mxu1 %vm6425_vm7, %v24354_v0  ;;  %17205 = vmatmul.mubr.msk.f32.vlgmr.msra.gmra.mxu0 %vm6425_vm7, %v23715_v40  ;;  %v2820_v30 = vsel %vm1313_vm0, %v27331_v44, %v2819_v51  ;;  %v2452_v12 = vadd.f32 %v24150_v4, %v2232_v15  ;;  %v27333_v44 = vld [vmem:[#allocation35_spill] sm:$0xff]  ;;  %v2449_v4 = vadd.f32 %v2353_v32, %v2229_v25  ;;  %v27339_v32 = vrot.slane %v24093_v42, 2  ;;  %v24500_v42 = vpop.f32.mrf.mxu0 }
 0x466   : > { %v4158_v11 = vsel %vm1313_vm0, %v4156_v43, %v27332_v61  ;;  %17180 = vmatpush3.msra.mxu1 %v24219_v55  ;;  %17214 = vmatprep.subr.mxu0 %v24219_v55  ;;  %v4716_v43 = vrot.slane %v4455_v3, 2  ;;  %v27334_v61 = vrot.slane %v24383_v48, 1  ;;  %v24491_v25 = vmul.f32 %v23720_v63, %v24259_v52 }
 0x467   : > { %17181 = vmatprep.subr.mxu1 %v24250_v57  ;;  %17183 = vmatprep.mubr.msk.f32.mxu1 %vm6425_vm7, %v27333_v44  ;;  %v3012_v15 = vadd.f32 %v2820_v30, %v2452_v12  ;;  %v4351_v7 = vadd.f32 %v4158_v11, %v3791_v35  ;;  %v26444_v35 = vrot.slane %v24450_v33, 2  ;;  %v4907_v2 = vadd.f32 %v24282_v58, %v4347_v8 }
 0x468   : > { %v2822_v6 = vsel %vm1313_vm0, %v2819_v51, %v27334_v61  ;;  %17215 = vmatpush3.msra.mxu0 %v24219_v55  ;;  %17218 = vmatprep.mubr.msk.f32.mxu0 %vm6425_vm7, %v23822_v56  ;;  %v27336_v51 = vrot.slane %v24288_v9, 1  ;;  %v27338_v61 = vrot.slane %v24292_v21, 2  ;;  %v27340_v11 = vrot.slane %v24205_v31, 2  ;;  %v17880_v31 = vld [vmem:[%s26017_s1 + $0x7] ss:$0 sm:$0xff] }
 0x469   : > { %17182 = vmatpush3.msra.mxu1 %v24250_v57  ;;  %17216 = vmatprep.subr.mxu0 %v24250_v57  ;;  %v1016_v58 = vmul.f32 %v24197_v37, %v23646_v47  ;;  %v24515_v8 = vmul.f32 %v17880_v31, %v24473_v19  ;;  %v27342_v37 = vld [vmem:[#allocation50_spill] sm:$0xff]  ;;  %v27343_v47 = vrot.slane %v24243_v41, 1 }
 0x46a   : > { %v2815_v3 = vsel %vm1313_vm0, %v27337_v23, %v27336_v51  ;;  %v3375_v30 = vsel %vm1874_vm1, %v27339_v32, %v27338_v61  ;;  %17193 = vmatprep.subr.mxu1 %v24219_v55  ;;  %17217 = vmatpush3.msra.mxu0 %v24250_v57  ;;  %v3380_v12 = vsel %vm1874_vm1, %v27340_v11, %v3379_v39  ;;  %v27341_v23 = vld [vmem:[#allocation26_spill] sm:$0xff]  ;;  %v4152_v32 = vrot.slane %v24457_v13, 1 }
 0x46b   : > { %v3013_v51 = vadd.f32 %v2822_v6, %v2453_v17  ;;  %17184 = vmatmul.mubr.msk.f32.vlgmr.msra.gmra.mxu1 %vm6425_vm7, %v27341_v23  ;;  %17219 = vmatmul.mubr.msk.f32.vlgmr.msra.gmra.mxu0 %vm6425_vm7, %v23792_v60  ;;  %v4718_v61 = vsel %vm1874_vm1, %v4716_v43, %v26445_v26  ;;  %v4159_v6 = vrot.slane %v24468_v14, 1  ;;  %v3009_v17 = vadd.f32 %v2815_v3, %v2449_v4  ;;  %v17881_v4 = vld [vmem:[%s26017_s1 + $0x8] ss:$0 sm:$0xff] }
 0x46c   : > { %17194 = vmatpush3.msra.mxu1 %v24219_v55  ;;  %17228 = vmatprep.subr.mxu0 %v24219_v55  ;;  %v3572_v43 = vadd.f32 %v3380_v12, %v3012_v15  ;;  %v4911_v11 = vadd.f32 %v4718_v61, %v4351_v7  ;;  %v1673_v31 = vadd.f32 %v27343_v47, %v1016_v58  ;;  %v24540_v7 = vpop.f32.mrf.mxu0  ;;  %v26446_v61 = vrot.slane %v24298_v46, 1 }
 0x46d   : > { %17195 = vmatprep.subr.mxu1 %v24250_v57  ;;  %17197 = vmatprep.mubr.msk.f32.mxu1 %vm6425_vm7, %v27342_v37  ;;  %v3382_v14 = vsel %vm1874_vm1, %v3379_v39, %v26444_v35  ;;  %v24532_v3 = vmul.f32 %v17881_v4, %v3590_v38  ;;  %v3696_v13 = vmul.f32 %v23720_v63, %v24338_v53  ;;  %v24547_v39 = vld [vmem:[%s26019_s3 + $0x68] sm:$0xff]  ;;  %v27345_v47 = vrot.slane %v24165_v50, 1 }
 0x46e   : > { %17229 = vmatpush3.msra.mxu0 %v24219_v55  ;;  %17232 = vmatprep.mubr.msk.f32.mxu0 %vm6425_vm7, %v23866_v10  ;;  %v3573_v41 = vadd.f32 %v3382_v14, %v3013_v51  ;;  %v3697_v15 = vmul.f32 %v23720_v63, %v3590_v38  ;;  %v24550_v12 = vmul.f32 %v17881_v4, %v24259_v52  ;;  %v26447_v51 = vrot.slane %v24515_v8, 1  ;;  %v27346_v35 = vld [vmem:[#allocation37_spill] sm:$0xff] }
 0x46f   : > { %17196 = vmatpush3.msra.mxu1 %v24250_v57  ;;  %17230 = vmatprep.subr.mxu0 %v24250_v57  ;;  %v2358_v53 = vmul.f32 %v24415_v54, %v24257_v27  ;;  %v27344_v63 = vrot.slane %v24364_v29, 1  ;;  %v3569_v58 = vadd.f32 %v3375_v30, %v3009_v17  ;;  %v4153_v52 = vsel %vm1313_vm0, %v27345_v47, %v4152_v32  ;;  %v24568_v29 = vpop.f32.mrf.mxu0  ;;  %v24584_v17 = vld [vmem:[%s26019_s3 + $0x60] sm:$0xff] }
 0x470   : > { %17207 = vmatprep.subr.mxu1 %v24219_v55  ;;  %17231 = vmatpush3.msra.mxu0 %v24250_v57  ;;  %v3792_v14 = vadd.f32 %v3696_v13, %v3572_v43  ;;  %v24571_v54 = vadd.f32 %v23771_v1, %v4911_v11  ;;  %v24576_v30 = vmul.f32 %v17881_v4, %v24473_v19  ;;  %v4719_v50 = vrot.slane %v24532_v3, 2  ;;  %v27348_v11 = vld [vmem:[#allocation30_spill] sm:$0xff] }
 0x471   : > { %v4160_v38 = vsel %vm1313_vm0, %v27344_v63, %v4159_v6  ;;  %17198 = vmatmul.mubr.msk.f32.vlgmr.msra.gmra.mxu1 %vm6425_vm7, %v27346_v35  ;;  %17233 = vmatmul.mubr.msk.f32.vlgmr.msra.gmra.mxu0 %vm6425_vm7, %v23838_v49  ;;  %v27347_v63 = vrot.slane %v24327_v16, 2  ;;  %v2450_v1 = vadd.f32 %v24274_v18, %v24332_v59  ;;  %v3793_v43 = vadd.f32 %v3697_v15, %v3573_v41  ;;  %v27349_v59 = vld [vmem:[#allocation9_spill] sm:$0xff] }
 0x472   : > { %17208 = vmatpush3.msra.mxu1 %v24219_v55  ;;  %17242 = vmatprep.subr.mxu0 %v24547_v39  ;;  %v4352_v16 = vadd.f32 %v4160_v38, %v3792_v14  ;;  %v4712_v3 = vrot.slane %v24550_v12, 2  ;;  %v4162_v18 = vsel %vm1313_vm0, %v4159_v6, %v26447_v51  ;;  %v3789_v41 = vadd.f32 %v24491_v25, %v3569_v58  ;;  %v27350_v15 = vld [vmem:[#allocation61_spill] sm:$0xff]  ;;  %v27352_v58 = vld [vmem:[#allocation20_spill] sm:$0xff] }
 0x473   : > { %v2234_v26 = vadd.f32 %v27347_v63, %v1673_v31  ;;  %17209 = vmatprep.subr.mxu1 %v24250_v57  ;;  %17211 = vmatprep.mubr.msk.f32.mxu1 %vm6425_vm7, %v27348_v11  ;;  %v24594_v31 = vld [vmem:[%s26018_s2] ss:$0 sm:$0xff]  ;;  %v4348_v38 = vadd.f32 %v4153_v52, %v27350_v15  ;;  %v5110_v6 = vmax.f32 %v24571_v54, 0.0  ;;  %v26448_v12 = vrot.slane %v24576_v30, 2 }
 0x474   : > { %v24597_v4 = vadd.f32 %v24594_v31, %v4907_v2  ;;  %17243 = vmatpush3.msra.mxu0 %v24547_v39  ;;  %17246 = vmatprep.mubr.msk.f32.mxu0 %vm6425_vm7, %v27349_v59  ;;  %v24610_v2 = vpop.f32.mrf.mxu0  ;;  %v4714_v47 = vrot.slane %v27352_v58, 2  ;;  %v4353_v52 = vadd.f32 %v4162_v18, %v3793_v43  ;;  %v27353_v63 = vld [vmem:[#allocation44_spill] sm:$0xff]  ;;  %v27355_v59 = vrot.slane %v24288_v9, 1 }
 0x475   : > { %v2454_v13 = vadd.f32 %v2358_v53, %v2234_v26  ;;  %17210 = vmatpush3.msra.mxu1 %v24250_v57  ;;  %17244 = vmatprep.subr.mxu0 %v24584_v17  ;;  %v4155_v26 = vsel %vm1313_vm0, %v4152_v32, %v26446_v61  ;;  %v27351_v53 = vrot.slane %v24427_v24, 2  ;;  %v27354_v32 = vld [vmem:[#allocation46_spill] sm:$0xff]  ;;  %v27358_v43 = vrot.slane %v24383_v48, 1 }
 0x476   : > { %17221 = vmatprep.subr.mxu1 %v24219_v55  ;;  %17245 = vmatpush3.msra.mxu0 %v24584_v17  ;;  %v24627_v54 = vpop.f32.mrf.mxu0  ;;  %v5106_v24 = vmax.f32 %v24597_v4, 0.0  ;;  %v3010_v15 = vadd.f32 %v27355_v59, %v2450_v1  ;;  %v4349_v18 = vadd.f32 %v4155_v26, %v3789_v41  ;;  %v17883_v4 = vld [vmem:[%s26017_s1 + $0x6] ss:$0 sm:$0xff]  ;;  %v27359_v1 = vld [vmem:[#allocation55_spill] sm:$0xff]  ;;  %v4722_v48 = vsel %vm1874_vm1, %v4719_v50, %v26448_v12 }
 0x477   : > { %v4720_v25 = vsel %vm1874_vm1, %v27351_v53, %v4719_v50  ;;  %17212 = vmatmul.mubr.msk.f32.vlgmr.msra.gmra.mxu1 %vm6425_vm7, %v27353_v63  ;;  %17247 = vmatmul.mubr.msk.f32.vlgmr.msra.gmra.mxu0 %vm6425_vm7, %v27354_v32  ;;  %v27356_v53 = vld [vmem:[#allocation64_spill] sm:$0xff]  ;;  %v3698_v9 = vmul.f32 %v17883_v4, %v24473_v19  ;;  %v4913_v19 = vadd.f32 %v4722_v48, %v4353_v52  ;;  %v27364_v52 = vrot.slane %v24292_v21, 2 }
 0x478   : > { %v4912_v14 = vadd.f32 %v4720_v25, %v4352_v16  ;;  %v27357_v61 = vrot.slane %v27356_v53, 2  ;;  %v3014_v16 = vadd.f32 %v27358_v43, %v2454_v13  ;;  %17222 = vmatpush3.msra.mxu1 %v24219_v55  ;;  %17256 = vmatprep.subr.mxu0 %v24547_v39  ;;  %v27360_v13 = vld [vmem:[#allocation34_spill] sm:$0xff]  ;;  %v24659_v59 = vpop.f32.mrf.mxu0  ;;  %v5160_v50 = vrot.slane %v5106_v24, 1 }
 0x479   : > { %17223 = vmatprep.subr.mxu1 %v24250_v57  ;;  %17225 = vmatprep.mubr.msk.f32.mxu1 %vm6425_vm7, %v27359_v1  ;;  %v3694_v53 = vmul.f32 %v17883_v4, %v24257_v27  ;;  %v4715_v43 = vsel %vm1874_vm1, %v4712_v3, %v4714_v47  ;;  %v27366_v27 = vld [vmem:[#allocation17_spill] sm:$0xff] }
 0x47a   : > { %v4713_v51 = vsel %vm1874_vm1, %v27357_v61, %v4712_v3  ;;  %v5161_v61 = vrot.slane %v5110_v6, 1  ;;  %17257 = vmatpush3.msra.mxu0 %v24547_v39  ;;  %17260 = vmatprep.mubr.msk.f32.mxu0 %vm6425_vm7, %v27360_v13  ;;  %v5015_v32 = vadd.f32 %v24594_v31, %v4912_v14  ;;  %v27363_v13 = vrot.slane %v24450_v33, 2  ;;  %v24676_v3 = vpop.f32.mrf.mxu0 }
 0x47b   : > { %v4908_v25 = vadd.f32 %v4713_v51, %v4348_v38  ;;  %v27361_v51 = vld [vmem:[#allocation16_spill] sm:$0xff]  ;;  %v27362_v38 = vld [vmem:[#allocation11_spill] sm:$0xff]  ;;  %17224 = vmatpush3.msra.mxu1 %v24250_v57  ;;  %17258 = vmatprep.subr.mxu0 %v24584_v17  ;;  %v3570_v14 = vadd.f32 %v27364_v52, %v3010_v15  ;;  %v4909_v48 = vadd.f32 %v4715_v43, %v4349_v18 }
 0x47c   : > { %v11131_v41 = vrot.slane %v27361_v51, 2  ;;  %v24654_v26 = vrot.slane %v27362_v38, 2  ;;  %v3574_v12 = vadd.f32 %v27363_v13, %v3014_v16  ;;  %17235 = vmatprep.subr.mxu1 %v24219_v55  ;;  %17259 = vmatpush3.msra.mxu0 %v24584_v17  ;;  %v24678_v33 = vmax.f32 %v5110_v6, %v5161_v61 }
 0x47d   : > { %v5011_v49 = vadd.f32 %v24594_v31, %v4908_v25  ;;  %17226 = vmatmul.mubr.msk.f32.vlgmr.msra.gmra.mxu1 %vm6425_vm7, %v27365_v28  ;;  %17261 = vmatmul.mubr.msk.f32.vlgmr.msra.gmra.mxu0 %vm6425_vm7, %v27366_v27  ;;  %v5016_v15 = vadd.f32 %v24594_v31, %v4913_v19  ;;  %v5111_v18 = vmax.f32 %v5015_v32, 0.0  ;;  %v24690_v25 = vpop.f32.mrf.mxu0  ;;  %v24692_v6 = vmax.f32 %v5106_v24, %v5160_v50 }
 0x47e   : > { %v3794_v16 = vadd.f32 %v3698_v9, %v3574_v12  ;;  %17236 = vmatpush3.msra.mxu1 %v24219_v55  ;;  %17270 = vmatprep.subr.mxu0 %v24547_v39  ;;  %v24684_v21 = vsel %vm1874_vm1, %v11131_v41, %v24654_v26  ;;  %v3790_v12 = vadd.f32 %v3694_v53, %v3570_v14  ;;  %v27367_v55 = vld [vmem:[#allocation39_spill] sm:$0xff]  ;;  %v5545_v41 = vrot.slane %v24678_v33, 1 }
 0x47f   : > { %17237 = vmatprep.subr.mxu1 %v24250_v57  ;;  %17239 = vmatprep.mubr.msk.f32.mxu1 %vm6425_vm7, %v24684_v21  ;;  %v5012_v4 = vadd.f32 %v24594_v31, %v4909_v48  ;;  %v5107_v9 = vmax.f32 %v5011_v49, 0.0  ;;  %v24700_v61 = vpop.f32.mrf.mxu0  ;;  %v27368_v24 = vrot.slane %v24515_v8, 1  ;;  %v5112_v32 = vmax.f32 %v5016_v15, 0.0  ;;  %v27369_v49 = vld [vmem:[#allocation7_spill] sm:$0xff]  ;;  %v27371_v48 = vld [vmem:[#allocation33_spill] sm:$0xff]  ;;  %v27373_v15 = vld [vmem:[#allocation40_spill] sm:$0xff] }
 0x480   : > { %17271 = vmatpush3.msra.mxu0 %v24547_v39  ;;  %17274 = vmatprep.mubr.msk.f32.mxu0 %vm6425_vm7, %v27367_v55  ;;  %v5257_v50 = vrot.slane %v5111_v18, 1  ;;  %v27370_v53 = vrot.slane %v24298_v46, 1  ;;  %v5544_v8 = vrot.slane %v24692_v6, 1  ;;  %v5593_v14 = vrot.slane %v24678_v33, 2 }
 0x481   : > { %17238 = vmatpush3.msra.mxu1 %v24250_v57  ;;  %17272 = vmatprep.subr.mxu0 %v24584_v17  ;;  %v4354_v19 = vadd.f32 %v27368_v24, %v3794_v16  ;;  %v24711_v57 = vpop.f32.mrf.mxu0  ;;  %v5108_v13 = vmax.f32 %v5012_v4, 0.0  ;;  %v5256_v52 = vrot.slane %v5107_v9, 1  ;;  %v27372_v46 = vrot.slane %v24576_v30, 2 }
 0x482   : > { %17249 = vmatprep.subr.mxu1 %v24547_v39  ;;  %17273 = vmatpush3.msra.mxu0 %v24584_v17  ;;  %v4350_v43 = vadd.f32 %v27370_v53, %v3790_v12  ;;  %v6146_v12 = vsel %vm6122_vm2, %v24678_v33, %v5545_v41  ;;  %v24731_v55 = vmax.f32 %v5111_v18, %v5257_v50  ;;  %v5353_v4 = vrot.slane %v5112_v32, 1  ;;  %v27375_v50 = vld [vmem:[#allocation57_spill] sm:$0xff] }
 0x483   : > { %17240 = vmatmul.mubr.msk.f32.vlgmr.msra.gmra.mxu1 %vm6425_vm7, %v24654_v26  ;;  %17275 = vmatmul.mubr.msk.f32.vlgmr.msra.gmra.mxu0 %vm6425_vm7, %v27369_v49  ;;  %v24722_v27 = vpop.f32.mrf.mxu0  ;;  %v4914_v16 = vadd.f32 %v27372_v46, %v4354_v19  ;;  %v5592_v24 = vrot.slane %v24692_v6, 2  ;;  %v6145_v18 = vsel %vm6122_vm2, %v24692_v6, %v5544_v8  ;;  %v5352_v41 = vrot.slane %v5108_v13, 1  ;;  %v27374_v19 = vld [vmem:[#allocation21_spill] sm:$0xff]  ;;  %v27376_v46 = vld [vmem:[#allocation24_spill] sm:$0xff] }
 0x484   : > { %17250 = vmatpush3.msra.mxu1 %v24547_v39  ;;  %17284 = vmatprep.subr.mxu0 %v24547_v39  ;;  %v4910_v30 = vadd.f32 %v4714_v47, %v4350_v43  ;;  %v24748_v53 = vmax.f32 %v5107_v9, %v5256_v52  ;;  %v5641_v47 = vrot.slane %v24678_v33, 3  ;;  %v24759_v8 = vmax.f32 %v5112_v32, %v5353_v4 }
 0x485   : > { %17251 = vmatprep.subr.mxu1 %v24584_v17  ;;  %17253 = vmatprep.mubr.msk.f32.mxu1 %vm6425_vm7, %v27371_v48  ;;  %v24736_v49 = vpop.f32.mrf.mxu0  ;;  %v6171_v48 = vsel %vm6147_vm3, %v6146_v12, %v5593_v14  ;;  %v24752_v58 = vadd.f32 %v24594_v31, %v4914_v16  ;;  %v5713_v9 = vrot.slane %v24731_v55, 4  ;;  %v6170_v52 = vsel %vm6147_vm3, %v6145_v18, %v5592_v24  ;;  %v27377_v24 = vld [vmem:[#allocation29_spill] sm:$0xff] }
 0x486   : > { %17285 = vmatpush3.msra.mxu0 %v24547_v39  ;;  %17288 = vmatprep.mubr.msk.f32.mxu0 %vm6425_vm7, %v27373_v15  ;;  %v24767_v14 = vadd.f32 %v24594_v31, %v4910_v30  ;;  %v5640_v33 = vrot.slane %v24692_v6, 3  ;;  %v6196_v32 = vsel %vm6172_vm4, %v6171_v48, %v5641_v47  ;;  %v24776_v15 = vmax.f32 %v5108_v13, %v5352_v41  ;;  %v24783_v31 = vld [vmem:[%s26019_s3 + $0x78] sm:$0xff] }
 0x487   : > { %17252 = vmatpush3.msra.mxu1 %v24584_v17  ;;  %17286 = vmatprep.subr.mxu0 %v24584_v17  ;;  %v24757_v43 = vpop.f32.mrf.mxu0  ;;  %v5712_v12 = vrot.slane %v24748_v53, 4  ;;  %v5761_v6 = vrot.slane %v24731_v55, 5  ;;  %v5929_v4 = vrot.slane %v24759_v8, 1  ;;  %v6221_v30 = vsel %vm6197_vm5, %v6196_v32, %v5713_v9 }
 0x488   : > { %17263 = vmatprep.subr.mxu1 %v24547_v39  ;;  %17287 = vmatpush3.msra.mxu0 %v24584_v17  ;;  %v6195_v13 = vsel %vm6172_vm4, %v6170_v52, %v5640_v33  ;;  %v5109_v41 = vmax.f32 %v24767_v14, 0.0  ;;  %v5977_v9 = vrot.slane %v24759_v8, 2  ;;  %v27380_v52 = vld [vmem:[#allocation49_spill] sm:$0xff]  ;;  %v5809_v32 = vrot.slane %v24731_v55, 6 }
 0x489   : > { %17254 = vmatmul.mubr.msk.f32.vlgmr.msra.gmra.mxu1 %vm6425_vm7, %v27374_v19  ;;  %17289 = vmatmul.mubr.msk.f32.vlgmr.msra.gmra.mxu0 %vm6425_vm7, %v27375_v50  ;;  %v24774_v16 = vpop.f32.mrf.mxu0  ;;  %v24805_v19 = vld [vmem:[%s26019_s3 + $0x70] sm:$0xff]  ;;  %v5760_v50 = vrot.slane %v24748_v53, 5  ;;  %v6220_v48 = vsel %vm6197_vm5, %v6195_v13, %v5712_v12  ;;  %v6246_v14 = vsel %vm6222_vm6, %v6221_v30, %v5761_v6  ;;  %v6318_v12 = vsel %vm6122_vm2, %v24759_v8, %v5929_v4 }
 0x48a   : > { %17264 = vmatpush3.msra.mxu1 %v24547_v39  ;;  %17298 = vmatprep.subr.mxu0 %v24547_v39  ;;  %v5448_v13 = vrot.slane %v5109_v41, 1  ;;  %v5976_v6 = vrot.slane %v24776_v15, 2  ;;  %v27382_v30 = vld [vmem:[#allocation6_spill] sm:$0xff]  ;;  %v6270_v4 = vsel %vm1874_vm1, %v6246_v14, %v5809_v32 }
 0x48b   : > { %17265 = vmatprep.subr.mxu1 %v24584_v17  ;;  %17267 = vmatprep.mubr.msk.f32.mxu1 %vm6425_vm7, %v27376_v46 }
 0x48c   : > { %17299 = vmatpush3.msra.mxu0 %v24547_v39  ;;  %17302 = vmatprep.mubr.msk.f32.mxu0 %vm6425_vm7, %v27361_v51  ;;  %v5113_v51 = vmax.f32 %v24752_v58, 0.0  ;;  %v24797_v18 = vpop.f32.mrf.mxu0  ;;  %v5928_v58 = vrot.slane %v24776_v15, 1  ;;  %v5496_v14 = vmax.f32 %v5109_v41, %v5448_v13  ;;  %v27387_v41 = vld [vmem:[#allocation51_spill] sm:$0xff] }
 0x48d   : > { %17266 = vmatpush3.msra.mxu1 %v24584_v17  ;;  %17300 = vmatprep.subr.mxu0 %v24584_v17  ;;  %27378 = vst [vmem:[#allocation43_spill] sm:$0xff] %v24797_v18  ;;  %v27384_v18 = vld [vmem:[#allocation67_spill] sm:$0xff] }
 0x48e   : > { %17277 = vmatprep.subr.mxu1 %v24547_v39  ;;  %17301 = vmatpush3.msra.mxu0 %v24584_v17  ;;  %v7805_v47 = vpop.f32.mrf.mxu0  ;;  %v5449_v46 = vrot.slane %v5113_v51, 1 }
 0x48f   : > { %17268 = vmatmul.mubr.msk.f32.vlgmr.msra.gmra.mxu1 %vm6425_vm7, %v27377_v24  ;;  %17303 = vmatmul.mubr.msk.f32.vlgmr.msra.gmra.mxu0 %vm6425_vm7, %v27362_v38  ;;  %v27379_v38 = vld [vmem:[#allocation47_spill] sm:$0xff]  ;;  %v24819_v33 = vadd.f32 %v7805_v47, %v24659_v59  ;;  %v6245_v24 = vsel %vm6222_vm6, %v6220_v48, %v5760_v50  ;;  %v5808_v47 = vrot.slane %v24748_v53, 6  ;;  %v5857_v48 = vrot.slane %v24731_v55, 7 }
 0x490   : > { %17278 = vmatpush3.msra.mxu1 %v24547_v39  ;;  %17312 = vmatprep.subr.mxu0 %v24783_v31  ;;  %v16954_v59 = vpop.f32.mrf.mxu0  ;;  %v5497_v50 = vmax.f32 %v5113_v51, %v5449_v46  ;;  %v27385_v46 = vld [vmem:[#allocation25_spill] sm:$0xff]  ;;  %v5856_v55 = vrot.slane %v24748_v53, 7 }
 0x491   : > { %17279 = vmatprep.subr.mxu1 %v24584_v17  ;;  %17281 = vmatprep.mubr.msk.f32.mxu1 %vm6425_vm7, %v27379_v38  ;;  %27381 = vst [vmem:[#allocation31_spill] sm:$0xff] %v24819_v33  ;;  %v27383_v38 = vld [vmem:[#allocation48_spill] sm:$0xff]  ;;  %v24839_v33 = vadd.f32 %v16954_v59, %v24676_v3  ;;  %v6025_v3 = vrot.slane %v24759_v8, 3  ;;  %v6024_v8 = vrot.slane %v24776_v15, 3  ;;  %v27388_v59 = vld [vmem:[#allocation18_spill] sm:$0xff] }
 0x492   : > { %17313 = vmatpush3.msra.mxu0 %v24783_v31  ;;  %17316 = vmatprep.mubr.msk.f32.mxu0 %vm6425_vm7, %v27380_v52  ;;  %v6317_v52 = vsel %vm6122_vm2, %v24776_v15, %v5928_v58  ;;  %v6269_v58 = vsel %vm1874_vm1, %v6245_v24, %v5808_v47  ;;  %v6096_v15 = vrot.slane %v5496_v14, 4  ;;  %v27396_v14 = vld [vmem:[#allocation52_spill] sm:$0xff] }
 0x493   : > { %17280 = vmatpush3.msra.mxu1 %v24584_v17  ;;  %17314 = vmatprep.subr.mxu0 %v24805_v19  ;;  %v6341_v32 = vsel %vm6147_vm3, %v6317_v52, %v5976_v6  ;;  %v6293_v53 = vsel %vm1313_vm0, %v6269_v58, %v5856_v55  ;;  %v24893_v52 = vpop.f32.mrf.mxu1  ;;  %v27393_v58 = vld [vmem:[#allocation36_spill] sm:$0xff] }
 0x494   : > { %17291 = vmatprep.subr.mxu1 %v24547_v39  ;;  %17315 = vmatpush3.msra.mxu0 %v24805_v19  ;;  %v6365_v24 = vsel %vm6172_vm4, %v6341_v32, %v6024_v8  ;;  %v27397_v32 = vld [vmem:[#allocation69_spill] sm:$0xff] }
 0x495   : > { %17282 = vmatmul.mubr.msk.f32.vlgmr.msra.gmra.mxu1 %vm6425_vm7, %v27382_v30  ;;  %17317 = vmatmul.mubr.msk.f32.vlgmr.msra.gmra.mxu0 %vm6425_vm7, %v27383_v38  ;;  %v6342_v30 = vsel %vm6147_vm3, %v6318_v12, %v5977_v9  ;;  %v7963_v38 = vpop.f32.mrf.mxu0  ;;  %v6294_v9 = vsel %vm1313_vm0, %v6270_v4, %v5857_v48  ;;  %v27386_v12 = vld [vmem:[#allocation60_spill] sm:$0xff]  ;;  %v6389_v47 = vsel %vm6197_vm5, %v6365_v24, %v6096_v15  ;;  %v24905_v48 = vpop.f32.mrf.mxu1  ;;  %v27399_v15 = vld [vmem:[#allocation15_spill] sm:$0xff] }
 0x496   : > { %17292 = vmatpush3.msra.mxu1 %v24547_v39  ;;  %17326 = vmatprep.subr.mxu0 %v24783_v31  ;;  %v24851_v51 = vadd.f32 %v7963_v38, %v24690_v25  ;;  %v6366_v25 = vsel %vm6172_vm4, %v6342_v30, %v6025_v3  ;;  %v24870_v13 = vmax.f32 %v6293_v53, %v6294_v9  ;;  %v27389_v4 = vld [vmem:[#allocation56_spill] sm:$0xff]  ;;  %v27392_v30 = vld [vmem:[#allocation14_spill] sm:$0xff]  ;;  %v27398_v53 = vld [vmem:[#allocation65_spill] sm:$0xff] }
 0x497   : > { %17293 = vmatprep.subr.mxu1 %v24584_v17  ;;  %17295 = vmatprep.mubr.msk.f32.mxu1 %vm6425_vm7, %v27384_v18  ;;  %v6097_v18 = vrot.slane %v5497_v50, 4  ;;  %v27391_v50 = vld [vmem:[#allocation42_spill] sm:$0xff]  ;;  %v24915_v38 = vpop.f32.mrf.mxu1 }
 0x498   : > { %17327 = vmatpush3.msra.mxu0 %v24783_v31  ;;  %17330 = vmatprep.mubr.msk.f32.mxu0 %vm6425_vm7, %v27385_v46  ;;  %v27394_v46 = vld [vmem:[#allocation8_spill] sm:$0xff]  ;;  %v27395_v9 = vld [vmem:[#allocation38_spill] sm:$0xff]  ;;  %v12690_v8 = vrot.slane %v24870_v13, 1 }
 0x499   : > { %17294 = vmatpush3.msra.mxu1 %v24584_v17  ;;  %17328 = vmatprep.subr.mxu0 %v24805_v19  ;;  %v6390_v6 = vsel %vm6197_vm5, %v6366_v25, %v6097_v18  ;;  %v24932_v3 = vpop.f32.mrf.mxu1 }
 0x49a   : > { %17305 = vmatprep.subr.mxu1 %v24547_v39  ;;  %17329 = vmatpush3.msra.mxu0 %v24805_v19 }
 0x49b   : > { %17296 = vmatmul.mubr.msk.f32.vlgmr.msra.gmra.mxu1 %vm6425_vm7, %v27386_v12  ;;  %17331 = vmatmul.mubr.msk.f32.vlgmr.msra.gmra.mxu0 %vm6425_vm7, %v27387_v41  ;;  %v24945_v55 = vpop.f32.mrf.mxu1 }
 0x49c   : > { %17306 = vmatpush3.msra.mxu1 %v24547_v39  ;;  %17340 = vmatprep.subr.mxu0 %v24783_v31  ;;  %v24885_v39 = vmax.f32 %v6389_v47, %v6390_v6 }
 0x49d   : > { %17307 = vmatprep.subr.mxu1 %v24584_v17  ;;  %17309 = vmatprep.mubr.msk.f32.mxu1 %vm6425_vm7, %v24870_v13 }
 0x49e   : > { %17341 = vmatpush3.msra.mxu0 %v24783_v31  ;;  %17344 = vmatprep.mubr.msk.f32.mxu0 %vm6425_vm7, %v27388_v59  ;;  %v7490_v59 = vadd.f32 %v24736_v49, %v24540_v7  ;;  %v7648_v49 = vadd.f32 %v24774_v16, %v24610_v2  ;;  %v13471_v2 = vrot.slane %v24885_v39, 2 }
 0x49f   : > { %17308 = vmatpush3.msra.mxu1 %v24584_v17  ;;  %17342 = vmatprep.subr.mxu0 %v24805_v19  ;;  %v27390_v17 = vld [vmem:[#allocation19_spill] sm:$0xff] }
 0x4a0   : > { %17319 = vmatprep.subr.mxu1 %v24783_v31  ;;  %17343 = vmatpush3.msra.mxu0 %v24805_v19 }
 0x4a1   : > { %17310 = vmatmul.mubr.msk.f32.vlgmr.msra.gmra.mxu1 %vm6425_vm7, %v24885_v39  ;;  %17345 = vmatmul.mubr.msk.f32.vlgmr.msra.gmra.mxu0 %vm6425_vm7, %v27389_v4 }
 0x4a2   : > { %17320 = vmatpush3.msra.mxu1 %v24783_v31  ;;  %17354 = vmatprep.subr.mxu0 %v24783_v31 }
 0x4a3   : > { %17321 = vmatprep.subr.mxu1 %v24805_v19  ;;  %17323 = vmatprep.mubr.msk.f32.mxu1 %vm6425_vm7, %v27390_v17 }
 0x4a4   : > { %17355 = vmatpush3.msra.mxu0 %v24783_v31  ;;  %17358 = vmatprep.mubr.msk.f32.mxu0 %vm6425_vm7, %v27391_v50  ;;  %v27400_v50 = vld [vmem:[#allocation43_spill] sm:$0xff] }
 0x4a5   : > { %17322 = vmatpush3.msra.mxu1 %v24805_v19  ;;  %17356 = vmatprep.subr.mxu0 %v24805_v19 }
 0x4a6   : > { %17333 = vmatprep.subr.mxu1 %v24783_v31  ;;  %17357 = vmatpush3.msra.mxu0 %v24805_v19 }
 0x4a7   : > { %17324 = vmatmul.mubr.msk.f32.vlgmr.msra.gmra.mxu1 %vm6425_vm7, %v27392_v30  ;;  %17359 = vmatmul.mubr.msk.f32.vlgmr.msra.gmra.mxu0 %vm6425_vm7, %v27327_v22  ;;  %v24928_v22 = vld [vmem:[%s26019_s3 + $0x88] sm:$0xff]  ;;  %v7811_v30 = vadd.f32 %v27400_v50, %v24627_v54 }
 0x4a8   : > { %17334 = vmatpush3.msra.mxu1 %v24783_v31  ;;  %17368 = vmatprep.subr.mxu0 %v24783_v31 }
 0x4a9   : > { %17335 = vmatprep.subr.mxu1 %v24805_v19  ;;  %17337 = vmatprep.mubr.msk.f32.mxu1 %vm6425_vm7, %v27393_v58 }
 0x4aa   : > { %17369 = vmatpush3.msra.mxu0 %v24783_v31  ;;  %17372 = vmatprep.mubr.msk.f32.mxu0 %vm6425_vm7, %v24389_v36  ;;  %v24943_v36 = vld [vmem:[%s26019_s3 + $0x80] sm:$0xff] }
 0x4ab   : > { %17336 = vmatpush3.msra.mxu1 %v24805_v19  ;;  %17370 = vmatprep.subr.mxu0 %v24805_v19 }
 0x4ac   : > { %17347 = vmatprep.subr.mxu1 %v24783_v31  ;;  %17371 = vmatpush3.msra.mxu0 %v24805_v19 }
 0x4ad   : > { %17338 = vmatmul.mubr.msk.f32.vlgmr.msra.gmra.mxu1 %vm6425_vm7, %v27394_v46  ;;  %17373 = vmatmul.mubr.msk.f32.vlgmr.msra.gmra.mxu0 %vm6425_vm7, %v24354_v0  ;;  %v24957_v0 = vpop.f32.mrf.mxu1 }
 0x4ae   : > { %17348 = vmatpush3.msra.mxu1 %v24783_v31  ;;  %17382 = vmatprep.subr.mxu0 %v24928_v22 }
 0x4af   : > { %17349 = vmatprep.subr.mxu1 %v24805_v19  ;;  %17351 = vmatprep.mubr.msk.f32.mxu1 %vm6425_vm7, %v27395_v9 }
 0x4b0   : > { %17383 = vmatpush3.msra.mxu0 %v24928_v22  ;;  %17386 = vmatprep.mubr.msk.f32.mxu0 %vm6425_vm7, %v27333_v44 }
 0x4b1   : > { %17350 = vmatpush3.msra.mxu1 %v24805_v19  ;;  %17384 = vmatprep.subr.mxu0 %v24943_v36 }
 0x4b2   : > { %17361 = vmatprep.subr.mxu1 %v24783_v31  ;;  %17385 = vmatpush3.msra.mxu0 %v24943_v36 }
 0x4b3   : > { %17352 = vmatmul.mubr.msk.f32.vlgmr.msra.gmra.mxu1 %vm6425_vm7, %v27396_v14  ;;  %17387 = vmatmul.mubr.msk.f32.vlgmr.msra.gmra.mxu0 %vm6425_vm7, %v27341_v23  ;;  %v24965_v44 = vpop.f32.mrf.mxu1  ;;  %v12691_v23 = vrot.slane %v24885_v39, 1 }
 0x4b4   : > { %17362 = vmatpush3.msra.mxu1 %v24783_v31  ;;  %17396 = vmatprep.subr.mxu0 %v24928_v22 }
 0x4b5   : > { %17363 = vmatprep.subr.mxu1 %v24805_v19  ;;  %17365 = vmatprep.mubr.msk.f32.mxu1 %vm6425_vm7, %v27397_v32  ;;  %v24975_v25 = vpop.f32.mrf.mxu1 }
 0x4b6   : > { %17397 = vmatpush3.msra.mxu0 %v24928_v22  ;;  %17400 = vmatprep.mubr.msk.f32.mxu0 %vm6425_vm7, %v27342_v37  ;;  %v12692_v37 = vsel %vm1313_vm0, %v12690_v8, %v12691_v23 }
 0x4b7   : > { %17364 = vmatpush3.msra.mxu1 %v24805_v19  ;;  %17398 = vmatprep.subr.mxu0 %v24943_v36  ;;  %v24981_v18 = vpop.f32.mrf.mxu1 }
 0x4b8   : > { %17375 = vmatprep.subr.mxu1 %v24783_v31  ;;  %17399 = vmatpush3.msra.mxu0 %v24943_v36  ;;  %v7416_v16 = vadd.f32 %v24981_v18, %v24436_v34 }
 0x4b9   : > { %17366 = vmatmul.mubr.msk.f32.vlgmr.msra.gmra.mxu1 %vm6425_vm7, %v27398_v53  ;;  %17401 = vmatmul.mubr.msk.f32.vlgmr.msra.gmra.mxu0 %vm6425_vm7, %v27346_v35  ;;  %v24990_v12 = vpop.f32.mrf.mxu1  ;;  %v7337_v35 = vadd.f32 %v24700_v61, %v24373_v5 }
 0x4ba   : > { %17376 = vmatpush3.msra.mxu1 %v24783_v31  ;;  %17410 = vmatprep.subr.mxu0 %v24928_v22 }
 0x4bb   : > { %17377 = vmatprep.subr.mxu1 %v24805_v19  ;;  %17379 = vmatprep.mubr.msk.f32.mxu1 %vm6425_vm7, %v12692_v37 }
 0x4bc   : > { %17411 = vmatpush3.msra.mxu0 %v24928_v22  ;;  %17414 = vmatprep.mubr.msk.f32.mxu0 %vm6425_vm7, %v27348_v11  ;;  %v24997_v41 = vpop.f32.mrf.mxu1  ;;  %v16968_v24 = vpop.f32.mrf.mxu0  ;;  %v7332_v11 = vadd.f32 %v24711_v57, %v24419_v45 }
 0x4bd   : > { %17378 = vmatpush3.msra.mxu1 %v24805_v19  ;;  %17412 = vmatprep.subr.mxu0 %v24943_v36  ;;  %v25012_v19 = vadd.f32 %v16968_v24, %v7337_v35  ;;  %v7574_v8 = vadd.f32 %v24997_v41, %v24893_v52 }
 0x4be   : > { %17389 = vmatprep.subr.mxu1 %v24928_v22  ;;  %17413 = vmatpush3.msra.mxu0 %v24943_v36  ;;  %v25005_v31 = vpop.f32.mrf.mxu1  ;;  %v8127_v61 = vpop.f32.mrf.mxu0 }
 0x4bf   : > { %17380 = vmatmul.mubr.msk.f32.vlgmr.msra.gmra.mxu1 %vm6425_vm7, %v12691_v23  ;;  %17415 = vmatmul.mubr.msk.f32.vlgmr.msra.gmra.mxu0 %vm6425_vm7, %v27353_v63  ;;  %v25021_v6 = vadd.f32 %v8127_v61, %v7332_v11  ;;  %v7495_v63 = vadd.f32 %v24722_v27, %v24500_v42  ;;  %v7569_v18 = vadd.f32 %v25005_v31, %v24905_v48 }
 0x4c0   : > { %17390 = vmatpush3.msra.mxu1 %v24928_v22  ;;  %17424 = vmatprep.subr.mxu0 %v24928_v22  ;;  %v25016_v5 = vpop.f32.mrf.mxu1 }
 0x4c1   : > { %17391 = vmatprep.subr.mxu1 %v24943_v36  ;;  %17393 = vmatprep.mubr.msk.f32.mxu1 %vm6425_vm7, %v27399_v15 }
 0x4c2   : > { %17425 = vmatpush3.msra.mxu0 %v24928_v22  ;;  %17428 = vmatprep.mubr.msk.f32.mxu0 %vm6425_vm7, %v27359_v1  ;;  %v25026_v45 = vpop.f32.mrf.mxu1 }
 0x4c3   : > { %17392 = vmatpush3.msra.mxu1 %v24943_v36  ;;  %17426 = vmatprep.subr.mxu0 %v24943_v36  ;;  %v7727_v41 = vadd.f32 %v25026_v45, %v24932_v3 }
 0x4c4   : > { %17427 = vmatpush3.msra.mxu0 %v24943_v36  ;;  %17394 = vmatmul.mubr.msk.f32.vlgmr.msra.gmra.mxu1 %vm6425_vm7, %v23643_v62 }
 0x4c5   : > { %17403 = vmatprep.subr.mxu1 %v24928_v22  ;;  %17429 = vmatmul.mubr.msk.f32.vlgmr.msra.gmra.mxu0 %vm6425_vm7, %v27365_v28  ;;  %v25038_v1 = vpop.f32.mrf.mxu1  ;;  %v16982_v57 = vpop.f32.mrf.mxu0 }
 0x4c6   : > { %17438 = vmatprep.subr.mxu0 %v24928_v22  ;;  %17404 = vmatpush3.msra.mxu1 %v24928_v22  ;;  %v25044_v47 = vadd.f32 %v16982_v57, %v7495_v63  ;;  %v7890_v57 = vadd.f32 %v25038_v1, %v24945_v55 }
 0x4c7   : > { %17407 = vmatprep.mubr.msk.f32.mxu1 %vm6425_vm7, %v23758_v20  ;;  %17439 = vmatpush3.msra.mxu0 %v24928_v22  ;;  %v7884_v62 = vpop.f32.mrf.mxu1  ;;  %v8291_v42 = vpop.f32.mrf.mxu0  ;;  %v7653_v20 = vadd.f32 %v24757_v43, %v24568_v29 }
 0x4c8   : > { %17442 = vmatprep.mubr.msk.f32.mxu0 %vm6425_vm7, %v24684_v21  ;;  %17405 = vmatprep.subr.mxu1 %v24943_v36  ;;  %v25053_v28 = vadd.f32 %v7884_v62, %v24957_v0  ;;  %v25055_v27 = vadd.f32 %v8291_v42, %v7490_v59  ;;  %v27402_v0 = vld [vmem:[#allocation41_spill] sm:$0xff] }
 0x4c9   : > { %17440 = vmatprep.subr.mxu0 %v24943_v36  ;;  %17406 = vmatpush3.msra.mxu1 %v24943_v36 }
 0x4ca   : > { %17441 = vmatpush3.msra.mxu0 %v24943_v36  ;;  %17408 = vmatmul.mubr.msk.f32.vlgmr.msra.gmra.mxu1 %vm6425_vm7, %v23715_v40 }
 0x4cb   : > { %17417 = vmatprep.subr.mxu1 %v24928_v22  ;;  %17443 = vmatmul.mubr.msk.f32.vlgmr.msra.gmra.mxu0 %vm6425_vm7, %v24654_v26  ;;  %v16961_v7 = vpop.f32.mrf.mxu1  ;;  %v16996_v21 = vpop.f32.mrf.mxu0 }
 0x4cc   : > { %17418 = vmatpush3.msra.mxu1 %v24928_v22  ;;  %17421 = vmatprep.mubr.msk.f32.mxu1 %vm6425_vm7, %v23822_v56  ;;  %v25073_v40 = vadd.f32 %v16961_v7, %v24965_v44  ;;  %v25075_v4 = vadd.f32 %v16996_v21, %v7653_v20  ;;  %v13470_v56 = vrot.slane %v24870_v13, 2  ;;  %v27401_v13 = vld [vmem:[#allocation10_spill] sm:$0xff]  ;;  %v27403_v44 = vld [vmem:[#allocation31_spill] sm:$0xff] }
 0x4cd   : > { %17419 = vmatprep.subr.mxu1 %v24943_v36  ;;  %v8042_v29 = vpop.f32.mrf.mxu1  ;;  %v8455_v43 = vpop.f32.mrf.mxu0  ;;  %v7411_v39 = vadd.f32 %v24990_v12, %v27401_v13 }
 0x4ce   : > { %17420 = vmatpush3.msra.mxu1 %v24943_v36  ;;  %v25080_v26 = vadd.f32 %v8042_v29, %v24975_v25  ;;  %v25082_v17 = vadd.f32 %v8455_v43, %v7648_v49 }
 0x4cf   : > { %17422 = vmatmul.mubr.msk.f32.vlgmr.msra.gmra.mxu1 %vm6425_vm7, %v23792_v60  ;;  %17431 = vmatprep.subr.mxu1 %v24928_v22 }
 0x4d0   : > { %17432 = vmatpush3.msra.mxu1 %v24928_v22  ;;  %17435 = vmatprep.mubr.msk.f32.mxu1 %vm6425_vm7, %v23866_v10  ;;  %v13472_v10 = vsel %vm1874_vm1, %v13470_v56, %v13471_v2 }
 0x4d1   : > { %17433 = vmatprep.subr.mxu1 %v24943_v36  ;;  %v16975_v60 = vpop.f32.mrf.mxu1  ;;  %v17010_v58 = vpop.f32.mrf.mxu0 }
 0x4d2   : > { %17434 = vmatpush3.msra.mxu1 %v24943_v36  ;;  %v8877_v46 = vadd.f32 %v16975_v60, %v7416_v16  ;;  %v8887_v9 = vadd.f32 %v17010_v58, %v7811_v30 }
 0x4d3   : > { %17436 = vmatmul.mubr.msk.f32.vlgmr.msra.gmra.mxu1 %vm6425_vm7, %v27402_v0  ;;  %17445 = vmatprep.subr.mxu1 %v24928_v22  ;;  %v8209_v34 = vpop.f32.mrf.mxu1  ;;  %v8619_v54 = vpop.f32.mrf.mxu0 }
 0x4d4   : > { %17446 = vmatpush3.msra.mxu1 %v24928_v22  ;;  %17449 = vmatprep.mubr.msk.f32.mxu1 %vm6425_vm7, %v13472_v10  ;;  %v8876_v14 = vadd.f32 %v8209_v34, %v7411_v39  ;;  %v8886_v32 = vadd.f32 %v8619_v54, %v27403_v44 }
 0x4d5   : > { %17447 = vmatprep.subr.mxu1 %v24943_v36 }
 0x4d6   : > { %17448 = vmatpush3.msra.mxu1 %v24943_v36  ;;  %v7732_v36 = vadd.f32 %v25016_v5, %v24915_v38 }
 0x4d7   : > { %17450 = vmatmul.mubr.msk.f32.vlgmr.msra.gmra.mxu1 %vm6425_vm7, %v13471_v2  ;;  %v16989_v23 = vpop.f32.mrf.mxu1  ;;  %v17024_v25 = vpop.f32.mrf.mxu0 }
 0x4d8   : > { %v8881_v22 = vadd.f32 %v16989_v23, %v7574_v8  ;;  %v8891_v53 = vadd.f32 %v17024_v25, %v24839_v33 }
 0x4d9   : > { %v8373_v37 = vpop.f32.mrf.mxu1  ;;  %v8783_v12 = vpop.f32.mrf.mxu0 }
 0x4da   : > { %v8880_v35 = vadd.f32 %v8373_v37, %v7569_v18  ;;  %v8890_v24 = vadd.f32 %v8783_v12, %v24851_v51 }
 0x4dd   : > { %v17003_v11 = vpop.f32.mrf.mxu1  ;;  %v17038_v52 = vpop.f32.mrf.mxu0 }
 0x4de   : > { %v8885_v61 = vadd.f32 %v17003_v11, %v7732_v36  ;;  %v9654_v15 = vadd.f32 %v17038_v52, %v25012_v19 }
 0x4df   : > { %v8537_v48 = vpop.f32.mrf.mxu1  ;;  %v8963_v31 = vpop.f32.mrf.mxu0 }
 0x4e0   : > { %v8884_v63 = vadd.f32 %v8537_v48, %v7727_v41  ;;  %v9653_v33 = vadd.f32 %v8963_v31, %v25021_v6 }
 0x4e3   : > { %v17017_v51 = vpop.f32.mrf.mxu1  ;;  %v17052_v59 = vpop.f32.mrf.mxu0 }
 0x4e4   : > { %v8889_v62 = vadd.f32 %v17017_v51, %v7890_v57  ;;  %v9658_v38 = vadd.f32 %v17052_v59, %v25044_v47 }
 0x4e5   : > { %v8701_v5 = vpop.f32.mrf.mxu1  ;;  %v9113_v42 = vpop.f32.mrf.mxu0 }
 0x4e6   : > { %v8888_v3 = vadd.f32 %v8701_v5, %v25053_v28  ;;  %v9657_v45 = vadd.f32 %v9113_v42, %v25055_v27 }
 0x4e9   : > { %v17031_v19 = vpop.f32.mrf.mxu1  ;;  %v17066_v20 = vpop.f32.mrf.mxu0 }
 0x4ea   : > { %v8893_v7 = vadd.f32 %v17031_v19, %v25073_v40  ;;  %v9662_v6 = vadd.f32 %v17066_v20, %v25075_v4 }
 0x4eb   : > { %v8865_v21 = vpop.f32.mrf.mxu1  ;;  %v9263_v49 = vpop.f32.mrf.mxu0 }
 0x4ec   : > { %v8892_v55 = vadd.f32 %v8865_v21, %v25080_v26  ;;  %v9661_v1 = vadd.f32 %v9263_v49, %v25082_v17 }
 0x4ef   : > { %v17045_v29 = vpop.f32.mrf.mxu1  ;;  %v17080_v47 = vpop.f32.mrf.mxu0 }
 0x4f0   : > { %v9656_v43 = vadd.f32 %v17045_v29, %v8877_v46  ;;  %v9666_v56 = vadd.f32 %v17080_v47, %v8887_v9 }
 0x4f1   : > { %v9038_v2 = vpop.f32.mrf.mxu1  ;;  %v9413_v28 = vpop.f32.mrf.mxu0 }
 0x4f2   : > { %v9655_v16 = vadd.f32 %v9038_v2, %v8876_v14  ;;  %v9665_v27 = vadd.f32 %v9413_v28, %v8886_v32 }
 0x4f5   : > { %v17059_v50 = vpop.f32.mrf.mxu1  ;;  %v17094_v30 = vpop.f32.mrf.mxu0 }
 0x4f6   : > { %v9660_v60 = vadd.f32 %v17059_v50, %v8881_v22  ;;  %v9670_v40 = vadd.f32 %v17094_v30, %v8891_v53 }
 0x4f7   : > { %v9188_v58 = vpop.f32.mrf.mxu1  ;;  %v9563_v4 = vpop.f32.mrf.mxu0 }
 0x4f8   : > { %v9659_v13 = vadd.f32 %v9188_v58, %v8880_v35  ;;  %v9669_v39 = vadd.f32 %v9563_v4, %v8890_v24  ;;  %v16199_v4 = vld [vmem:[%s26021_s5 + $0x38] sm:$0xff] }
 0x4fb   : > { %v17073_v0 = vpop.f32.mrf.mxu1  ;;  %v17108_v26 = vpop.f32.mrf.mxu0 }
 0x4fc   : > { %v9664_v10 = vadd.f32 %v17073_v0, %v8885_v61  ;;  %v25131_v17 = vadd.f32 %v17108_v26, %v9654_v15  ;;  %v16198_v0 = vld [vmem:[%s26021_s5 + $0x30] sm:$0xff] }
 0x4fd   : > { %v9338_v34 = vpop.f32.mrf.mxu1  ;;  %v9742_v46 = vpop.f32.mrf.mxu0  ;;  %v16209_v26 = vld [vmem:[%s26021_s5 + $0x70] sm:$0xff] }
 0x4fe   : > { %v9663_v9 = vadd.f32 %v9338_v34, %v8884_v63  ;;  %v25133_v54 = vadd.f32 %v9742_v46, %v9653_v33 }
 0x501   : > { %v17087_v14 = vpop.f32.mrf.mxu1  ;;  %v17122_v44 = vpop.f32.mrf.mxu0 }
 0x502   : > { %v9668_v32 = vadd.f32 %v17087_v14, %v8889_v62  ;;  %v10438_v8 = vadd.f32 %v17122_v44, %v9658_v38 }
 0x503   : > { %v9488_v23 = vpop.f32.mrf.mxu1  ;;  %v9892_v25 = vpop.f32.mrf.mxu0 }
 0x504   : > { %v9667_v18 = vadd.f32 %v9488_v23, %v8888_v3  ;;  %v25135_v22 = vadd.f32 %v9892_v25, %v9657_v45  ;;  %v16196_v23 = vld [vmem:[%s26021_s5 + $0x20] sm:$0xff] }
 0x507   : > { %v17101_v53 = vpop.f32.mrf.mxu1  ;;  %v17136_v37 = vpop.f32.mrf.mxu0 }
 0x508   : > { %v9672_v12 = vadd.f32 %v17101_v53, %v8893_v7  ;;  %v10442_v35 = vadd.f32 %v17136_v37, %v9662_v6  ;;  %v16207_v53 = vld [vmem:[%s26021_s5 + $0x60] sm:$0xff] }
 0x509   : > { %v9644_v24 = vpop.f32.mrf.mxu1  ;;  %v10042_v36 = vpop.f32.mrf.mxu0 }
 0x50a   : > { %v9671_v11 = vadd.f32 %v9644_v24, %v8892_v55  ;;  %v10441_v52 = vadd.f32 %v10042_v36, %v9661_v1 }
 0x50d   : > { %v17115_v41 = vpop.f32.mrf.mxu1  ;;  %v17150_v61 = vpop.f32.mrf.mxu0 }
 0x50e   : > { %v25137_v15 = vadd.f32 %v17115_v41, %v9656_v43  ;;  %v10446_v48 = vadd.f32 %v17150_v61, %v9666_v56 }
 0x50f   : > { %v9817_v31 = vpop.f32.mrf.mxu1  ;;  %v10192_v63 = vpop.f32.mrf.mxu0 }
 0x510   : > { %v25139_v33 = vadd.f32 %v9817_v31, %v9655_v16  ;;  %v10445_v57 = vadd.f32 %v10192_v63, %v9665_v27 }
 0x513   : > { %v17129_v51 = vpop.f32.mrf.mxu1  ;;  %v17164_v59 = vpop.f32.mrf.mxu0 }
 0x514   : > { %v10440_v62 = vadd.f32 %v17129_v51, %v9660_v60  ;;  %v10450_v38 = vadd.f32 %v17164_v59, %v9670_v40 }
 0x515   : > { %v9967_v5 = vpop.f32.mrf.mxu1  ;;  %v10342_v42 = vpop.f32.mrf.mxu0 }
 0x516   : > { %v25141_v3 = vadd.f32 %v9967_v5, %v9659_v13  ;;  %v10449_v45 = vadd.f32 %v10342_v42, %v9669_v39  ;;  %v16210_v13 = vld [vmem:[%s26021_s5 + $0x78] sm:$0xff]  ;;  %v17947_v39 = vmov 0.0  }
 0x517   : > { %17452 = vmatprep.subr.mxu0 %v17947_v39  ;;  %17485 = vmatprep.subr.mxu1 %v17947_v39 }
 0x518   : > { %17453 = vmatpush3.msra.mxu0 %v16199_v4  ;;  %17486 = vmatpush3.msra.mxu1 %v16210_v13 }
 0x519   : > { %v17143_v19 = vpop.f32.mrf.mxu1  ;;  %v25143_v20 = vpop.f32.mrf.mxu0  ;;  %17454 = vmatprep.subr.mxu0 %v17947_v39  ;;  %17487 = vmatprep.subr.mxu1 %v17947_v39 }
 0x51a   : > { %v25145_v7 = vadd.f32 %v17143_v19, %v9664_v10  ;;  %17455 = vmatpush3.msra.mxu0 %v16198_v0  ;;  %17488 = vmatpush3.msra.mxu1 %v16209_v26 }
 0x51b   : > { %v10117_v6 = vpop.f32.mrf.mxu1  ;;  %v25147_v21 = vpop.f32.mrf.mxu0  ;;  %17456 = vmatprep.subr.mxu0 %v17947_v39  ;;  %17489 = vmatprep.subr.mxu1 %v17947_v39 }
 0x51c   : > { %v25149_v49 = vadd.f32 %v10117_v6, %v9663_v9  ;;  %17460 = vmatprep.mubr.msk.f32.mxu0 %vm17948_vm8, %v17947_v39  ;;  %17493 = vmatprep.mubr.msk.f32.mxu1 %vm17948_vm8, %v17947_v39 }
 0x51f   : > { %v17157_v55 = vpop.f32.mrf.mxu1  ;;  %v17192_v1 = vpop.f32.mrf.mxu0 }
 0x520   : > { %v25151_v29 = vadd.f32 %v17157_v55, %v9668_v32  ;;  %v25153_v47 = vadd.f32 %v17192_v1, %v10438_v8  ;;  %v16197_v32 = vld [vmem:[%s26021_s5 + $0x28] sm:$0xff] }
 0x521   : > { %v10267_v43 = vpop.f32.mrf.mxu1  ;;  %v25155_v56 = vpop.f32.mrf.mxu0  ;;  %v16208_v8 = vld [vmem:[%s26021_s5 + $0x68] sm:$0xff]  ;;  %17457 = vmatpush3.msra.mxu0 %v16197_v32 }
 0x522   : > { %v25157_v2 = vadd.f32 %v10267_v43, %v9667_v18  ;;  %17490 = vmatpush3.msra.mxu1 %v16208_v8  ;;  %17458 = vmatprep.subr.mxu0 %v17947_v39 }
 0x523   : > { %17491 = vmatprep.subr.mxu1 %v17947_v39  ;;  %17459 = vmatpush3.msra.mxu0 %v16196_v23 }
 0x524   : > { %17492 = vmatpush3.msra.mxu1 %v16207_v53  ;;  %17463 = vmatprep.subr.mxu0 %v17947_v39 }
 0x525   : > { %v17171_v28 = vpop.f32.mrf.mxu1  ;;  %v17206_v16 = vpop.f32.mrf.mxu0  ;;  %17507 = vmatprep.subr.mxu1 %v17947_v39 }
 0x526   : > { %v25159_v27 = vadd.f32 %v17171_v28, %v9672_v12  ;;  %v25161_v50 = vadd.f32 %v17206_v16, %v10442_v35 }
 0x527   : > { %v10424_v30 = vpop.f32.mrf.mxu1  ;;  %v10822_v60 = vpop.f32.mrf.mxu0 }
 0x528   : > { %v25163_v40 = vadd.f32 %v10424_v30, %v9671_v11  ;;  %v25165_v58 = vadd.f32 %v10822_v60, %v10441_v52 }
 0x52b   : > { %v25181_v10 = vpop.f32.mrf.mxu1  ;;  %v17220_v34 = vpop.f32.mrf.mxu0 }
 0x52c   : > { %v11226_v46 = vadd.f32 %v17220_v34, %v10446_v48 }
 0x52d   : > { %v25185_v9 = vpop.f32.mrf.mxu1  ;;  %v10972_v14 = vpop.f32.mrf.mxu0 }
 0x52e   : > { %v11225_v44 = vadd.f32 %v10972_v14, %v10445_v57 }
 0x531   : > { %v17199_v25 = vpop.f32.mrf.mxu1  ;;  %v17234_v18 = vpop.f32.mrf.mxu0 }
 0x532   : > { %v25201_v37 = vadd.f32 %v17199_v25, %v10440_v62  ;;  %v11230_v12 = vadd.f32 %v17234_v18, %v10450_v38 }
 0x533   : > { %v25205_v35 = vpop.f32.mrf.mxu1  ;;  %v11122_v24 = vpop.f32.mrf.mxu0 }
 0x534   : > { %v11229_v36 = vadd.f32 %v11122_v24, %v10449_v45 }
 0x537   : > { %v17213_v11 = vpop.f32.mrf.mxu1  ;;  %v17248_v52 = vpop.f32.mrf.mxu0 }
 0x538   : > { %v11224_v41 = vadd.f32 %v17213_v11, %v25145_v7 }
 0x539   : > { %v10897_v61 = vpop.f32.mrf.mxu1  ;;  %v11302_v48 = vpop.f32.mrf.mxu0 }
 0x53a   : > { %v11223_v31 = vadd.f32 %v10897_v61, %v25149_v49 }
 0x53d   : > { %v17227_v63 = vpop.f32.mrf.mxu1  ;;  %v25215_v57 = vpop.f32.mrf.mxu0 }
 0x53e   : > { %v11228_v51 = vadd.f32 %v17227_v63, %v25151_v29 }
 0x53f   : > { %v11047_v59 = vpop.f32.mrf.mxu1  ;;  %v25218_v62 = vpop.f32.mrf.mxu0 }
 0x540   : > { %v11227_v38 = vadd.f32 %v11047_v59, %v25157_v2 }
 0x543   : > { %v17241_v5 = vpop.f32.mrf.mxu1  ;;  %v17276_v42 = vpop.f32.mrf.mxu0 }
 0x544   : > { %v11232_v45 = vadd.f32 %v17241_v5, %v25159_v27  ;;  %v25223_v19 = vadd.f32 %v17276_v42, %v25161_v50  ;;  %v11214_v42 = vadd.f32 %v25143_v20, %v25131_v17  ;;  %v25268_v17 = vld [vmem:[%s26020_s4] ss:$0 sm:$0xff] }
 0x545   : > { %v11204_v7 = vpop.f32.mrf.mxu1  ;;  %v11602_v6 = vpop.f32.mrf.mxu0 }
 0x546   : > { %v11231_v49 = vadd.f32 %v11204_v7, %v25163_v40  ;;  %v25227_v55 = vadd.f32 %v11602_v6, %v25165_v58 }
 0x549   : > { %v25229_v1 = vpop.f32.mrf.mxu1  ;;  %v17290_v29 = vpop.f32.mrf.mxu0 }
 0x54a   : > { %v12005_v43 = vadd.f32 %v17290_v29, %v11226_v46  ;;  %v11993_v29 = vadd.f32 %v17248_v52, %v11214_v42 }
 0x54b   : > { %v25231_v28 = vpop.f32.mrf.mxu1  ;;  %v11752_v2 = vpop.f32.mrf.mxu0 }
 0x54c   : > { %v12004_v16 = vadd.f32 %v11752_v2, %v11225_v44 }
 0x54f   : > { %v25233_v30 = vpop.f32.mrf.mxu1  ;;  %v17304_v27 = vpop.f32.mrf.mxu0 }
 0x550   : > { %v12009_v50 = vadd.f32 %v17304_v27, %v11230_v12 }
 0x551   : > { %v25235_v60 = vpop.f32.mrf.mxu1  ;;  %v11902_v4 = vpop.f32.mrf.mxu0 }
 0x552   : > { %v12008_v13 = vadd.f32 %v11902_v4, %v11229_v36 }
 0x555   : > { %v17283_v40 = vpop.f32.mrf.mxu1  ;;  %v17318_v0 = vpop.f32.mrf.mxu0 }
 0x556   : > { %v25237_v58 = vadd.f32 %v17283_v40, %v11224_v41 }
 0x557   : > { %v11677_v26 = vpop.f32.mrf.mxu1  ;;  %v12081_v34 = vpop.f32.mrf.mxu0 }
 0x558   : > { %v25239_v14 = vadd.f32 %v11677_v26, %v11223_v31 }
 0x55b   : > { %v17297_v46 = vpop.f32.mrf.mxu1  ;;  %v17332_v32 = vpop.f32.mrf.mxu0 }
 0x55c   : > { %v12007_v8 = vadd.f32 %v17297_v46, %v11228_v51 }
 0x55d   : > { %v11827_v44 = vpop.f32.mrf.mxu1  ;;  %v12231_v23 = vpop.f32.mrf.mxu0 }
 0x55e   : > { %v12006_v25 = vadd.f32 %v11827_v44, %v11227_v38 }
 0x561   : > { %v17311_v18 = vpop.f32.mrf.mxu1  ;;  %v17346_v53 = vpop.f32.mrf.mxu0 }
 0x562   : > { %v25241_v12 = vadd.f32 %v17311_v18, %v11232_v45 }
 0x563   : > { %v11983_v24 = vpop.f32.mrf.mxu1  ;;  %v12381_v36 = vpop.f32.mrf.mxu0 }
 0x564   : > { %v25243_v11 = vadd.f32 %v11983_v24, %v11231_v49  ;;  %v11213_v49 = vadd.f32 %v25147_v21, %v25133_v54  ;;  %v11997_v54 = vadd.f32 %v25215_v57, %v25153_v47 }
 0x566   : > { %v11992_v2 = vadd.f32 %v11302_v48, %v11213_v49  ;;  %v11217_v48 = vadd.f32 %v25155_v56, %v25135_v22 }
 0x567   : > { %v17325_v41 = vpop.f32.mrf.mxu1  ;;  %v17360_v61 = vpop.f32.mrf.mxu0 }
 0x568   : > { %v25245_v63 = vadd.f32 %v17360_v61, %v12005_v43  ;;  %v12772_v20 = vadd.f32 %v12081_v34, %v11992_v2  ;;  %v11996_v44 = vadd.f32 %v25218_v62, %v11217_v48  ;;  %v11215_v62 = vadd.f32 %v25185_v9, %v25139_v33 }
 0x569   : > { %v25247_v31 = vpop.f32.mrf.mxu1  ;;  %v12531_v59 = vpop.f32.mrf.mxu0 }
 0x56a   : > { %v25249_v5 = vadd.f32 %v12531_v59, %v12004_v16  ;;  %v12773_v16 = vadd.f32 %v17318_v0, %v11993_v29 }
 0x56d   : > { %v25251_v51 = vpop.f32.mrf.mxu1  ;;  %v17374_v38 = vpop.f32.mrf.mxu0 }
 0x56e   : > { %v25255_v45 = vadd.f32 %v17374_v38, %v12009_v50  ;;  %v12776_v38 = vadd.f32 %v12231_v23, %v11996_v44 }
 0x56f   : > { %v25257_v7 = vpop.f32.mrf.mxu1  ;;  %v12681_v6 = vpop.f32.mrf.mxu0 }
 0x570   : > { %v25261_v43 = vadd.f32 %v12681_v6, %v12008_v13  ;;  %v12777_v13 = vadd.f32 %v17332_v32, %v11997_v54  ;;  %v11216_v6 = vadd.f32 %v25181_v10, %v25137_v15  ;;  %v12781_v15 = vadd.f32 %v17346_v53, %v25223_v19 }
 0x572   : > { %v11995_v23 = vadd.f32 %v25229_v1, %v11216_v6 }
 0x573   : > { %v25263_v27 = vpop.f32.mrf.mxu1  ;;  %v17388_v4 = vpop.f32.mrf.mxu0 }
 0x574   : > { %v13553_v50 = vadd.f32 %v17388_v4, %v12773_v16  ;;  %v11994_v16 = vadd.f32 %v25231_v28, %v11215_v62  ;;  %v12775_v33 = vadd.f32 %v17325_v41, %v11995_v23 }
 0x575   : > { %v25270_v40 = vpop.f32.mrf.mxu1  ;;  %v12861_v26 = vpop.f32.mrf.mxu0 }
 0x576   : > { %v13580_v21 = vadd.f32 %v25268_v17, %v13553_v50  ;;  %v13552_v52 = vadd.f32 %v12861_v26, %v12772_v20  ;;  %v12780_v50 = vadd.f32 %v12381_v36, %v25227_v55 }
 0x578   : > { %v13600_v0 = vmax.f32 %v13580_v21, 0.0  ;;  %v13579_v46 = vadd.f32 %v25268_v17, %v13552_v52 }
 0x579   : > { %v17367_v34 = vpop.f32.mrf.mxu1  ;;  %v17402_v18 = vpop.f32.mrf.mxu0 }
 0x57a   : > { %v13599_v24 = vmax.f32 %v13579_v46, 0.0  ;;  %v25279_v61 = vadd.f32 %v17367_v34, %v12007_v8  ;;  %v13557_v59 = vadd.f32 %v17402_v18, %v12777_v13  ;;  %v13669_v47 = vrot.slane %v13600_v0, 1 }
 0x57b   : > { %v12606_v57 = vpop.f32.mrf.mxu1  ;;  %v13011_v42 = vpop.f32.mrf.mxu0  ;;  %v11219_v8 = vadd.f32 %v25205_v35, %v25141_v3 }
 0x57c   : > { %v13629_v22 = vrot.slane %v13599_v24, 1  ;;  %v13584_v56 = vadd.f32 %v25268_v17, %v13557_v59  ;;  %v25284_v32 = vadd.f32 %v12606_v57, %v12006_v25  ;;  %v13556_v49 = vadd.f32 %v13011_v42, %v12776_v38 }
 0x57d   : > { %v13689_v10 = vmax.f32 %v13600_v0, %v13669_v47  ;;  %v11998_v0 = vadd.f32 %v25235_v60, %v11219_v8  ;;  %v12774_v47 = vadd.f32 %v25247_v31, %v11994_v16 }
 0x57e   : > { %v13649_v29 = vmax.f32 %v13599_v24, %v13629_v22  ;;  %v13604_v2 = vmax.f32 %v13584_v56, 0.0  ;;  %v13583_v4 = vadd.f32 %v25268_v17, %v13556_v49 }
 0x57f   : > { %v17381_v25 = vpop.f32.mrf.mxu1  ;;  %v17416_v20 = vpop.f32.mrf.mxu0  ;;  %v13779_v13 = vrot.slane %v13689_v10, 4  ;;  %v12778_v6 = vadd.f32 %v25257_v7, %v11998_v0 }
 0x580   : > { %v13709_v9 = vrot.slane %v13649_v29, 1  ;;  %v13729_v26 = vrot.slane %v13649_v29, 2  ;;  %v13749_v54 = vrot.slane %v13649_v29, 3  ;;  %v13603_v3 = vmax.f32 %v13583_v4, 0.0 }
 0x581   : > { %v25296_v35 = vadd.f32 %v17381_v25, %v25241_v12  ;;  %v13561_v1 = vadd.f32 %v17416_v20, %v12781_v15  ;;  %v12763_v21 = vpop.f32.mrf.mxu1  ;;  %v13161_v28 = vpop.f32.mrf.mxu0  ;;  %v13671_v53 = vrot.slane %v13604_v2, 1  ;;  %v11999_v12 = vadd.f32 %v25233_v30, %v25201_v37 }
 0x582   : > { %v13799_v19 = vsel %vm6122_vm2, %v13649_v29, %v13709_v9  ;;  %v25300_v52 = vadd.f32 %v12763_v21, %v25243_v11  ;;  %v13560_v48 = vadd.f32 %v13161_v28, %v12780_v50  ;;  %v13631_v36 = vrot.slane %v13603_v3, 1 }
 0x583   : > { %v13809_v55 = vsel %vm6147_vm3, %v13799_v19, %v13729_v26  ;;  %v13588_v41 = vadd.f32 %v25268_v17, %v13561_v1  ;;  %v25315_v57 = vmax.f32 %v13604_v2, %v13671_v53  ;;  %v12779_v42 = vadd.f32 %v25251_v51, %v11999_v12 }
 0x584   : > { %v13819_v46 = vsel %vm6172_vm4, %v13809_v55, %v13749_v54  ;;  %v13587_v44 = vadd.f32 %v25268_v17, %v13560_v48  ;;  %v17395_v34 = vpop.f32.mrf.mxu1  ;;  %v25312_v18 = vmax.f32 %v13603_v3, %v13631_v36  ;;  %v25325_v29 = vadd.f32 %v25263_v27, %v25237_v58 }
 0x585   : > { %v25310_v11 = vsel %vm6197_vm5, %v13819_v46, %v13779_v13  ;;  %v13608_v24 = vmax.f32 %v13588_v41, 0.0  ;;  %v13555_v59 = vadd.f32 %v17395_v34, %v12775_v33  ;;  %v17430_v38 = vpop.f32.mrf.mxu0  ;;  %v13781_v2 = vrot.slane %v25315_v57, 4 }
 0x586   : > { %v13607_v37 = vmax.f32 %v13587_v44, 0.0  ;;  %v13565_v30 = vadd.f32 %v17430_v38, %v25245_v63  ;;  %v12936_v60 = vpop.f32.mrf.mxu1  ;;  %v13711_v22 = vrot.slane %v25312_v18, 1  ;;  %v25329_v63 = vadd.f32 %v25270_v40, %v25239_v14 }
 0x587   : > { %v13673_v56 = vrot.slane %v13608_v24, 1  ;;  %v13311_v62 = vpop.f32.mrf.mxu0  ;;  %v13582_v8 = vadd.f32 %v25268_v17, %v13555_v59  ;;  %v13554_v31 = vadd.f32 %v12936_v60, %v12774_v47  ;;  %v13731_v16 = vrot.slane %v25312_v18, 2 }
 0x588   : > { %v13633_v49 = vrot.slane %v13607_v37, 1  ;;  %v13592_v23 = vadd.f32 %v25268_v17, %v13565_v30  ;;  %v13564_v7 = vadd.f32 %v13311_v62, %v25249_v5  ;;  %v13801_v14 = vsel %vm6122_vm2, %v25312_v18, %v13711_v22 }
 0x589   : > { %v13693_v51 = vmax.f32 %v13608_v24, %v13673_v56  ;;  %v13602_v10 = vmax.f32 %v13582_v8, 0.0  ;;  %v13581_v20 = vadd.f32 %v25268_v17, %v13554_v31  ;;  %v13751_v24 = vrot.slane %v25312_v18, 3 }
 0x58a   : > { %v13653_v15 = vmax.f32 %v13607_v37, %v13633_v49  ;;  %v17409_v4 = vpop.f32.mrf.mxu1  ;;  %v13612_v25 = vmax.f32 %v13592_v23, 0.0  ;;  %v13591_v58 = vadd.f32 %v25268_v17, %v13564_v7  ;;  %v25351_v37 = vsel %vm6147_vm3, %v13801_v14, %v13731_v16 }
 0x58b   : > { %v13559_v27 = vadd.f32 %v17409_v4, %v12779_v42  ;;  %v17444_v50 = vpop.f32.mrf.mxu0  ;;  %v13670_v5 = vrot.slane %v13602_v10, 1  ;;  %v13783_v26 = vrot.slane %v13693_v51, 4  ;;  %v13601_v54 = vmax.f32 %v13581_v20, 0.0 }
 0x58c   : > { %v13713_v40 = vrot.slane %v13653_v15, 1  ;;  %v13733_v33 = vrot.slane %v13653_v15, 2  ;;  %v13086_v9 = vpop.f32.mrf.mxu1  ;;  %v13611_v3 = vmax.f32 %v13591_v58, 0.0  ;;  %v13753_v21 = vrot.slane %v13653_v15, 3 }
 0x58d   : > { %v13586_v1 = vadd.f32 %v25268_v17, %v13559_v27  ;;  %v13569_v19 = vadd.f32 %v17444_v50, %v25255_v45  ;;  %v13558_v53 = vadd.f32 %v13086_v9, %v12778_v6  ;;  %v13675_v13 = vrot.slane %v13612_v25, 1  ;;  %v13461_v41 = vpop.f32.mrf.mxu0 }
 0x58e   : > { %v13803_v28 = vsel %vm6122_vm2, %v13653_v15, %v13713_v40  ;;  %v13630_v55 = vrot.slane %v13601_v54, 1  ;;  %v13635_v36 = vrot.slane %v13611_v3, 1  ;;  %v13690_v46 = vmax.f32 %v13602_v10, %v13670_v5 }
 0x58f   : > { %v13813_v48 = vsel %vm6147_vm3, %v13803_v28, %v13733_v33  ;;  %v17423_v12 = vpop.f32.mrf.mxu1  ;;  %v13606_v44 = vmax.f32 %v13586_v1, 0.0  ;;  %v13596_v34 = vadd.f32 %v25268_v17, %v13569_v19  ;;  %v13585_v60 = vadd.f32 %v25268_v17, %v13558_v53 }
 0x590   : > { %v13823_v0 = vsel %vm6172_vm4, %v13813_v48, %v13753_v21  ;;  %v13650_v45 = vmax.f32 %v13601_v54, %v13630_v55  ;;  %v25348_v38 = vmax.f32 %v13611_v3, %v13635_v36  ;;  %v13568_v42 = vadd.f32 %v13461_v41, %v25261_v43 }
 0x591   : > { %v25346_v59 = vsel %vm6197_vm5, %v13823_v0, %v13783_v26  ;;  %v13236_v47 = vpop.f32.mrf.mxu1  ;;  %v13616_v30 = vmax.f32 %v13596_v34, 0.0  ;;  %v25355_v6 = vmax.f32 %v13612_v25, %v13675_v13  ;;  %v13780_v8 = vrot.slane %v13690_v46, 4 }
 0x592   : > { %v13710_v22 = vrot.slane %v13650_v45, 1  ;;  %v13730_v56 = vrot.slane %v13650_v45, 2  ;;  %v13715_v62 = vrot.slane %v25348_v38, 1  ;;  %v13750_v23 = vrot.slane %v13650_v45, 3 }
 0x593   : > { %v17437_v49 = vpop.f32.mrf.mxu1  ;;  %v13672_v31 = vrot.slane %v13606_v44, 1  ;;  %v13677_v51 = vrot.slane %v13616_v30, 1  ;;  %v13735_v16 = vrot.slane %v25348_v38, 2  ;;  %v13605_v15 = vmax.f32 %v13585_v60, 0.0 }
 0x594   : > { %v13800_v7 = vsel %vm6122_vm2, %v13650_v45, %v13710_v22  ;;  %v13595_v10 = vadd.f32 %v25268_v17, %v13568_v42  ;;  %v13755_v25 = vrot.slane %v25348_v38, 3  ;;  %v13805_v20 = vsel %vm6122_vm2, %v25348_v38, %v13715_v62  ;;  %v16217_v38 = vld [vmem:[%s26021_s5 + $0xa0] sm:$0xff] }
 0x595   : > { %v13386_v4 = vpop.f32.mrf.mxu1  ;;  %v13810_v43 = vsel %vm6147_vm3, %v13800_v7, %v13730_v56  ;;  %v13697_v58 = vmax.f32 %v13616_v30, %v13677_v51  ;;  %v13632_v50 = vrot.slane %v13605_v15, 1  ;;  %v13563_v40 = vadd.f32 %v17423_v12, %v25325_v29 }
 0x596   : > { %v13820_v27 = vsel %vm6172_vm4, %v13810_v43, %v13750_v23  ;;  %v13615_v14 = vmax.f32 %v13595_v10, 0.0  ;;  %v25368_v5 = vmax.f32 %v13606_v44, %v13672_v31  ;;  %v13562_v9 = vadd.f32 %v13236_v47, %v25329_v63 }
 0x597   : > { %v13830_v33 = vsel %vm6197_vm5, %v13820_v27, %v13780_v8  ;;  %v13567_v26 = vadd.f32 %v17437_v49, %v25279_v61  ;;  %v17451_v54 = vpop.f32.mrf.mxu1  ;;  %v25375_v1 = vmax.f32 %v13605_v15, %v13632_v50  ;;  %v13590_v28 = vadd.f32 %v25268_v17, %v13563_v40 }
 0x598   : > { %v25373_v3 = vmax.f32 %v25310_v11, %v13830_v33  ;;  %v13637_v21 = vrot.slane %v13615_v14, 1  ;;  %v25379_v19 = vsel %vm6147_vm3, %v13805_v20, %v13735_v16  ;;  %v13589_v29 = vadd.f32 %v25268_v17, %v13562_v9  ;;  %v16220_v9 = vld [vmem:[%s26021_s5 + $0xb8] sm:$0xff] }
 0x599   : > { %v13594_v53 = vadd.f32 %v25268_v17, %v13567_v26  ;;  %v13566_v63 = vadd.f32 %v13386_v4, %v25284_v32  ;;  %v13787_v48 = vrot.slane %v13697_v58, 4  ;;  %v13712_v61 = vrot.slane %v25375_v1, 1  ;;  %v13543_v0 = vpop.f32.mrf.mxu1 }
 0x59a   : > { %v13657_v13 = vmax.f32 %v13615_v14, %v13637_v21  ;;  %v13571_v11 = vadd.f32 %v17451_v54, %v25296_v35  ;;  %v13610_v55 = vmax.f32 %v13590_v28, 0.0  ;;  %v13609_v36 = vmax.f32 %v13589_v29, 0.0 }
 0x59b   : > { %v13614_v41 = vmax.f32 %v13594_v53, 0.0  ;;  %v13593_v12 = vadd.f32 %v25268_v17, %v13566_v63  ;;  %v13732_v46 = vrot.slane %v25375_v1, 2  ;;  %v13802_v44 = vsel %vm6122_vm2, %v25375_v1, %v13712_v61  ;;  %v13846_v63 = vld [vmem:[%s26021_s5 + $0x10] sm:$0xff] }
 0x59c   : > { %v13717_v34 = vrot.slane %v13657_v13, 1  ;;  %v13737_v32 = vrot.slane %v13657_v13, 2  ;;  %v13757_v45 = vrot.slane %v13657_v13, 3  ;;  %v13674_v47 = vrot.slane %v13610_v55, 1 }
 0x59d   : > { %v13634_v30 = vrot.slane %v13609_v36, 1  ;;  %v13676_v60 = vrot.slane %v13614_v41, 1  ;;  %v13613_v42 = vmax.f32 %v13593_v12, 0.0  ;;  %v13598_v22 = vadd.f32 %v25268_v17, %v13571_v11 }
 0x59e   : > { %v13807_v35 = vsel %vm6122_vm2, %v13657_v13, %v13717_v34  ;;  %v13570_v56 = vadd.f32 %v13543_v0, %v25300_v52  ;;  %v13752_v62 = vrot.slane %v25375_v1, 3  ;;  %v13694_v8 = vmax.f32 %v13610_v55, %v13674_v47 }
 0x59f   : > { %v13817_v49 = vsel %vm6147_vm3, %v13807_v35, %v13737_v32  ;;  %v13654_v23 = vmax.f32 %v13609_v36, %v13634_v30  ;;  %v13636_v51 = vrot.slane %v13613_v42, 1  ;;  %v13618_v7 = vmax.f32 %v13598_v22, 0.0  ;;  %v13844_v32 = vld [vmem:[%s26021_s5] sm:$0xff]  ;;  %v16205_v22 = vld [vmem:[%s26021_s5 + $0x58] sm:$0xff] }
 0x5a0   : > { %v13827_v31 = vsel %vm6172_vm4, %v13817_v49, %v13757_v45  ;;  %v13597_v16 = vadd.f32 %v25268_v17, %v13570_v56  ;;  %v13812_v15 = vsel %vm6147_vm3, %v13802_v44, %v13732_v46  ;;  %v25401_v20 = vmax.f32 %v13614_v41, %v13676_v60  ;;  %v13847_v17 = vld [vmem:[%s26021_s5 + $0x18] sm:$0xff] }
 0x5a1   : > { %v25399_v10 = vsel %vm6197_vm5, %v13827_v31, %v13787_v48  ;;  %v13714_v4 = vrot.slane %v13654_v23, 1  ;;  %v13734_v43 = vrot.slane %v13654_v23, 2  ;;  %v13754_v52 = vrot.slane %v13654_v23, 3  ;;  %v16219_v48 = vld [vmem:[%s26021_s5 + $0xb0] sm:$0xff]  ;;  %v16230_v56 = vld [vmem:[%s26021_s5 + $0xf8] sm:$0xff] }
 0x5a2   : > { %v13656_v58 = vmax.f32 %v13613_v42, %v13636_v51  ;;  %v13678_v27 = vrot.slane %v13618_v7, 1  ;;  %v13617_v14 = vmax.f32 %v13597_v16, 0.0  ;;  %v13854_v40 = vrot.slane %v25373_v3, 1  ;;  %v16229_v31 = vld [vmem:[%s26021_s5 + $0xf0] sm:$0xff]  ;;  %v16203_v51 = vld [vmem:[%s26021_s5 + $0x48] sm:$0xff]  ;;  %v16202_v16 = vld [vmem:[%s26021_s5 + $0x40] sm:$0xff] }
 0x5a3   : > { %v13804_v50 = vsel %vm6122_vm2, %v13654_v23, %v13714_v4  ;;  %v14084_v33 = vrot.slane %v25373_v3, 3  ;;  %v13784_v26 = vrot.slane %v13694_v8, 4  ;;  %v13821_v61 = vsel %vm6172_vm4, %v25351_v37, %v13751_v24  ;;  %v13845_v24 = vld [vmem:[%s26021_s5 + $0x8] sm:$0xff]  ;;  %v16204_v23 = vld [vmem:[%s26021_s5 + $0x50] sm:$0xff] }
 0x5a4   : > { %v13814_v54 = vsel %vm6147_vm3, %v13804_v50, %v13734_v43  ;;  %v13716_v1 = vrot.slane %v13656_v58, 1  ;;  %v13736_v21 = vrot.slane %v13656_v58, 2  ;;  %v13698_v29 = vmax.f32 %v13618_v7, %v13678_v27  ;;  %17461 = vmatmul.mubr.msk.f32.vlgmr.msra.gmra.mxu0 %vm13855_vm9, %v13854_v40  ;;  %v16218_v37 = vld [vmem:[%s26021_s5 + $0xa8] sm:$0xff]  ;;  %v16215_v43 = vld [vmem:[%s26021_s5 + $0x98] sm:$0xff]  ;;  %v16237_v40 = vld [vmem:[%s26021_s5 + $0x120] sm:$0xff] }
 0x5a5   : > { %v13824_v28 = vsel %vm6172_vm4, %v13814_v54, %v13754_v52  ;;  %v13638_v53 = vrot.slane %v13617_v14, 1  ;;  %17494 = vmatmul.mubr.msk.f32.vlgmr.msra.gmra.mxu1 %vm13855_vm9, %v14084_v33  ;;  %v13782_v13 = vrot.slane %v25368_v5, 4  ;;  %17464 = vmatpush3.msra.mxu0 %v13847_v17  ;;  %v13822_v36 = vsel %vm6172_vm4, %v13812_v15, %v13752_v62  ;;  %v16228_v7 = vld [vmem:[%s26021_s5 + $0xe8] sm:$0xff]  ;;  %v16227_v15 = vld [vmem:[%s26021_s5 + $0xe0] sm:$0xff]  ;;  %v16240_v52 = vld [vmem:[%s26021_s5 + $0x138] sm:$0xff] }
 0x5a6   : > { %v13834_v11 = vsel %vm6197_vm5, %v13824_v28, %v13784_v26  ;;  %v13806_v55 = vsel %vm6122_vm2, %v13656_v58, %v13716_v1  ;;  %17508 = vmatpush3.msra.mxu1 %v16220_v9  ;;  %v13785_v41 = vrot.slane %v25355_v6, 4  ;;  %17465 = vmatprep.subr.mxu0 %v17947_v39  ;;  %v13756_v5 = vrot.slane %v13656_v58, 3  ;;  %v16239_v58 = vld [vmem:[%s26021_s5 + $0x130] sm:$0xff]  ;;  %v16213_v27 = vld [vmem:[%s26021_s5 + $0x88] sm:$0xff]  ;;  %v16225_v9 = vld [vmem:[%s26021_s5 + $0xd8] sm:$0xff] }
 0x5a7   : > { %v25432_v12 = vmax.f32 %v25346_v59, %v13834_v11  ;;  %v13816_v18 = vsel %vm6147_vm3, %v13806_v55, %v13736_v21  ;;  %v13658_v0 = vmax.f32 %v13617_v14, %v13638_v53  ;;  %17509 = vmatprep.subr.mxu1 %v17947_v39  ;;  %17466 = vmatpush3.msra.mxu0 %v13846_v63  ;;  %v13788_v30 = vrot.slane %v13698_v29, 4  ;;  %v16238_v50 = vld [vmem:[%s26021_s5 + $0x128] sm:$0xff]  ;;  %v16212_v14 = vld [vmem:[%s26021_s5 + $0x80] sm:$0xff]  ;;  %v16250_v26 = vld [vmem:[%s26021_s5 + $0x178] sm:$0xff] }
 0x5a8   : > { %17510 = vmatpush3.msra.mxu1 %v16219_v48  ;;  %v13831_v59 = vsel %vm6197_vm5, %v13821_v61, %v13781_v2  ;;  %v13832_v6 = vsel %vm6197_vm5, %v13822_v36, %v13782_v13  ;;  %v13825_v46 = vsel %vm6172_vm4, %v25379_v19, %v13755_v25  ;;  %17467 = vmatprep.subr.mxu0 %v17947_v39  ;;  %v13786_v2 = vrot.slane %v25401_v20, 4  ;;  %v16214_v20 = vld [vmem:[%s26021_s5 + $0x90] sm:$0xff]  ;;  %v16223_v1 = vld [vmem:[%s26021_s5 + $0xc8] sm:$0xff]  ;;  %v16222_v28 = vld [vmem:[%s26021_s5 + $0xc0] sm:$0xff] }
 0x5a9   : > { %v13718_v44 = vrot.slane %v13658_v0, 1  ;;  %v13738_v34 = vrot.slane %v13658_v0, 2  ;;  %17511 = vmatprep.subr.mxu1 %v17947_v39  ;;  %v25456_v57 = vmax.f32 %v13831_v59, %v13832_v6  ;;  %17468 = vmatpush3.msra.mxu0 %v13845_v24  ;;  %v13826_v25 = vsel %vm6172_vm4, %v13816_v18, %v13756_v5  ;;  %v16249_v54 = vld [vmem:[%s26021_s5 + $0x170] sm:$0xff]  ;;  %v16248_v21 = vld [vmem:[%s26021_s5 + $0x168] sm:$0xff]  ;;  %v16247_v29 = vld [vmem:[%s26021_s5 + $0x160] sm:$0xff] }
 0x5aa   : > { %17512 = vmatpush3.msra.mxu1 %v16218_v37  ;;  %v13835_v19 = vsel %vm6197_vm5, %v13825_v46, %v13785_v41  ;;  %v13758_v45 = vrot.slane %v13658_v0, 3  ;;  %17469 = vmatprep.subr.mxu0 %v17947_v39  ;;  %v13836_v35 = vsel %vm6197_vm5, %v13826_v25, %v13786_v2  ;;  %v14163_v17 = vrot.slane %v25373_v3, 4  ;;  %v16235_v48 = vld [vmem:[%s26021_s5 + $0x118] sm:$0xff]  ;;  %v16234_v13 = vld [vmem:[%s26021_s5 + $0x110] sm:$0xff]  ;;  %v16233_v55 = vld [vmem:[%s26021_s5 + $0x108] sm:$0xff] }
 0x5ab   : > { %v13808_v47 = vsel %vm6122_vm2, %v13658_v0, %v13718_v44  ;;  %17513 = vmatprep.subr.mxu1 %v17947_v39  ;;  %17470 = vmatpush3.msra.mxu0 %v13844_v32  ;;  %v25480_v62 = vmax.f32 %v13835_v19, %v13836_v35  ;;  %v14400_v4 = vrot.slane %v25456_v57, 2  ;;  %v14558_v33 = vrot.slane %v25456_v57, 4  ;;  %v16260_v61 = vld [vmem:[%s26021_s5 + $0x1b8] sm:$0xff]  ;;  %v16259_v11 = vld [vmem:[%s26021_s5 + $0x1b0] sm:$0xff]  ;;  %v16258_v36 = vld [vmem:[%s26021_s5 + $0x1a8] sm:$0xff] }
 0x5ac   : > { %v13818_v60 = vsel %vm6147_vm3, %v13808_v47, %v13738_v34  ;;  %17471 = vmatprep.mubr.msk.f32.mxu0 %vm17948_vm8, %v17947_v39  ;;  %17514 = vmatpush3.msra.mxu1 %v16217_v38  ;;  %v14321_v53 = vrot.slane %v25456_v57, 1  ;;  %v14716_v63 = vrot.slane %v25432_v12, 1  ;;  %v16232_v41 = vld [vmem:[%s26021_s5 + $0x100] sm:$0xff]  ;;  %v14479_v0 = vrot.slane %v25456_v57, 3  ;;  %v16245_v37 = vld [vmem:[%s26021_s5 + $0x158] sm:$0xff]  ;;  %v16244_v59 = vld [vmem:[%s26021_s5 + $0x150] sm:$0xff] }
 0x5ad   : > { %v13828_v42 = vsel %vm6172_vm4, %v13818_v60, %v13758_v45  ;;  %17515 = vmatprep.mubr.msk.f32.mxu1 %vm17948_vm8, %v17947_v39  ;;  %17472 = vmatmul.mubr.msk.f32.vlgmr.msra.gmra.mxu0 %vm13855_vm9, %v25373_v3  ;;  %v16257_v18 = vld [vmem:[%s26021_s5 + $0x1a0] sm:$0xff]  ;;  %v14874_v24 = vrot.slane %v25432_v12, 3  ;;  %v16270_v5 = vld [vmem:[%s26021_s5 + $0x1f8] sm:$0xff]  ;;  %v16269_v6 = vld [vmem:[%s26021_s5 + $0x1f0] sm:$0xff]  ;;  %v14795_v60 = vrot.slane %v25432_v12, 2  ;;  %v15190_v35 = vrot.slane %v25480_v62, 2 }
 0x5ae   : > { %v13838_v49 = vsel %vm6197_vm5, %v13828_v42, %v13788_v30  ;;  %17474 = vmatprep.subr.mxu0 %v17947_v39  ;;  %17516 = vmatmul.mubr.msk.f32.vlgmr.msra.gmra.mxu1 %vm13855_vm9, %v25456_v57  ;;  %v16243_v46 = vld [vmem:[%s26021_s5 + $0x148] sm:$0xff]  ;;  %v16242_v34 = vld [vmem:[%s26021_s5 + $0x140] sm:$0xff]  ;;  %v16255_v57 = vld [vmem:[%s26021_s5 + $0x198] sm:$0xff] }
 0x5af   : > { %v25487_v8 = vmax.f32 %v25399_v10, %v13838_v49  ;;  %17529 = vmatprep.subr.mxu1 %v17947_v39  ;;  %17475 = vmatpush3.msra.mxu0 %v16205_v22  ;;  %v14005_v10 = vrot.slane %v25373_v3, 2  ;;  %v16224_v3 = vld [vmem:[%s26021_s5 + $0xd0] sm:$0xff]  ;;  %v16268_v44 = vld [vmem:[%s26021_s5 + $0x1e8] sm:$0xff]  ;;  %v16267_v32 = vld [vmem:[%s26021_s5 + $0x1e0] sm:$0xff] }
 0x5b0   : > { %17530 = vmatpush3.msra.mxu1 %v16230_v56  ;;  %17476 = vmatprep.subr.mxu0 %v17947_v39  ;;  %v16280_v2 = vld [vmem:[%s26021_s5 + $0x238] sm:$0xff]  ;;  %v16254_v38 = vld [vmem:[%s26021_s5 + $0x190] sm:$0xff]  ;;  %v16253_v19 = vld [vmem:[%s26021_s5 + $0x188] sm:$0xff] }
 0x5b1   : > { %17531 = vmatprep.subr.mxu1 %v17947_v39  ;;  %17477 = vmatpush3.msra.mxu0 %v16204_v23  ;;  %v16279_v25 = vld [vmem:[%s26021_s5 + $0x230] sm:$0xff]  ;;  %v16278_v45 = vld [vmem:[%s26021_s5 + $0x228] sm:$0xff]  ;;  %v16252_v47 = vld [vmem:[%s26021_s5 + $0x180] sm:$0xff] }
 0x5b2   : > { %17532 = vmatpush3.msra.mxu1 %v16229_v31  ;;  %17478 = vmatprep.subr.mxu0 %v17947_v39  ;;  %v16277_v30 = vld [vmem:[%s26021_s5 + $0x220] sm:$0xff]  ;;  %v16265_v42 = vld [vmem:[%s26021_s5 + $0x1d8] sm:$0xff]  ;;  %v16264_v56 = vld [vmem:[%s26021_s5 + $0x1d0] sm:$0xff] }
 0x5b3   : > { %17533 = vmatprep.subr.mxu1 %v17947_v39  ;;  %17479 = vmatpush3.msra.mxu0 %v16203_v51  ;;  %v16290_v22 = vld [vmem:[%s26021_s5 + $0x278] sm:$0xff]  ;;  %v16289_v49 = vld [vmem:[%s26021_s5 + $0x270] sm:$0xff]  ;;  %v16263_v23 = vld [vmem:[%s26021_s5 + $0x1c8] sm:$0xff] }
 0x5b4   : > { %17534 = vmatpush3.msra.mxu1 %v16228_v7  ;;  %17480 = vmatprep.subr.mxu0 %v17947_v39  ;;  %v16288_v31 = vld [vmem:[%s26021_s5 + $0x268] sm:$0xff]  ;;  %v16262_v51 = vld [vmem:[%s26021_s5 + $0x1c0] sm:$0xff] }
 0x5b5   : > { %17535 = vmatprep.subr.mxu1 %v17947_v39  ;;  %17481 = vmatpush3.msra.mxu0 %v16202_v16  ;;  %v16287_v7 = vld [vmem:[%s26021_s5 + $0x260] sm:$0xff]  ;;  %v14953_v16 = vrot.slane %v25432_v12, 4 }
 0x5b6   : > { %17482 = vmatprep.mubr.msk.f32.mxu0 %vm17948_vm8, %v17947_v39  ;;  %17536 = vmatpush3.msra.mxu1 %v16227_v15  ;;  %v15348_v15 = vrot.slane %v25480_v62, 4 }
 0x5b7   : > { %17537 = vmatprep.mubr.msk.f32.mxu1 %vm17948_vm8, %v17947_v39  ;;  %17483 = vmatmul.mubr.msk.f32.vlgmr.msra.gmra.mxu0 %vm13855_vm9, %v14005_v10  ;;  %v16275_v10 = vld [vmem:[%s26021_s5 + $0x218] sm:$0xff] }
 0x5b8   : > { %17496 = vmatprep.subr.mxu0 %v17947_v39  ;;  %17538 = vmatmul.mubr.msk.f32.vlgmr.msra.gmra.mxu1 %vm13855_vm9, %v14400_v4  ;;  %v16300_v4 = vld [vmem:[%s26021_s5 + $0x2b8] sm:$0xff] }
 0x5b9   : > { %17551 = vmatprep.subr.mxu1 %v17947_v39  ;;  %17497 = vmatpush3.msra.mxu0 %v16215_v43  ;;  %v16299_v43 = vld [vmem:[%s26021_s5 + $0x2b0] sm:$0xff] }
 0x5ba   : > { %17552 = vmatpush3.msra.mxu1 %v16240_v52  ;;  %17498 = vmatprep.subr.mxu0 %v17947_v39  ;;  %v16273_v52 = vld [vmem:[%s26021_s5 + $0x208] sm:$0xff] }
 0x5bb   : > { %17553 = vmatprep.subr.mxu1 %v17947_v39  ;;  %17499 = vmatpush3.msra.mxu0 %v16214_v20  ;;  %v16298_v20 = vld [vmem:[%s26021_s5 + $0x2a8] sm:$0xff] }
 0x5bc   : > { %17554 = vmatpush3.msra.mxu1 %v16239_v58  ;;  %17500 = vmatprep.subr.mxu0 %v17947_v39  ;;  %v16272_v58 = vld [vmem:[%s26021_s5 + $0x200] sm:$0xff] }
 0x5bd   : > { %17555 = vmatprep.subr.mxu1 %v17947_v39  ;;  %17501 = vmatpush3.msra.mxu0 %v16213_v27  ;;  %v16297_v27 = vld [vmem:[%s26021_s5 + $0x2a0] sm:$0xff] }
 0x5be   : > { %17556 = vmatpush3.msra.mxu1 %v16238_v50  ;;  %17502 = vmatprep.subr.mxu0 %v17947_v39  ;;  %v15111_v50 = vrot.slane %v25480_v62, 1 }
 0x5bf   : > { %17557 = vmatprep.subr.mxu1 %v17947_v39  ;;  %17503 = vmatpush3.msra.mxu0 %v16212_v14  ;;  %v15506_v14 = vrot.slane %v25487_v8, 1 }
 0x5c0   : > { %17504 = vmatprep.mubr.msk.f32.mxu0 %vm17948_vm8, %v17947_v39  ;;  %17558 = vmatpush3.msra.mxu1 %v16237_v40  ;;  %v16285_v40 = vld [vmem:[%s26021_s5 + $0x258] sm:$0xff] }
 0x5c1   : > { %17559 = vmatprep.mubr.msk.f32.mxu1 %vm17948_vm8, %v17947_v39  ;;  %17505 = vmatmul.mubr.msk.f32.vlgmr.msra.gmra.mxu0 %vm13855_vm9, %v14163_v17  ;;  %v16310_v17 = vld [vmem:[%s26021_s5 + $0x2f8] sm:$0xff] }
 0x5c2   : > { %17518 = vmatprep.subr.mxu0 %v17947_v39  ;;  %17560 = vmatmul.mubr.msk.f32.vlgmr.msra.gmra.mxu1 %vm13855_vm9, %v14558_v33  ;;  %v16284_v33 = vld [vmem:[%s26021_s5 + $0x250] sm:$0xff] }
 0x5c3   : > { %17573 = vmatprep.subr.mxu1 %v17947_v39  ;;  %17519 = vmatpush3.msra.mxu0 %v16225_v9  ;;  %v16309_v9 = vld [vmem:[%s26021_s5 + $0x2f0] sm:$0xff] }
 0x5c4   : > { %17574 = vmatpush3.msra.mxu1 %v16250_v26  ;;  %17520 = vmatprep.subr.mxu0 %v17947_v39  ;;  %v16283_v26 = vld [vmem:[%s26021_s5 + $0x248] sm:$0xff] }
 0x5c5   : > { %17575 = vmatprep.subr.mxu1 %v17947_v39  ;;  %17521 = vmatpush3.msra.mxu0 %v16224_v3  ;;  %v16308_v3 = vld [vmem:[%s26021_s5 + $0x2e8] sm:$0xff] }
 0x5c6   : > { %17576 = vmatpush3.msra.mxu1 %v16249_v54  ;;  %17522 = vmatprep.subr.mxu0 %v17947_v39  ;;  %v16282_v54 = vld [vmem:[%s26021_s5 + $0x240] sm:$0xff] }
 0x5c7   : > { %17577 = vmatprep.subr.mxu1 %v17947_v39  ;;  %17523 = vmatpush3.msra.mxu0 %v16223_v1  ;;  %v16307_v1 = vld [vmem:[%s26021_s5 + $0x2e0] sm:$0xff] }
 0x5c8   : > { %17578 = vmatpush3.msra.mxu1 %v16248_v21  ;;  %17524 = vmatprep.subr.mxu0 %v17947_v39  ;;  %v15269_v21 = vrot.slane %v25480_v62, 3 }
 0x5c9   : > { %17579 = vmatprep.subr.mxu1 %v17947_v39  ;;  %17525 = vmatpush3.msra.mxu0 %v16222_v28  ;;  %v16295_v28 = vld [vmem:[%s26021_s5 + $0x298] sm:$0xff] }
 0x5ca   : > { %17526 = vmatprep.mubr.msk.f32.mxu0 %vm17948_vm8, %v17947_v39  ;;  %17580 = vmatpush3.msra.mxu1 %v16247_v29  ;;  %v15664_v29 = vrot.slane %v25487_v8, 3 }
 0x5cb   : > { %17581 = vmatprep.mubr.msk.f32.mxu1 %vm17948_vm8, %v17947_v39  ;;  %17527 = vmatmul.mubr.msk.f32.vlgmr.msra.gmra.mxu0 %vm13855_vm9, %v14321_v53  ;;  %v16294_v53 = vld [vmem:[%s26021_s5 + $0x290] sm:$0xff] }
 0x5cc   : > { %17540 = vmatprep.subr.mxu0 %v17947_v39  ;;  %17582 = vmatmul.mubr.msk.f32.vlgmr.msra.gmra.mxu1 %vm13855_vm9, %v14716_v63  ;;  %v16292_v63 = vld [vmem:[%s26021_s5 + $0x280] sm:$0xff] }
 0x5cd   : > { %17595 = vmatprep.subr.mxu1 %v17947_v39  ;;  %17541 = vmatpush3.msra.mxu0 %v16235_v48  ;;  %v16305_v48 = vld [vmem:[%s26021_s5 + $0x2d8] sm:$0xff] }
 0x5ce   : > { %17596 = vmatpush3.msra.mxu1 %v16260_v61  ;;  %17542 = vmatprep.subr.mxu0 %v17947_v39  ;;  %v16304_v61 = vld [vmem:[%s26021_s5 + $0x2d0] sm:$0xff] }
 0x5cf   : > { %17597 = vmatprep.subr.mxu1 %v17947_v39  ;;  %17543 = vmatpush3.msra.mxu0 %v16234_v13  ;;  %v16303_v13 = vld [vmem:[%s26021_s5 + $0x2c8] sm:$0xff] }
 0x5d0   : > { %17598 = vmatpush3.msra.mxu1 %v16259_v11  ;;  %17544 = vmatprep.subr.mxu0 %v17947_v39  ;;  %v16302_v11 = vld [vmem:[%s26021_s5 + $0x2c0] sm:$0xff] }
 0x5d1   : > { %17599 = vmatprep.subr.mxu1 %v17947_v39  ;;  %17545 = vmatpush3.msra.mxu0 %v16233_v55  ;;  %v15585_v55 = vrot.slane %v25487_v8, 2 }
 0x5d2   : > { %17600 = vmatpush3.msra.mxu1 %v16258_v36  ;;  %17546 = vmatprep.subr.mxu0 %v17947_v39  ;;  %v16315_v36 = vld [vmem:[%s26021_s5 + $0x318] sm:$0xff] }
 0x5d3   : > { %17601 = vmatprep.subr.mxu1 %v17947_v39  ;;  %17547 = vmatpush3.msra.mxu0 %v16232_v41  ;;  %v16314_v41 = vld [vmem:[%s26021_s5 + $0x310] sm:$0xff] }
 0x5d4   : > { %17548 = vmatprep.mubr.msk.f32.mxu0 %vm17948_vm8, %v17947_v39  ;;  %17602 = vmatpush3.msra.mxu1 %v16257_v18  ;;  %v16313_v18 = vld [vmem:[%s26021_s5 + $0x308] sm:$0xff] }
 0x5d5   : > { %17603 = vmatprep.mubr.msk.f32.mxu1 %vm17948_vm8, %v17947_v39  ;;  %17549 = vmatmul.mubr.msk.f32.vlgmr.msra.gmra.mxu0 %vm13855_vm9, %v14479_v0  ;;  %v16312_v0 = vld [vmem:[%s26021_s5 + $0x300] sm:$0xff] }
 0x5d6   : > { %17562 = vmatprep.subr.mxu0 %v17947_v39  ;;  %17604 = vmatmul.mubr.msk.f32.vlgmr.msra.gmra.mxu1 %vm13855_vm9, %v14874_v24  ;;  %v15743_v24 = vrot.slane %v25487_v8, 4 }
 0x5d7   : > { %17617 = vmatprep.subr.mxu1 %v17947_v39  ;;  %17563 = vmatpush3.msra.mxu0 %v16245_v37  ;;  %v15835_v37 = vld [vmem:[%s26023_s7 + $0x78] sm:$0xff] }
 0x5d8   : > { %17618 = vmatpush3.msra.mxu1 %v16270_v5  ;;  %17564 = vmatprep.subr.mxu0 %v17947_v39  ;;  %v15834_v5 = vld [vmem:[%s26023_s7 + $0x70] sm:$0xff] }
 0x5d9   : > { %17619 = vmatprep.subr.mxu1 %v17947_v39  ;;  %17565 = vmatpush3.msra.mxu0 %v16244_v59  ;;  %v15833_v59 = vld [vmem:[%s26023_s7 + $0x68] sm:$0xff] }
 0x5da   : > { %17620 = vmatpush3.msra.mxu1 %v16269_v6  ;;  %17566 = vmatprep.subr.mxu0 %v17947_v39  ;;  %v15831_v6 = vld [vmem:[%s26023_s7 + $0x58] sm:$0xff] }
 0x5db   : > { %17621 = vmatprep.subr.mxu1 %v17947_v39  ;;  %17567 = vmatpush3.msra.mxu0 %v16243_v46  ;;  %v15830_v46 = vld [vmem:[%s26023_s7 + $0x50] sm:$0xff] }
 0x5dc   : > { %17622 = vmatpush3.msra.mxu1 %v16268_v44  ;;  %17568 = vmatprep.subr.mxu0 %v17947_v39  ;;  %v15829_v44 = vld [vmem:[%s26023_s7 + $0x48] sm:$0xff] }
 0x5dd   : > { %17623 = vmatprep.subr.mxu1 %v17947_v39  ;;  %17569 = vmatpush3.msra.mxu0 %v16242_v34  ;;  %v15828_v34 = vld [vmem:[%s26023_s7 + $0x40] sm:$0xff] }
 0x5de   : > { %17570 = vmatprep.mubr.msk.f32.mxu0 %vm17948_vm8, %v17947_v39  ;;  %17624 = vmatpush3.msra.mxu1 %v16267_v32  ;;  %v15827_v32 = vld [vmem:[%s26023_s7 + $0x38] sm:$0xff] }
 0x5df   : > { %17625 = vmatprep.mubr.msk.f32.mxu1 %vm17948_vm8, %v17947_v39  ;;  %17571 = vmatmul.mubr.msk.f32.vlgmr.msra.gmra.mxu0 %vm13855_vm9, %v25432_v12  ;;  %v16274_v12 = vld [vmem:[%s26021_s5 + $0x210] sm:$0xff] }
 0x5e0   : > { %17584 = vmatprep.subr.mxu0 %v17947_v39  ;;  %17626 = vmatmul.mubr.msk.f32.vlgmr.msra.gmra.mxu1 %vm13855_vm9, %v25480_v62  ;;  %v16293_v62 = vld [vmem:[%s26021_s5 + $0x288] sm:$0xff] }
 0x5e1   : > { %17639 = vmatprep.subr.mxu1 %v17947_v39  ;;  %17585 = vmatpush3.msra.mxu0 %v16255_v57  ;;  %v15826_v57 = vld [vmem:[%s26023_s7 + $0x30] sm:$0xff] }
 0x5e2   : > { %17640 = vmatpush3.msra.mxu1 %v16280_v2  ;;  %17586 = vmatprep.subr.mxu0 %v17947_v39  ;;  %v15825_v2 = vld [vmem:[%s26023_s7 + $0x28] sm:$0xff] }
 0x5e3   : > { %17641 = vmatprep.subr.mxu1 %v17947_v39  ;;  %17587 = vmatpush3.msra.mxu0 %v16254_v38  ;;  %v15824_v38 = vld [vmem:[%s26023_s7 + $0x20] sm:$0xff] }
 0x5e4   : > { %17642 = vmatpush3.msra.mxu1 %v16279_v25  ;;  %17588 = vmatprep.subr.mxu0 %v17947_v39 }
 0x5e5   : > { %17643 = vmatprep.subr.mxu1 %v17947_v39  ;;  %17589 = vmatpush3.msra.mxu0 %v16253_v19 }
 0x5e6   : > { %17644 = vmatpush3.msra.mxu1 %v16278_v45  ;;  %17590 = vmatprep.subr.mxu0 %v17947_v39  ;;  %v15823_v45 = vld [vmem:[%s26023_s7 + $0x18] sm:$0xff] }
 0x5e7   : > { %17645 = vmatprep.subr.mxu1 %v17947_v39  ;;  %17591 = vmatpush3.msra.mxu0 %v16252_v47  ;;  %v15822_v47 = vld [vmem:[%s26023_s7 + $0x10] sm:$0xff] }
 0x5e8   : > { %17592 = vmatprep.mubr.msk.f32.mxu0 %vm17948_vm8, %v17947_v39  ;;  %17646 = vmatpush3.msra.mxu1 %v16277_v30 }
 0x5e9   : > { %17647 = vmatprep.mubr.msk.f32.mxu1 %vm17948_vm8, %v17947_v39  ;;  %17593 = vmatmul.mubr.msk.f32.vlgmr.msra.gmra.mxu0 %vm13855_vm9, %v14795_v60 }
 0x5ea   : > { %17606 = vmatprep.subr.mxu0 %v17947_v39  ;;  %17648 = vmatmul.mubr.msk.f32.vlgmr.msra.gmra.mxu1 %vm13855_vm9, %v15190_v35  ;;  %v15821_v35 = vld [vmem:[%s26023_s7 + $0x8] sm:$0xff] }
 0x5eb   : > { %17661 = vmatprep.subr.mxu1 %v17947_v39  ;;  %17607 = vmatpush3.msra.mxu0 %v16265_v42  ;;  %v15820_v42 = vld [vmem:[%s26023_s7] sm:$0xff] }
 0x5ec   : > { %17662 = vmatpush3.msra.mxu1 %v16290_v22  ;;  %17608 = vmatprep.subr.mxu0 %v17947_v39 }
 0x5ed   : > { %17663 = vmatprep.subr.mxu1 %v17947_v39  ;;  %17609 = vmatpush3.msra.mxu0 %v16264_v56 }
 0x5ee   : > { %17664 = vmatpush3.msra.mxu1 %v16289_v49  ;;  %17610 = vmatprep.subr.mxu0 %v17947_v39 }
 0x5ef   : > { %17665 = vmatprep.subr.mxu1 %v17947_v39  ;;  %17611 = vmatpush3.msra.mxu0 %v16263_v23 }
 0x5f0   : > { %17666 = vmatpush3.msra.mxu1 %v16288_v31  ;;  %17612 = vmatprep.subr.mxu0 %v17947_v39 }
 0x5f1   : > { %17667 = vmatprep.subr.mxu1 %v17947_v39  ;;  %17613 = vmatpush3.msra.mxu0 %v16262_v51 }
 0x5f2   : > { %17614 = vmatprep.mubr.msk.f32.mxu0 %vm17948_vm8, %v17947_v39  ;;  %17668 = vmatpush3.msra.mxu1 %v16287_v7 }
 0x5f3   : > { %17669 = vmatprep.mubr.msk.f32.mxu1 %vm17948_vm8, %v17947_v39  ;;  %17615 = vmatmul.mubr.msk.f32.vlgmr.msra.gmra.mxu0 %vm13855_vm9, %v14953_v16 }
 0x5f4   : > { %17628 = vmatprep.subr.mxu0 %v17947_v39  ;;  %17670 = vmatmul.mubr.msk.f32.vlgmr.msra.gmra.mxu1 %vm13855_vm9, %v15348_v15 }
 0x5f5   : > { %17683 = vmatprep.subr.mxu1 %v17947_v39  ;;  %17629 = vmatpush3.msra.mxu0 %v16275_v10 }
 0x5f6   : > { %17684 = vmatpush3.msra.mxu1 %v16300_v4  ;;  %17630 = vmatprep.subr.mxu0 %v17947_v39 }
 0x5f7   : > { %17685 = vmatprep.subr.mxu1 %v17947_v39  ;;  %17631 = vmatpush3.msra.mxu0 %v16274_v12 }
 0x5f8   : > { %17686 = vmatpush3.msra.mxu1 %v16299_v43  ;;  %17632 = vmatprep.subr.mxu0 %v17947_v39 }
 0x5f9   : > { %17687 = vmatprep.subr.mxu1 %v17947_v39  ;;  %17633 = vmatpush3.msra.mxu0 %v16273_v52 }
 0x5fa   : > { %17688 = vmatpush3.msra.mxu1 %v16298_v20  ;;  %17634 = vmatprep.subr.mxu0 %v17947_v39 }
 0x5fb   : > { %17689 = vmatprep.subr.mxu1 %v17947_v39  ;;  %17635 = vmatpush3.msra.mxu0 %v16272_v58 }
 0x5fc   : > { %17636 = vmatprep.mubr.msk.f32.mxu0 %vm17948_vm8, %v17947_v39  ;;  %17690 = vmatpush3.msra.mxu1 %v16297_v27 }
 0x5fd   : > { %17691 = vmatprep.mubr.msk.f32.mxu1 %vm17948_vm8, %v17947_v39  ;;  %17637 = vmatmul.mubr.msk.f32.vlgmr.msra.gmra.mxu0 %vm13855_vm9, %v15111_v50 }
 0x5fe   : > { %17650 = vmatprep.subr.mxu0 %v17947_v39  ;;  %17692 = vmatmul.mubr.msk.f32.vlgmr.msra.gmra.mxu1 %vm13855_vm9, %v15506_v14 }
 0x5ff   : > { %17705 = vmatprep.subr.mxu1 %v17947_v39  ;;  %17651 = vmatpush3.msra.mxu0 %v16285_v40 }
 0x600   : > { %17706 = vmatpush3.msra.mxu1 %v16310_v17  ;;  %17652 = vmatprep.subr.mxu0 %v17947_v39 }
 0x601   : > { %17707 = vmatprep.subr.mxu1 %v17947_v39  ;;  %17653 = vmatpush3.msra.mxu0 %v16284_v33 }
 0x602   : > { %17708 = vmatpush3.msra.mxu1 %v16309_v9  ;;  %17654 = vmatprep.subr.mxu0 %v17947_v39 }
 0x603   : > { %17709 = vmatprep.subr.mxu1 %v17947_v39  ;;  %17655 = vmatpush3.msra.mxu0 %v16283_v26 }
 0x604   : > { %17710 = vmatpush3.msra.mxu1 %v16308_v3  ;;  %17656 = vmatprep.subr.mxu0 %v17947_v39 }
 0x605   : > { %17711 = vmatprep.subr.mxu1 %v17947_v39  ;;  %17657 = vmatpush3.msra.mxu0 %v16282_v54 }
 0x606   : > { %17658 = vmatprep.mubr.msk.f32.mxu0 %vm17948_vm8, %v17947_v39  ;;  %17712 = vmatpush3.msra.mxu1 %v16307_v1 }
 0x607   : > { %17713 = vmatprep.mubr.msk.f32.mxu1 %vm17948_vm8, %v17947_v39  ;;  %17659 = vmatmul.mubr.msk.f32.vlgmr.msra.gmra.mxu0 %vm13855_vm9, %v15269_v21 }
 0x608   : > { %17672 = vmatprep.subr.mxu0 %v17947_v39  ;;  %17714 = vmatmul.mubr.msk.f32.vlgmr.msra.gmra.mxu1 %vm13855_vm9, %v15664_v29 }
 0x609   : > { %17673 = vmatpush3.msra.mxu0 %v16295_v28  ;;  %17680 = vmatprep.mubr.msk.f32.mxu0 %vm17948_vm8, %v17947_v39 }
 0x60a   : > { %17674 = vmatprep.subr.mxu0 %v17947_v39  ;;  %17727 = vmatprep.subr.mxu1 %v17947_v39 }
 0x60b   : > { %17675 = vmatpush3.msra.mxu0 %v16294_v53  ;;  %17759 = vmatprep.mubr.msk.f32.mxu1 %vm17948_vm8, %v17947_v39 }
 0x60c   : > { %17676 = vmatprep.subr.mxu0 %v17947_v39  ;;  %17728 = vmatpush3.msra.mxu1 %v15835_v37 }
 0x60d   : > { %17677 = vmatpush3.msra.mxu0 %v16293_v62  ;;  %17729 = vmatprep.subr.mxu1 %v17947_v39 }
 0x60e   : > { %17678 = vmatprep.subr.mxu0 %v17947_v39  ;;  %17730 = vmatpush3.msra.mxu1 %v15834_v5 }
 0x60f   : > { %17679 = vmatpush3.msra.mxu0 %v16292_v63  ;;  %17731 = vmatprep.subr.mxu1 %v17947_v39 }
 0x610   : > { %17681 = vmatmul.mubr.msk.f32.vlgmr.msra.gmra.mxu0 %vm13855_vm9, %v25487_v8  ;;  %17694 = vmatprep.subr.mxu0 %v17947_v39  ;;  %v15832_v8 = vld [vmem:[%s26023_s7 + $0x60] sm:$0xff] }
 0x611   : > { %17695 = vmatpush3.msra.mxu0 %v16305_v48  ;;  %17702 = vmatprep.mubr.msk.f32.mxu0 %vm17948_vm8, %v17947_v39 }
 0x612   : > { %17696 = vmatprep.subr.mxu0 %v17947_v39  ;;  %17732 = vmatpush3.msra.mxu1 %v15833_v59 }
 0x613   : > { %17697 = vmatpush3.msra.mxu0 %v16304_v61  ;;  %17733 = vmatprep.subr.mxu1 %v17947_v39 }
 0x614   : > { %17698 = vmatprep.subr.mxu0 %v17947_v39  ;;  %17734 = vmatpush3.msra.mxu1 %v15832_v8 }
 0x615   : > { %17699 = vmatpush3.msra.mxu0 %v16303_v13  ;;  %17735 = vmatprep.subr.mxu1 %v17947_v39 }
 0x616   : > { %17700 = vmatprep.subr.mxu0 %v17947_v39  ;;  %17736 = vmatpush3.msra.mxu1 %v15831_v6 }
 0x617   : > { %17701 = vmatpush3.msra.mxu0 %v16302_v11  ;;  %17737 = vmatprep.subr.mxu1 %v17947_v39 }
 0x618   : > { %17703 = vmatmul.mubr.msk.f32.vlgmr.msra.gmra.mxu0 %vm13855_vm9, %v15585_v55  ;;  %17716 = vmatprep.subr.mxu0 %v17947_v39 }
 0x619   : > { %17717 = vmatpush3.msra.mxu0 %v16315_v36  ;;  %17724 = vmatprep.mubr.msk.f32.mxu0 %vm17948_vm8, %v17947_v39 }
 0x61a   : > { %17718 = vmatprep.subr.mxu0 %v17947_v39  ;;  %17738 = vmatpush3.msra.mxu1 %v15830_v46 }
 0x61b   : > { %17719 = vmatpush3.msra.mxu0 %v16314_v41  ;;  %17739 = vmatprep.subr.mxu1 %v17947_v39 }
 0x61c   : > { %17720 = vmatprep.subr.mxu0 %v17947_v39  ;;  %17740 = vmatpush3.msra.mxu1 %v15829_v44 }
 0x61d   : > { %17721 = vmatpush3.msra.mxu0 %v16313_v18  ;;  %17741 = vmatprep.subr.mxu1 %v17947_v39 }
 0x61e   : > { %17722 = vmatprep.subr.mxu0 %v17947_v39  ;;  %17742 = vmatpush3.msra.mxu1 %v15828_v34 }
 0x61f   : > { %17723 = vmatpush3.msra.mxu0 %v16312_v0  ;;  %17743 = vmatprep.subr.mxu1 %v17947_v39 }
 0x620   : > { %17725 = vmatmul.mubr.msk.f32.vlgmr.msra.gmra.mxu0 %vm13855_vm9, %v15743_v24  ;;  %17744 = vmatpush3.msra.mxu1 %v15827_v32 }
 0x621   : > { %17745 = vmatprep.subr.mxu1 %v17947_v39 }
 0x622   : > { %17746 = vmatpush3.msra.mxu1 %v15826_v57 }
 0x623   : > { %17747 = vmatprep.subr.mxu1 %v17947_v39 }
 0x624   : > { %17748 = vmatpush3.msra.mxu1 %v15825_v2 }
 0x625   : > { %17749 = vmatprep.subr.mxu1 %v17947_v39 }
 0x626   : > { %17750 = vmatpush3.msra.mxu1 %v15824_v38 }
 0x627   : > { %17751 = vmatprep.subr.mxu1 %v17947_v39 }
 0x628   : > { %17752 = vmatpush3.msra.mxu1 %v15823_v45 }
 0x629   : > { %17753 = vmatprep.subr.mxu1 %v17947_v39 }
 0x62a   : > { %17754 = vmatpush3.msra.mxu1 %v15822_v47 }
 0x62b   : > { %17755 = vmatprep.subr.mxu1 %v17947_v39 }
 0x62c   : > { %17756 = vmatpush3.msra.mxu1 %v15821_v35 }
 0x62d   : > { %17757 = vmatprep.subr.mxu1 %v17947_v39 }
 0x62e   : > { %17758 = vmatpush3.msra.mxu1 %v15820_v42 }
 0x664   : > { %v13924_v25 = vpop.f32.mrf.mxu0 }
 0x665   : > { %v14153_v19 = vpop.f32.mrf.mxu1 }
 0x666   : > { %v17462_v30 = vpop.f32.mrf.mxu0 }
 0x667   : > { %v17495_v60 = vpop.f32.mrf.mxu1 }
 0x66d   : > { %v13996_v22 = vpop.f32.mrf.mxu0 }
 0x66e   : > { %v13997_v56 = vadd.f32 %v13996_v22, %v13924_v25  ;;  %v14311_v49 = vpop.f32.mrf.mxu1 }
 0x66f   : > { %v17473_v23 = vpop.f32.mrf.mxu0 }
 0x670   : > { %v17517_v31 = vpop.f32.mrf.mxu1 }
 0x671   : > { %v15817_v31 = vld [vmem:[%s26022_s6] sm:$0x1] }
 0x677   : > { %v14074_v51 = vpop.f32.mrf.mxu0 }
 0x678   : > { %v14078_v7 = vadd.f32 %v14074_v51, %v13997_v56  ;;  %v14469_v16 = vpop.f32.mrf.mxu1 }
 0x679   : > { %v17484_v15 = vpop.f32.mrf.mxu0 }
 0x67a   : > { %v17539_v10 = vpop.f32.mrf.mxu1  ;;  %v14157_v4 = vadd.f32 %v14153_v19, %v14078_v7 }
 0x67b   : > { %v15836_v10 = vld [vmem:[%s26024_s8] sm:$0x1] }
 0x681   : > { %v14232_v12 = vpop.f32.mrf.mxu0 }
 0x682   : > { %v14236_v43 = vadd.f32 %v14232_v12, %v14157_v4  ;;  %v14627_v52 = vpop.f32.mrf.mxu1 }
 0x683   : > { %v17506_v20 = vpop.f32.mrf.mxu0 }
 0x684   : > { %v17561_v58 = vpop.f32.mrf.mxu1  ;;  %v14315_v27 = vadd.f32 %v14311_v49, %v14236_v43 }
 0x68b   : > { %v14390_v50 = vpop.f32.mrf.mxu0 }
 0x68c   : > { %v14394_v39 = vadd.f32 %v14390_v50, %v14315_v27  ;;  %v14785_v14 = vpop.f32.mrf.mxu1 }
 0x68d   : > { %v17528_v40 = vpop.f32.mrf.mxu0 }
 0x68e   : > { %v17583_v17 = vpop.f32.mrf.mxu1  ;;  %v14473_v33 = vadd.f32 %v14469_v16, %v14394_v39 }
 0x695   : > { %v14548_v9 = vpop.f32.mrf.mxu0 }
 0x696   : > { %v14943_v26 = vpop.f32.mrf.mxu1  ;;  %v14552_v61 = vadd.f32 %v14548_v9, %v14473_v33 }
 0x697   : > { %v17550_v3 = vpop.f32.mrf.mxu0 }
 0x698   : > { %v17605_v54 = vpop.f32.mrf.mxu1  ;;  %v14631_v11 = vadd.f32 %v14627_v52, %v14552_v61 }
 0x69f   : > { %v14706_v1 = vpop.f32.mrf.mxu0 }
 0x6a0   : > { %v15101_v21 = vpop.f32.mrf.mxu1  ;;  %v14710_v41 = vadd.f32 %v14706_v1, %v14631_v11 }
 0x6a1   : > { %v17572_v28 = vpop.f32.mrf.mxu0 }
 0x6a2   : > { %v17627_v29 = vpop.f32.mrf.mxu1  ;;  %v14789_v0 = vadd.f32 %v14785_v14, %v14710_v41 }
 0x6a9   : > { %v14864_v53 = vpop.f32.mrf.mxu0 }
 0x6aa   : > { %v15259_v62 = vpop.f32.mrf.mxu1  ;;  %v14868_v24 = vadd.f32 %v14864_v53, %v14789_v0 }
 0x6ab   : > { %v17594_v63 = vpop.f32.mrf.mxu0 }
 0x6ac   : > { %v17649_v48 = vpop.f32.mrf.mxu1  ;;  %v14947_v8 = vadd.f32 %v14943_v26, %v14868_v24 }
 0x6b3   : > { %v15022_v13 = vpop.f32.mrf.mxu0 }
 0x6b4   : > { %v15417_v55 = vpop.f32.mrf.mxu1  ;;  %v15026_v46 = vadd.f32 %v15022_v13, %v14947_v8 }
 0x6b5   : > { %v17616_v36 = vpop.f32.mrf.mxu0 }
 0x6b6   : > { %v17671_v18 = vpop.f32.mrf.mxu1  ;;  %v15105_v44 = vadd.f32 %v15101_v21, %v15026_v46 }
 0x6bd   : > { %v15180_v37 = vpop.f32.mrf.mxu0 }
 0x6be   : > { %v15575_v5 = vpop.f32.mrf.mxu1  ;;  %v15184_v32 = vadd.f32 %v15180_v37, %v15105_v44 }
 0x6bf   : > { %v17638_v59 = vpop.f32.mrf.mxu0 }
 0x6c0   : > { %v17693_v6 = vpop.f32.mrf.mxu1  ;;  %v15263_v25 = vadd.f32 %v15259_v62, %v15184_v32 }
 0x6c7   : > { %v15338_v34 = vpop.f32.mrf.mxu0 }
 0x6c8   : > { %v15733_v57 = vpop.f32.mrf.mxu1  ;;  %v15342_v19 = vadd.f32 %v15338_v34, %v15263_v25 }
 0x6c9   : > { %v17660_v2 = vpop.f32.mrf.mxu0 }
 0x6ca   : > { %v17715_v38 = vpop.f32.mrf.mxu1  ;;  %v15421_v30 = vadd.f32 %v15417_v55, %v15342_v19 }
 0x6d0   : > { %v15496_v45 = vpop.f32.mrf.mxu0 }
 0x6d1   : > { %v15500_v60 = vadd.f32 %v15496_v45, %v15421_v30 }
 0x6d2   : > { %v17682_v47 = vpop.f32.mrf.mxu0 }
 0x6d3   : > { %v15579_v42 = vadd.f32 %v15575_v5, %v15500_v60 }
 0x6d8   : > { %v15654_v35 = vpop.f32.mrf.mxu0 }
 0x6d9   : > { %v15658_v56 = vadd.f32 %v15654_v35, %v15579_v42 }
 0x6da   : > { %v17704_v22 = vpop.f32.mrf.mxu0 }
 0x6db   : > { %v15737_v49 = vadd.f32 %v15733_v57, %v15658_v56 }
 0x6e0   : > { %v15812_v23 = vpop.f32.mrf.mxu0 }
 0x6e1   : > { %v15816_v51 = vadd.f32 %v15812_v23, %v15737_v49 }
 0x6e2   : > { %v17726_v7 = vpop.f32.mrf.mxu0 }
 0x6e3   : > { %v15818_v16 = vadd.f32 %v15817_v31, %v15816_v51 }
 0x6e5   : > { %v15819_v15 = vmax.f32 %v15818_v16, 0.0 }
 0x6e7   : > { %17760 = vmatmul.mubr.f32.vlgmr.msra.gmra.mxu1 %v15819_v15 }
 0x7a7   : > { %v15903_v4 = vpop.f32.mrf.mxu1 }
 0x7a8   : > { %v15904_v12 = vadd.f32 %v15903_v4, %v15836_v10 }
 0x7a9   : > { %v17761_v43 = vpop.f32.mrf.mxu1 }
 0x7aa   : > { %15907 = vst [vmem:[%s324_s21] sm:$0x1] %v15904_v12 }
 0x7ab   : > { %17897 = shalt.err (!%p17894_p3)
}
 0x7ac   : > { %s17898_s16 = scalar_lea.hbm %s25981_s26, 16  ;;  %s17902_s21 = scalar_lea.hbm %s26025_s9, 32 }
 0x7ad   : > { %p17899_p4 = scmp.ne.s32.totalorder %s25981_s26, %s17898_s16  ;;  %p17903_p9 = scmp.lt.s32.totalorder %s25981_s26, %s26025_s9 }
 0x7ae   : > { %p17904_p10 = scmp.lt.s32.totalorder %s17902_s21, %s17898_s16 }
 0x7af   : > { %p17900_p7 = pnand %p17899_p4, %p18038_p5 }
 0x7b0   : > { %p17905_p11 = por %p17904_p10, %p17903_p9 }
 0x7b1   : > { %p17901_p8 = pneg %p17900_p7 }
 0x7b3   : > { %p17906_p12 = pnand %p17905_p11, %p17901_p8 }
 0x7b5   : > { %17909 = shalt.err (!%p17906_p12)
}
 0x7b6   : > { %17763 = dma.vmem_to_hbm [thread:$0]  (%p18038_p5), %s15922_s22, 16, %s25981_s26, %s15909_s27  }
 0x7b7 PF: > { %p17769_p13 = scmp.ge.s32.totalorder %s17944_s12, 2  ;;  %s15933_s25 = sand.u32 1, %s17932_s30  }
 0x7b8   : > { %s15934_s28 = scalar_lea.sflag [#allocation3], %s15933_s25 }
 0x7b9   : > { %p17766_p0 = pnand %p17769_p13, %p18042_p6 }
 0x7bb   : > { %p17767_p1 = pneg %p17766_p0 }
 0x7bd   : > { %17927 = dma.done.wait (%p17767_p1), %s15934_s28, 16  }
 0x7be   : > { %17929 = vsyncadd (%p17767_p1), %s15934_s28, 4294967280  ;;  %p19_p2 = scmp.ge.s32.totalorder %s18025_s15, 4   ;;  %s27404_s30 = smov %s17936_s10 }
 0x7bf   : > { %s27405_s10 = smov %s17940_s11  ;;  %s27406_s11 = smov %s18036_s18 }
 0x7c0   : > { %s27407_s12 = smov %s18025_s15  ;;  %21 = sbr.rel (!%p19_p2) target bundleno = 3 (0x3), region = 131 }
 0x7c5   :  { %15938 = vsyncpa [#allocation3], 1 }
 0x7c6   :  { %15940 = vsyncpa [#allocation3 + $0x1], 1 }

</bundles_post_ra>
